<compile_context>
chip_gen: v7x
topology: tpu7x:2x2x1
jax: 0.10.0
libtpu: 0.0.40
codegen_flags: <defaults>
</compile_context>

<pallas_src>
import functools

import jax
import jax.numpy as jnp
from jax.experimental import pallas as pl
from jax.experimental.pallas import tpu as pltpu

LRELU_SLOPE = 0.1  # modules.LRELU_SLOPE

# ----------------------- model configuration (small) -----------------------
PERIOD = 3
GIN = 16                       # gin_channels
UPSAMPLE_RATES = (2, 2, 2)
FINAL_DIM = 32
EXTEND = 4                     # ConvNext2d channel-expansion factor ("4" arg)
LN_EPS = 1e-6                  # TODO(synk): torch nn.LayerNorm default is 1e-5; ConvNext2d unverified.


def _gelu_tanh(x):
    # TODO(synk): torch nn.GELU default is the exact erf form; tanh approx here.
    c = jnp.float32(0.7978845608028654)
    return 0.5 * x * (1.0 + jnp.tanh(c * (x + 0.044715 * x * x * x)))


# ===================== static polyphase conv geometry =======================
#
# Each stage implements the flip/pad/conv/flip pattern rewritten as
#   y[r] = sum_k w_rev[k] * x_leftpad[off + r*S + k],   off = Hin-1-(Ho-1)*S
# Its (K-1)-left-padded input is stored split into `phi_in` lane phases
#   Xin[a][n] = x_leftpad[phi_in*n + a]
# and it writes its output already split into `phi_out` phases of the NEXT
# stage's (pad_next)-left-padded input:
#   Xnext[a][n] = y[phi_out*n + a - pad_next]
# With phi_in == S * phi_out every read and write is a contiguous lane slab.


def _stage_geom(h_in, k, s, phi_in, phi_out, pad_next):
    assert phi_in == s * phi_out
    h_out = (h_in - 1) // s + 1
    off = h_in - 1 - (h_out - 1) * s
    phases = []
    for a in range(phi_out):
        n0 = max(0, -(-(pad_next - a) // phi_out))
        n1 = (h_out - 1 + pad_next - a) // phi_out
        taps = []
        for kk in range(k):
            c = off + s * (a - pad_next) + kk
            taps.append((c % phi_in, c // phi_in))
        phases.append(dict(n0=n0, n1=n1, w=n1 - n0 + 1, taps=tuple(taps)))
    return h_out, phases


def _build_geometry(H):
    s_init = UPSAMPLE_RATES[-1]
    strides = [s_init] + [u for u in UPSAMPLE_RATES[::-1][1:]]
    kernels = [3 * s for s in strides]
    k_post = 3
    n_stage = len(strides)
    phi = [1] * (n_stage + 1)
    for i in range(n_stage - 1, -1, -1):
        phi[i] = strides[i] * phi[i + 1]
    pad_next = [kernels[i + 1] - 1 for i in range(n_stage - 1)] + [k_post - 1]
    geoms = []
    h = H
    for i in range(n_stage):
        h_out, phases = _stage_geom(h, kernels[i], strides[i], phi[i],
                                    phi[i + 1], pad_next[i])
        geoms.append(dict(
            h_in=h, h_out=h_out, k=kernels[i], s=strides[i],
            phi_in=phi[i], phi_out=phi[i + 1], pad_next=pad_next[i],
            n_in=-(-(h + kernels[i] - 1) // phi[i]),
            n_out=-(-(h_out + pad_next[i]) // phi[i + 1]),
            phases=phases))
        h = h_out
    return geoms


# ============================ fused Pallas kernel ===========================


def _fused_disc_kernel(
        # inputs
        x0_ref, w0_ref, b0_ref,
        dw1_ref, dwb1_ref, lng1_ref, lnb1_ref, cond1_ref,
        pw11_ref, pb11_ref, pw12_ref, pb12_ref,
        dw2_ref, dwb2_ref, lng2_ref, lnb2_ref, cond2_ref,
        pw21_ref, pb21_ref, pw22_ref, pb22_ref,
        wp_ref, bp_ref,
        # outputs (phase-split intermediate maps double as VMEM working store)
        x1_ref, x2_ref, x3_ref, post_ref,
        # scratch: merged per-block activation slabs (lane-dense matmul operand)
        act1_ref, act2_ref,
        *, geoms, period, eps):
    g0, g1, g2 = geoms

    # Zero-init the phase-split padded maps (covers the causal left-pad zeros
    # and any never-written tail lanes).
    for p in range(period):
        for a in range(g0["phi_out"]):
            x1_ref[0, p, a] = jnp.zeros(x1_ref.shape[-2:], x1_ref.dtype)
        for a in range(g1["phi_out"]):
            x2_ref[0, p, a] = jnp.zeros(x2_ref.shape[-2:], x2_ref.dtype)
        x3_ref[0, p] = jnp.zeros(x3_ref.shape[-2:], x3_ref.dtype)

    # --------------------- stage 0: init conv + leaky relu ------------------
    phi0 = g0["phi_in"]
    for p in range(period):
        for a, ph in enumerate(g0["phases"]):
            if ph["w"] <= 0:
                continue
            n0, n1 = ph["n0"], ph["n1"]
            acc = None
            for k, (sp, sh) in enumerate(ph["taps"]):
                row = x0_ref[0, p * phi0 + sp: p * phi0 + sp + 1,
                             n0 + sh: n1 + 1 + sh]                  # (1, W)
                term = w0_ref[:, k:k + 1] * row                     # (C0, W)
                acc = term if acc is None else acc + term
            acc = acc + b0_ref[...]
            acc = jnp.where(acc >= 0, acc, LRELU_SLOPE * acc)
            x1_ref[0, p, a, :, n0:n1 + 1] = acc

    # ------- ConvNext block front half: depthwise conv + LN + cond ----------
    def dw_ln_to_slab(geom, src_read, dw_ref, dwb_ref, lng_ref, lnb_ref, cond,
                      act_ref):
        pieces, col = [], 0
        for p in range(period):
            for a, ph in enumerate(geom["phases"]):
                if ph["w"] <= 0:
                    continue
                n0, n1, w = ph["n0"], ph["n1"], ph["w"]
                acc = None
                for k, (sp, sh) in enumerate(ph["taps"]):
                    xs = src_read(p, sp, n0 + sh, n1 + 1 + sh)       # (C, W)
                    term = dw_ref[:, k:k + 1] * xs
                    acc = term if acc is None else acc + term
                acc = acc + dwb_ref[...]
                mu = jnp.mean(acc, axis=0, keepdims=True)
                var = jnp.mean(jnp.square(acc - mu), axis=0, keepdims=True)
                acc = (acc - mu) * jax.lax.rsqrt(var + eps)
                acc = acc * lng_ref[...] + lnb_ref[...] + cond
                act_ref[:, col:col + w] = acc
                pieces.append((p, a, col, w, n0, n1))
                col += w
        return pieces

    # ------------------------------ block 1 ----------------------------------
    pieces1 = dw_ln_to_slab(
        g1, lambda p, sp, lo, hi: x1_ref[0, p, sp, :, lo:hi],
        dw1_ref, dwb1_ref, lng1_ref, lnb1_ref, cond1_ref[0], act1_ref)
    # one merged pw1/pw2 matmul pair (bf16 operands cast once, f32 accumulate)
    h = jnp.dot(pw11_ref[...], act1_ref[...].astype(jnp.bfloat16),
                preferred_element_type=jnp.float32) + pb11_ref[...]
    h = _gelu_tanh(h)
    y = jnp.dot(pw12_ref[...], h.astype(jnp.bfloat16),
                preferred_element_type=jnp.float32) + pb12_ref[...]
    for (p, a, col, w, n0, n1) in pieces1:
        x2_ref[0, p, a, :, n0:n1 + 1] = y[:, col:col + w]

    # ------------------------------ block 2 ----------------------------------
    pieces2 = dw_ln_to_slab(
        g2, lambda p, sp, lo, hi: x2_ref[0, p, sp, :, lo:hi],
        dw2_ref, dwb2_ref, lng2_ref, lnb2_ref, cond2_ref[0], act2_ref)
    h = jnp.dot(pw21_ref[...], act2_ref[...].astype(jnp.bfloat16),
                preferred_element_type=jnp.float32) + pb21_ref[...]
    h = _gelu_tanh(h)
    y = jnp.dot(pw22_ref[...], h.astype(jnp.bfloat16),
                preferred_element_type=jnp.float32) + pb22_ref[...]
    for (p, a, col, w, n0, n1) in pieces2:
        # block 2's output feeds conv_post (stride 1, left pad 2): contiguous.
        x3_ref[0, p, :, n0:n1 + 1] = y[:, col:col + w]

    # ------------------------------ conv_post --------------------------------
    h3 = g2["h_out"]
    for p in range(period):
        acc = None
        for k in range(wp_ref.shape[-1]):
            term = wp_ref[:, k:k + 1] * x3_ref[0, p, :, k:k + h3]
            acc = term if acc is None else acc + term
        post_ref[0, p:p + 1, :] = jnp.sum(acc, axis=0, keepdims=True) + bp_ref[...]


# ============================ wrapper / forward =============================


def _rep_spec(arr):
    nd = arr.ndim
    return pl.BlockSpec(arr.shape, lambda b, _n=nd: (0,) * _n)


def _bat_spec(arr):
    nd = arr.ndim
    return pl.BlockSpec((1,) + arr.shape[1:],
                        lambda b, _n=nd: (b,) + (0,) * (_n - 1))


def _dephase(xph, pad, h):
    """(B, P, Phi, C, N) phase-split padded map -> (B, P, C, h) natural order."""
    B_, P_, Phi, C_, N_ = xph.shape
    flat = jnp.transpose(xph, (0, 1, 3, 4, 2)).reshape(B_, P_, C_, N_ * Phi)
    return flat[..., pad:pad + h]


def discriminator_p_forward(x, g, p):
    """x: (B, 1, T) audio, g: (B, GIN, 1) speaker embedding.

    Returns (out, fmaps). fmaps are in the kernel-native (B, period, C, H)
    layout (torch NCHW layout = fmap.transpose(0, 2, 3, 1))."""
    B, C, T = x.shape
    assert C == 1
    assert len(p["blocks"]) == 2, "kernel is specialized to 2 ConvNext blocks"
    if T % PERIOD != 0:
        n_pad = PERIOD - T % PERIOD
        x = jnp.pad(x, ((0, 0), (0, 0), (n_pad, 0)), mode="reflect")
        T = T + n_pad
    H = T // PERIOD
    geoms = _build_geometry(H)
    g0, g1, g2 = geoms
    assert g2["phi_out"] == 1

    # one-time XLA prep on the raw 1-channel signal: period rows + 8-phase split
    # rows[b, p, h] = x[b, 0, h*period + p]   (the torch .view(b,1,H,P) layout)
    xs = jnp.transpose(x[:, 0, :].reshape(B, H, PERIOD), (0, 2, 1))
    phi0, k0 = g0["phi_in"], g0["k"]
    L0, N0 = H + k0 - 1, g0["n_in"]
    xq = jnp.pad(xs, ((0, 0), (0, 0), (k0 - 1, N0 * phi0 - L0)))
    x0ph = jnp.transpose(xq.reshape(B, PERIOD, N0, phi0), (0, 1, 3, 2))
    x0ph = x0ph.reshape(B, PERIOD * phi0, N0)

    blk1, blk2 = p["blocks"]
    gv = g.reshape(B, GIN)
    cond1 = (gv @ blk1["cond_w"] + blk1["cond_b"])[:, :, None]      # (B, C0, 1)
    cond2 = (gv @ blk2["cond_w"] + blk2["cond_b"])[:, :, None]      # (B, C1, 1)

    H1, H2, H3 = g0["h_out"], g1["h_out"], g2["h_out"]
    N1, N2 = g0["n_out"], g1["n_out"]
    C0 = p["init_w_revT"].shape[0]          # block-1 in channels
    C1 = blk1["pw2_wT"].shape[0]            # block-2 in channels
    C2 = blk2["pw2_wT"].shape[0]            # conv_post in channels

    defs = [
        (x0ph, True), (p["init_w_revT"], False), (p["init_b"], False),
        (blk1["dw_revT"], False), (blk1["dw_b"], False), (blk1["ln_g"], False),
        (blk1["ln_b"], False), (cond1, True), (blk1["pw1_wT"], False),
        (blk1["pw1_b"], False), (blk1["pw2_wT"], False), (blk1["pw2_b"], False),
        (blk2["dw_revT"], False), (blk2["dw_b"], False), (blk2["ln_g"], False),
        (blk2["ln_b"], False), (cond2, True), (blk2["pw1_wT"], False),
        (blk2["pw1_b"], False), (blk2["pw2_wT"], False), (blk2["pw2_b"], False),
        (p["post_wT"], False), (p["post_b"], False),
    ]
    operands = [a for a, _ in defs]
    in_specs = [(_bat_spec(a) if bat else _rep_spec(a)) for a, bat in defs]

    out_shape = (
        jax.ShapeDtypeStruct((B, PERIOD, g0["phi_out"], C0, N1), jnp.float32),
        jax.ShapeDtypeStruct((B, PERIOD, g1["phi_out"], C1, N2), jnp.float32),
        jax.ShapeDtypeStruct((B, PERIOD, C2, H3 + g2["pad_next"]), jnp.float32),
        jax.ShapeDtypeStruct((B, PERIOD, H3), jnp.float32),
    )
    out_specs = (
        pl.BlockSpec((1, PERIOD, g0["phi_out"], C0, N1), lambda b: (b, 0, 0, 0, 0)),
        pl.BlockSpec((1, PERIOD, g1["phi_out"], C1, N2), lambda b: (b, 0, 0, 0, 0)),
        pl.BlockSpec((1, PERIOD, C2, H3 + g2["pad_next"]), lambda b: (b, 0, 0, 0)),
        pl.BlockSpec((1, PERIOD, H3), lambda b: (b, 0, 0)),
    )

    x1o, x2o, x3o, post = pl.pallas_call(
        functools.partial(_fused_disc_kernel, geoms=geoms, period=PERIOD,
                          eps=LN_EPS),
        out_shape=out_shape,
        grid=(B,),
        in_specs=in_specs,
        out_specs=out_specs,
        scratch_shapes=[
            pltpu.VMEM((C0, PERIOD * H2), jnp.float32),   # block-1 merged act slab
            pltpu.VMEM((C1, PERIOD * H3), jnp.float32),   # block-2 merged act slab
        ],
        compiler_params=pltpu.CompilerParams(dimension_semantics=("parallel",)),
    )(*operands)

    # output-side layout only (no inter-layer XLA work): de-phase the fmaps and
    # flatten the conv_post result in torch order (h-major, period-minor).
    fmaps = [
        _dephase(x1o, g0["pad_next"], H1),
        _dephase(x2o, g1["pad_next"], H2),
        x3o[..., g2["pad_next"]:g2["pad_next"] + H3],
    ]
    out = jnp.transpose(post, (0, 2, 1)).reshape(B, H3 * PERIOD)
    return out, fmaps


# ======================= pure-JAX reference (no Pallas) =====================


def _ref_strided_taps(x, s, K):
    """tap k of the flip/pad/conv/flip strided conv: x_leftpad[off + r*s + k]."""
    h_in = x.shape[-1]
    h_out = (h_in - 1) // s + 1
    off = h_in - 1 - (h_out - 1) * s
    pad = [(0, 0)] * (x.ndim - 1) + [(K - 1, 0)]
    xp = jnp.pad(x, pad)
    taps = [xp[..., off + k: off + k + (h_out - 1) * s + 1: s] for k in range(K)]
    return taps, h_out


def reference_forward(x, g, p):
    B, C, T = x.shape
    if T % PERIOD != 0:
        n_pad = PERIOD - T % PERIOD
        x = jnp.pad(x, ((0, 0), (0, 0), (n_pad, 0)), mode="reflect")
        T = T + n_pad
    H = T // PERIOD
    xs = jnp.transpose(x[:, 0, :].reshape(B, H, PERIOD), (0, 2, 1))
    gv = g.reshape(B, GIN)

    s0 = UPSAMPLE_RATES[-1]
    taps, _ = _ref_strided_taps(xs, s0, 3 * s0)
    y = sum(p["init_w_revT"][None, None, :, k:k + 1] * taps[k][:, :, None, :]
            for k in range(3 * s0))
    y = y + p["init_b"][None, None]
    y = jnp.where(y >= 0, y, LRELU_SLOPE * y)
    fmaps = [y]

    for u, blk in zip(UPSAMPLE_RATES[::-1][1:], p["blocks"]):
        K = 3 * u
        taps, _ = _ref_strided_taps(y, u, K)
        a = sum(blk["dw_revT"][None, None, :, k:k + 1] * taps[k] for k in range(K))
        a = a + blk["dw_b"][None, None]
        mu = jnp.mean(a, axis=2, keepdims=True)
        var = jnp.mean(jnp.square(a - mu), axis=2, keepdims=True)
        a = (a - mu) * jax.lax.rsqrt(var + LN_EPS)
        cond = gv @ blk["cond_w"] + blk["cond_b"]
        a = a * blk["ln_g"][None, None] + blk["ln_b"][None, None] + cond[:, None, :, None]
        h = jnp.einsum("ic,bpcr->bpir", blk["pw1_wT"], a.astype(jnp.bfloat16),
                       preferred_element_type=jnp.float32) + blk["pw1_b"][None, None]
        h = _gelu_tanh(h)
        y = jnp.einsum("oi,bpir->bpor", blk["pw2_wT"], h.astype(jnp.bfloat16),
                       preferred_element_type=jnp.float32) + blk["pw2_b"][None, None]
        fmaps.append(y)

    H3 = y.shape[-1]
    yp = jnp.pad(y, ((0, 0), (0, 0), (0, 0), (2, 0)))
    post = sum(jnp.sum(p["post_wT"][None, None, :, k:k + 1] * yp[..., k:k + H3], axis=2)
               for k in range(3))
    post = post + p["post_b"][0, 0]
    out = jnp.transpose(post, (0, 2, 1)).reshape(B, H3 * PERIOD)
    return out, fmaps


# ============================ parameter setup ===============================


def init_params(key):
    keys = iter(jax.random.split(key, 64))

    def nrm(shape, scale):
        return jax.random.normal(next(keys), shape, jnp.float32) * scale

    p = {}
    N = len(UPSAMPLE_RATES)
    s0 = UPSAMPLE_RATES[-1]
    k0 = s0 * 3
    c0 = FINAL_DIM // 2 ** (N - 1)
    # weight_norm at init is the identity reparametrization -> plain weights.
    w0 = nrm((k0, c0), 1.0 / k0 ** 0.5)
    p["init_w_revT"] = jnp.transpose(w0[::-1], (1, 0))          # (C0, K0), taps reversed
    p["init_b"] = nrm((c0, 1), 0.01)

    p["blocks"] = []
    for i, u in enumerate(UPSAMPLE_RATES[::-1][1:], start=1):
        cin = FINAL_DIM // 2 ** (N - i)
        cout = FINAL_DIM // 2 ** (N - i - 1)
        K = u * 3
        inner = cin * EXTEND
        dw = nrm((K, cin), 1.0 / K ** 0.5)
        pw1 = nrm((cin, inner), 1.0 / cin ** 0.5)
        pw2 = nrm((inner, cout), 1.0 / inner ** 0.5)
        blk = dict(
            dw_revT=jnp.transpose(dw[::-1], (1, 0)),            # (cin, K) reversed taps
            dw_b=nrm((cin, 1), 0.01),
            ln_g=jnp.ones((cin, 1), jnp.float32),
            ln_b=jnp.zeros((cin, 1), jnp.float32),
            cond_w=nrm((GIN, cin), 1.0 / GIN ** 0.5),
            cond_b=nrm((cin,), 0.01),
            pw1_wT=jnp.transpose(pw1, (1, 0)).astype(jnp.bfloat16),   # (inner, cin)
            pw1_b=nrm((inner, 1), 0.01),
            pw2_wT=jnp.transpose(pw2, (1, 0)).astype(jnp.bfloat16),   # (cout, inner)
            pw2_b=nrm((cout, 1), 0.01),
        )
        p["blocks"].append(blk)

    w_post = nrm((3, FINAL_DIM), 1.0 / (3 * FINAL_DIM) ** 0.5)
    p["post_wT"] = jnp.transpose(w_post, (1, 0))                # (C, 3)
    p["post_b"] = nrm((1, 1), 0.01)
    return p


# ================================== main ====================================

if __name__ == "__main__":
    key = jax.random.PRNGKey(0)
    kx, kg, kp = jax.random.split(key, 3)

    B, T = 2, 100                      # T % PERIOD != 0 exercises the reflect pad
    x = jax.random.normal(kx, (B, 1, T), jnp.float32)
    g = jax.random.normal(kg, (B, GIN, 1), jnp.float32)
    params = init_params(kp)

    out, fmaps = jax.jit(discriminator_p_forward)(x, g, params)
    jax.block_until_ready((out, fmaps))

    # ---- shape checks: T'=102 -> H=34 -> 17 -> 9 -> 5 -----------------------
    Tp = T + (PERIOD - T % PERIOD) % PERIOD
    geoms = _build_geometry(Tp // PERIOD)
    hs = [gg["h_out"] for gg in geoms]
    N = len(UPSAMPLE_RATES)
    assert out.shape == (B, hs[-1] * PERIOD), out.shape
    for j, fm in enumerate(fmaps):
        cj = FINAL_DIM // 2 ** (N - 1 - j)
        assert fm.shape == (B, PERIOD, cj, hs[j]), (j, fm.shape)

    # ---- numerics vs. the pure-JAX reference of the same math ---------------
    ref_out, ref_fmaps = jax.jit(reference_forward)(x, g, params)
    assert jnp.allclose(out, ref_out, rtol=2e-2, atol=2e-2), \
        float(jnp.max(jnp.abs(out - ref_out)))
    for j, (fm, rf) in enumerate(zip(fmaps, ref_fmaps)):
        assert jnp.allclose(fm, rf, rtol=2e-2, atol=2e-2), \
            (j, float(jnp.max(jnp.abs(fm - rf))))

    print("KERNEL_OK")
</pallas_src>

<mosaic_0001>
module attributes {stable_mosaic.version = 11 : i64} {
  func.func @_fused_disc_kernel(%arg0: i32, %arg1: memref<1x24x5xf32, #tpu.memory_space<vmem>>, %arg2: memref<8x6xf32, #tpu.memory_space<vmem>>, %arg3: memref<8x1xf32, #tpu.memory_space<vmem>>, %arg4: memref<8x6xf32, #tpu.memory_space<vmem>>, %arg5: memref<8x1xf32, #tpu.memory_space<vmem>>, %arg6: memref<8x1xf32, #tpu.memory_space<vmem>>, %arg7: memref<8x1xf32, #tpu.memory_space<vmem>>, %arg8: memref<1x8x1xf32, #tpu.memory_space<vmem>>, %arg9: memref<32x8xbf16, #tpu.memory_space<vmem>>, %arg10: memref<32x1xf32, #tpu.memory_space<vmem>>, %arg11: memref<16x32xbf16, #tpu.memory_space<vmem>>, %arg12: memref<16x1xf32, #tpu.memory_space<vmem>>, %arg13: memref<16x6xf32, #tpu.memory_space<vmem>>, %arg14: memref<16x1xf32, #tpu.memory_space<vmem>>, %arg15: memref<16x1xf32, #tpu.memory_space<vmem>>, %arg16: memref<16x1xf32, #tpu.memory_space<vmem>>, %arg17: memref<1x16x1xf32, #tpu.memory_space<vmem>>, %arg18: memref<64x16xbf16, #tpu.memory_space<vmem>>, %arg19: memref<64x1xf32, #tpu.memory_space<vmem>>, %arg20: memref<32x64xbf16, #tpu.memory_space<vmem>>, %arg21: memref<32x1xf32, #tpu.memory_space<vmem>>, %arg22: memref<32x3xf32, #tpu.memory_space<vmem>>, %arg23: memref<1x1xf32, #tpu.memory_space<vmem>>, %arg24: memref<1x3x4x8x6xf32, #tpu.memory_space<vmem>>, %arg25: memref<1x3x2x16x7xf32, #tpu.memory_space<vmem>>, %arg26: memref<1x3x32x7xf32, #tpu.memory_space<vmem>>, %arg27: memref<1x3x5xf32, #tpu.memory_space<vmem>>, %arg28: memref<8x27xf32, #tpu.memory_space<vmem>>, %arg29: memref<16x15xf32, #tpu.memory_space<vmem>>) attributes {dimension_semantics = [#tpu.dimension_semantics<parallel>], iteration_bounds = array<i64: 2>, scalar_prefetch = 0 : i64, scratch_operands = 2 : i64, tpu.core_type = #tpu.core_type<tc>, window_params = [{transform_indices = @transform_0, window_bounds = array<i64: 1, 24, 5>}, {pipeline_mode = #tpu.pipeline_mode<synchronous>, transform_indices = @transform_1, window_bounds = array<i64: 8, 6>}, {pipeline_mode = #tpu.pipeline_mode<synchronous>, transform_indices = @transform_2, window_bounds = array<i64: 8, 1>}, {pipeline_mode = #tpu.pipeline_mode<synchronous>, transform_indices = @transform_3, window_bounds = array<i64: 8, 6>}, {pipeline_mode = #tpu.pipeline_mode<synchronous>, transform_indices = @transform_4, window_bounds = array<i64: 8, 1>}, {pipeline_mode = #tpu.pipeline_mode<synchronous>, transform_indices = @transform_5, window_bounds = array<i64: 8, 1>}, {pipeline_mode = #tpu.pipeline_mode<synchronous>, transform_indices = @transform_6, window_bounds = array<i64: 8, 1>}, {transform_indices = @transform_7, window_bounds = array<i64: 1, 8, 1>}, {pipeline_mode = #tpu.pipeline_mode<synchronous>, transform_indices = @transform_8, window_bounds = array<i64: 32, 8>}, {pipeline_mode = #tpu.pipeline_mode<synchronous>, transform_indices = @transform_9, window_bounds = array<i64: 32, 1>}, {pipeline_mode = #tpu.pipeline_mode<synchronous>, transform_indices = @transform_10, window_bounds = array<i64: 16, 32>}, {pipeline_mode = #tpu.pipeline_mode<synchronous>, transform_indices = @transform_11, window_bounds = array<i64: 16, 1>}, {pipeline_mode = #tpu.pipeline_mode<synchronous>, transform_indices = @transform_12, window_bounds = array<i64: 16, 6>}, {pipeline_mode = #tpu.pipeline_mode<synchronous>, transform_indices = @transform_13, window_bounds = array<i64: 16, 1>}, {pipeline_mode = #tpu.pipeline_mode<synchronous>, transform_indices = @transform_14, window_bounds = array<i64: 16, 1>}, {pipeline_mode = #tpu.pipeline_mode<synchronous>, transform_indices = @transform_15, window_bounds = array<i64: 16, 1>}, {transform_indices = @transform_16, window_bounds = array<i64: 1, 16, 1>}, {pipeline_mode = #tpu.pipeline_mode<synchronous>, transform_indices = @transform_17, window_bounds = array<i64: 64, 16>}, {pipeline_mode = #tpu.pipeline_mode<synchronous>, transform_indices = @transform_18, window_bounds = array<i64: 64, 1>}, {pipeline_mode = #tpu.pipeline_mode<synchronous>, transform_indices = @transform_19, window_bounds = array<i64: 32, 64>}, {pipeline_mode = #tpu.pipeline_mode<synchronous>, transform_indices = @transform_20, window_bounds = array<i64: 32, 1>}, {pipeline_mode = #tpu.pipeline_mode<synchronous>, transform_indices = @transform_21, window_bounds = array<i64: 32, 3>}, {pipeline_mode = #tpu.pipeline_mode<synchronous>, transform_indices = @transform_22, window_bounds = array<i64: 1, 1>}, {transform_indices = @transform_23, window_bounds = array<i64: 1, 3, 4, 8, 6>}, {transform_indices = @transform_24, window_bounds = array<i64: 1, 3, 2, 16, 7>}, {transform_indices = @transform_25, window_bounds = array<i64: 1, 3, 32, 7>}, {transform_indices = @transform_26, window_bounds = array<i64: 1, 3, 5>}]} {
    %cst = arith.constant 0.000000e+00 : f32
    %0 = vector.broadcast %cst : f32 to vector<8x6xf32>
    %c0 = arith.constant 0 : index
    %c0_0 = arith.constant 0 : index
    %c0_1 = arith.constant 0 : index
    %c0_2 = arith.constant 0 : index
    %c0_3 = arith.constant 0 : index
    %1 = vector.load %arg24[%c0, %c0_0, %c0_1, %c0_2, %c0_3] : memref<1x3x4x8x6xf32, #tpu.memory_space<vmem>>, vector<1x1x1x8x6xf32>
    %2 = vector.shape_cast %1 : vector<1x1x1x8x6xf32> to vector<8x6xf32>
    %3 = vector.shape_cast %0 : vector<8x6xf32> to vector<1x1x1x8x6xf32>
    tpu.vector_store %arg24[%c0, %c0_0, %c0_1, %c0_2, %c0_3], %3 {strides = array<i32>} : memref<1x3x4x8x6xf32, #tpu.memory_space<vmem>>, vector<1x1x1x8x6xf32>,
    %cst_4 = arith.constant 0.000000e+00 : f32
    %4 = vector.broadcast %cst_4 : f32 to vector<8x6xf32>
    %c0_5 = arith.constant 0 : index
    %c0_6 = arith.constant 0 : index
    %c1 = arith.constant 1 : index
    %c0_7 = arith.constant 0 : index
    %c0_8 = arith.constant 0 : index
    %5 = vector.load %arg24[%c0_5, %c0_6, %c1, %c0_7, %c0_8] : memref<1x3x4x8x6xf32, #tpu.memory_space<vmem>>, vector<1x1x1x8x6xf32>
    %6 = vector.shape_cast %5 : vector<1x1x1x8x6xf32> to vector<8x6xf32>
    %7 = vector.shape_cast %4 : vector<8x6xf32> to vector<1x1x1x8x6xf32>
    tpu.vector_store %arg24[%c0_5, %c0_6, %c1, %c0_7, %c0_8], %7 {strides = array<i32>} : memref<1x3x4x8x6xf32, #tpu.memory_space<vmem>>, vector<1x1x1x8x6xf32>,
    %cst_9 = arith.constant 0.000000e+00 : f32
    %8 = vector.broadcast %cst_9 : f32 to vector<8x6xf32>
    %c0_10 = arith.constant 0 : index
    %c0_11 = arith.constant 0 : index
    %c2 = arith.constant 2 : index
    %c0_12 = arith.constant 0 : index
    %c0_13 = arith.constant 0 : index
    %9 = vector.load %arg24[%c0_10, %c0_11, %c2, %c0_12, %c0_13] : memref<1x3x4x8x6xf32, #tpu.memory_space<vmem>>, vector<1x1x1x8x6xf32>
    %10 = vector.shape_cast %9 : vector<1x1x1x8x6xf32> to vector<8x6xf32>
    %11 = vector.shape_cast %8 : vector<8x6xf32> to vector<1x1x1x8x6xf32>
    tpu.vector_store %arg24[%c0_10, %c0_11, %c2, %c0_12, %c0_13], %11 {strides = array<i32>} : memref<1x3x4x8x6xf32, #tpu.memory_space<vmem>>, vector<1x1x1x8x6xf32>,
    %cst_14 = arith.constant 0.000000e+00 : f32
    %12 = vector.broadcast %cst_14 : f32 to vector<8x6xf32>
    %c0_15 = arith.constant 0 : index
    %c0_16 = arith.constant 0 : index
    %c3 = arith.constant 3 : index
    %c0_17 = arith.constant 0 : index
    %c0_18 = arith.constant 0 : index
    %13 = vector.load %arg24[%c0_15, %c0_16, %c3, %c0_17, %c0_18] : memref<1x3x4x8x6xf32, #tpu.memory_space<vmem>>, vector<1x1x1x8x6xf32>
    %14 = vector.shape_cast %13 : vector<1x1x1x8x6xf32> to vector<8x6xf32>
    %15 = vector.shape_cast %12 : vector<8x6xf32> to vector<1x1x1x8x6xf32>
    tpu.vector_store %arg24[%c0_15, %c0_16, %c3, %c0_17, %c0_18], %15 {strides = array<i32>} : memref<1x3x4x8x6xf32, #tpu.memory_space<vmem>>, vector<1x1x1x8x6xf32>,
    %cst_19 = arith.constant 0.000000e+00 : f32
    %16 = vector.broadcast %cst_19 : f32 to vector<16x7xf32>
    %c0_20 = arith.constant 0 : index
    %c0_21 = arith.constant 0 : index
    %c0_22 = arith.constant 0 : index
    %c0_23 = arith.constant 0 : index
    %c0_24 = arith.constant 0 : index
    %17 = vector.load %arg25[%c0_20, %c0_21, %c0_22, %c0_23, %c0_24] : memref<1x3x2x16x7xf32, #tpu.memory_space<vmem>>, vector<1x1x1x16x7xf32>
    %18 = vector.shape_cast %17 : vector<1x1x1x16x7xf32> to vector<16x7xf32>
    %19 = vector.shape_cast %16 : vector<16x7xf32> to vector<1x1x1x16x7xf32>
    tpu.vector_store %arg25[%c0_20, %c0_21, %c0_22, %c0_23, %c0_24], %19 {strides = array<i32>} : memref<1x3x2x16x7xf32, #tpu.memory_space<vmem>>, vector<1x1x1x16x7xf32>,
    %cst_25 = arith.constant 0.000000e+00 : f32
    %20 = vector.broadcast %cst_25 : f32 to vector<16x7xf32>
    %c0_26 = arith.constant 0 : index
    %c0_27 = arith.constant 0 : index
    %c1_28 = arith.constant 1 : index
    %c0_29 = arith.constant 0 : index
    %c0_30 = arith.constant 0 : index
    %21 = vector.load %arg25[%c0_26, %c0_27, %c1_28, %c0_29, %c0_30] : memref<1x3x2x16x7xf32, #tpu.memory_space<vmem>>, vector<1x1x1x16x7xf32>
    %22 = vector.shape_cast %21 : vector<1x1x1x16x7xf32> to vector<16x7xf32>
    %23 = vector.shape_cast %20 : vector<16x7xf32> to vector<1x1x1x16x7xf32>
    tpu.vector_store %arg25[%c0_26, %c0_27, %c1_28, %c0_29, %c0_30], %23 {strides = array<i32>} : memref<1x3x2x16x7xf32, #tpu.memory_space<vmem>>, vector<1x1x1x16x7xf32>,
    %cst_31 = arith.constant 0.000000e+00 : f32
    %24 = vector.broadcast %cst_31 : f32 to vector<32x7xf32>
    %c0_32 = arith.constant 0 : index
    %c0_33 = arith.constant 0 : index
    %c0_34 = arith.constant 0 : index
    %c0_35 = arith.constant 0 : index
    %25 = vector.load %arg26[%c0_32, %c0_33, %c0_34, %c0_35] : memref<1x3x32x7xf32, #tpu.memory_space<vmem>>, vector<1x1x32x7xf32>
    %26 = vector.shape_cast %25 : vector<1x1x32x7xf32> to vector<32x7xf32>
    %27 = vector.shape_cast %24 : vector<32x7xf32> to vector<1x1x32x7xf32>
    tpu.vector_store %arg26[%c0_32, %c0_33, %c0_34, %c0_35], %27 {strides = array<i32>} : memref<1x3x32x7xf32, #tpu.memory_space<vmem>>, vector<1x1x32x7xf32>,
    %cst_36 = arith.constant 0.000000e+00 : f32
    %28 = vector.broadcast %cst_36 : f32 to vector<8x6xf32>
    %c0_37 = arith.constant 0 : index
    %c1_38 = arith.constant 1 : index
    %c0_39 = arith.constant 0 : index
    %c0_40 = arith.constant 0 : index
    %c0_41 = arith.constant 0 : index
    %29 = vector.load %arg24[%c0_37, %c1_38, %c0_39, %c0_40, %c0_41] : memref<1x3x4x8x6xf32, #tpu.memory_space<vmem>>, vector<1x1x1x8x6xf32>
    %30 = vector.shape_cast %29 : vector<1x1x1x8x6xf32> to vector<8x6xf32>
    %31 = vector.shape_cast %28 : vector<8x6xf32> to vector<1x1x1x8x6xf32>
    tpu.vector_store %arg24[%c0_37, %c1_38, %c0_39, %c0_40, %c0_41], %31 {strides = array<i32>} : memref<1x3x4x8x6xf32, #tpu.memory_space<vmem>>, vector<1x1x1x8x6xf32>,
    %cst_42 = arith.constant 0.000000e+00 : f32
    %32 = vector.broadcast %cst_42 : f32 to vector<8x6xf32>
    %c0_43 = arith.constant 0 : index
    %c1_44 = arith.constant 1 : index
    %c1_45 = arith.constant 1 : index
    %c0_46 = arith.constant 0 : index
    %c0_47 = arith.constant 0 : index
    %33 = vector.load %arg24[%c0_43, %c1_44, %c1_45, %c0_46, %c0_47] : memref<1x3x4x8x6xf32, #tpu.memory_space<vmem>>, vector<1x1x1x8x6xf32>
    %34 = vector.shape_cast %33 : vector<1x1x1x8x6xf32> to vector<8x6xf32>
    %35 = vector.shape_cast %32 : vector<8x6xf32> to vector<1x1x1x8x6xf32>
    tpu.vector_store %arg24[%c0_43, %c1_44, %c1_45, %c0_46, %c0_47], %35 {strides = array<i32>} : memref<1x3x4x8x6xf32, #tpu.memory_space<vmem>>, vector<1x1x1x8x6xf32>,
    %cst_48 = arith.constant 0.000000e+00 : f32
    %36 = vector.broadcast %cst_48 : f32 to vector<8x6xf32>
    %c0_49 = arith.constant 0 : index
    %c1_50 = arith.constant 1 : index
    %c2_51 = arith.constant 2 : index
    %c0_52 = arith.constant 0 : index
    %c0_53 = arith.constant 0 : index
    %37 = vector.load %arg24[%c0_49, %c1_50, %c2_51, %c0_52, %c0_53] : memref<1x3x4x8x6xf32, #tpu.memory_space<vmem>>, vector<1x1x1x8x6xf32>
    %38 = vector.shape_cast %37 : vector<1x1x1x8x6xf32> to vector<8x6xf32>
    %39 = vector.shape_cast %36 : vector<8x6xf32> to vector<1x1x1x8x6xf32>
    tpu.vector_store %arg24[%c0_49, %c1_50, %c2_51, %c0_52, %c0_53], %39 {strides = array<i32>} : memref<1x3x4x8x6xf32, #tpu.memory_space<vmem>>, vector<1x1x1x8x6xf32>,
    %cst_54 = arith.constant 0.000000e+00 : f32
    %40 = vector.broadcast %cst_54 : f32 to vector<8x6xf32>
    %c0_55 = arith.constant 0 : index
    %c1_56 = arith.constant 1 : index
    %c3_57 = arith.constant 3 : index
    %c0_58 = arith.constant 0 : index
    %c0_59 = arith.constant 0 : index
    %41 = vector.load %arg24[%c0_55, %c1_56, %c3_57, %c0_58, %c0_59] : memref<1x3x4x8x6xf32, #tpu.memory_space<vmem>>, vector<1x1x1x8x6xf32>
    %42 = vector.shape_cast %41 : vector<1x1x1x8x6xf32> to vector<8x6xf32>
    %43 = vector.shape_cast %40 : vector<8x6xf32> to vector<1x1x1x8x6xf32>
    tpu.vector_store %arg24[%c0_55, %c1_56, %c3_57, %c0_58, %c0_59], %43 {strides = array<i32>} : memref<1x3x4x8x6xf32, #tpu.memory_space<vmem>>, vector<1x1x1x8x6xf32>,
    %cst_60 = arith.constant 0.000000e+00 : f32
    %44 = vector.broadcast %cst_60 : f32 to vector<16x7xf32>
    %c0_61 = arith.constant 0 : index
    %c1_62 = arith.constant 1 : index
    %c0_63 = arith.constant 0 : index
    %c0_64 = arith.constant 0 : index
    %c0_65 = arith.constant 0 : index
    %45 = vector.load %arg25[%c0_61, %c1_62, %c0_63, %c0_64, %c0_65] : memref<1x3x2x16x7xf32, #tpu.memory_space<vmem>>, vector<1x1x1x16x7xf32>
    %46 = vector.shape_cast %45 : vector<1x1x1x16x7xf32> to vector<16x7xf32>
    %47 = vector.shape_cast %44 : vector<16x7xf32> to vector<1x1x1x16x7xf32>
    tpu.vector_store %arg25[%c0_61, %c1_62, %c0_63, %c0_64, %c0_65], %47 {strides = array<i32>} : memref<1x3x2x16x7xf32, #tpu.memory_space<vmem>>, vector<1x1x1x16x7xf32>,
    %cst_66 = arith.constant 0.000000e+00 : f32
    %48 = vector.broadcast %cst_66 : f32 to vector<16x7xf32>
    %c0_67 = arith.constant 0 : index
    %c1_68 = arith.constant 1 : index
    %c1_69 = arith.constant 1 : index
    %c0_70 = arith.constant 0 : index
    %c0_71 = arith.constant 0 : index
    %49 = vector.load %arg25[%c0_67, %c1_68, %c1_69, %c0_70, %c0_71] : memref<1x3x2x16x7xf32, #tpu.memory_space<vmem>>, vector<1x1x1x16x7xf32>
    %50 = vector.shape_cast %49 : vector<1x1x1x16x7xf32> to vector<16x7xf32>
    %51 = vector.shape_cast %48 : vector<16x7xf32> to vector<1x1x1x16x7xf32>
    tpu.vector_store %arg25[%c0_67, %c1_68, %c1_69, %c0_70, %c0_71], %51 {strides = array<i32>} : memref<1x3x2x16x7xf32, #tpu.memory_space<vmem>>, vector<1x1x1x16x7xf32>,
    %cst_72 = arith.constant 0.000000e+00 : f32
    %52 = vector.broadcast %cst_72 : f32 to vector<32x7xf32>
    %c0_73 = arith.constant 0 : index
    %c1_74 = arith.constant 1 : index
    %c0_75 = arith.constant 0 : index
    %c0_76 = arith.constant 0 : index
    %53 = vector.load %arg26[%c0_73, %c1_74, %c0_75, %c0_76] : memref<1x3x32x7xf32, #tpu.memory_space<vmem>>, vector<1x1x32x7xf32>
    %54 = vector.shape_cast %53 : vector<1x1x32x7xf32> to vector<32x7xf32>
    %55 = vector.shape_cast %52 : vector<32x7xf32> to vector<1x1x32x7xf32>
    tpu.vector_store %arg26[%c0_73, %c1_74, %c0_75, %c0_76], %55 {strides = array<i32>} : memref<1x3x32x7xf32, #tpu.memory_space<vmem>>, vector<1x1x32x7xf32>,
    %cst_77 = arith.constant 0.000000e+00 : f32
    %56 = vector.broadcast %cst_77 : f32 to vector<8x6xf32>
    %c0_78 = arith.constant 0 : index
    %c2_79 = arith.constant 2 : index
    %c0_80 = arith.constant 0 : index
    %c0_81 = arith.constant 0 : index
    %c0_82 = arith.constant 0 : index
    %57 = vector.load %arg24[%c0_78, %c2_79, %c0_80, %c0_81, %c0_82] : memref<1x3x4x8x6xf32, #tpu.memory_space<vmem>>, vector<1x1x1x8x6xf32>
    %58 = vector.shape_cast %57 : vector<1x1x1x8x6xf32> to vector<8x6xf32>
    %59 = vector.shape_cast %56 : vector<8x6xf32> to vector<1x1x1x8x6xf32>
    tpu.vector_store %arg24[%c0_78, %c2_79, %c0_80, %c0_81, %c0_82], %59 {strides = array<i32>} : memref<1x3x4x8x6xf32, #tpu.memory_space<vmem>>, vector<1x1x1x8x6xf32>,
    %cst_83 = arith.constant 0.000000e+00 : f32
    %60 = vector.broadcast %cst_83 : f32 to vector<8x6xf32>
    %c0_84 = arith.constant 0 : index
    %c2_85 = arith.constant 2 : index
    %c1_86 = arith.constant 1 : index
    %c0_87 = arith.constant 0 : index
    %c0_88 = arith.constant 0 : index
    %61 = vector.load %arg24[%c0_84, %c2_85, %c1_86, %c0_87, %c0_88] : memref<1x3x4x8x6xf32, #tpu.memory_space<vmem>>, vector<1x1x1x8x6xf32>
    %62 = vector.shape_cast %61 : vector<1x1x1x8x6xf32> to vector<8x6xf32>
    %63 = vector.shape_cast %60 : vector<8x6xf32> to vector<1x1x1x8x6xf32>
    tpu.vector_store %arg24[%c0_84, %c2_85, %c1_86, %c0_87, %c0_88], %63 {strides = array<i32>} : memref<1x3x4x8x6xf32, #tpu.memory_space<vmem>>, vector<1x1x1x8x6xf32>,
    %cst_89 = arith.constant 0.000000e+00 : f32
    %64 = vector.broadcast %cst_89 : f32 to vector<8x6xf32>
    %c0_90 = arith.constant 0 : index
    %c2_91 = arith.constant 2 : index
    %c2_92 = arith.constant 2 : index
    %c0_93 = arith.constant 0 : index
    %c0_94 = arith.constant 0 : index
    %65 = vector.load %arg24[%c0_90, %c2_91, %c2_92, %c0_93, %c0_94] : memref<1x3x4x8x6xf32, #tpu.memory_space<vmem>>, vector<1x1x1x8x6xf32>
    %66 = vector.shape_cast %65 : vector<1x1x1x8x6xf32> to vector<8x6xf32>
    %67 = vector.shape_cast %64 : vector<8x6xf32> to vector<1x1x1x8x6xf32>
    tpu.vector_store %arg24[%c0_90, %c2_91, %c2_92, %c0_93, %c0_94], %67 {strides = array<i32>} : memref<1x3x4x8x6xf32, #tpu.memory_space<vmem>>, vector<1x1x1x8x6xf32>,
    %cst_95 = arith.constant 0.000000e+00 : f32
    %68 = vector.broadcast %cst_95 : f32 to vector<8x6xf32>
    %c0_96 = arith.constant 0 : index
    %c2_97 = arith.constant 2 : index
    %c3_98 = arith.constant 3 : index
    %c0_99 = arith.constant 0 : index
    %c0_100 = arith.constant 0 : index
    %69 = vector.load %arg24[%c0_96, %c2_97, %c3_98, %c0_99, %c0_100] : memref<1x3x4x8x6xf32, #tpu.memory_space<vmem>>, vector<1x1x1x8x6xf32>
    %70 = vector.shape_cast %69 : vector<1x1x1x8x6xf32> to vector<8x6xf32>
    %71 = vector.shape_cast %68 : vector<8x6xf32> to vector<1x1x1x8x6xf32>
    tpu.vector_store %arg24[%c0_96, %c2_97, %c3_98, %c0_99, %c0_100], %71 {strides = array<i32>} : memref<1x3x4x8x6xf32, #tpu.memory_space<vmem>>, vector<1x1x1x8x6xf32>,
    %cst_101 = arith.constant 0.000000e+00 : f32
    %72 = vector.broadcast %cst_101 : f32 to vector<16x7xf32>
    %c0_102 = arith.constant 0 : index
    %c2_103 = arith.constant 2 : index
    %c0_104 = arith.constant 0 : index
    %c0_105 = arith.constant 0 : index
    %c0_106 = arith.constant 0 : index
    %73 = vector.load %arg25[%c0_102, %c2_103, %c0_104, %c0_105, %c0_106] : memref<1x3x2x16x7xf32, #tpu.memory_space<vmem>>, vector<1x1x1x16x7xf32>
    %74 = vector.shape_cast %73 : vector<1x1x1x16x7xf32> to vector<16x7xf32>
    %75 = vector.shape_cast %72 : vector<16x7xf32> to vector<1x1x1x16x7xf32>
    tpu.vector_store %arg25[%c0_102, %c2_103, %c0_104, %c0_105, %c0_106], %75 {strides = array<i32>} : memref<1x3x2x16x7xf32, #tpu.memory_space<vmem>>, vector<1x1x1x16x7xf32>,
    %cst_107 = arith.constant 0.000000e+00 : f32
    %76 = vector.broadcast %cst_107 : f32 to vector<16x7xf32>
    %c0_108 = arith.constant 0 : index
    %c2_109 = arith.constant 2 : index
    %c1_110 = arith.constant 1 : index
    %c0_111 = arith.constant 0 : index
    %c0_112 = arith.constant 0 : index
    %77 = vector.load %arg25[%c0_108, %c2_109, %c1_110, %c0_111, %c0_112] : memref<1x3x2x16x7xf32, #tpu.memory_space<vmem>>, vector<1x1x1x16x7xf32>
    %78 = vector.shape_cast %77 : vector<1x1x1x16x7xf32> to vector<16x7xf32>
    %79 = vector.shape_cast %76 : vector<16x7xf32> to vector<1x1x1x16x7xf32>
    tpu.vector_store %arg25[%c0_108, %c2_109, %c1_110, %c0_111, %c0_112], %79 {strides = array<i32>} : memref<1x3x2x16x7xf32, #tpu.memory_space<vmem>>, vector<1x1x1x16x7xf32>,
    %cst_113 = arith.constant 0.000000e+00 : f32
    %80 = vector.broadcast %cst_113 : f32 to vector<32x7xf32>
    %c0_114 = arith.constant 0 : index
    %c2_115 = arith.constant 2 : index
    %c0_116 = arith.constant 0 : index
    %c0_117 = arith.constant 0 : index
    %81 = vector.load %arg26[%c0_114, %c2_115, %c0_116, %c0_117] : memref<1x3x32x7xf32, #tpu.memory_space<vmem>>, vector<1x1x32x7xf32>
    %82 = vector.shape_cast %81 : vector<1x1x32x7xf32> to vector<32x7xf32>
    %83 = vector.shape_cast %80 : vector<32x7xf32> to vector<1x1x32x7xf32>
    tpu.vector_store %arg26[%c0_114, %c2_115, %c0_116, %c0_117], %83 {strides = array<i32>} : memref<1x3x32x7xf32, #tpu.memory_space<vmem>>, vector<1x1x32x7xf32>,
    %c0_118 = arith.constant 0 : index
    %c7 = arith.constant 7 : index
    %c0_119 = arith.constant 0 : index
    %84 = vector.load %arg1[%c0_118, %c7, %c0_119] : memref<1x24x5xf32, #tpu.memory_space<vmem>>, vector<1x1x4xf32>
    %85 = vector.shape_cast %84 : vector<1x1x4xf32> to vector<1x4xf32>
    %c0_120 = arith.constant 0 : index
    %c0_121 = arith.constant 0 : index
    %86 = vector.load %arg2[%c0_120, %c0_121] : memref<8x6xf32, #tpu.memory_space<vmem>>, vector<8x1xf32>
    %87 = vector.broadcast %86 : vector<8x1xf32> to vector<8x4xf32>
    %88 = vector.broadcast %85 : vector<1x4xf32> to vector<8x4xf32>
    %89 = arith.mulf %87, %88 : vector<8x4xf32>
    %c0_122 = arith.constant 0 : index
    %c0_123 = arith.constant 0 : index
    %c1_124 = arith.constant 1 : index
    %90 = vector.load %arg1[%c0_122, %c0_123, %c1_124] : memref<1x24x5xf32, #tpu.memory_space<vmem>>, vector<1x1x4xf32>
    %91 = vector.shape_cast %90 : vector<1x1x4xf32> to vector<1x4xf32>
    %c0_125 = arith.constant 0 : index
    %c1_126 = arith.constant 1 : index
    %92 = vector.load %arg2[%c0_125, %c1_126] : memref<8x6xf32, #tpu.memory_space<vmem>>, vector<8x1xf32>
    %93 = vector.broadcast %92 : vector<8x1xf32> to vector<8x4xf32>
    %94 = vector.broadcast %91 : vector<1x4xf32> to vector<8x4xf32>
    %95 = arith.mulf %93, %94 : vector<8x4xf32>
    %96 = arith.addf %89, %95 : vector<8x4xf32>
    %c0_127 = arith.constant 0 : index
    %c1_128 = arith.constant 1 : index
    %c1_129 = arith.constant 1 : index
    %97 = vector.load %arg1[%c0_127, %c1_128, %c1_129] : memref<1x24x5xf32, #tpu.memory_space<vmem>>, vector<1x1x4xf32>
    %98 = vector.shape_cast %97 : vector<1x1x4xf32> to vector<1x4xf32>
    %c0_130 = arith.constant 0 : index
    %c2_131 = arith.constant 2 : index
    %99 = vector.load %arg2[%c0_130, %c2_131] : memref<8x6xf32, #tpu.memory_space<vmem>>, vector<8x1xf32>
    %100 = vector.broadcast %99 : vector<8x1xf32> to vector<8x4xf32>
    %101 = vector.broadcast %98 : vector<1x4xf32> to vector<8x4xf32>
    %102 = arith.mulf %100, %101 : vector<8x4xf32>
    %103 = arith.addf %96, %102 : vector<8x4xf32>
    %c0_132 = arith.constant 0 : index
    %c2_133 = arith.constant 2 : index
    %c1_134 = arith.constant 1 : index
    %104 = vector.load %arg1[%c0_132, %c2_133, %c1_134] : memref<1x24x5xf32, #tpu.memory_space<vmem>>, vector<1x1x4xf32>
    %105 = vector.shape_cast %104 : vector<1x1x4xf32> to vector<1x4xf32>
    %c0_135 = arith.constant 0 : index
    %c3_136 = arith.constant 3 : index
    %106 = vector.load %arg2[%c0_135, %c3_136] : memref<8x6xf32, #tpu.memory_space<vmem>>, vector<8x1xf32>
    %107 = vector.broadcast %106 : vector<8x1xf32> to vector<8x4xf32>
    %108 = vector.broadcast %105 : vector<1x4xf32> to vector<8x4xf32>
    %109 = arith.mulf %107, %108 : vector<8x4xf32>
    %110 = arith.addf %103, %109 : vector<8x4xf32>
    %c0_137 = arith.constant 0 : index
    %c3_138 = arith.constant 3 : index
    %c1_139 = arith.constant 1 : index
    %111 = vector.load %arg1[%c0_137, %c3_138, %c1_139] : memref<1x24x5xf32, #tpu.memory_space<vmem>>, vector<1x1x4xf32>
    %112 = vector.shape_cast %111 : vector<1x1x4xf32> to vector<1x4xf32>
    %c0_140 = arith.constant 0 : index
    %c4 = arith.constant 4 : index
    %113 = vector.load %arg2[%c0_140, %c4] : memref<8x6xf32, #tpu.memory_space<vmem>>, vector<8x1xf32>
    %114 = vector.broadcast %113 : vector<8x1xf32> to vector<8x4xf32>
    %115 = vector.broadcast %112 : vector<1x4xf32> to vector<8x4xf32>
    %116 = arith.mulf %114, %115 : vector<8x4xf32>
    %117 = arith.addf %110, %116 : vector<8x4xf32>
    %c0_141 = arith.constant 0 : index
    %c4_142 = arith.constant 4 : index
    %c1_143 = arith.constant 1 : index
    %118 = vector.load %arg1[%c0_141, %c4_142, %c1_143] : memref<1x24x5xf32, #tpu.memory_space<vmem>>, vector<1x1x4xf32>
    %119 = vector.shape_cast %118 : vector<1x1x4xf32> to vector<1x4xf32>
    %c0_144 = arith.constant 0 : index
    %c5 = arith.constant 5 : index
    %120 = vector.load %arg2[%c0_144, %c5] : memref<8x6xf32, #tpu.memory_space<vmem>>, vector<8x1xf32>
    %121 = vector.broadcast %120 : vector<8x1xf32> to vector<8x4xf32>
    %122 = vector.broadcast %119 : vector<1x4xf32> to vector<8x4xf32>
    %123 = arith.mulf %121, %122 : vector<8x4xf32>
    %124 = arith.addf %117, %123 : vector<8x4xf32>
    %c0_145 = arith.constant 0 : index
    %c0_146 = arith.constant 0 : index
    %125 = vector.load %arg3[%c0_145, %c0_146] : memref<8x1xf32, #tpu.memory_space<vmem>>, vector<8x1xf32>
    %126 = vector.broadcast %125 : vector<8x1xf32> to vector<8x4xf32>
    %127 = arith.addf %124, %126 : vector<8x4xf32>
    %cst_147 = arith.constant 0.000000e+00 : f32
    %128 = vector.broadcast %cst_147 : f32 to vector<8x4xf32>
    %129 = arith.cmpf oge, %127, %128 : vector<8x4xf32>
    %cst_148 = arith.constant 1.000000e-01 : f32
    %130 = vector.broadcast %cst_148 : f32 to vector<8x4xf32>
    %131 = arith.mulf %130, %127 : vector<8x4xf32>
    %132 = arith.select %129, %127, %131 : vector<8x4xi1>, vector<8x4xf32>
    %c0_149 = arith.constant 0 : index
    %c0_150 = arith.constant 0 : index
    %c0_151 = arith.constant 0 : index
    %c0_152 = arith.constant 0 : index
    %c2_153 = arith.constant 2 : index
    %133 = vector.load %arg24[%c0_149, %c0_150, %c0_151, %c0_152, %c2_153] : memref<1x3x4x8x6xf32, #tpu.memory_space<vmem>>, vector<1x1x1x8x4xf32>
    %134 = vector.shape_cast %133 : vector<1x1x1x8x4xf32> to vector<8x4xf32>
    %135 = vector.shape_cast %132 : vector<8x4xf32> to vector<1x1x1x8x4xf32>
    tpu.vector_store %arg24[%c0_149, %c0_150, %c0_151, %c0_152, %c2_153], %135 {strides = array<i32>} : memref<1x3x4x8x6xf32, #tpu.memory_space<vmem>>, vector<1x1x1x8x4xf32>,
    %c0_154 = arith.constant 0 : index
    %c1_155 = arith.constant 1 : index
    %c0_156 = arith.constant 0 : index
    %136 = vector.load %arg1[%c0_154, %c1_155, %c0_156] : memref<1x24x5xf32, #tpu.memory_space<vmem>>, vector<1x1x5xf32>
    %137 = vector.shape_cast %136 : vector<1x1x5xf32> to vector<1x5xf32>
    %c0_157 = arith.constant 0 : index
    %c0_158 = arith.constant 0 : index
    %138 = vector.load %arg2[%c0_157, %c0_158] : memref<8x6xf32, #tpu.memory_space<vmem>>, vector<8x1xf32>
    %139 = vector.broadcast %138 : vector<8x1xf32> to vector<8x5xf32>
    %140 = vector.broadcast %137 : vector<1x5xf32> to vector<8x5xf32>
    %141 = arith.mulf %139, %140 : vector<8x5xf32>
    %c0_159 = arith.constant 0 : index
    %c2_160 = arith.constant 2 : index
    %c0_161 = arith.constant 0 : index
    %142 = vector.load %arg1[%c0_159, %c2_160, %c0_161] : memref<1x24x5xf32, #tpu.memory_space<vmem>>, vector<1x1x5xf32>
    %143 = vector.shape_cast %142 : vector<1x1x5xf32> to vector<1x5xf32>
    %c0_162 = arith.constant 0 : index
    %c1_163 = arith.constant 1 : index
    %144 = vector.load %arg2[%c0_162, %c1_163] : memref<8x6xf32, #tpu.memory_space<vmem>>, vector<8x1xf32>
    %145 = vector.broadcast %144 : vector<8x1xf32> to vector<8x5xf32>
    %146 = vector.broadcast %143 : vector<1x5xf32> to vector<8x5xf32>
    %147 = arith.mulf %145, %146 : vector<8x5xf32>
    %148 = arith.addf %141, %147 : vector<8x5xf32>
    %c0_164 = arith.constant 0 : index
    %c3_165 = arith.constant 3 : index
    %c0_166 = arith.constant 0 : index
    %149 = vector.load %arg1[%c0_164, %c3_165, %c0_166] : memref<1x24x5xf32, #tpu.memory_space<vmem>>, vector<1x1x5xf32>
    %150 = vector.shape_cast %149 : vector<1x1x5xf32> to vector<1x5xf32>
    %c0_167 = arith.constant 0 : index
    %c2_168 = arith.constant 2 : index
    %151 = vector.load %arg2[%c0_167, %c2_168] : memref<8x6xf32, #tpu.memory_space<vmem>>, vector<8x1xf32>
    %152 = vector.broadcast %151 : vector<8x1xf32> to vector<8x5xf32>
    %153 = vector.broadcast %150 : vector<1x5xf32> to vector<8x5xf32>
    %154 = arith.mulf %152, %153 : vector<8x5xf32>
    %155 = arith.addf %148, %154 : vector<8x5xf32>
    %c0_169 = arith.constant 0 : index
    %c4_170 = arith.constant 4 : index
    %c0_171 = arith.constant 0 : index
    %156 = vector.load %arg1[%c0_169, %c4_170, %c0_171] : memref<1x24x5xf32, #tpu.memory_space<vmem>>, vector<1x1x5xf32>
    %157 = vector.shape_cast %156 : vector<1x1x5xf32> to vector<1x5xf32>
    %c0_172 = arith.constant 0 : index
    %c3_173 = arith.constant 3 : index
    %158 = vector.load %arg2[%c0_172, %c3_173] : memref<8x6xf32, #tpu.memory_space<vmem>>, vector<8x1xf32>
    %159 = vector.broadcast %158 : vector<8x1xf32> to vector<8x5xf32>
    %160 = vector.broadcast %157 : vector<1x5xf32> to vector<8x5xf32>
    %161 = arith.mulf %159, %160 : vector<8x5xf32>
    %162 = arith.addf %155, %161 : vector<8x5xf32>
    %c0_174 = arith.constant 0 : index
    %c5_175 = arith.constant 5 : index
    %c0_176 = arith.constant 0 : index
    %163 = vector.load %arg1[%c0_174, %c5_175, %c0_176] : memref<1x24x5xf32, #tpu.memory_space<vmem>>, vector<1x1x5xf32>
    %164 = vector.shape_cast %163 : vector<1x1x5xf32> to vector<1x5xf32>
    %c0_177 = arith.constant 0 : index
    %c4_178 = arith.constant 4 : index
    %165 = vector.load %arg2[%c0_177, %c4_178] : memref<8x6xf32, #tpu.memory_space<vmem>>, vector<8x1xf32>
    %166 = vector.broadcast %165 : vector<8x1xf32> to vector<8x5xf32>
    %167 = vector.broadcast %164 : vector<1x5xf32> to vector<8x5xf32>
    %168 = arith.mulf %166, %167 : vector<8x5xf32>
    %169 = arith.addf %162, %168 : vector<8x5xf32>
    %c0_179 = arith.constant 0 : index
    %c6 = arith.constant 6 : index
    %c0_180 = arith.constant 0 : index
    %170 = vector.load %arg1[%c0_179, %c6, %c0_180] : memref<1x24x5xf32, #tpu.memory_space<vmem>>, vector<1x1x5xf32>
    %171 = vector.shape_cast %170 : vector<1x1x5xf32> to vector<1x5xf32>
    %c0_181 = arith.constant 0 : index
    %c5_182 = arith.constant 5 : index
    %172 = vector.load %arg2[%c0_181, %c5_182] : memref<8x6xf32, #tpu.memory_space<vmem>>, vector<8x1xf32>
    %173 = vector.broadcast %172 : vector<8x1xf32> to vector<8x5xf32>
    %174 = vector.broadcast %171 : vector<1x5xf32> to vector<8x5xf32>
    %175 = arith.mulf %173, %174 : vector<8x5xf32>
    %176 = arith.addf %169, %175 : vector<8x5xf32>
    %c0_183 = arith.constant 0 : index
    %c0_184 = arith.constant 0 : index
    %177 = vector.load %arg3[%c0_183, %c0_184] : memref<8x1xf32, #tpu.memory_space<vmem>>, vector<8x1xf32>
    %178 = vector.broadcast %177 : vector<8x1xf32> to vector<8x5xf32>
    %179 = arith.addf %176, %178 : vector<8x5xf32>
    %cst_185 = arith.constant 0.000000e+00 : f32
    %180 = vector.broadcast %cst_185 : f32 to vector<8x5xf32>
    %181 = arith.cmpf oge, %179, %180 : vector<8x5xf32>
    %cst_186 = arith.constant 1.000000e-01 : f32
    %182 = vector.broadcast %cst_186 : f32 to vector<8x5xf32>
    %183 = arith.mulf %182, %179 : vector<8x5xf32>
    %184 = arith.select %181, %179, %183 : vector<8x5xi1>, vector<8x5xf32>
    %c0_187 = arith.constant 0 : index
    %c0_188 = arith.constant 0 : index
    %c1_189 = arith.constant 1 : index
    %c0_190 = arith.constant 0 : index
    %c1_191 = arith.constant 1 : index
    %185 = vector.load %arg24[%c0_187, %c0_188, %c1_189, %c0_190, %c1_191] : memref<1x3x4x8x6xf32, #tpu.memory_space<vmem>>, vector<1x1x1x8x5xf32>
    %186 = vector.shape_cast %185 : vector<1x1x1x8x5xf32> to vector<8x5xf32>
    %187 = vector.shape_cast %184 : vector<8x5xf32> to vector<1x1x1x8x5xf32>
    tpu.vector_store %arg24[%c0_187, %c0_188, %c1_189, %c0_190, %c1_191], %187 {strides = array<i32>} : memref<1x3x4x8x6xf32, #tpu.memory_space<vmem>>, vector<1x1x1x8x5xf32>,
    %c0_192 = arith.constant 0 : index
    %c3_193 = arith.constant 3 : index
    %c0_194 = arith.constant 0 : index
    %188 = vector.load %arg1[%c0_192, %c3_193, %c0_194] : memref<1x24x5xf32, #tpu.memory_space<vmem>>, vector<1x1x4xf32>
    %189 = vector.shape_cast %188 : vector<1x1x4xf32> to vector<1x4xf32>
    %c0_195 = arith.constant 0 : index
    %c0_196 = arith.constant 0 : index
    %190 = vector.load %arg2[%c0_195, %c0_196] : memref<8x6xf32, #tpu.memory_space<vmem>>, vector<8x1xf32>
    %191 = vector.broadcast %190 : vector<8x1xf32> to vector<8x4xf32>
    %192 = vector.broadcast %189 : vector<1x4xf32> to vector<8x4xf32>
    %193 = arith.mulf %191, %192 : vector<8x4xf32>
    %c0_197 = arith.constant 0 : index
    %c4_198 = arith.constant 4 : index
    %c0_199 = arith.constant 0 : index
    %194 = vector.load %arg1[%c0_197, %c4_198, %c0_199] : memref<1x24x5xf32, #tpu.memory_space<vmem>>, vector<1x1x4xf32>
    %195 = vector.shape_cast %194 : vector<1x1x4xf32> to vector<1x4xf32>
    %c0_200 = arith.constant 0 : index
    %c1_201 = arith.constant 1 : index
    %196 = vector.load %arg2[%c0_200, %c1_201] : memref<8x6xf32, #tpu.memory_space<vmem>>, vector<8x1xf32>
    %197 = vector.broadcast %196 : vector<8x1xf32> to vector<8x4xf32>
    %198 = vector.broadcast %195 : vector<1x4xf32> to vector<8x4xf32>
    %199 = arith.mulf %197, %198 : vector<8x4xf32>
    %200 = arith.addf %193, %199 : vector<8x4xf32>
    %c0_202 = arith.constant 0 : index
    %c5_203 = arith.constant 5 : index
    %c0_204 = arith.constant 0 : index
    %201 = vector.load %arg1[%c0_202, %c5_203, %c0_204] : memref<1x24x5xf32, #tpu.memory_space<vmem>>, vector<1x1x4xf32>
    %202 = vector.shape_cast %201 : vector<1x1x4xf32> to vector<1x4xf32>
    %c0_205 = arith.constant 0 : index
    %c2_206 = arith.constant 2 : index
    %203 = vector.load %arg2[%c0_205, %c2_206] : memref<8x6xf32, #tpu.memory_space<vmem>>, vector<8x1xf32>
    %204 = vector.broadcast %203 : vector<8x1xf32> to vector<8x4xf32>
    %205 = vector.broadcast %202 : vector<1x4xf32> to vector<8x4xf32>
    %206 = arith.mulf %204, %205 : vector<8x4xf32>
    %207 = arith.addf %200, %206 : vector<8x4xf32>
    %c0_207 = arith.constant 0 : index
    %c6_208 = arith.constant 6 : index
    %c0_209 = arith.constant 0 : index
    %208 = vector.load %arg1[%c0_207, %c6_208, %c0_209] : memref<1x24x5xf32, #tpu.memory_space<vmem>>, vector<1x1x4xf32>
    %209 = vector.shape_cast %208 : vector<1x1x4xf32> to vector<1x4xf32>
    %c0_210 = arith.constant 0 : index
    %c3_211 = arith.constant 3 : index
    %210 = vector.load %arg2[%c0_210, %c3_211] : memref<8x6xf32, #tpu.memory_space<vmem>>, vector<8x1xf32>
    %211 = vector.broadcast %210 : vector<8x1xf32> to vector<8x4xf32>
    %212 = vector.broadcast %209 : vector<1x4xf32> to vector<8x4xf32>
    %213 = arith.mulf %211, %212 : vector<8x4xf32>
    %214 = arith.addf %207, %213 : vector<8x4xf32>
    %c0_212 = arith.constant 0 : index
    %c7_213 = arith.constant 7 : index
    %c0_214 = arith.constant 0 : index
    %215 = vector.load %arg1[%c0_212, %c7_213, %c0_214] : memref<1x24x5xf32, #tpu.memory_space<vmem>>, vector<1x1x4xf32>
    %216 = vector.shape_cast %215 : vector<1x1x4xf32> to vector<1x4xf32>
    %c0_215 = arith.constant 0 : index
    %c4_216 = arith.constant 4 : index
    %217 = vector.load %arg2[%c0_215, %c4_216] : memref<8x6xf32, #tpu.memory_space<vmem>>, vector<8x1xf32>
    %218 = vector.broadcast %217 : vector<8x1xf32> to vector<8x4xf32>
    %219 = vector.broadcast %216 : vector<1x4xf32> to vector<8x4xf32>
    %220 = arith.mulf %218, %219 : vector<8x4xf32>
    %221 = arith.addf %214, %220 : vector<8x4xf32>
    %c0_217 = arith.constant 0 : index
    %c0_218 = arith.constant 0 : index
    %c1_219 = arith.constant 1 : index
    %222 = vector.load %arg1[%c0_217, %c0_218, %c1_219] : memref<1x24x5xf32, #tpu.memory_space<vmem>>, vector<1x1x4xf32>
    %223 = vector.shape_cast %222 : vector<1x1x4xf32> to vector<1x4xf32>
    %c0_220 = arith.constant 0 : index
    %c5_221 = arith.constant 5 : index
    %224 = vector.load %arg2[%c0_220, %c5_221] : memref<8x6xf32, #tpu.memory_space<vmem>>, vector<8x1xf32>
    %225 = vector.broadcast %224 : vector<8x1xf32> to vector<8x4xf32>
    %226 = vector.broadcast %223 : vector<1x4xf32> to vector<8x4xf32>
    %227 = arith.mulf %225, %226 : vector<8x4xf32>
    %228 = arith.addf %221, %227 : vector<8x4xf32>
    %c0_222 = arith.constant 0 : index
    %c0_223 = arith.constant 0 : index
    %229 = vector.load %arg3[%c0_222, %c0_223] : memref<8x1xf32, #tpu.memory_space<vmem>>, vector<8x1xf32>
    %230 = vector.broadcast %229 : vector<8x1xf32> to vector<8x4xf32>
    %231 = arith.addf %228, %230 : vector<8x4xf32>
    %cst_224 = arith.constant 0.000000e+00 : f32
    %232 = vector.broadcast %cst_224 : f32 to vector<8x4xf32>
    %233 = arith.cmpf oge, %231, %232 : vector<8x4xf32>
    %cst_225 = arith.constant 1.000000e-01 : f32
    %234 = vector.broadcast %cst_225 : f32 to vector<8x4xf32>
    %235 = arith.mulf %234, %231 : vector<8x4xf32>
    %236 = arith.select %233, %231, %235 : vector<8x4xi1>, vector<8x4xf32>
    %c0_226 = arith.constant 0 : index
    %c0_227 = arith.constant 0 : index
    %c2_228 = arith.constant 2 : index
    %c0_229 = arith.constant 0 : index
    %c1_230 = arith.constant 1 : index
    %237 = vector.load %arg24[%c0_226, %c0_227, %c2_228, %c0_229, %c1_230] : memref<1x3x4x8x6xf32, #tpu.memory_space<vmem>>, vector<1x1x1x8x4xf32>
    %238 = vector.shape_cast %237 : vector<1x1x1x8x4xf32> to vector<8x4xf32>
    %239 = vector.shape_cast %236 : vector<8x4xf32> to vector<1x1x1x8x4xf32>
    tpu.vector_store %arg24[%c0_226, %c0_227, %c2_228, %c0_229, %c1_230], %239 {strides = array<i32>} : memref<1x3x4x8x6xf32, #tpu.memory_space<vmem>>, vector<1x1x1x8x4xf32>,
    %c0_231 = arith.constant 0 : index
    %c5_232 = arith.constant 5 : index
    %c0_233 = arith.constant 0 : index
    %240 = vector.load %arg1[%c0_231, %c5_232, %c0_233] : memref<1x24x5xf32, #tpu.memory_space<vmem>>, vector<1x1x4xf32>
    %241 = vector.shape_cast %240 : vector<1x1x4xf32> to vector<1x4xf32>
    %c0_234 = arith.constant 0 : index
    %c0_235 = arith.constant 0 : index
    %242 = vector.load %arg2[%c0_234, %c0_235] : memref<8x6xf32, #tpu.memory_space<vmem>>, vector<8x1xf32>
    %243 = vector.broadcast %242 : vector<8x1xf32> to vector<8x4xf32>
    %244 = vector.broadcast %241 : vector<1x4xf32> to vector<8x4xf32>
    %245 = arith.mulf %243, %244 : vector<8x4xf32>
    %c0_236 = arith.constant 0 : index
    %c6_237 = arith.constant 6 : index
    %c0_238 = arith.constant 0 : index
    %246 = vector.load %arg1[%c0_236, %c6_237, %c0_238] : memref<1x24x5xf32, #tpu.memory_space<vmem>>, vector<1x1x4xf32>
    %247 = vector.shape_cast %246 : vector<1x1x4xf32> to vector<1x4xf32>
    %c0_239 = arith.constant 0 : index
    %c1_240 = arith.constant 1 : index
    %248 = vector.load %arg2[%c0_239, %c1_240] : memref<8x6xf32, #tpu.memory_space<vmem>>, vector<8x1xf32>
    %249 = vector.broadcast %248 : vector<8x1xf32> to vector<8x4xf32>
    %250 = vector.broadcast %247 : vector<1x4xf32> to vector<8x4xf32>
    %251 = arith.mulf %249, %250 : vector<8x4xf32>
    %252 = arith.addf %245, %251 : vector<8x4xf32>
    %c0_241 = arith.constant 0 : index
    %c7_242 = arith.constant 7 : index
    %c0_243 = arith.constant 0 : index
    %253 = vector.load %arg1[%c0_241, %c7_242, %c0_243] : memref<1x24x5xf32, #tpu.memory_space<vmem>>, vector<1x1x4xf32>
    %254 = vector.shape_cast %253 : vector<1x1x4xf32> to vector<1x4xf32>
    %c0_244 = arith.constant 0 : index
    %c2_245 = arith.constant 2 : index
    %255 = vector.load %arg2[%c0_244, %c2_245] : memref<8x6xf32, #tpu.memory_space<vmem>>, vector<8x1xf32>
    %256 = vector.broadcast %255 : vector<8x1xf32> to vector<8x4xf32>
    %257 = vector.broadcast %254 : vector<1x4xf32> to vector<8x4xf32>
    %258 = arith.mulf %256, %257 : vector<8x4xf32>
    %259 = arith.addf %252, %258 : vector<8x4xf32>
    %c0_246 = arith.constant 0 : index
    %c0_247 = arith.constant 0 : index
    %c1_248 = arith.constant 1 : index
    %260 = vector.load %arg1[%c0_246, %c0_247, %c1_248] : memref<1x24x5xf32, #tpu.memory_space<vmem>>, vector<1x1x4xf32>
    %261 = vector.shape_cast %260 : vector<1x1x4xf32> to vector<1x4xf32>
    %c0_249 = arith.constant 0 : index
    %c3_250 = arith.constant 3 : index
    %262 = vector.load %arg2[%c0_249, %c3_250] : memref<8x6xf32, #tpu.memory_space<vmem>>, vector<8x1xf32>
    %263 = vector.broadcast %262 : vector<8x1xf32> to vector<8x4xf32>
    %264 = vector.broadcast %261 : vector<1x4xf32> to vector<8x4xf32>
    %265 = arith.mulf %263, %264 : vector<8x4xf32>
    %266 = arith.addf %259, %265 : vector<8x4xf32>
    %c0_251 = arith.constant 0 : index
    %c1_252 = arith.constant 1 : index
    %c1_253 = arith.constant 1 : index
    %267 = vector.load %arg1[%c0_251, %c1_252, %c1_253] : memref<1x24x5xf32, #tpu.memory_space<vmem>>, vector<1x1x4xf32>
    %268 = vector.shape_cast %267 : vector<1x1x4xf32> to vector<1x4xf32>
    %c0_254 = arith.constant 0 : index
    %c4_255 = arith.constant 4 : index
    %269 = vector.load %arg2[%c0_254, %c4_255] : memref<8x6xf32, #tpu.memory_space<vmem>>, vector<8x1xf32>
    %270 = vector.broadcast %269 : vector<8x1xf32> to vector<8x4xf32>
    %271 = vector.broadcast %268 : vector<1x4xf32> to vector<8x4xf32>
    %272 = arith.mulf %270, %271 : vector<8x4xf32>
    %273 = arith.addf %266, %272 : vector<8x4xf32>
    %c0_256 = arith.constant 0 : index
    %c2_257 = arith.constant 2 : index
    %c1_258 = arith.constant 1 : index
    %274 = vector.load %arg1[%c0_256, %c2_257, %c1_258] : memref<1x24x5xf32, #tpu.memory_space<vmem>>, vector<1x1x4xf32>
    %275 = vector.shape_cast %274 : vector<1x1x4xf32> to vector<1x4xf32>
    %c0_259 = arith.constant 0 : index
    %c5_260 = arith.constant 5 : index
    %276 = vector.load %arg2[%c0_259, %c5_260] : memref<8x6xf32, #tpu.memory_space<vmem>>, vector<8x1xf32>
    %277 = vector.broadcast %276 : vector<8x1xf32> to vector<8x4xf32>
    %278 = vector.broadcast %275 : vector<1x4xf32> to vector<8x4xf32>
    %279 = arith.mulf %277, %278 : vector<8x4xf32>
    %280 = arith.addf %273, %279 : vector<8x4xf32>
    %c0_261 = arith.constant 0 : index
    %c0_262 = arith.constant 0 : index
    %281 = vector.load %arg3[%c0_261, %c0_262] : memref<8x1xf32, #tpu.memory_space<vmem>>, vector<8x1xf32>
    %282 = vector.broadcast %281 : vector<8x1xf32> to vector<8x4xf32>
    %283 = arith.addf %280, %282 : vector<8x4xf32>
    %cst_263 = arith.constant 0.000000e+00 : f32
    %284 = vector.broadcast %cst_263 : f32 to vector<8x4xf32>
    %285 = arith.cmpf oge, %283, %284 : vector<8x4xf32>
    %cst_264 = arith.constant 1.000000e-01 : f32
    %286 = vector.broadcast %cst_264 : f32 to vector<8x4xf32>
    %287 = arith.mulf %286, %283 : vector<8x4xf32>
    %288 = arith.select %285, %283, %287 : vector<8x4xi1>, vector<8x4xf32>
    %c0_265 = arith.constant 0 : index
    %c0_266 = arith.constant 0 : index
    %c3_267 = arith.constant 3 : index
    %c0_268 = arith.constant 0 : index
    %c1_269 = arith.constant 1 : index
    %289 = vector.load %arg24[%c0_265, %c0_266, %c3_267, %c0_268, %c1_269] : memref<1x3x4x8x6xf32, #tpu.memory_space<vmem>>, vector<1x1x1x8x4xf32>
    %290 = vector.shape_cast %289 : vector<1x1x1x8x4xf32> to vector<8x4xf32>
    %291 = vector.shape_cast %288 : vector<8x4xf32> to vector<1x1x1x8x4xf32>
    tpu.vector_store %arg24[%c0_265, %c0_266, %c3_267, %c0_268, %c1_269], %291 {strides = array<i32>} : memref<1x3x4x8x6xf32, #tpu.memory_space<vmem>>, vector<1x1x1x8x4xf32>,
    %c0_270 = arith.constant 0 : index
    %c15 = arith.constant 15 : index
    %c0_271 = arith.constant 0 : index
    %292 = vector.load %arg1[%c0_270, %c15, %c0_271] : memref<1x24x5xf32, #tpu.memory_space<vmem>>, vector<1x1x4xf32>
    %293 = vector.shape_cast %292 : vector<1x1x4xf32> to vector<1x4xf32>
    %c0_272 = arith.constant 0 : index
    %c0_273 = arith.constant 0 : index
    %294 = vector.load %arg2[%c0_272, %c0_273] : memref<8x6xf32, #tpu.memory_space<vmem>>, vector<8x1xf32>
    %295 = vector.broadcast %294 : vector<8x1xf32> to vector<8x4xf32>
    %296 = vector.broadcast %293 : vector<1x4xf32> to vector<8x4xf32>
    %297 = arith.mulf %295, %296 : vector<8x4xf32>
    %c0_274 = arith.constant 0 : index
    %c8 = arith.constant 8 : index
    %c1_275 = arith.constant 1 : index
    %298 = vector.load %arg1[%c0_274, %c8, %c1_275] : memref<1x24x5xf32, #tpu.memory_space<vmem>>, vector<1x1x4xf32>
    %299 = vector.shape_cast %298 : vector<1x1x4xf32> to vector<1x4xf32>
    %c0_276 = arith.constant 0 : index
    %c1_277 = arith.constant 1 : index
    %300 = vector.load %arg2[%c0_276, %c1_277] : memref<8x6xf32, #tpu.memory_space<vmem>>, vector<8x1xf32>
    %301 = vector.broadcast %300 : vector<8x1xf32> to vector<8x4xf32>
    %302 = vector.broadcast %299 : vector<1x4xf32> to vector<8x4xf32>
    %303 = arith.mulf %301, %302 : vector<8x4xf32>
    %304 = arith.addf %297, %303 : vector<8x4xf32>
    %c0_278 = arith.constant 0 : index
    %c9 = arith.constant 9 : index
    %c1_279 = arith.constant 1 : index
    %305 = vector.load %arg1[%c0_278, %c9, %c1_279] : memref<1x24x5xf32, #tpu.memory_space<vmem>>, vector<1x1x4xf32>
    %306 = vector.shape_cast %305 : vector<1x1x4xf32> to vector<1x4xf32>
    %c0_280 = arith.constant 0 : index
    %c2_281 = arith.constant 2 : index
    %307 = vector.load %arg2[%c0_280, %c2_281] : memref<8x6xf32, #tpu.memory_space<vmem>>, vector<8x1xf32>
    %308 = vector.broadcast %307 : vector<8x1xf32> to vector<8x4xf32>
    %309 = vector.broadcast %306 : vector<1x4xf32> to vector<8x4xf32>
    %310 = arith.mulf %308, %309 : vector<8x4xf32>
    %311 = arith.addf %304, %310 : vector<8x4xf32>
    %c0_282 = arith.constant 0 : index
    %c10 = arith.constant 10 : index
    %c1_283 = arith.constant 1 : index
    %312 = vector.load %arg1[%c0_282, %c10, %c1_283] : memref<1x24x5xf32, #tpu.memory_space<vmem>>, vector<1x1x4xf32>
    %313 = vector.shape_cast %312 : vector<1x1x4xf32> to vector<1x4xf32>
    %c0_284 = arith.constant 0 : index
    %c3_285 = arith.constant 3 : index
    %314 = vector.load %arg2[%c0_284, %c3_285] : memref<8x6xf32, #tpu.memory_space<vmem>>, vector<8x1xf32>
    %315 = vector.broadcast %314 : vector<8x1xf32> to vector<8x4xf32>
    %316 = vector.broadcast %313 : vector<1x4xf32> to vector<8x4xf32>
    %317 = arith.mulf %315, %316 : vector<8x4xf32>
    %318 = arith.addf %311, %317 : vector<8x4xf32>
    %c0_286 = arith.constant 0 : index
    %c11 = arith.constant 11 : index
    %c1_287 = arith.constant 1 : index
    %319 = vector.load %arg1[%c0_286, %c11, %c1_287] : memref<1x24x5xf32, #tpu.memory_space<vmem>>, vector<1x1x4xf32>
    %320 = vector.shape_cast %319 : vector<1x1x4xf32> to vector<1x4xf32>
    %c0_288 = arith.constant 0 : index
    %c4_289 = arith.constant 4 : index
    %321 = vector.load %arg2[%c0_288, %c4_289] : memref<8x6xf32, #tpu.memory_space<vmem>>, vector<8x1xf32>
    %322 = vector.broadcast %321 : vector<8x1xf32> to vector<8x4xf32>
    %323 = vector.broadcast %320 : vector<1x4xf32> to vector<8x4xf32>
    %324 = arith.mulf %322, %323 : vector<8x4xf32>
    %325 = arith.addf %318, %324 : vector<8x4xf32>
    %c0_290 = arith.constant 0 : index
    %c12 = arith.constant 12 : index
    %c1_291 = arith.constant 1 : index
    %326 = vector.load %arg1[%c0_290, %c12, %c1_291] : memref<1x24x5xf32, #tpu.memory_space<vmem>>, vector<1x1x4xf32>
    %327 = vector.shape_cast %326 : vector<1x1x4xf32> to vector<1x4xf32>
    %c0_292 = arith.constant 0 : index
    %c5_293 = arith.constant 5 : index
    %328 = vector.load %arg2[%c0_292, %c5_293] : memref<8x6xf32, #tpu.memory_space<vmem>>, vector<8x1xf32>
    %329 = vector.broadcast %328 : vector<8x1xf32> to vector<8x4xf32>
    %330 = vector.broadcast %327 : vector<1x4xf32> to vector<8x4xf32>
    %331 = arith.mulf %329, %330 : vector<8x4xf32>
    %332 = arith.addf %325, %331 : vector<8x4xf32>
    %c0_294 = arith.constant 0 : index
    %c0_295 = arith.constant 0 : index
    %333 = vector.load %arg3[%c0_294, %c0_295] : memref<8x1xf32, #tpu.memory_space<vmem>>, vector<8x1xf32>
    %334 = vector.broadcast %333 : vector<8x1xf32> to vector<8x4xf32>
    %335 = arith.addf %332, %334 : vector<8x4xf32>
    %cst_296 = arith.constant 0.000000e+00 : f32
    %336 = vector.broadcast %cst_296 : f32 to vector<8x4xf32>
    %337 = arith.cmpf oge, %335, %336 : vector<8x4xf32>
    %cst_297 = arith.constant 1.000000e-01 : f32
    %338 = vector.broadcast %cst_297 : f32 to vector<8x4xf32>
    %339 = arith.mulf %338, %335 : vector<8x4xf32>
    %340 = arith.select %337, %335, %339 : vector<8x4xi1>, vector<8x4xf32>
    %c0_298 = arith.constant 0 : index
    %c1_299 = arith.constant 1 : index
    %c0_300 = arith.constant 0 : index
    %c0_301 = arith.constant 0 : index
    %c2_302 = arith.constant 2 : index
    %341 = vector.load %arg24[%c0_298, %c1_299, %c0_300, %c0_301, %c2_302] : memref<1x3x4x8x6xf32, #tpu.memory_space<vmem>>, vector<1x1x1x8x4xf32>
    %342 = vector.shape_cast %341 : vector<1x1x1x8x4xf32> to vector<8x4xf32>
    %343 = vector.shape_cast %340 : vector<8x4xf32> to vector<1x1x1x8x4xf32>
    tpu.vector_store %arg24[%c0_298, %c1_299, %c0_300, %c0_301, %c2_302], %343 {strides = array<i32>} : memref<1x3x4x8x6xf32, #tpu.memory_space<vmem>>, vector<1x1x1x8x4xf32>,
    %c0_303 = arith.constant 0 : index
    %c9_304 = arith.constant 9 : index
    %c0_305 = arith.constant 0 : index
    %344 = vector.load %arg1[%c0_303, %c9_304, %c0_305] : memref<1x24x5xf32, #tpu.memory_space<vmem>>, vector<1x1x5xf32>
    %345 = vector.shape_cast %344 : vector<1x1x5xf32> to vector<1x5xf32>
    %c0_306 = arith.constant 0 : index
    %c0_307 = arith.constant 0 : index
    %346 = vector.load %arg2[%c0_306, %c0_307] : memref<8x6xf32, #tpu.memory_space<vmem>>, vector<8x1xf32>
    %347 = vector.broadcast %346 : vector<8x1xf32> to vector<8x5xf32>
    %348 = vector.broadcast %345 : vector<1x5xf32> to vector<8x5xf32>
    %349 = arith.mulf %347, %348 : vector<8x5xf32>
    %c0_308 = arith.constant 0 : index
    %c10_309 = arith.constant 10 : index
    %c0_310 = arith.constant 0 : index
    %350 = vector.load %arg1[%c0_308, %c10_309, %c0_310] : memref<1x24x5xf32, #tpu.memory_space<vmem>>, vector<1x1x5xf32>
    %351 = vector.shape_cast %350 : vector<1x1x5xf32> to vector<1x5xf32>
    %c0_311 = arith.constant 0 : index
    %c1_312 = arith.constant 1 : index
    %352 = vector.load %arg2[%c0_311, %c1_312] : memref<8x6xf32, #tpu.memory_space<vmem>>, vector<8x1xf32>
    %353 = vector.broadcast %352 : vector<8x1xf32> to vector<8x5xf32>
    %354 = vector.broadcast %351 : vector<1x5xf32> to vector<8x5xf32>
    %355 = arith.mulf %353, %354 : vector<8x5xf32>
    %356 = arith.addf %349, %355 : vector<8x5xf32>
    %c0_313 = arith.constant 0 : index
    %c11_314 = arith.constant 11 : index
    %c0_315 = arith.constant 0 : index
    %357 = vector.load %arg1[%c0_313, %c11_314, %c0_315] : memref<1x24x5xf32, #tpu.memory_space<vmem>>, vector<1x1x5xf32>
    %358 = vector.shape_cast %357 : vector<1x1x5xf32> to vector<1x5xf32>
    %c0_316 = arith.constant 0 : index
    %c2_317 = arith.constant 2 : index
    %359 = vector.load %arg2[%c0_316, %c2_317] : memref<8x6xf32, #tpu.memory_space<vmem>>, vector<8x1xf32>
    %360 = vector.broadcast %359 : vector<8x1xf32> to vector<8x5xf32>
    %361 = vector.broadcast %358 : vector<1x5xf32> to vector<8x5xf32>
    %362 = arith.mulf %360, %361 : vector<8x5xf32>
    %363 = arith.addf %356, %362 : vector<8x5xf32>
    %c0_318 = arith.constant 0 : index
    %c12_319 = arith.constant 12 : index
    %c0_320 = arith.constant 0 : index
    %364 = vector.load %arg1[%c0_318, %c12_319, %c0_320] : memref<1x24x5xf32, #tpu.memory_space<vmem>>, vector<1x1x5xf32>
    %365 = vector.shape_cast %364 : vector<1x1x5xf32> to vector<1x5xf32>
    %c0_321 = arith.constant 0 : index
    %c3_322 = arith.constant 3 : index
    %366 = vector.load %arg2[%c0_321, %c3_322] : memref<8x6xf32, #tpu.memory_space<vmem>>, vector<8x1xf32>
    %367 = vector.broadcast %366 : vector<8x1xf32> to vector<8x5xf32>
    %368 = vector.broadcast %365 : vector<1x5xf32> to vector<8x5xf32>
    %369 = arith.mulf %367, %368 : vector<8x5xf32>
    %370 = arith.addf %363, %369 : vector<8x5xf32>
    %c0_323 = arith.constant 0 : index
    %c13 = arith.constant 13 : index
    %c0_324 = arith.constant 0 : index
    %371 = vector.load %arg1[%c0_323, %c13, %c0_324] : memref<1x24x5xf32, #tpu.memory_space<vmem>>, vector<1x1x5xf32>
    %372 = vector.shape_cast %371 : vector<1x1x5xf32> to vector<1x5xf32>
    %c0_325 = arith.constant 0 : index
    %c4_326 = arith.constant 4 : index
    %373 = vector.load %arg2[%c0_325, %c4_326] : memref<8x6xf32, #tpu.memory_space<vmem>>, vector<8x1xf32>
    %374 = vector.broadcast %373 : vector<8x1xf32> to vector<8x5xf32>
    %375 = vector.broadcast %372 : vector<1x5xf32> to vector<8x5xf32>
    %376 = arith.mulf %374, %375 : vector<8x5xf32>
    %377 = arith.addf %370, %376 : vector<8x5xf32>
    %c0_327 = arith.constant 0 : index
    %c14 = arith.constant 14 : index
    %c0_328 = arith.constant 0 : index
    %378 = vector.load %arg1[%c0_327, %c14, %c0_328] : memref<1x24x5xf32, #tpu.memory_space<vmem>>, vector<1x1x5xf32>
    %379 = vector.shape_cast %378 : vector<1x1x5xf32> to vector<1x5xf32>
    %c0_329 = arith.constant 0 : index
    %c5_330 = arith.constant 5 : index
    %380 = vector.load %arg2[%c0_329, %c5_330] : memref<8x6xf32, #tpu.memory_space<vmem>>, vector<8x1xf32>
    %381 = vector.broadcast %380 : vector<8x1xf32> to vector<8x5xf32>
    %382 = vector.broadcast %379 : vector<1x5xf32> to vector<8x5xf32>
    %383 = arith.mulf %381, %382 : vector<8x5xf32>
    %384 = arith.addf %377, %383 : vector<8x5xf32>
    %c0_331 = arith.constant 0 : index
    %c0_332 = arith.constant 0 : index
    %385 = vector.load %arg3[%c0_331, %c0_332] : memref<8x1xf32, #tpu.memory_space<vmem>>, vector<8x1xf32>
    %386 = vector.broadcast %385 : vector<8x1xf32> to vector<8x5xf32>
    %387 = arith.addf %384, %386 : vector<8x5xf32>
    %cst_333 = arith.constant 0.000000e+00 : f32
    %388 = vector.broadcast %cst_333 : f32 to vector<8x5xf32>
    %389 = arith.cmpf oge, %387, %388 : vector<8x5xf32>
    %cst_334 = arith.constant 1.000000e-01 : f32
    %390 = vector.broadcast %cst_334 : f32 to vector<8x5xf32>
    %391 = arith.mulf %390, %387 : vector<8x5xf32>
    %392 = arith.select %389, %387, %391 : vector<8x5xi1>, vector<8x5xf32>
    %c0_335 = arith.constant 0 : index
    %c1_336 = arith.constant 1 : index
    %c1_337 = arith.constant 1 : index
    %c0_338 = arith.constant 0 : index
    %c1_339 = arith.constant 1 : index
    %393 = vector.load %arg24[%c0_335, %c1_336, %c1_337, %c0_338, %c1_339] : memref<1x3x4x8x6xf32, #tpu.memory_space<vmem>>, vector<1x1x1x8x5xf32>
    %394 = vector.shape_cast %393 : vector<1x1x1x8x5xf32> to vector<8x5xf32>
    %395 = vector.shape_cast %392 : vector<8x5xf32> to vector<1x1x1x8x5xf32>
    tpu.vector_store %arg24[%c0_335, %c1_336, %c1_337, %c0_338, %c1_339], %395 {strides = array<i32>} : memref<1x3x4x8x6xf32, #tpu.memory_space<vmem>>, vector<1x1x1x8x5xf32>,
    %c0_340 = arith.constant 0 : index
    %c11_341 = arith.constant 11 : index
    %c0_342 = arith.constant 0 : index
    %396 = vector.load %arg1[%c0_340, %c11_341, %c0_342] : memref<1x24x5xf32, #tpu.memory_space<vmem>>, vector<1x1x4xf32>
    %397 = vector.shape_cast %396 : vector<1x1x4xf32> to vector<1x4xf32>
    %c0_343 = arith.constant 0 : index
    %c0_344 = arith.constant 0 : index
    %398 = vector.load %arg2[%c0_343, %c0_344] : memref<8x6xf32, #tpu.memory_space<vmem>>, vector<8x1xf32>
    %399 = vector.broadcast %398 : vector<8x1xf32> to vector<8x4xf32>
    %400 = vector.broadcast %397 : vector<1x4xf32> to vector<8x4xf32>
    %401 = arith.mulf %399, %400 : vector<8x4xf32>
    %c0_345 = arith.constant 0 : index
    %c12_346 = arith.constant 12 : index
    %c0_347 = arith.constant 0 : index
    %402 = vector.load %arg1[%c0_345, %c12_346, %c0_347] : memref<1x24x5xf32, #tpu.memory_space<vmem>>, vector<1x1x4xf32>
    %403 = vector.shape_cast %402 : vector<1x1x4xf32> to vector<1x4xf32>
    %c0_348 = arith.constant 0 : index
    %c1_349 = arith.constant 1 : index
    %404 = vector.load %arg2[%c0_348, %c1_349] : memref<8x6xf32, #tpu.memory_space<vmem>>, vector<8x1xf32>
    %405 = vector.broadcast %404 : vector<8x1xf32> to vector<8x4xf32>
    %406 = vector.broadcast %403 : vector<1x4xf32> to vector<8x4xf32>
    %407 = arith.mulf %405, %406 : vector<8x4xf32>
    %408 = arith.addf %401, %407 : vector<8x4xf32>
    %c0_350 = arith.constant 0 : index
    %c13_351 = arith.constant 13 : index
    %c0_352 = arith.constant 0 : index
    %409 = vector.load %arg1[%c0_350, %c13_351, %c0_352] : memref<1x24x5xf32, #tpu.memory_space<vmem>>, vector<1x1x4xf32>
    %410 = vector.shape_cast %409 : vector<1x1x4xf32> to vector<1x4xf32>
    %c0_353 = arith.constant 0 : index
    %c2_354 = arith.constant 2 : index
    %411 = vector.load %arg2[%c0_353, %c2_354] : memref<8x6xf32, #tpu.memory_space<vmem>>, vector<8x1xf32>
    %412 = vector.broadcast %411 : vector<8x1xf32> to vector<8x4xf32>
    %413 = vector.broadcast %410 : vector<1x4xf32> to vector<8x4xf32>
    %414 = arith.mulf %412, %413 : vector<8x4xf32>
    %415 = arith.addf %408, %414 : vector<8x4xf32>
    %c0_355 = arith.constant 0 : index
    %c14_356 = arith.constant 14 : index
    %c0_357 = arith.constant 0 : index
    %416 = vector.load %arg1[%c0_355, %c14_356, %c0_357] : memref<1x24x5xf32, #tpu.memory_space<vmem>>, vector<1x1x4xf32>
    %417 = vector.shape_cast %416 : vector<1x1x4xf32> to vector<1x4xf32>
    %c0_358 = arith.constant 0 : index
    %c3_359 = arith.constant 3 : index
    %418 = vector.load %arg2[%c0_358, %c3_359] : memref<8x6xf32, #tpu.memory_space<vmem>>, vector<8x1xf32>
    %419 = vector.broadcast %418 : vector<8x1xf32> to vector<8x4xf32>
    %420 = vector.broadcast %417 : vector<1x4xf32> to vector<8x4xf32>
    %421 = arith.mulf %419, %420 : vector<8x4xf32>
    %422 = arith.addf %415, %421 : vector<8x4xf32>
    %c0_360 = arith.constant 0 : index
    %c15_361 = arith.constant 15 : index
    %c0_362 = arith.constant 0 : index
    %423 = vector.load %arg1[%c0_360, %c15_361, %c0_362] : memref<1x24x5xf32, #tpu.memory_space<vmem>>, vector<1x1x4xf32>
    %424 = vector.shape_cast %423 : vector<1x1x4xf32> to vector<1x4xf32>
    %c0_363 = arith.constant 0 : index
    %c4_364 = arith.constant 4 : index
    %425 = vector.load %arg2[%c0_363, %c4_364] : memref<8x6xf32, #tpu.memory_space<vmem>>, vector<8x1xf32>
    %426 = vector.broadcast %425 : vector<8x1xf32> to vector<8x4xf32>
    %427 = vector.broadcast %424 : vector<1x4xf32> to vector<8x4xf32>
    %428 = arith.mulf %426, %427 : vector<8x4xf32>
    %429 = arith.addf %422, %428 : vector<8x4xf32>
    %c0_365 = arith.constant 0 : index
    %c8_366 = arith.constant 8 : index
    %c1_367 = arith.constant 1 : index
    %430 = vector.load %arg1[%c0_365, %c8_366, %c1_367] : memref<1x24x5xf32, #tpu.memory_space<vmem>>, vector<1x1x4xf32>
    %431 = vector.shape_cast %430 : vector<1x1x4xf32> to vector<1x4xf32>
    %c0_368 = arith.constant 0 : index
    %c5_369 = arith.constant 5 : index
    %432 = vector.load %arg2[%c0_368, %c5_369] : memref<8x6xf32, #tpu.memory_space<vmem>>, vector<8x1xf32>
    %433 = vector.broadcast %432 : vector<8x1xf32> to vector<8x4xf32>
    %434 = vector.broadcast %431 : vector<1x4xf32> to vector<8x4xf32>
    %435 = arith.mulf %433, %434 : vector<8x4xf32>
    %436 = arith.addf %429, %435 : vector<8x4xf32>
    %c0_370 = arith.constant 0 : index
    %c0_371 = arith.constant 0 : index
    %437 = vector.load %arg3[%c0_370, %c0_371] : memref<8x1xf32, #tpu.memory_space<vmem>>, vector<8x1xf32>
    %438 = vector.broadcast %437 : vector<8x1xf32> to vector<8x4xf32>
    %439 = arith.addf %436, %438 : vector<8x4xf32>
    %cst_372 = arith.constant 0.000000e+00 : f32
    %440 = vector.broadcast %cst_372 : f32 to vector<8x4xf32>
    %441 = arith.cmpf oge, %439, %440 : vector<8x4xf32>
    %cst_373 = arith.constant 1.000000e-01 : f32
    %442 = vector.broadcast %cst_373 : f32 to vector<8x4xf32>
    %443 = arith.mulf %442, %439 : vector<8x4xf32>
    %444 = arith.select %441, %439, %443 : vector<8x4xi1>, vector<8x4xf32>
    %c0_374 = arith.constant 0 : index
    %c1_375 = arith.constant 1 : index
    %c2_376 = arith.constant 2 : index
    %c0_377 = arith.constant 0 : index
    %c1_378 = arith.constant 1 : index
    %445 = vector.load %arg24[%c0_374, %c1_375, %c2_376, %c0_377, %c1_378] : memref<1x3x4x8x6xf32, #tpu.memory_space<vmem>>, vector<1x1x1x8x4xf32>
    %446 = vector.shape_cast %445 : vector<1x1x1x8x4xf32> to vector<8x4xf32>
    %447 = vector.shape_cast %444 : vector<8x4xf32> to vector<1x1x1x8x4xf32>
    tpu.vector_store %arg24[%c0_374, %c1_375, %c2_376, %c0_377, %c1_378], %447 {strides = array<i32>} : memref<1x3x4x8x6xf32, #tpu.memory_space<vmem>>, vector<1x1x1x8x4xf32>,
    %c0_379 = arith.constant 0 : index
    %c13_380 = arith.constant 13 : index
    %c0_381 = arith.constant 0 : index
    %448 = vector.load %arg1[%c0_379, %c13_380, %c0_381] : memref<1x24x5xf32, #tpu.memory_space<vmem>>, vector<1x1x4xf32>
    %449 = vector.shape_cast %448 : vector<1x1x4xf32> to vector<1x4xf32>
    %c0_382 = arith.constant 0 : index
    %c0_383 = arith.constant 0 : index
    %450 = vector.load %arg2[%c0_382, %c0_383] : memref<8x6xf32, #tpu.memory_space<vmem>>, vector<8x1xf32>
    %451 = vector.broadcast %450 : vector<8x1xf32> to vector<8x4xf32>
    %452 = vector.broadcast %449 : vector<1x4xf32> to vector<8x4xf32>
    %453 = arith.mulf %451, %452 : vector<8x4xf32>
    %c0_384 = arith.constant 0 : index
    %c14_385 = arith.constant 14 : index
    %c0_386 = arith.constant 0 : index
    %454 = vector.load %arg1[%c0_384, %c14_385, %c0_386] : memref<1x24x5xf32, #tpu.memory_space<vmem>>, vector<1x1x4xf32>
    %455 = vector.shape_cast %454 : vector<1x1x4xf32> to vector<1x4xf32>
    %c0_387 = arith.constant 0 : index
    %c1_388 = arith.constant 1 : index
    %456 = vector.load %arg2[%c0_387, %c1_388] : memref<8x6xf32, #tpu.memory_space<vmem>>, vector<8x1xf32>
    %457 = vector.broadcast %456 : vector<8x1xf32> to vector<8x4xf32>
    %458 = vector.broadcast %455 : vector<1x4xf32> to vector<8x4xf32>
    %459 = arith.mulf %457, %458 : vector<8x4xf32>
    %460 = arith.addf %453, %459 : vector<8x4xf32>
    %c0_389 = arith.constant 0 : index
    %c15_390 = arith.constant 15 : index
    %c0_391 = arith.constant 0 : index
    %461 = vector.load %arg1[%c0_389, %c15_390, %c0_391] : memref<1x24x5xf32, #tpu.memory_space<vmem>>, vector<1x1x4xf32>
    %462 = vector.shape_cast %461 : vector<1x1x4xf32> to vector<1x4xf32>
    %c0_392 = arith.constant 0 : index
    %c2_393 = arith.constant 2 : index
    %463 = vector.load %arg2[%c0_392, %c2_393] : memref<8x6xf32, #tpu.memory_space<vmem>>, vector<8x1xf32>
    %464 = vector.broadcast %463 : vector<8x1xf32> to vector<8x4xf32>
    %465 = vector.broadcast %462 : vector<1x4xf32> to vector<8x4xf32>
    %466 = arith.mulf %464, %465 : vector<8x4xf32>
    %467 = arith.addf %460, %466 : vector<8x4xf32>
    %c0_394 = arith.constant 0 : index
    %c8_395 = arith.constant 8 : index
    %c1_396 = arith.constant 1 : index
    %468 = vector.load %arg1[%c0_394, %c8_395, %c1_396] : memref<1x24x5xf32, #tpu.memory_space<vmem>>, vector<1x1x4xf32>
    %469 = vector.shape_cast %468 : vector<1x1x4xf32> to vector<1x4xf32>
    %c0_397 = arith.constant 0 : index
    %c3_398 = arith.constant 3 : index
    %470 = vector.load %arg2[%c0_397, %c3_398] : memref<8x6xf32, #tpu.memory_space<vmem>>, vector<8x1xf32>
    %471 = vector.broadcast %470 : vector<8x1xf32> to vector<8x4xf32>
    %472 = vector.broadcast %469 : vector<1x4xf32> to vector<8x4xf32>
    %473 = arith.mulf %471, %472 : vector<8x4xf32>
    %474 = arith.addf %467, %473 : vector<8x4xf32>
    %c0_399 = arith.constant 0 : index
    %c9_400 = arith.constant 9 : index
    %c1_401 = arith.constant 1 : index
    %475 = vector.load %arg1[%c0_399, %c9_400, %c1_401] : memref<1x24x5xf32, #tpu.memory_space<vmem>>, vector<1x1x4xf32>
    %476 = vector.shape_cast %475 : vector<1x1x4xf32> to vector<1x4xf32>
    %c0_402 = arith.constant 0 : index
    %c4_403 = arith.constant 4 : index
    %477 = vector.load %arg2[%c0_402, %c4_403] : memref<8x6xf32, #tpu.memory_space<vmem>>, vector<8x1xf32>
    %478 = vector.broadcast %477 : vector<8x1xf32> to vector<8x4xf32>
    %479 = vector.broadcast %476 : vector<1x4xf32> to vector<8x4xf32>
    %480 = arith.mulf %478, %479 : vector<8x4xf32>
    %481 = arith.addf %474, %480 : vector<8x4xf32>
    %c0_404 = arith.constant 0 : index
    %c10_405 = arith.constant 10 : index
    %c1_406 = arith.constant 1 : index
    %482 = vector.load %arg1[%c0_404, %c10_405, %c1_406] : memref<1x24x5xf32, #tpu.memory_space<vmem>>, vector<1x1x4xf32>
    %483 = vector.shape_cast %482 : vector<1x1x4xf32> to vector<1x4xf32>
    %c0_407 = arith.constant 0 : index
    %c5_408 = arith.constant 5 : index
    %484 = vector.load %arg2[%c0_407, %c5_408] : memref<8x6xf32, #tpu.memory_space<vmem>>, vector<8x1xf32>
    %485 = vector.broadcast %484 : vector<8x1xf32> to vector<8x4xf32>
    %486 = vector.broadcast %483 : vector<1x4xf32> to vector<8x4xf32>
    %487 = arith.mulf %485, %486 : vector<8x4xf32>
    %488 = arith.addf %481, %487 : vector<8x4xf32>
    %c0_409 = arith.constant 0 : index
    %c0_410 = arith.constant 0 : index
    %489 = vector.load %arg3[%c0_409, %c0_410] : memref<8x1xf32, #tpu.memory_space<vmem>>, vector<8x1xf32>
    %490 = vector.broadcast %489 : vector<8x1xf32> to vector<8x4xf32>
    %491 = arith.addf %488, %490 : vector<8x4xf32>
    %cst_411 = arith.constant 0.000000e+00 : f32
    %492 = vector.broadcast %cst_411 : f32 to vector<8x4xf32>
    %493 = arith.cmpf oge, %491, %492 : vector<8x4xf32>
    %cst_412 = arith.constant 1.000000e-01 : f32
    %494 = vector.broadcast %cst_412 : f32 to vector<8x4xf32>
    %495 = arith.mulf %494, %491 : vector<8x4xf32>
    %496 = arith.select %493, %491, %495 : vector<8x4xi1>, vector<8x4xf32>
    %c0_413 = arith.constant 0 : index
    %c1_414 = arith.constant 1 : index
    %c3_415 = arith.constant 3 : index
    %c0_416 = arith.constant 0 : index
    %c1_417 = arith.constant 1 : index
    %497 = vector.load %arg24[%c0_413, %c1_414, %c3_415, %c0_416, %c1_417] : memref<1x3x4x8x6xf32, #tpu.memory_space<vmem>>, vector<1x1x1x8x4xf32>
    %498 = vector.shape_cast %497 : vector<1x1x1x8x4xf32> to vector<8x4xf32>
    %499 = vector.shape_cast %496 : vector<8x4xf32> to vector<1x1x1x8x4xf32>
    tpu.vector_store %arg24[%c0_413, %c1_414, %c3_415, %c0_416, %c1_417], %499 {strides = array<i32>} : memref<1x3x4x8x6xf32, #tpu.memory_space<vmem>>, vector<1x1x1x8x4xf32>,
    %c0_418 = arith.constant 0 : index
    %c23 = arith.constant 23 : index
    %c0_419 = arith.constant 0 : index
    %500 = vector.load %arg1[%c0_418, %c23, %c0_419] : memref<1x24x5xf32, #tpu.memory_space<vmem>>, vector<1x1x4xf32>
    %501 = vector.shape_cast %500 : vector<1x1x4xf32> to vector<1x4xf32>
    %c0_420 = arith.constant 0 : index
    %c0_421 = arith.constant 0 : index
    %502 = vector.load %arg2[%c0_420, %c0_421] : memref<8x6xf32, #tpu.memory_space<vmem>>, vector<8x1xf32>
    %503 = vector.broadcast %502 : vector<8x1xf32> to vector<8x4xf32>
    %504 = vector.broadcast %501 : vector<1x4xf32> to vector<8x4xf32>
    %505 = arith.mulf %503, %504 : vector<8x4xf32>
    %c0_422 = arith.constant 0 : index
    %c16 = arith.constant 16 : index
    %c1_423 = arith.constant 1 : index
    %506 = vector.load %arg1[%c0_422, %c16, %c1_423] : memref<1x24x5xf32, #tpu.memory_space<vmem>>, vector<1x1x4xf32>
    %507 = vector.shape_cast %506 : vector<1x1x4xf32> to vector<1x4xf32>
    %c0_424 = arith.constant 0 : index
    %c1_425 = arith.constant 1 : index
    %508 = vector.load %arg2[%c0_424, %c1_425] : memref<8x6xf32, #tpu.memory_space<vmem>>, vector<8x1xf32>
    %509 = vector.broadcast %508 : vector<8x1xf32> to vector<8x4xf32>
    %510 = vector.broadcast %507 : vector<1x4xf32> to vector<8x4xf32>
    %511 = arith.mulf %509, %510 : vector<8x4xf32>
    %512 = arith.addf %505, %511 : vector<8x4xf32>
    %c0_426 = arith.constant 0 : index
    %c17 = arith.constant 17 : index
    %c1_427 = arith.constant 1 : index
    %513 = vector.load %arg1[%c0_426, %c17, %c1_427] : memref<1x24x5xf32, #tpu.memory_space<vmem>>, vector<1x1x4xf32>
    %514 = vector.shape_cast %513 : vector<1x1x4xf32> to vector<1x4xf32>
    %c0_428 = arith.constant 0 : index
    %c2_429 = arith.constant 2 : index
    %515 = vector.load %arg2[%c0_428, %c2_429] : memref<8x6xf32, #tpu.memory_space<vmem>>, vector<8x1xf32>
    %516 = vector.broadcast %515 : vector<8x1xf32> to vector<8x4xf32>
    %517 = vector.broadcast %514 : vector<1x4xf32> to vector<8x4xf32>
    %518 = arith.mulf %516, %517 : vector<8x4xf32>
    %519 = arith.addf %512, %518 : vector<8x4xf32>
    %c0_430 = arith.constant 0 : index
    %c18 = arith.constant 18 : index
    %c1_431 = arith.constant 1 : index
    %520 = vector.load %arg1[%c0_430, %c18, %c1_431] : memref<1x24x5xf32, #tpu.memory_space<vmem>>, vector<1x1x4xf32>
    %521 = vector.shape_cast %520 : vector<1x1x4xf32> to vector<1x4xf32>
    %c0_432 = arith.constant 0 : index
    %c3_433 = arith.constant 3 : index
    %522 = vector.load %arg2[%c0_432, %c3_433] : memref<8x6xf32, #tpu.memory_space<vmem>>, vector<8x1xf32>
    %523 = vector.broadcast %522 : vector<8x1xf32> to vector<8x4xf32>
    %524 = vector.broadcast %521 : vector<1x4xf32> to vector<8x4xf32>
    %525 = arith.mulf %523, %524 : vector<8x4xf32>
    %526 = arith.addf %519, %525 : vector<8x4xf32>
    %c0_434 = arith.constant 0 : index
    %c19 = arith.constant 19 : index
    %c1_435 = arith.constant 1 : index
    %527 = vector.load %arg1[%c0_434, %c19, %c1_435] : memref<1x24x5xf32, #tpu.memory_space<vmem>>, vector<1x1x4xf32>
    %528 = vector.shape_cast %527 : vector<1x1x4xf32> to vector<1x4xf32>
    %c0_436 = arith.constant 0 : index
    %c4_437 = arith.constant 4 : index
    %529 = vector.load %arg2[%c0_436, %c4_437] : memref<8x6xf32, #tpu.memory_space<vmem>>, vector<8x1xf32>
    %530 = vector.broadcast %529 : vector<8x1xf32> to vector<8x4xf32>
    %531 = vector.broadcast %528 : vector<1x4xf32> to vector<8x4xf32>
    %532 = arith.mulf %530, %531 : vector<8x4xf32>
    %533 = arith.addf %526, %532 : vector<8x4xf32>
    %c0_438 = arith.constant 0 : index
    %c20 = arith.constant 20 : index
    %c1_439 = arith.constant 1 : index
    %534 = vector.load %arg1[%c0_438, %c20, %c1_439] : memref<1x24x5xf32, #tpu.memory_space<vmem>>, vector<1x1x4xf32>
    %535 = vector.shape_cast %534 : vector<1x1x4xf32> to vector<1x4xf32>
    %c0_440 = arith.constant 0 : index
    %c5_441 = arith.constant 5 : index
    %536 = vector.load %arg2[%c0_440, %c5_441] : memref<8x6xf32, #tpu.memory_space<vmem>>, vector<8x1xf32>
    %537 = vector.broadcast %536 : vector<8x1xf32> to vector<8x4xf32>
    %538 = vector.broadcast %535 : vector<1x4xf32> to vector<8x4xf32>
    %539 = arith.mulf %537, %538 : vector<8x4xf32>
    %540 = arith.addf %533, %539 : vector<8x4xf32>
    %c0_442 = arith.constant 0 : index
    %c0_443 = arith.constant 0 : index
    %541 = vector.load %arg3[%c0_442, %c0_443] : memref<8x1xf32, #tpu.memory_space<vmem>>, vector<8x1xf32>
    %542 = vector.broadcast %541 : vector<8x1xf32> to vector<8x4xf32>
    %543 = arith.addf %540, %542 : vector<8x4xf32>
    %cst_444 = arith.constant 0.000000e+00 : f32
    %544 = vector.broadcast %cst_444 : f32 to vector<8x4xf32>
    %545 = arith.cmpf oge, %543, %544 : vector<8x4xf32>
    %cst_445 = arith.constant 1.000000e-01 : f32
    %546 = vector.broadcast %cst_445 : f32 to vector<8x4xf32>
    %547 = arith.mulf %546, %543 : vector<8x4xf32>
    %548 = arith.select %545, %543, %547 : vector<8x4xi1>, vector<8x4xf32>
    %c0_446 = arith.constant 0 : index
    %c2_447 = arith.constant 2 : index
    %c0_448 = arith.constant 0 : index
    %c0_449 = arith.constant 0 : index
    %c2_450 = arith.constant 2 : index
    %549 = vector.load %arg24[%c0_446, %c2_447, %c0_448, %c0_449, %c2_450] : memref<1x3x4x8x6xf32, #tpu.memory_space<vmem>>, vector<1x1x1x8x4xf32>
    %550 = vector.shape_cast %549 : vector<1x1x1x8x4xf32> to vector<8x4xf32>
    %551 = vector.shape_cast %548 : vector<8x4xf32> to vector<1x1x1x8x4xf32>
    tpu.vector_store %arg24[%c0_446, %c2_447, %c0_448, %c0_449, %c2_450], %551 {strides = array<i32>} : memref<1x3x4x8x6xf32, #tpu.memory_space<vmem>>, vector<1x1x1x8x4xf32>,
    %c0_451 = arith.constant 0 : index
    %c17_452 = arith.constant 17 : index
    %c0_453 = arith.constant 0 : index
    %552 = vector.load %arg1[%c0_451, %c17_452, %c0_453] : memref<1x24x5xf32, #tpu.memory_space<vmem>>, vector<1x1x5xf32>
    %553 = vector.shape_cast %552 : vector<1x1x5xf32> to vector<1x5xf32>
    %c0_454 = arith.constant 0 : index
    %c0_455 = arith.constant 0 : index
    %554 = vector.load %arg2[%c0_454, %c0_455] : memref<8x6xf32, #tpu.memory_space<vmem>>, vector<8x1xf32>
    %555 = vector.broadcast %554 : vector<8x1xf32> to vector<8x5xf32>
    %556 = vector.broadcast %553 : vector<1x5xf32> to vector<8x5xf32>
    %557 = arith.mulf %555, %556 : vector<8x5xf32>
    %c0_456 = arith.constant 0 : index
    %c18_457 = arith.constant 18 : index
    %c0_458 = arith.constant 0 : index
    %558 = vector.load %arg1[%c0_456, %c18_457, %c0_458] : memref<1x24x5xf32, #tpu.memory_space<vmem>>, vector<1x1x5xf32>
    %559 = vector.shape_cast %558 : vector<1x1x5xf32> to vector<1x5xf32>
    %c0_459 = arith.constant 0 : index
    %c1_460 = arith.constant 1 : index
    %560 = vector.load %arg2[%c0_459, %c1_460] : memref<8x6xf32, #tpu.memory_space<vmem>>, vector<8x1xf32>
    %561 = vector.broadcast %560 : vector<8x1xf32> to vector<8x5xf32>
    %562 = vector.broadcast %559 : vector<1x5xf32> to vector<8x5xf32>
    %563 = arith.mulf %561, %562 : vector<8x5xf32>
    %564 = arith.addf %557, %563 : vector<8x5xf32>
    %c0_461 = arith.constant 0 : index
    %c19_462 = arith.constant 19 : index
    %c0_463 = arith.constant 0 : index
    %565 = vector.load %arg1[%c0_461, %c19_462, %c0_463] : memref<1x24x5xf32, #tpu.memory_space<vmem>>, vector<1x1x5xf32>
    %566 = vector.shape_cast %565 : vector<1x1x5xf32> to vector<1x5xf32>
    %c0_464 = arith.constant 0 : index
    %c2_465 = arith.constant 2 : index
    %567 = vector.load %arg2[%c0_464, %c2_465] : memref<8x6xf32, #tpu.memory_space<vmem>>, vector<8x1xf32>
    %568 = vector.broadcast %567 : vector<8x1xf32> to vector<8x5xf32>
    %569 = vector.broadcast %566 : vector<1x5xf32> to vector<8x5xf32>
    %570 = arith.mulf %568, %569 : vector<8x5xf32>
    %571 = arith.addf %564, %570 : vector<8x5xf32>
    %c0_466 = arith.constant 0 : index
    %c20_467 = arith.constant 20 : index
    %c0_468 = arith.constant 0 : index
    %572 = vector.load %arg1[%c0_466, %c20_467, %c0_468] : memref<1x24x5xf32, #tpu.memory_space<vmem>>, vector<1x1x5xf32>
    %573 = vector.shape_cast %572 : vector<1x1x5xf32> to vector<1x5xf32>
    %c0_469 = arith.constant 0 : index
    %c3_470 = arith.constant 3 : index
    %574 = vector.load %arg2[%c0_469, %c3_470] : memref<8x6xf32, #tpu.memory_space<vmem>>, vector<8x1xf32>
    %575 = vector.broadcast %574 : vector<8x1xf32> to vector<8x5xf32>
    %576 = vector.broadcast %573 : vector<1x5xf32> to vector<8x5xf32>
    %577 = arith.mulf %575, %576 : vector<8x5xf32>
    %578 = arith.addf %571, %577 : vector<8x5xf32>
    %c0_471 = arith.constant 0 : index
    %c21 = arith.constant 21 : index
    %c0_472 = arith.constant 0 : index
    %579 = vector.load %arg1[%c0_471, %c21, %c0_472] : memref<1x24x5xf32, #tpu.memory_space<vmem>>, vector<1x1x5xf32>
    %580 = vector.shape_cast %579 : vector<1x1x5xf32> to vector<1x5xf32>
    %c0_473 = arith.constant 0 : index
    %c4_474 = arith.constant 4 : index
    %581 = vector.load %arg2[%c0_473, %c4_474] : memref<8x6xf32, #tpu.memory_space<vmem>>, vector<8x1xf32>
    %582 = vector.broadcast %581 : vector<8x1xf32> to vector<8x5xf32>
    %583 = vector.broadcast %580 : vector<1x5xf32> to vector<8x5xf32>
    %584 = arith.mulf %582, %583 : vector<8x5xf32>
    %585 = arith.addf %578, %584 : vector<8x5xf32>
    %c0_475 = arith.constant 0 : index
    %c22 = arith.constant 22 : index
    %c0_476 = arith.constant 0 : index
    %586 = vector.load %arg1[%c0_475, %c22, %c0_476] : memref<1x24x5xf32, #tpu.memory_space<vmem>>, vector<1x1x5xf32>
    %587 = vector.shape_cast %586 : vector<1x1x5xf32> to vector<1x5xf32>
    %c0_477 = arith.constant 0 : index
    %c5_478 = arith.constant 5 : index
    %588 = vector.load %arg2[%c0_477, %c5_478] : memref<8x6xf32, #tpu.memory_space<vmem>>, vector<8x1xf32>
    %589 = vector.broadcast %588 : vector<8x1xf32> to vector<8x5xf32>
    %590 = vector.broadcast %587 : vector<1x5xf32> to vector<8x5xf32>
    %591 = arith.mulf %589, %590 : vector<8x5xf32>
    %592 = arith.addf %585, %591 : vector<8x5xf32>
    %c0_479 = arith.constant 0 : index
    %c0_480 = arith.constant 0 : index
    %593 = vector.load %arg3[%c0_479, %c0_480] : memref<8x1xf32, #tpu.memory_space<vmem>>, vector<8x1xf32>
    %594 = vector.broadcast %593 : vector<8x1xf32> to vector<8x5xf32>
    %595 = arith.addf %592, %594 : vector<8x5xf32>
    %cst_481 = arith.constant 0.000000e+00 : f32
    %596 = vector.broadcast %cst_481 : f32 to vector<8x5xf32>
    %597 = arith.cmpf oge, %595, %596 : vector<8x5xf32>
    %cst_482 = arith.constant 1.000000e-01 : f32
    %598 = vector.broadcast %cst_482 : f32 to vector<8x5xf32>
    %599 = arith.mulf %598, %595 : vector<8x5xf32>
    %600 = arith.select %597, %595, %599 : vector<8x5xi1>, vector<8x5xf32>
    %c0_483 = arith.constant 0 : index
    %c2_484 = arith.constant 2 : index
    %c1_485 = arith.constant 1 : index
    %c0_486 = arith.constant 0 : index
    %c1_487 = arith.constant 1 : index
    %601 = vector.load %arg24[%c0_483, %c2_484, %c1_485, %c0_486, %c1_487] : memref<1x3x4x8x6xf32, #tpu.memory_space<vmem>>, vector<1x1x1x8x5xf32>
    %602 = vector.shape_cast %601 : vector<1x1x1x8x5xf32> to vector<8x5xf32>
    %603 = vector.shape_cast %600 : vector<8x5xf32> to vector<1x1x1x8x5xf32>
    tpu.vector_store %arg24[%c0_483, %c2_484, %c1_485, %c0_486, %c1_487], %603 {strides = array<i32>} : memref<1x3x4x8x6xf32, #tpu.memory_space<vmem>>, vector<1x1x1x8x5xf32>,
    %c0_488 = arith.constant 0 : index
    %c19_489 = arith.constant 19 : index
    %c0_490 = arith.constant 0 : index
    %604 = vector.load %arg1[%c0_488, %c19_489, %c0_490] : memref<1x24x5xf32, #tpu.memory_space<vmem>>, vector<1x1x4xf32>
    %605 = vector.shape_cast %604 : vector<1x1x4xf32> to vector<1x4xf32>
    %c0_491 = arith.constant 0 : index
    %c0_492 = arith.constant 0 : index
    %606 = vector.load %arg2[%c0_491, %c0_492] : memref<8x6xf32, #tpu.memory_space<vmem>>, vector<8x1xf32>
    %607 = vector.broadcast %606 : vector<8x1xf32> to vector<8x4xf32>
    %608 = vector.broadcast %605 : vector<1x4xf32> to vector<8x4xf32>
    %609 = arith.mulf %607, %608 : vector<8x4xf32>
    %c0_493 = arith.constant 0 : index
    %c20_494 = arith.constant 20 : index
    %c0_495 = arith.constant 0 : index
    %610 = vector.load %arg1[%c0_493, %c20_494, %c0_495] : memref<1x24x5xf32, #tpu.memory_space<vmem>>, vector<1x1x4xf32>
    %611 = vector.shape_cast %610 : vector<1x1x4xf32> to vector<1x4xf32>
    %c0_496 = arith.constant 0 : index
    %c1_497 = arith.constant 1 : index
    %612 = vector.load %arg2[%c0_496, %c1_497] : memref<8x6xf32, #tpu.memory_space<vmem>>, vector<8x1xf32>
    %613 = vector.broadcast %612 : vector<8x1xf32> to vector<8x4xf32>
    %614 = vector.broadcast %611 : vector<1x4xf32> to vector<8x4xf32>
    %615 = arith.mulf %613, %614 : vector<8x4xf32>
    %616 = arith.addf %609, %615 : vector<8x4xf32>
    %c0_498 = arith.constant 0 : index
    %c21_499 = arith.constant 21 : index
    %c0_500 = arith.constant 0 : index
    %617 = vector.load %arg1[%c0_498, %c21_499, %c0_500] : memref<1x24x5xf32, #tpu.memory_space<vmem>>, vector<1x1x4xf32>
    %618 = vector.shape_cast %617 : vector<1x1x4xf32> to vector<1x4xf32>
    %c0_501 = arith.constant 0 : index
    %c2_502 = arith.constant 2 : index
    %619 = vector.load %arg2[%c0_501, %c2_502] : memref<8x6xf32, #tpu.memory_space<vmem>>, vector<8x1xf32>
    %620 = vector.broadcast %619 : vector<8x1xf32> to vector<8x4xf32>
    %621 = vector.broadcast %618 : vector<1x4xf32> to vector<8x4xf32>
    %622 = arith.mulf %620, %621 : vector<8x4xf32>
    %623 = arith.addf %616, %622 : vector<8x4xf32>
    %c0_503 = arith.constant 0 : index
    %c22_504 = arith.constant 22 : index
    %c0_505 = arith.constant 0 : index
    %624 = vector.load %arg1[%c0_503, %c22_504, %c0_505] : memref<1x24x5xf32, #tpu.memory_space<vmem>>, vector<1x1x4xf32>
    %625 = vector.shape_cast %624 : vector<1x1x4xf32> to vector<1x4xf32>
    %c0_506 = arith.constant 0 : index
    %c3_507 = arith.constant 3 : index
    %626 = vector.load %arg2[%c0_506, %c3_507] : memref<8x6xf32, #tpu.memory_space<vmem>>, vector<8x1xf32>
    %627 = vector.broadcast %626 : vector<8x1xf32> to vector<8x4xf32>
    %628 = vector.broadcast %625 : vector<1x4xf32> to vector<8x4xf32>
    %629 = arith.mulf %627, %628 : vector<8x4xf32>
    %630 = arith.addf %623, %629 : vector<8x4xf32>
    %c0_508 = arith.constant 0 : index
    %c23_509 = arith.constant 23 : index
    %c0_510 = arith.constant 0 : index
    %631 = vector.load %arg1[%c0_508, %c23_509, %c0_510] : memref<1x24x5xf32, #tpu.memory_space<vmem>>, vector<1x1x4xf32>
    %632 = vector.shape_cast %631 : vector<1x1x4xf32> to vector<1x4xf32>
    %c0_511 = arith.constant 0 : index
    %c4_512 = arith.constant 4 : index
    %633 = vector.load %arg2[%c0_511, %c4_512] : memref<8x6xf32, #tpu.memory_space<vmem>>, vector<8x1xf32>
    %634 = vector.broadcast %633 : vector<8x1xf32> to vector<8x4xf32>
    %635 = vector.broadcast %632 : vector<1x4xf32> to vector<8x4xf32>
    %636 = arith.mulf %634, %635 : vector<8x4xf32>
    %637 = arith.addf %630, %636 : vector<8x4xf32>
    %c0_513 = arith.constant 0 : index
    %c16_514 = arith.constant 16 : index
    %c1_515 = arith.constant 1 : index
    %638 = vector.load %arg1[%c0_513, %c16_514, %c1_515] : memref<1x24x5xf32, #tpu.memory_space<vmem>>, vector<1x1x4xf32>
    %639 = vector.shape_cast %638 : vector<1x1x4xf32> to vector<1x4xf32>
    %c0_516 = arith.constant 0 : index
    %c5_517 = arith.constant 5 : index
    %640 = vector.load %arg2[%c0_516, %c5_517] : memref<8x6xf32, #tpu.memory_space<vmem>>, vector<8x1xf32>
    %641 = vector.broadcast %640 : vector<8x1xf32> to vector<8x4xf32>
    %642 = vector.broadcast %639 : vector<1x4xf32> to vector<8x4xf32>
    %643 = arith.mulf %641, %642 : vector<8x4xf32>
    %644 = arith.addf %637, %643 : vector<8x4xf32>
    %c0_518 = arith.constant 0 : index
    %c0_519 = arith.constant 0 : index
    %645 = vector.load %arg3[%c0_518, %c0_519] : memref<8x1xf32, #tpu.memory_space<vmem>>, vector<8x1xf32>
    %646 = vector.broadcast %645 : vector<8x1xf32> to vector<8x4xf32>
    %647 = arith.addf %644, %646 : vector<8x4xf32>
    %cst_520 = arith.constant 0.000000e+00 : f32
    %648 = vector.broadcast %cst_520 : f32 to vector<8x4xf32>
    %649 = arith.cmpf oge, %647, %648 : vector<8x4xf32>
    %cst_521 = arith.constant 1.000000e-01 : f32
    %650 = vector.broadcast %cst_521 : f32 to vector<8x4xf32>
    %651 = arith.mulf %650, %647 : vector<8x4xf32>
    %652 = arith.select %649, %647, %651 : vector<8x4xi1>, vector<8x4xf32>
    %c0_522 = arith.constant 0 : index
    %c2_523 = arith.constant 2 : index
    %c2_524 = arith.constant 2 : index
    %c0_525 = arith.constant 0 : index
    %c1_526 = arith.constant 1 : index
    %653 = vector.load %arg24[%c0_522, %c2_523, %c2_524, %c0_525, %c1_526] : memref<1x3x4x8x6xf32, #tpu.memory_space<vmem>>, vector<1x1x1x8x4xf32>
    %654 = vector.shape_cast %653 : vector<1x1x1x8x4xf32> to vector<8x4xf32>
    %655 = vector.shape_cast %652 : vector<8x4xf32> to vector<1x1x1x8x4xf32>
    tpu.vector_store %arg24[%c0_522, %c2_523, %c2_524, %c0_525, %c1_526], %655 {strides = array<i32>} : memref<1x3x4x8x6xf32, #tpu.memory_space<vmem>>, vector<1x1x1x8x4xf32>,
    %c0_527 = arith.constant 0 : index
    %c21_528 = arith.constant 21 : index
    %c0_529 = arith.constant 0 : index
    %656 = vector.load %arg1[%c0_527, %c21_528, %c0_529] : memref<1x24x5xf32, #tpu.memory_space<vmem>>, vector<1x1x4xf32>
    %657 = vector.shape_cast %656 : vector<1x1x4xf32> to vector<1x4xf32>
    %c0_530 = arith.constant 0 : index
    %c0_531 = arith.constant 0 : index
    %658 = vector.load %arg2[%c0_530, %c0_531] : memref<8x6xf32, #tpu.memory_space<vmem>>, vector<8x1xf32>
    %659 = vector.broadcast %658 : vector<8x1xf32> to vector<8x4xf32>
    %660 = vector.broadcast %657 : vector<1x4xf32> to vector<8x4xf32>
    %661 = arith.mulf %659, %660 : vector<8x4xf32>
    %c0_532 = arith.constant 0 : index
    %c22_533 = arith.constant 22 : index
    %c0_534 = arith.constant 0 : index
    %662 = vector.load %arg1[%c0_532, %c22_533, %c0_534] : memref<1x24x5xf32, #tpu.memory_space<vmem>>, vector<1x1x4xf32>
    %663 = vector.shape_cast %662 : vector<1x1x4xf32> to vector<1x4xf32>
    %c0_535 = arith.constant 0 : index
    %c1_536 = arith.constant 1 : index
    %664 = vector.load %arg2[%c0_535, %c1_536] : memref<8x6xf32, #tpu.memory_space<vmem>>, vector<8x1xf32>
    %665 = vector.broadcast %664 : vector<8x1xf32> to vector<8x4xf32>
    %666 = vector.broadcast %663 : vector<1x4xf32> to vector<8x4xf32>
    %667 = arith.mulf %665, %666 : vector<8x4xf32>
    %668 = arith.addf %661, %667 : vector<8x4xf32>
    %c0_537 = arith.constant 0 : index
    %c23_538 = arith.constant 23 : index
    %c0_539 = arith.constant 0 : index
    %669 = vector.load %arg1[%c0_537, %c23_538, %c0_539] : memref<1x24x5xf32, #tpu.memory_space<vmem>>, vector<1x1x4xf32>
    %670 = vector.shape_cast %669 : vector<1x1x4xf32> to vector<1x4xf32>
    %c0_540 = arith.constant 0 : index
    %c2_541 = arith.constant 2 : index
    %671 = vector.load %arg2[%c0_540, %c2_541] : memref<8x6xf32, #tpu.memory_space<vmem>>, vector<8x1xf32>
    %672 = vector.broadcast %671 : vector<8x1xf32> to vector<8x4xf32>
    %673 = vector.broadcast %670 : vector<1x4xf32> to vector<8x4xf32>
    %674 = arith.mulf %672, %673 : vector<8x4xf32>
    %675 = arith.addf %668, %674 : vector<8x4xf32>
    %c0_542 = arith.constant 0 : index
    %c16_543 = arith.constant 16 : index
    %c1_544 = arith.constant 1 : index
    %676 = vector.load %arg1[%c0_542, %c16_543, %c1_544] : memref<1x24x5xf32, #tpu.memory_space<vmem>>, vector<1x1x4xf32>
    %677 = vector.shape_cast %676 : vector<1x1x4xf32> to vector<1x4xf32>
    %c0_545 = arith.constant 0 : index
    %c3_546 = arith.constant 3 : index
    %678 = vector.load %arg2[%c0_545, %c3_546] : memref<8x6xf32, #tpu.memory_space<vmem>>, vector<8x1xf32>
    %679 = vector.broadcast %678 : vector<8x1xf32> to vector<8x4xf32>
    %680 = vector.broadcast %677 : vector<1x4xf32> to vector<8x4xf32>
    %681 = arith.mulf %679, %680 : vector<8x4xf32>
    %682 = arith.addf %675, %681 : vector<8x4xf32>
    %c0_547 = arith.constant 0 : index
    %c17_548 = arith.constant 17 : index
    %c1_549 = arith.constant 1 : index
    %683 = vector.load %arg1[%c0_547, %c17_548, %c1_549] : memref<1x24x5xf32, #tpu.memory_space<vmem>>, vector<1x1x4xf32>
    %684 = vector.shape_cast %683 : vector<1x1x4xf32> to vector<1x4xf32>
    %c0_550 = arith.constant 0 : index
    %c4_551 = arith.constant 4 : index
    %685 = vector.load %arg2[%c0_550, %c4_551] : memref<8x6xf32, #tpu.memory_space<vmem>>, vector<8x1xf32>
    %686 = vector.broadcast %685 : vector<8x1xf32> to vector<8x4xf32>
    %687 = vector.broadcast %684 : vector<1x4xf32> to vector<8x4xf32>
    %688 = arith.mulf %686, %687 : vector<8x4xf32>
    %689 = arith.addf %682, %688 : vector<8x4xf32>
    %c0_552 = arith.constant 0 : index
    %c18_553 = arith.constant 18 : index
    %c1_554 = arith.constant 1 : index
    %690 = vector.load %arg1[%c0_552, %c18_553, %c1_554] : memref<1x24x5xf32, #tpu.memory_space<vmem>>, vector<1x1x4xf32>
    %691 = vector.shape_cast %690 : vector<1x1x4xf32> to vector<1x4xf32>
    %c0_555 = arith.constant 0 : index
    %c5_556 = arith.constant 5 : index
    %692 = vector.load %arg2[%c0_555, %c5_556] : memref<8x6xf32, #tpu.memory_space<vmem>>, vector<8x1xf32>
    %693 = vector.broadcast %692 : vector<8x1xf32> to vector<8x4xf32>
    %694 = vector.broadcast %691 : vector<1x4xf32> to vector<8x4xf32>
    %695 = arith.mulf %693, %694 : vector<8x4xf32>
    %696 = arith.addf %689, %695 : vector<8x4xf32>
    %c0_557 = arith.constant 0 : index
    %c0_558 = arith.constant 0 : index
    %697 = vector.load %arg3[%c0_557, %c0_558] : memref<8x1xf32, #tpu.memory_space<vmem>>, vector<8x1xf32>
    %698 = vector.broadcast %697 : vector<8x1xf32> to vector<8x4xf32>
    %699 = arith.addf %696, %698 : vector<8x4xf32>
    %cst_559 = arith.constant 0.000000e+00 : f32
    %700 = vector.broadcast %cst_559 : f32 to vector<8x4xf32>
    %701 = arith.cmpf oge, %699, %700 : vector<8x4xf32>
    %cst_560 = arith.constant 1.000000e-01 : f32
    %702 = vector.broadcast %cst_560 : f32 to vector<8x4xf32>
    %703 = arith.mulf %702, %699 : vector<8x4xf32>
    %704 = arith.select %701, %699, %703 : vector<8x4xi1>, vector<8x4xf32>
    %c0_561 = arith.constant 0 : index
    %c2_562 = arith.constant 2 : index
    %c3_563 = arith.constant 3 : index
    %c0_564 = arith.constant 0 : index
    %c1_565 = arith.constant 1 : index
    %705 = vector.load %arg24[%c0_561, %c2_562, %c3_563, %c0_564, %c1_565] : memref<1x3x4x8x6xf32, #tpu.memory_space<vmem>>, vector<1x1x1x8x4xf32>
    %706 = vector.shape_cast %705 : vector<1x1x1x8x4xf32> to vector<8x4xf32>
    %707 = vector.shape_cast %704 : vector<8x4xf32> to vector<1x1x1x8x4xf32>
    tpu.vector_store %arg24[%c0_561, %c2_562, %c3_563, %c0_564, %c1_565], %707 {strides = array<i32>} : memref<1x3x4x8x6xf32, #tpu.memory_space<vmem>>, vector<1x1x1x8x4xf32>,
    %c0_566 = arith.constant 0 : index
    %c0_567 = arith.constant 0 : index
    %c0_568 = arith.constant 0 : index
    %708 = vector.load %arg8[%c0_566, %c0_567, %c0_568] : memref<1x8x1xf32, #tpu.memory_space<vmem>>, vector<1x8x1xf32>
    %709 = vector.shape_cast %708 : vector<1x8x1xf32> to vector<8x1xf32>
    %c0_569 = arith.constant 0 : index
    %c0_570 = arith.constant 0 : index
    %c2_571 = arith.constant 2 : index
    %c0_572 = arith.constant 0 : index
    %c0_573 = arith.constant 0 : index
    %710 = vector.load %arg24[%c0_569, %c0_570, %c2_571, %c0_572, %c0_573] : memref<1x3x4x8x6xf32, #tpu.memory_space<vmem>>, vector<1x1x1x8x4xf32>
    %711 = vector.shape_cast %710 : vector<1x1x1x8x4xf32> to vector<8x4xf32>
    %c0_574 = arith.constant 0 : index
    %c0_575 = arith.constant 0 : index
    %712 = vector.load %arg4[%c0_574, %c0_575] : memref<8x6xf32, #tpu.memory_space<vmem>>, vector<8x1xf32>
    %713 = vector.broadcast %712 : vector<8x1xf32> to vector<8x4xf32>
    %714 = arith.mulf %713, %711 : vector<8x4xf32>
    %c0_576 = arith.constant 0 : index
    %c0_577 = arith.constant 0 : index
    %c3_578 = arith.constant 3 : index
    %c0_579 = arith.constant 0 : index
    %c0_580 = arith.constant 0 : index
    %715 = vector.load %arg24[%c0_576, %c0_577, %c3_578, %c0_579, %c0_580] : memref<1x3x4x8x6xf32, #tpu.memory_space<vmem>>, vector<1x1x1x8x4xf32>
    %716 = vector.shape_cast %715 : vector<1x1x1x8x4xf32> to vector<8x4xf32>
    %c0_581 = arith.constant 0 : index
    %c1_582 = arith.constant 1 : index
    %717 = vector.load %arg4[%c0_581, %c1_582] : memref<8x6xf32, #tpu.memory_space<vmem>>, vector<8x1xf32>
    %718 = vector.broadcast %717 : vector<8x1xf32> to vector<8x4xf32>
    %719 = arith.mulf %718, %716 : vector<8x4xf32>
    %720 = arith.addf %714, %719 : vector<8x4xf32>
    %c0_583 = arith.constant 0 : index
    %c0_584 = arith.constant 0 : index
    %c0_585 = arith.constant 0 : index
    %c0_586 = arith.constant 0 : index
    %c1_587 = arith.constant 1 : index
    %721 = vector.load %arg24[%c0_583, %c0_584, %c0_585, %c0_586, %c1_587] : memref<1x3x4x8x6xf32, #tpu.memory_space<vmem>>, vector<1x1x1x8x4xf32>
    %722 = vector.shape_cast %721 : vector<1x1x1x8x4xf32> to vector<8x4xf32>
    %c0_588 = arith.constant 0 : index
    %c2_589 = arith.constant 2 : index
    %723 = vector.load %arg4[%c0_588, %c2_589] : memref<8x6xf32, #tpu.memory_space<vmem>>, vector<8x1xf32>
    %724 = vector.broadcast %723 : vector<8x1xf32> to vector<8x4xf32>
    %725 = arith.mulf %724, %722 : vector<8x4xf32>
    %726 = arith.addf %720, %725 : vector<8x4xf32>
    %c0_590 = arith.constant 0 : index
    %c0_591 = arith.constant 0 : index
    %c1_592 = arith.constant 1 : index
    %c0_593 = arith.constant 0 : index
    %c1_594 = arith.constant 1 : index
    %727 = vector.load %arg24[%c0_590, %c0_591, %c1_592, %c0_593, %c1_594] : memref<1x3x4x8x6xf32, #tpu.memory_space<vmem>>, vector<1x1x1x8x4xf32>
    %728 = vector.shape_cast %727 : vector<1x1x1x8x4xf32> to vector<8x4xf32>
    %c0_595 = arith.constant 0 : index
    %c3_596 = arith.constant 3 : index
    %729 = vector.load %arg4[%c0_595, %c3_596] : memref<8x6xf32, #tpu.memory_space<vmem>>, vector<8x1xf32>
    %730 = vector.broadcast %729 : vector<8x1xf32> to vector<8x4xf32>
    %731 = arith.mulf %730, %728 : vector<8x4xf32>
    %732 = arith.addf %726, %731 : vector<8x4xf32>
    %c0_597 = arith.constant 0 : index
    %c0_598 = arith.constant 0 : index
    %c2_599 = arith.constant 2 : index
    %c0_600 = arith.constant 0 : index
    %c1_601 = arith.constant 1 : index
    %733 = vector.load %arg24[%c0_597, %c0_598, %c2_599, %c0_600, %c1_601] : memref<1x3x4x8x6xf32, #tpu.memory_space<vmem>>, vector<1x1x1x8x4xf32>
    %734 = vector.shape_cast %733 : vector<1x1x1x8x4xf32> to vector<8x4xf32>
    %c0_602 = arith.constant 0 : index
    %c4_603 = arith.constant 4 : index
    %735 = vector.load %arg4[%c0_602, %c4_603] : memref<8x6xf32, #tpu.memory_space<vmem>>, vector<8x1xf32>
    %736 = vector.broadcast %735 : vector<8x1xf32> to vector<8x4xf32>
    %737 = arith.mulf %736, %734 : vector<8x4xf32>
    %738 = arith.addf %732, %737 : vector<8x4xf32>
    %c0_604 = arith.constant 0 : index
    %c0_605 = arith.constant 0 : index
    %c3_606 = arith.constant 3 : index
    %c0_607 = arith.constant 0 : index
    %c1_608 = arith.constant 1 : index
    %739 = vector.load %arg24[%c0_604, %c0_605, %c3_606, %c0_607, %c1_608] : memref<1x3x4x8x6xf32, #tpu.memory_space<vmem>>, vector<1x1x1x8x4xf32>
    %740 = vector.shape_cast %739 : vector<1x1x1x8x4xf32> to vector<8x4xf32>
    %c0_609 = arith.constant 0 : index
    %c5_610 = arith.constant 5 : index
    %741 = vector.load %arg4[%c0_609, %c5_610] : memref<8x6xf32, #tpu.memory_space<vmem>>, vector<8x1xf32>
    %742 = vector.broadcast %741 : vector<8x1xf32> to vector<8x4xf32>
    %743 = arith.mulf %742, %740 : vector<8x4xf32>
    %744 = arith.addf %738, %743 : vector<8x4xf32>
    %c0_611 = arith.constant 0 : index
    %c0_612 = arith.constant 0 : index
    %745 = vector.load %arg5[%c0_611, %c0_612] : memref<8x1xf32, #tpu.memory_space<vmem>>, vector<8x1xf32>
    %746 = vector.broadcast %745 : vector<8x1xf32> to vector<8x4xf32>
    %747 = arith.addf %744, %746 : vector<8x4xf32>
    %cst_613 = arith.constant dense<0.000000e+00> : vector<4xf32>
    %748 = vector.multi_reduction <add>, %747, %cst_613 [0] : vector<8x4xf32> to vector<4xf32>
    %749 = vector.shape_cast %748 : vector<4xf32> to vector<1x4xf32>
    %cst_614 = arith.constant 8.000000e+00 : f32
    %750 = vector.broadcast %cst_614 : f32 to vector<1x4xf32>
    %751 = arith.divf %749, %750 : vector<1x4xf32>
    %752 = vector.broadcast %751 : vector<1x4xf32> to vector<8x4xf32>
    %753 = arith.subf %747, %752 : vector<8x4xf32>
    %754 = arith.mulf %753, %753 : vector<8x4xf32>
    %cst_615 = arith.constant dense<0.000000e+00> : vector<4xf32>
    %755 = vector.multi_reduction <add>, %754, %cst_615 [0] : vector<8x4xf32> to vector<4xf32>
    %756 = vector.shape_cast %755 : vector<4xf32> to vector<1x4xf32>
    %cst_616 = arith.constant 8.000000e+00 : f32
    %757 = vector.broadcast %cst_616 : f32 to vector<1x4xf32>
    %758 = arith.divf %756, %757 : vector<1x4xf32>
    %759 = vector.broadcast %751 : vector<1x4xf32> to vector<8x4xf32>
    %760 = arith.subf %747, %759 : vector<8x4xf32>
    %cst_617 = arith.constant 9.99999997E-7 : f32
    %761 = vector.broadcast %cst_617 : f32 to vector<1x4xf32>
    %762 = arith.addf %758, %761 : vector<1x4xf32>
    %763 = math.rsqrt %762 : vector<1x4xf32>
    %764 = vector.broadcast %763 : vector<1x4xf32> to vector<8x4xf32>
    %765 = arith.mulf %760, %764 : vector<8x4xf32>
    %c0_618 = arith.constant 0 : index
    %c0_619 = arith.constant 0 : index
    %766 = vector.load %arg6[%c0_618, %c0_619] : memref<8x1xf32, #tpu.memory_space<vmem>>, vector<8x1xf32>
    %767 = vector.broadcast %766 : vector<8x1xf32> to vector<8x4xf32>
    %768 = arith.mulf %765, %767 : vector<8x4xf32>
    %c0_620 = arith.constant 0 : index
    %c0_621 = arith.constant 0 : index
    %769 = vector.load %arg7[%c0_620, %c0_621] : memref<8x1xf32, #tpu.memory_space<vmem>>, vector<8x1xf32>
    %770 = vector.broadcast %769 : vector<8x1xf32> to vector<8x4xf32>
    %771 = arith.addf %768, %770 : vector<8x4xf32>
    %772 = vector.broadcast %709 : vector<8x1xf32> to vector<8x4xf32>
    %773 = arith.addf %771, %772 : vector<8x4xf32>
    %c0_622 = arith.constant 0 : index
    %c0_623 = arith.constant 0 : index
    %774 = vector.load %arg28[%c0_622, %c0_623] : memref<8x27xf32, #tpu.memory_space<vmem>>, vector<8x4xf32>
    tpu.vector_store %arg28[%c0_622, %c0_623], %773 {strides = array<i32>} : memref<8x27xf32, #tpu.memory_space<vmem>>, vector<8x4xf32>,
    %c0_624 = arith.constant 0 : index
    %c0_625 = arith.constant 0 : index
    %c0_626 = arith.constant 0 : index
    %c0_627 = arith.constant 0 : index
    %c0_628 = arith.constant 0 : index
    %775 = vector.load %arg24[%c0_624, %c0_625, %c0_626, %c0_627, %c0_628] : memref<1x3x4x8x6xf32, #tpu.memory_space<vmem>>, vector<1x1x1x8x5xf32>
    %776 = vector.shape_cast %775 : vector<1x1x1x8x5xf32> to vector<8x5xf32>
    %c0_629 = arith.constant 0 : index
    %c0_630 = arith.constant 0 : index
    %777 = vector.load %arg4[%c0_629, %c0_630] : memref<8x6xf32, #tpu.memory_space<vmem>>, vector<8x1xf32>
    %778 = vector.broadcast %777 : vector<8x1xf32> to vector<8x5xf32>
    %779 = arith.mulf %778, %776 : vector<8x5xf32>
    %c0_631 = arith.constant 0 : index
    %c0_632 = arith.constant 0 : index
    %c1_633 = arith.constant 1 : index
    %c0_634 = arith.constant 0 : index
    %c0_635 = arith.constant 0 : index
    %780 = vector.load %arg24[%c0_631, %c0_632, %c1_633, %c0_634, %c0_635] : memref<1x3x4x8x6xf32, #tpu.memory_space<vmem>>, vector<1x1x1x8x5xf32>
    %781 = vector.shape_cast %780 : vector<1x1x1x8x5xf32> to vector<8x5xf32>
    %c0_636 = arith.constant 0 : index
    %c1_637 = arith.constant 1 : index
    %782 = vector.load %arg4[%c0_636, %c1_637] : memref<8x6xf32, #tpu.memory_space<vmem>>, vector<8x1xf32>
    %783 = vector.broadcast %782 : vector<8x1xf32> to vector<8x5xf32>
    %784 = arith.mulf %783, %781 : vector<8x5xf32>
    %785 = arith.addf %779, %784 : vector<8x5xf32>
    %c0_638 = arith.constant 0 : index
    %c0_639 = arith.constant 0 : index
    %c2_640 = arith.constant 2 : index
    %c0_641 = arith.constant 0 : index
    %c0_642 = arith.constant 0 : index
    %786 = vector.load %arg24[%c0_638, %c0_639, %c2_640, %c0_641, %c0_642] : memref<1x3x4x8x6xf32, #tpu.memory_space<vmem>>, vector<1x1x1x8x5xf32>
    %787 = vector.shape_cast %786 : vector<1x1x1x8x5xf32> to vector<8x5xf32>
    %c0_643 = arith.constant 0 : index
    %c2_644 = arith.constant 2 : index
    %788 = vector.load %arg4[%c0_643, %c2_644] : memref<8x6xf32, #tpu.memory_space<vmem>>, vector<8x1xf32>
    %789 = vector.broadcast %788 : vector<8x1xf32> to vector<8x5xf32>
    %790 = arith.mulf %789, %787 : vector<8x5xf32>
    %791 = arith.addf %785, %790 : vector<8x5xf32>
    %c0_645 = arith.constant 0 : index
    %c0_646 = arith.constant 0 : index
    %c3_647 = arith.constant 3 : index
    %c0_648 = arith.constant 0 : index
    %c0_649 = arith.constant 0 : index
    %792 = vector.load %arg24[%c0_645, %c0_646, %c3_647, %c0_648, %c0_649] : memref<1x3x4x8x6xf32, #tpu.memory_space<vmem>>, vector<1x1x1x8x5xf32>
    %793 = vector.shape_cast %792 : vector<1x1x1x8x5xf32> to vector<8x5xf32>
    %c0_650 = arith.constant 0 : index
    %c3_651 = arith.constant 3 : index
    %794 = vector.load %arg4[%c0_650, %c3_651] : memref<8x6xf32, #tpu.memory_space<vmem>>, vector<8x1xf32>
    %795 = vector.broadcast %794 : vector<8x1xf32> to vector<8x5xf32>
    %796 = arith.mulf %795, %793 : vector<8x5xf32>
    %797 = arith.addf %791, %796 : vector<8x5xf32>
    %c0_652 = arith.constant 0 : index
    %c0_653 = arith.constant 0 : index
    %c0_654 = arith.constant 0 : index
    %c0_655 = arith.constant 0 : index
    %c1_656 = arith.constant 1 : index
    %798 = vector.load %arg24[%c0_652, %c0_653, %c0_654, %c0_655, %c1_656] : memref<1x3x4x8x6xf32, #tpu.memory_space<vmem>>, vector<1x1x1x8x5xf32>
    %799 = vector.shape_cast %798 : vector<1x1x1x8x5xf32> to vector<8x5xf32>
    %c0_657 = arith.constant 0 : index
    %c4_658 = arith.constant 4 : index
    %800 = vector.load %arg4[%c0_657, %c4_658] : memref<8x6xf32, #tpu.memory_space<vmem>>, vector<8x1xf32>
    %801 = vector.broadcast %800 : vector<8x1xf32> to vector<8x5xf32>
    %802 = arith.mulf %801, %799 : vector<8x5xf32>
    %803 = arith.addf %797, %802 : vector<8x5xf32>
    %c0_659 = arith.constant 0 : index
    %c0_660 = arith.constant 0 : index
    %c1_661 = arith.constant 1 : index
    %c0_662 = arith.constant 0 : index
    %c1_663 = arith.constant 1 : index
    %804 = vector.load %arg24[%c0_659, %c0_660, %c1_661, %c0_662, %c1_663] : memref<1x3x4x8x6xf32, #tpu.memory_space<vmem>>, vector<1x1x1x8x5xf32>
    %805 = vector.shape_cast %804 : vector<1x1x1x8x5xf32> to vector<8x5xf32>
    %c0_664 = arith.constant 0 : index
    %c5_665 = arith.constant 5 : index
    %806 = vector.load %arg4[%c0_664, %c5_665] : memref<8x6xf32, #tpu.memory_space<vmem>>, vector<8x1xf32>
    %807 = vector.broadcast %806 : vector<8x1xf32> to vector<8x5xf32>
    %808 = arith.mulf %807, %805 : vector<8x5xf32>
    %809 = arith.addf %803, %808 : vector<8x5xf32>
    %c0_666 = arith.constant 0 : index
    %c0_667 = arith.constant 0 : index
    %810 = vector.load %arg5[%c0_666, %c0_667] : memref<8x1xf32, #tpu.memory_space<vmem>>, vector<8x1xf32>
    %811 = vector.broadcast %810 : vector<8x1xf32> to vector<8x5xf32>
    %812 = arith.addf %809, %811 : vector<8x5xf32>
    %cst_668 = arith.constant dense<0.000000e+00> : vector<5xf32>
    %813 = vector.multi_reduction <add>, %812, %cst_668 [0] : vector<8x5xf32> to vector<5xf32>
    %814 = vector.shape_cast %813 : vector<5xf32> to vector<1x5xf32>
    %cst_669 = arith.constant 8.000000e+00 : f32
    %815 = vector.broadcast %cst_669 : f32 to vector<1x5xf32>
    %816 = arith.divf %814, %815 : vector<1x5xf32>
    %817 = vector.broadcast %816 : vector<1x5xf32> to vector<8x5xf32>
    %818 = arith.subf %812, %817 : vector<8x5xf32>
    %819 = arith.mulf %818, %818 : vector<8x5xf32>
    %cst_670 = arith.constant dense<0.000000e+00> : vector<5xf32>
    %820 = vector.multi_reduction <add>, %819, %cst_670 [0] : vector<8x5xf32> to vector<5xf32>
    %821 = vector.shape_cast %820 : vector<5xf32> to vector<1x5xf32>
    %cst_671 = arith.constant 8.000000e+00 : f32
    %822 = vector.broadcast %cst_671 : f32 to vector<1x5xf32>
    %823 = arith.divf %821, %822 : vector<1x5xf32>
    %824 = vector.broadcast %816 : vector<1x5xf32> to vector<8x5xf32>
    %825 = arith.subf %812, %824 : vector<8x5xf32>
    %cst_672 = arith.constant 9.99999997E-7 : f32
    %826 = vector.broadcast %cst_672 : f32 to vector<1x5xf32>
    %827 = arith.addf %823, %826 : vector<1x5xf32>
    %828 = math.rsqrt %827 : vector<1x5xf32>
    %829 = vector.broadcast %828 : vector<1x5xf32> to vector<8x5xf32>
    %830 = arith.mulf %825, %829 : vector<8x5xf32>
    %c0_673 = arith.constant 0 : index
    %c0_674 = arith.constant 0 : index
    %831 = vector.load %arg6[%c0_673, %c0_674] : memref<8x1xf32, #tpu.memory_space<vmem>>, vector<8x1xf32>
    %832 = vector.broadcast %831 : vector<8x1xf32> to vector<8x5xf32>
    %833 = arith.mulf %830, %832 : vector<8x5xf32>
    %c0_675 = arith.constant 0 : index
    %c0_676 = arith.constant 0 : index
    %834 = vector.load %arg7[%c0_675, %c0_676] : memref<8x1xf32, #tpu.memory_space<vmem>>, vector<8x1xf32>
    %835 = vector.broadcast %834 : vector<8x1xf32> to vector<8x5xf32>
    %836 = arith.addf %833, %835 : vector<8x5xf32>
    %837 = vector.broadcast %709 : vector<8x1xf32> to vector<8x5xf32>
    %838 = arith.addf %836, %837 : vector<8x5xf32>
    %c0_677 = arith.constant 0 : index
    %c4_678 = arith.constant 4 : index
    %839 = vector.load %arg28[%c0_677, %c4_678] : memref<8x27xf32, #tpu.memory_space<vmem>>, vector<8x5xf32>
    tpu.vector_store %arg28[%c0_677, %c4_678], %838 {strides = array<i32>} : memref<8x27xf32, #tpu.memory_space<vmem>>, vector<8x5xf32>,
    %c0_679 = arith.constant 0 : index
    %c1_680 = arith.constant 1 : index
    %c2_681 = arith.constant 2 : index
    %c0_682 = arith.constant 0 : index
    %c0_683 = arith.constant 0 : index
    %840 = vector.load %arg24[%c0_679, %c1_680, %c2_681, %c0_682, %c0_683] : memref<1x3x4x8x6xf32, #tpu.memory_space<vmem>>, vector<1x1x1x8x4xf32>
    %841 = vector.shape_cast %840 : vector<1x1x1x8x4xf32> to vector<8x4xf32>
    %c0_684 = arith.constant 0 : index
    %c0_685 = arith.constant 0 : index
    %842 = vector.load %arg4[%c0_684, %c0_685] : memref<8x6xf32, #tpu.memory_space<vmem>>, vector<8x1xf32>
    %843 = vector.broadcast %842 : vector<8x1xf32> to vector<8x4xf32>
    %844 = arith.mulf %843, %841 : vector<8x4xf32>
    %c0_686 = arith.constant 0 : index
    %c1_687 = arith.constant 1 : index
    %c3_688 = arith.constant 3 : index
    %c0_689 = arith.constant 0 : index
    %c0_690 = arith.constant 0 : index
    %845 = vector.load %arg24[%c0_686, %c1_687, %c3_688, %c0_689, %c0_690] : memref<1x3x4x8x6xf32, #tpu.memory_space<vmem>>, vector<1x1x1x8x4xf32>
    %846 = vector.shape_cast %845 : vector<1x1x1x8x4xf32> to vector<8x4xf32>
    %c0_691 = arith.constant 0 : index
    %c1_692 = arith.constant 1 : index
    %847 = vector.load %arg4[%c0_691, %c1_692] : memref<8x6xf32, #tpu.memory_space<vmem>>, vector<8x1xf32>
    %848 = vector.broadcast %847 : vector<8x1xf32> to vector<8x4xf32>
    %849 = arith.mulf %848, %846 : vector<8x4xf32>
    %850 = arith.addf %844, %849 : vector<8x4xf32>
    %c0_693 = arith.constant 0 : index
    %c1_694 = arith.constant 1 : index
    %c0_695 = arith.constant 0 : index
    %c0_696 = arith.constant 0 : index
    %c1_697 = arith.constant 1 : index
    %851 = vector.load %arg24[%c0_693, %c1_694, %c0_695, %c0_696, %c1_697] : memref<1x3x4x8x6xf32, #tpu.memory_space<vmem>>, vector<1x1x1x8x4xf32>
    %852 = vector.shape_cast %851 : vector<1x1x1x8x4xf32> to vector<8x4xf32>
    %c0_698 = arith.constant 0 : index
    %c2_699 = arith.constant 2 : index
    %853 = vector.load %arg4[%c0_698, %c2_699] : memref<8x6xf32, #tpu.memory_space<vmem>>, vector<8x1xf32>
    %854 = vector.broadcast %853 : vector<8x1xf32> to vector<8x4xf32>
    %855 = arith.mulf %854, %852 : vector<8x4xf32>
    %856 = arith.addf %850, %855 : vector<8x4xf32>
    %c0_700 = arith.constant 0 : index
    %c1_701 = arith.constant 1 : index
    %c1_702 = arith.constant 1 : index
    %c0_703 = arith.constant 0 : index
    %c1_704 = arith.constant 1 : index
    %857 = vector.load %arg24[%c0_700, %c1_701, %c1_702, %c0_703, %c1_704] : memref<1x3x4x8x6xf32, #tpu.memory_space<vmem>>, vector<1x1x1x8x4xf32>
    %858 = vector.shape_cast %857 : vector<1x1x1x8x4xf32> to vector<8x4xf32>
    %c0_705 = arith.constant 0 : index
    %c3_706 = arith.constant 3 : index
    %859 = vector.load %arg4[%c0_705, %c3_706] : memref<8x6xf32, #tpu.memory_space<vmem>>, vector<8x1xf32>
    %860 = vector.broadcast %859 : vector<8x1xf32> to vector<8x4xf32>
    %861 = arith.mulf %860, %858 : vector<8x4xf32>
    %862 = arith.addf %856, %861 : vector<8x4xf32>
    %c0_707 = arith.constant 0 : index
    %c1_708 = arith.constant 1 : index
    %c2_709 = arith.constant 2 : index
    %c0_710 = arith.constant 0 : index
    %c1_711 = arith.constant 1 : index
    %863 = vector.load %arg24[%c0_707, %c1_708, %c2_709, %c0_710, %c1_711] : memref<1x3x4x8x6xf32, #tpu.memory_space<vmem>>, vector<1x1x1x8x4xf32>
    %864 = vector.shape_cast %863 : vector<1x1x1x8x4xf32> to vector<8x4xf32>
    %c0_712 = arith.constant 0 : index
    %c4_713 = arith.constant 4 : index
    %865 = vector.load %arg4[%c0_712, %c4_713] : memref<8x6xf32, #tpu.memory_space<vmem>>, vector<8x1xf32>
    %866 = vector.broadcast %865 : vector<8x1xf32> to vector<8x4xf32>
    %867 = arith.mulf %866, %864 : vector<8x4xf32>
    %868 = arith.addf %862, %867 : vector<8x4xf32>
    %c0_714 = arith.constant 0 : index
    %c1_715 = arith.constant 1 : index
    %c3_716 = arith.constant 3 : index
    %c0_717 = arith.constant 0 : index
    %c1_718 = arith.constant 1 : index
    %869 = vector.load %arg24[%c0_714, %c1_715, %c3_716, %c0_717, %c1_718] : memref<1x3x4x8x6xf32, #tpu.memory_space<vmem>>, vector<1x1x1x8x4xf32>
    %870 = vector.shape_cast %869 : vector<1x1x1x8x4xf32> to vector<8x4xf32>
    %c0_719 = arith.constant 0 : index
    %c5_720 = arith.constant 5 : index
    %871 = vector.load %arg4[%c0_719, %c5_720] : memref<8x6xf32, #tpu.memory_space<vmem>>, vector<8x1xf32>
    %872 = vector.broadcast %871 : vector<8x1xf32> to vector<8x4xf32>
    %873 = arith.mulf %872, %870 : vector<8x4xf32>
    %874 = arith.addf %868, %873 : vector<8x4xf32>
    %c0_721 = arith.constant 0 : index
    %c0_722 = arith.constant 0 : index
    %875 = vector.load %arg5[%c0_721, %c0_722] : memref<8x1xf32, #tpu.memory_space<vmem>>, vector<8x1xf32>
    %876 = vector.broadcast %875 : vector<8x1xf32> to vector<8x4xf32>
    %877 = arith.addf %874, %876 : vector<8x4xf32>
    %cst_723 = arith.constant dense<0.000000e+00> : vector<4xf32>
    %878 = vector.multi_reduction <add>, %877, %cst_723 [0] : vector<8x4xf32> to vector<4xf32>
    %879 = vector.shape_cast %878 : vector<4xf32> to vector<1x4xf32>
    %cst_724 = arith.constant 8.000000e+00 : f32
    %880 = vector.broadcast %cst_724 : f32 to vector<1x4xf32>
    %881 = arith.divf %879, %880 : vector<1x4xf32>
    %882 = vector.broadcast %881 : vector<1x4xf32> to vector<8x4xf32>
    %883 = arith.subf %877, %882 : vector<8x4xf32>
    %884 = arith.mulf %883, %883 : vector<8x4xf32>
    %cst_725 = arith.constant dense<0.000000e+00> : vector<4xf32>
    %885 = vector.multi_reduction <add>, %884, %cst_725 [0] : vector<8x4xf32> to vector<4xf32>
    %886 = vector.shape_cast %885 : vector<4xf32> to vector<1x4xf32>
    %cst_726 = arith.constant 8.000000e+00 : f32
    %887 = vector.broadcast %cst_726 : f32 to vector<1x4xf32>
    %888 = arith.divf %886, %887 : vector<1x4xf32>
    %889 = vector.broadcast %881 : vector<1x4xf32> to vector<8x4xf32>
    %890 = arith.subf %877, %889 : vector<8x4xf32>
    %cst_727 = arith.constant 9.99999997E-7 : f32
    %891 = vector.broadcast %cst_727 : f32 to vector<1x4xf32>
    %892 = arith.addf %888, %891 : vector<1x4xf32>
    %893 = math.rsqrt %892 : vector<1x4xf32>
    %894 = vector.broadcast %893 : vector<1x4xf32> to vector<8x4xf32>
    %895 = arith.mulf %890, %894 : vector<8x4xf32>
    %c0_728 = arith.constant 0 : index
    %c0_729 = arith.constant 0 : index
    %896 = vector.load %arg6[%c0_728, %c0_729] : memref<8x1xf32, #tpu.memory_space<vmem>>, vector<8x1xf32>
    %897 = vector.broadcast %896 : vector<8x1xf32> to vector<8x4xf32>
    %898 = arith.mulf %895, %897 : vector<8x4xf32>
    %c0_730 = arith.constant 0 : index
    %c0_731 = arith.constant 0 : index
    %899 = vector.load %arg7[%c0_730, %c0_731] : memref<8x1xf32, #tpu.memory_space<vmem>>, vector<8x1xf32>
    %900 = vector.broadcast %899 : vector<8x1xf32> to vector<8x4xf32>
    %901 = arith.addf %898, %900 : vector<8x4xf32>
    %902 = vector.broadcast %709 : vector<8x1xf32> to vector<8x4xf32>
    %903 = arith.addf %901, %902 : vector<8x4xf32>
    %c0_732 = arith.constant 0 : index
    %c9_733 = arith.constant 9 : index
    %904 = vector.load %arg28[%c0_732, %c9_733] : memref<8x27xf32, #tpu.memory_space<vmem>>, vector<8x4xf32>
    tpu.vector_store %arg28[%c0_732, %c9_733], %903 {strides = array<i32>} : memref<8x27xf32, #tpu.memory_space<vmem>>, vector<8x4xf32>,
    %c0_734 = arith.constant 0 : index
    %c1_735 = arith.constant 1 : index
    %c0_736 = arith.constant 0 : index
    %c0_737 = arith.constant 0 : index
    %c0_738 = arith.constant 0 : index
    %905 = vector.load %arg24[%c0_734, %c1_735, %c0_736, %c0_737, %c0_738] : memref<1x3x4x8x6xf32, #tpu.memory_space<vmem>>, vector<1x1x1x8x5xf32>
    %906 = vector.shape_cast %905 : vector<1x1x1x8x5xf32> to vector<8x5xf32>
    %c0_739 = arith.constant 0 : index
    %c0_740 = arith.constant 0 : index
    %907 = vector.load %arg4[%c0_739, %c0_740] : memref<8x6xf32, #tpu.memory_space<vmem>>, vector<8x1xf32>
    %908 = vector.broadcast %907 : vector<8x1xf32> to vector<8x5xf32>
    %909 = arith.mulf %908, %906 : vector<8x5xf32>
    %c0_741 = arith.constant 0 : index
    %c1_742 = arith.constant 1 : index
    %c1_743 = arith.constant 1 : index
    %c0_744 = arith.constant 0 : index
    %c0_745 = arith.constant 0 : index
    %910 = vector.load %arg24[%c0_741, %c1_742, %c1_743, %c0_744, %c0_745] : memref<1x3x4x8x6xf32, #tpu.memory_space<vmem>>, vector<1x1x1x8x5xf32>
    %911 = vector.shape_cast %910 : vector<1x1x1x8x5xf32> to vector<8x5xf32>
    %c0_746 = arith.constant 0 : index
    %c1_747 = arith.constant 1 : index
    %912 = vector.load %arg4[%c0_746, %c1_747] : memref<8x6xf32, #tpu.memory_space<vmem>>, vector<8x1xf32>
    %913 = vector.broadcast %912 : vector<8x1xf32> to vector<8x5xf32>
    %914 = arith.mulf %913, %911 : vector<8x5xf32>
    %915 = arith.addf %909, %914 : vector<8x5xf32>
    %c0_748 = arith.constant 0 : index
    %c1_749 = arith.constant 1 : index
    %c2_750 = arith.constant 2 : index
    %c0_751 = arith.constant 0 : index
    %c0_752 = arith.constant 0 : index
    %916 = vector.load %arg24[%c0_748, %c1_749, %c2_750, %c0_751, %c0_752] : memref<1x3x4x8x6xf32, #tpu.memory_space<vmem>>, vector<1x1x1x8x5xf32>
    %917 = vector.shape_cast %916 : vector<1x1x1x8x5xf32> to vector<8x5xf32>
    %c0_753 = arith.constant 0 : index
    %c2_754 = arith.constant 2 : index
    %918 = vector.load %arg4[%c0_753, %c2_754] : memref<8x6xf32, #tpu.memory_space<vmem>>, vector<8x1xf32>
    %919 = vector.broadcast %918 : vector<8x1xf32> to vector<8x5xf32>
    %920 = arith.mulf %919, %917 : vector<8x5xf32>
    %921 = arith.addf %915, %920 : vector<8x5xf32>
    %c0_755 = arith.constant 0 : index
    %c1_756 = arith.constant 1 : index
    %c3_757 = arith.constant 3 : index
    %c0_758 = arith.constant 0 : index
    %c0_759 = arith.constant 0 : index
    %922 = vector.load %arg24[%c0_755, %c1_756, %c3_757, %c0_758, %c0_759] : memref<1x3x4x8x6xf32, #tpu.memory_space<vmem>>, vector<1x1x1x8x5xf32>
    %923 = vector.shape_cast %922 : vector<1x1x1x8x5xf32> to vector<8x5xf32>
    %c0_760 = arith.constant 0 : index
    %c3_761 = arith.constant 3 : index
    %924 = vector.load %arg4[%c0_760, %c3_761] : memref<8x6xf32, #tpu.memory_space<vmem>>, vector<8x1xf32>
    %925 = vector.broadcast %924 : vector<8x1xf32> to vector<8x5xf32>
    %926 = arith.mulf %925, %923 : vector<8x5xf32>
    %927 = arith.addf %921, %926 : vector<8x5xf32>
    %c0_762 = arith.constant 0 : index
    %c1_763 = arith.constant 1 : index
    %c0_764 = arith.constant 0 : index
    %c0_765 = arith.constant 0 : index
    %c1_766 = arith.constant 1 : index
    %928 = vector.load %arg24[%c0_762, %c1_763, %c0_764, %c0_765, %c1_766] : memref<1x3x4x8x6xf32, #tpu.memory_space<vmem>>, vector<1x1x1x8x5xf32>
    %929 = vector.shape_cast %928 : vector<1x1x1x8x5xf32> to vector<8x5xf32>
    %c0_767 = arith.constant 0 : index
    %c4_768 = arith.constant 4 : index
    %930 = vector.load %arg4[%c0_767, %c4_768] : memref<8x6xf32, #tpu.memory_space<vmem>>, vector<8x1xf32>
    %931 = vector.broadcast %930 : vector<8x1xf32> to vector<8x5xf32>
    %932 = arith.mulf %931, %929 : vector<8x5xf32>
    %933 = arith.addf %927, %932 : vector<8x5xf32>
    %c0_769 = arith.constant 0 : index
    %c1_770 = arith.constant 1 : index
    %c1_771 = arith.constant 1 : index
    %c0_772 = arith.constant 0 : index
    %c1_773 = arith.constant 1 : index
    %934 = vector.load %arg24[%c0_769, %c1_770, %c1_771, %c0_772, %c1_773] : memref<1x3x4x8x6xf32, #tpu.memory_space<vmem>>, vector<1x1x1x8x5xf32>
    %935 = vector.shape_cast %934 : vector<1x1x1x8x5xf32> to vector<8x5xf32>
    %c0_774 = arith.constant 0 : index
    %c5_775 = arith.constant 5 : index
    %936 = vector.load %arg4[%c0_774, %c5_775] : memref<8x6xf32, #tpu.memory_space<vmem>>, vector<8x1xf32>
    %937 = vector.broadcast %936 : vector<8x1xf32> to vector<8x5xf32>
    %938 = arith.mulf %937, %935 : vector<8x5xf32>
    %939 = arith.addf %933, %938 : vector<8x5xf32>
    %c0_776 = arith.constant 0 : index
    %c0_777 = arith.constant 0 : index
    %940 = vector.load %arg5[%c0_776, %c0_777] : memref<8x1xf32, #tpu.memory_space<vmem>>, vector<8x1xf32>
    %941 = vector.broadcast %940 : vector<8x1xf32> to vector<8x5xf32>
    %942 = arith.addf %939, %941 : vector<8x5xf32>
    %cst_778 = arith.constant dense<0.000000e+00> : vector<5xf32>
    %943 = vector.multi_reduction <add>, %942, %cst_778 [0] : vector<8x5xf32> to vector<5xf32>
    %944 = vector.shape_cast %943 : vector<5xf32> to vector<1x5xf32>
    %cst_779 = arith.constant 8.000000e+00 : f32
    %945 = vector.broadcast %cst_779 : f32 to vector<1x5xf32>
    %946 = arith.divf %944, %945 : vector<1x5xf32>
    %947 = vector.broadcast %946 : vector<1x5xf32> to vector<8x5xf32>
    %948 = arith.subf %942, %947 : vector<8x5xf32>
    %949 = arith.mulf %948, %948 : vector<8x5xf32>
    %cst_780 = arith.constant dense<0.000000e+00> : vector<5xf32>
    %950 = vector.multi_reduction <add>, %949, %cst_780 [0] : vector<8x5xf32> to vector<5xf32>
    %951 = vector.shape_cast %950 : vector<5xf32> to vector<1x5xf32>
    %cst_781 = arith.constant 8.000000e+00 : f32
    %952 = vector.broadcast %cst_781 : f32 to vector<1x5xf32>
    %953 = arith.divf %951, %952 : vector<1x5xf32>
    %954 = vector.broadcast %946 : vector<1x5xf32> to vector<8x5xf32>
    %955 = arith.subf %942, %954 : vector<8x5xf32>
    %cst_782 = arith.constant 9.99999997E-7 : f32
    %956 = vector.broadcast %cst_782 : f32 to vector<1x5xf32>
    %957 = arith.addf %953, %956 : vector<1x5xf32>
    %958 = math.rsqrt %957 : vector<1x5xf32>
    %959 = vector.broadcast %958 : vector<1x5xf32> to vector<8x5xf32>
    %960 = arith.mulf %955, %959 : vector<8x5xf32>
    %c0_783 = arith.constant 0 : index
    %c0_784 = arith.constant 0 : index
    %961 = vector.load %arg6[%c0_783, %c0_784] : memref<8x1xf32, #tpu.memory_space<vmem>>, vector<8x1xf32>
    %962 = vector.broadcast %961 : vector<8x1xf32> to vector<8x5xf32>
    %963 = arith.mulf %960, %962 : vector<8x5xf32>
    %c0_785 = arith.constant 0 : index
    %c0_786 = arith.constant 0 : index
    %964 = vector.load %arg7[%c0_785, %c0_786] : memref<8x1xf32, #tpu.memory_space<vmem>>, vector<8x1xf32>
    %965 = vector.broadcast %964 : vector<8x1xf32> to vector<8x5xf32>
    %966 = arith.addf %963, %965 : vector<8x5xf32>
    %967 = vector.broadcast %709 : vector<8x1xf32> to vector<8x5xf32>
    %968 = arith.addf %966, %967 : vector<8x5xf32>
    %c0_787 = arith.constant 0 : index
    %c13_788 = arith.constant 13 : index
    %969 = vector.load %arg28[%c0_787, %c13_788] : memref<8x27xf32, #tpu.memory_space<vmem>>, vector<8x5xf32>
    tpu.vector_store %arg28[%c0_787, %c13_788], %968 {strides = array<i32>} : memref<8x27xf32, #tpu.memory_space<vmem>>, vector<8x5xf32>,
    %c0_789 = arith.constant 0 : index
    %c2_790 = arith.constant 2 : index
    %c2_791 = arith.constant 2 : index
    %c0_792 = arith.constant 0 : index
    %c0_793 = arith.constant 0 : index
    %970 = vector.load %arg24[%c0_789, %c2_790, %c2_791, %c0_792, %c0_793] : memref<1x3x4x8x6xf32, #tpu.memory_space<vmem>>, vector<1x1x1x8x4xf32>
    %971 = vector.shape_cast %970 : vector<1x1x1x8x4xf32> to vector<8x4xf32>
    %c0_794 = arith.constant 0 : index
    %c0_795 = arith.constant 0 : index
    %972 = vector.load %arg4[%c0_794, %c0_795] : memref<8x6xf32, #tpu.memory_space<vmem>>, vector<8x1xf32>
    %973 = vector.broadcast %972 : vector<8x1xf32> to vector<8x4xf32>
    %974 = arith.mulf %973, %971 : vector<8x4xf32>
    %c0_796 = arith.constant 0 : index
    %c2_797 = arith.constant 2 : index
    %c3_798 = arith.constant 3 : index
    %c0_799 = arith.constant 0 : index
    %c0_800 = arith.constant 0 : index
    %975 = vector.load %arg24[%c0_796, %c2_797, %c3_798, %c0_799, %c0_800] : memref<1x3x4x8x6xf32, #tpu.memory_space<vmem>>, vector<1x1x1x8x4xf32>
    %976 = vector.shape_cast %975 : vector<1x1x1x8x4xf32> to vector<8x4xf32>
    %c0_801 = arith.constant 0 : index
    %c1_802 = arith.constant 1 : index
    %977 = vector.load %arg4[%c0_801, %c1_802] : memref<8x6xf32, #tpu.memory_space<vmem>>, vector<8x1xf32>
    %978 = vector.broadcast %977 : vector<8x1xf32> to vector<8x4xf32>
    %979 = arith.mulf %978, %976 : vector<8x4xf32>
    %980 = arith.addf %974, %979 : vector<8x4xf32>
    %c0_803 = arith.constant 0 : index
    %c2_804 = arith.constant 2 : index
    %c0_805 = arith.constant 0 : index
    %c0_806 = arith.constant 0 : index
    %c1_807 = arith.constant 1 : index
    %981 = vector.load %arg24[%c0_803, %c2_804, %c0_805, %c0_806, %c1_807] : memref<1x3x4x8x6xf32, #tpu.memory_space<vmem>>, vector<1x1x1x8x4xf32>
    %982 = vector.shape_cast %981 : vector<1x1x1x8x4xf32> to vector<8x4xf32>
    %c0_808 = arith.constant 0 : index
    %c2_809 = arith.constant 2 : index
    %983 = vector.load %arg4[%c0_808, %c2_809] : memref<8x6xf32, #tpu.memory_space<vmem>>, vector<8x1xf32>
    %984 = vector.broadcast %983 : vector<8x1xf32> to vector<8x4xf32>
    %985 = arith.mulf %984, %982 : vector<8x4xf32>
    %986 = arith.addf %980, %985 : vector<8x4xf32>
    %c0_810 = arith.constant 0 : index
    %c2_811 = arith.constant 2 : index
    %c1_812 = arith.constant 1 : index
    %c0_813 = arith.constant 0 : index
    %c1_814 = arith.constant 1 : index
    %987 = vector.load %arg24[%c0_810, %c2_811, %c1_812, %c0_813, %c1_814] : memref<1x3x4x8x6xf32, #tpu.memory_space<vmem>>, vector<1x1x1x8x4xf32>
    %988 = vector.shape_cast %987 : vector<1x1x1x8x4xf32> to vector<8x4xf32>
    %c0_815 = arith.constant 0 : index
    %c3_816 = arith.constant 3 : index
    %989 = vector.load %arg4[%c0_815, %c3_816] : memref<8x6xf32, #tpu.memory_space<vmem>>, vector<8x1xf32>
    %990 = vector.broadcast %989 : vector<8x1xf32> to vector<8x4xf32>
    %991 = arith.mulf %990, %988 : vector<8x4xf32>
    %992 = arith.addf %986, %991 : vector<8x4xf32>
    %c0_817 = arith.constant 0 : index
    %c2_818 = arith.constant 2 : index
    %c2_819 = arith.constant 2 : index
    %c0_820 = arith.constant 0 : index
    %c1_821 = arith.constant 1 : index
    %993 = vector.load %arg24[%c0_817, %c2_818, %c2_819, %c0_820, %c1_821] : memref<1x3x4x8x6xf32, #tpu.memory_space<vmem>>, vector<1x1x1x8x4xf32>
    %994 = vector.shape_cast %993 : vector<1x1x1x8x4xf32> to vector<8x4xf32>
    %c0_822 = arith.constant 0 : index
    %c4_823 = arith.constant 4 : index
    %995 = vector.load %arg4[%c0_822, %c4_823] : memref<8x6xf32, #tpu.memory_space<vmem>>, vector<8x1xf32>
    %996 = vector.broadcast %995 : vector<8x1xf32> to vector<8x4xf32>
    %997 = arith.mulf %996, %994 : vector<8x4xf32>
    %998 = arith.addf %992, %997 : vector<8x4xf32>
    %c0_824 = arith.constant 0 : index
    %c2_825 = arith.constant 2 : index
    %c3_826 = arith.constant 3 : index
    %c0_827 = arith.constant 0 : index
    %c1_828 = arith.constant 1 : index
    %999 = vector.load %arg24[%c0_824, %c2_825, %c3_826, %c0_827, %c1_828] : memref<1x3x4x8x6xf32, #tpu.memory_space<vmem>>, vector<1x1x1x8x4xf32>
    %1000 = vector.shape_cast %999 : vector<1x1x1x8x4xf32> to vector<8x4xf32>
    %c0_829 = arith.constant 0 : index
    %c5_830 = arith.constant 5 : index
    %1001 = vector.load %arg4[%c0_829, %c5_830] : memref<8x6xf32, #tpu.memory_space<vmem>>, vector<8x1xf32>
    %1002 = vector.broadcast %1001 : vector<8x1xf32> to vector<8x4xf32>
    %1003 = arith.mulf %1002, %1000 : vector<8x4xf32>
    %1004 = arith.addf %998, %1003 : vector<8x4xf32>
    %c0_831 = arith.constant 0 : index
    %c0_832 = arith.constant 0 : index
    %1005 = vector.load %arg5[%c0_831, %c0_832] : memref<8x1xf32, #tpu.memory_space<vmem>>, vector<8x1xf32>
    %1006 = vector.broadcast %1005 : vector<8x1xf32> to vector<8x4xf32>
    %1007 = arith.addf %1004, %1006 : vector<8x4xf32>
    %cst_833 = arith.constant dense<0.000000e+00> : vector<4xf32>
    %1008 = vector.multi_reduction <add>, %1007, %cst_833 [0] : vector<8x4xf32> to vector<4xf32>
    %1009 = vector.shape_cast %1008 : vector<4xf32> to vector<1x4xf32>
    %cst_834 = arith.constant 8.000000e+00 : f32
    %1010 = vector.broadcast %cst_834 : f32 to vector<1x4xf32>
    %1011 = arith.divf %1009, %1010 : vector<1x4xf32>
    %1012 = vector.broadcast %1011 : vector<1x4xf32> to vector<8x4xf32>
    %1013 = arith.subf %1007, %1012 : vector<8x4xf32>
    %1014 = arith.mulf %1013, %1013 : vector<8x4xf32>
    %cst_835 = arith.constant dense<0.000000e+00> : vector<4xf32>
    %1015 = vector.multi_reduction <add>, %1014, %cst_835 [0] : vector<8x4xf32> to vector<4xf32>
    %1016 = vector.shape_cast %1015 : vector<4xf32> to vector<1x4xf32>
    %cst_836 = arith.constant 8.000000e+00 : f32
    %1017 = vector.broadcast %cst_836 : f32 to vector<1x4xf32>
    %1018 = arith.divf %1016, %1017 : vector<1x4xf32>
    %1019 = vector.broadcast %1011 : vector<1x4xf32> to vector<8x4xf32>
    %1020 = arith.subf %1007, %1019 : vector<8x4xf32>
    %cst_837 = arith.constant 9.99999997E-7 : f32
    %1021 = vector.broadcast %cst_837 : f32 to vector<1x4xf32>
    %1022 = arith.addf %1018, %1021 : vector<1x4xf32>
    %1023 = math.rsqrt %1022 : vector<1x4xf32>
    %1024 = vector.broadcast %1023 : vector<1x4xf32> to vector<8x4xf32>
    %1025 = arith.mulf %1020, %1024 : vector<8x4xf32>
    %c0_838 = arith.constant 0 : index
    %c0_839 = arith.constant 0 : index
    %1026 = vector.load %arg6[%c0_838, %c0_839] : memref<8x1xf32, #tpu.memory_space<vmem>>, vector<8x1xf32>
    %1027 = vector.broadcast %1026 : vector<8x1xf32> to vector<8x4xf32>
    %1028 = arith.mulf %1025, %1027 : vector<8x4xf32>
    %c0_840 = arith.constant 0 : index
    %c0_841 = arith.constant 0 : index
    %1029 = vector.load %arg7[%c0_840, %c0_841] : memref<8x1xf32, #tpu.memory_space<vmem>>, vector<8x1xf32>
    %1030 = vector.broadcast %1029 : vector<8x1xf32> to vector<8x4xf32>
    %1031 = arith.addf %1028, %1030 : vector<8x4xf32>
    %1032 = vector.broadcast %709 : vector<8x1xf32> to vector<8x4xf32>
    %1033 = arith.addf %1031, %1032 : vector<8x4xf32>
    %c0_842 = arith.constant 0 : index
    %c18_843 = arith.constant 18 : index
    %1034 = vector.load %arg28[%c0_842, %c18_843] : memref<8x27xf32, #tpu.memory_space<vmem>>, vector<8x4xf32>
    tpu.vector_store %arg28[%c0_842, %c18_843], %1033 {strides = array<i32>} : memref<8x27xf32, #tpu.memory_space<vmem>>, vector<8x4xf32>,
    %c0_844 = arith.constant 0 : index
    %c2_845 = arith.constant 2 : index
    %c0_846 = arith.constant 0 : index
    %c0_847 = arith.constant 0 : index
    %c0_848 = arith.constant 0 : index
    %1035 = vector.load %arg24[%c0_844, %c2_845, %c0_846, %c0_847, %c0_848] : memref<1x3x4x8x6xf32, #tpu.memory_space<vmem>>, vector<1x1x1x8x5xf32>
    %1036 = vector.shape_cast %1035 : vector<1x1x1x8x5xf32> to vector<8x5xf32>
    %c0_849 = arith.constant 0 : index
    %c0_850 = arith.constant 0 : index
    %1037 = vector.load %arg4[%c0_849, %c0_850] : memref<8x6xf32, #tpu.memory_space<vmem>>, vector<8x1xf32>
    %1038 = vector.broadcast %1037 : vector<8x1xf32> to vector<8x5xf32>
    %1039 = arith.mulf %1038, %1036 : vector<8x5xf32>
    %c0_851 = arith.constant 0 : index
    %c2_852 = arith.constant 2 : index
    %c1_853 = arith.constant 1 : index
    %c0_854 = arith.constant 0 : index
    %c0_855 = arith.constant 0 : index
    %1040 = vector.load %arg24[%c0_851, %c2_852, %c1_853, %c0_854, %c0_855] : memref<1x3x4x8x6xf32, #tpu.memory_space<vmem>>, vector<1x1x1x8x5xf32>
    %1041 = vector.shape_cast %1040 : vector<1x1x1x8x5xf32> to vector<8x5xf32>
    %c0_856 = arith.constant 0 : index
    %c1_857 = arith.constant 1 : index
    %1042 = vector.load %arg4[%c0_856, %c1_857] : memref<8x6xf32, #tpu.memory_space<vmem>>, vector<8x1xf32>
    %1043 = vector.broadcast %1042 : vector<8x1xf32> to vector<8x5xf32>
    %1044 = arith.mulf %1043, %1041 : vector<8x5xf32>
    %1045 = arith.addf %1039, %1044 : vector<8x5xf32>
    %c0_858 = arith.constant 0 : index
    %c2_859 = arith.constant 2 : index
    %c2_860 = arith.constant 2 : index
    %c0_861 = arith.constant 0 : index
    %c0_862 = arith.constant 0 : index
    %1046 = vector.load %arg24[%c0_858, %c2_859, %c2_860, %c0_861, %c0_862] : memref<1x3x4x8x6xf32, #tpu.memory_space<vmem>>, vector<1x1x1x8x5xf32>
    %1047 = vector.shape_cast %1046 : vector<1x1x1x8x5xf32> to vector<8x5xf32>
    %c0_863 = arith.constant 0 : index
    %c2_864 = arith.constant 2 : index
    %1048 = vector.load %arg4[%c0_863, %c2_864] : memref<8x6xf32, #tpu.memory_space<vmem>>, vector<8x1xf32>
    %1049 = vector.broadcast %1048 : vector<8x1xf32> to vector<8x5xf32>
    %1050 = arith.mulf %1049, %1047 : vector<8x5xf32>
    %1051 = arith.addf %1045, %1050 : vector<8x5xf32>
    %c0_865 = arith.constant 0 : index
    %c2_866 = arith.constant 2 : index
    %c3_867 = arith.constant 3 : index
    %c0_868 = arith.constant 0 : index
    %c0_869 = arith.constant 0 : index
    %1052 = vector.load %arg24[%c0_865, %c2_866, %c3_867, %c0_868, %c0_869] : memref<1x3x4x8x6xf32, #tpu.memory_space<vmem>>, vector<1x1x1x8x5xf32>
    %1053 = vector.shape_cast %1052 : vector<1x1x1x8x5xf32> to vector<8x5xf32>
    %c0_870 = arith.constant 0 : index
    %c3_871 = arith.constant 3 : index
    %1054 = vector.load %arg4[%c0_870, %c3_871] : memref<8x6xf32, #tpu.memory_space<vmem>>, vector<8x1xf32>
    %1055 = vector.broadcast %1054 : vector<8x1xf32> to vector<8x5xf32>
    %1056 = arith.mulf %1055, %1053 : vector<8x5xf32>
    %1057 = arith.addf %1051, %1056 : vector<8x5xf32>
    %c0_872 = arith.constant 0 : index
    %c2_873 = arith.constant 2 : index
    %c0_874 = arith.constant 0 : index
    %c0_875 = arith.constant 0 : index
    %c1_876 = arith.constant 1 : index
    %1058 = vector.load %arg24[%c0_872, %c2_873, %c0_874, %c0_875, %c1_876] : memref<1x3x4x8x6xf32, #tpu.memory_space<vmem>>, vector<1x1x1x8x5xf32>
    %1059 = vector.shape_cast %1058 : vector<1x1x1x8x5xf32> to vector<8x5xf32>
    %c0_877 = arith.constant 0 : index
    %c4_878 = arith.constant 4 : index
    %1060 = vector.load %arg4[%c0_877, %c4_878] : memref<8x6xf32, #tpu.memory_space<vmem>>, vector<8x1xf32>
    %1061 = vector.broadcast %1060 : vector<8x1xf32> to vector<8x5xf32>
    %1062 = arith.mulf %1061, %1059 : vector<8x5xf32>
    %1063 = arith.addf %1057, %1062 : vector<8x5xf32>
    %c0_879 = arith.constant 0 : index
    %c2_880 = arith.constant 2 : index
    %c1_881 = arith.constant 1 : index
    %c0_882 = arith.constant 0 : index
    %c1_883 = arith.constant 1 : index
    %1064 = vector.load %arg24[%c0_879, %c2_880, %c1_881, %c0_882, %c1_883] : memref<1x3x4x8x6xf32, #tpu.memory_space<vmem>>, vector<1x1x1x8x5xf32>
    %1065 = vector.shape_cast %1064 : vector<1x1x1x8x5xf32> to vector<8x5xf32>
    %c0_884 = arith.constant 0 : index
    %c5_885 = arith.constant 5 : index
    %1066 = vector.load %arg4[%c0_884, %c5_885] : memref<8x6xf32, #tpu.memory_space<vmem>>, vector<8x1xf32>
    %1067 = vector.broadcast %1066 : vector<8x1xf32> to vector<8x5xf32>
    %1068 = arith.mulf %1067, %1065 : vector<8x5xf32>
    %1069 = arith.addf %1063, %1068 : vector<8x5xf32>
    %c0_886 = arith.constant 0 : index
    %c0_887 = arith.constant 0 : index
    %1070 = vector.load %arg5[%c0_886, %c0_887] : memref<8x1xf32, #tpu.memory_space<vmem>>, vector<8x1xf32>
    %1071 = vector.broadcast %1070 : vector<8x1xf32> to vector<8x5xf32>
    %1072 = arith.addf %1069, %1071 : vector<8x5xf32>
    %cst_888 = arith.constant dense<0.000000e+00> : vector<5xf32>
    %1073 = vector.multi_reduction <add>, %1072, %cst_888 [0] : vector<8x5xf32> to vector<5xf32>
    %1074 = vector.shape_cast %1073 : vector<5xf32> to vector<1x5xf32>
    %cst_889 = arith.constant 8.000000e+00 : f32
    %1075 = vector.broadcast %cst_889 : f32 to vector<1x5xf32>
    %1076 = arith.divf %1074, %1075 : vector<1x5xf32>
    %1077 = vector.broadcast %1076 : vector<1x5xf32> to vector<8x5xf32>
    %1078 = arith.subf %1072, %1077 : vector<8x5xf32>
    %1079 = arith.mulf %1078, %1078 : vector<8x5xf32>
    %cst_890 = arith.constant dense<0.000000e+00> : vector<5xf32>
    %1080 = vector.multi_reduction <add>, %1079, %cst_890 [0] : vector<8x5xf32> to vector<5xf32>
    %1081 = vector.shape_cast %1080 : vector<5xf32> to vector<1x5xf32>
    %cst_891 = arith.constant 8.000000e+00 : f32
    %1082 = vector.broadcast %cst_891 : f32 to vector<1x5xf32>
    %1083 = arith.divf %1081, %1082 : vector<1x5xf32>
    %1084 = vector.broadcast %1076 : vector<1x5xf32> to vector<8x5xf32>
    %1085 = arith.subf %1072, %1084 : vector<8x5xf32>
    %cst_892 = arith.constant 9.99999997E-7 : f32
    %1086 = vector.broadcast %cst_892 : f32 to vector<1x5xf32>
    %1087 = arith.addf %1083, %1086 : vector<1x5xf32>
    %1088 = math.rsqrt %1087 : vector<1x5xf32>
    %1089 = vector.broadcast %1088 : vector<1x5xf32> to vector<8x5xf32>
    %1090 = arith.mulf %1085, %1089 : vector<8x5xf32>
    %c0_893 = arith.constant 0 : index
    %c0_894 = arith.constant 0 : index
    %1091 = vector.load %arg6[%c0_893, %c0_894] : memref<8x1xf32, #tpu.memory_space<vmem>>, vector<8x1xf32>
    %1092 = vector.broadcast %1091 : vector<8x1xf32> to vector<8x5xf32>
    %1093 = arith.mulf %1090, %1092 : vector<8x5xf32>
    %c0_895 = arith.constant 0 : index
    %c0_896 = arith.constant 0 : index
    %1094 = vector.load %arg7[%c0_895, %c0_896] : memref<8x1xf32, #tpu.memory_space<vmem>>, vector<8x1xf32>
    %1095 = vector.broadcast %1094 : vector<8x1xf32> to vector<8x5xf32>
    %1096 = arith.addf %1093, %1095 : vector<8x5xf32>
    %1097 = vector.broadcast %709 : vector<8x1xf32> to vector<8x5xf32>
    %1098 = arith.addf %1096, %1097 : vector<8x5xf32>
    %c0_897 = arith.constant 0 : index
    %c22_898 = arith.constant 22 : index
    %1099 = vector.load %arg28[%c0_897, %c22_898] : memref<8x27xf32, #tpu.memory_space<vmem>>, vector<8x5xf32>
    tpu.vector_store %arg28[%c0_897, %c22_898], %1098 {strides = array<i32>} : memref<8x27xf32, #tpu.memory_space<vmem>>, vector<8x5xf32>,
    %c0_899 = arith.constant 0 : index
    %c0_900 = arith.constant 0 : index
    %1100 = vector.load %arg9[%c0_899, %c0_900] : memref<32x8xbf16, #tpu.memory_space<vmem>>, vector<32x8xbf16>
    %c0_901 = arith.constant 0 : index
    %c0_902 = arith.constant 0 : index
    %1101 = vector.load %arg28[%c0_901, %c0_902] : memref<8x27xf32, #tpu.memory_space<vmem>>, vector<8x27xf32>
    %1102 = arith.truncf %1101 : vector<8x27xf32> to vector<8x27xbf16>
    %cst_903 = arith.constant dense<0.000000e+00> : vector<32x27xf32>
    %1103 = tpu.matmul %1100, %1102, %cst_903 {dimension_numbers = #tpu.dot_dimension_numbers<[1], [0], [0], [1], [0, 0, 1, 1], [], []>} : vector<32x8xbf16>, vector<8x27xbf16>, vector<32x27xf32> -> vector<32x27xf32>
    %c0_904 = arith.constant 0 : index
    %c0_905 = arith.constant 0 : index
    %1104 = vector.load %arg10[%c0_904, %c0_905] : memref<32x1xf32, #tpu.memory_space<vmem>>, vector<32x1xf32>
    %1105 = vector.broadcast %1104 : vector<32x1xf32> to vector<32x27xf32>
    %1106 = arith.addf %1103, %1105 : vector<32x27xf32>
    %cst_906 = arith.constant 5.000000e-01 : f32
    %1107 = vector.broadcast %cst_906 : f32 to vector<32x27xf32>
    %1108 = arith.mulf %1107, %1106 : vector<32x27xf32>
    %cst_907 = arith.constant 4.471500e-02 : f32
    %1109 = vector.broadcast %cst_907 : f32 to vector<32x27xf32>
    %1110 = arith.mulf %1109, %1106 : vector<32x27xf32>
    %1111 = arith.mulf %1110, %1106 : vector<32x27xf32>
    %1112 = arith.mulf %1111, %1106 : vector<32x27xf32>
    %1113 = arith.addf %1106, %1112 : vector<32x27xf32>
    %cst_908 = arith.constant 0.797884583 : f32
    %1114 = vector.broadcast %cst_908 : f32 to vector<32x27xf32>
    %1115 = arith.mulf %1114, %1113 : vector<32x27xf32>
    %1116 = math.tanh %1115 : vector<32x27xf32>
    %cst_909 = arith.constant 1.000000e+00 : f32
    %1117 = vector.broadcast %cst_909 : f32 to vector<32x27xf32>
    %1118 = arith.addf %1117, %1116 : vector<32x27xf32>
    %1119 = arith.mulf %1108, %1118 : vector<32x27xf32>
    %c0_910 = arith.constant 0 : index
    %c0_911 = arith.constant 0 : index
    %1120 = vector.load %arg11[%c0_910, %c0_911] : memref<16x32xbf16, #tpu.memory_space<vmem>>, vector<16x32xbf16>
    %1121 = arith.truncf %1119 : vector<32x27xf32> to vector<32x27xbf16>
    %cst_912 = arith.constant dense<0.000000e+00> : vector<16x27xf32>
    %1122 = tpu.matmul %1120, %1121, %cst_912 {dimension_numbers = #tpu.dot_dimension_numbers<[1], [0], [0], [1], [0, 0, 1, 1], [], []>} : vector<16x32xbf16>, vector<32x27xbf16>, vector<16x27xf32> -> vector<16x27xf32>
    %c0_913 = arith.constant 0 : index
    %c0_914 = arith.constant 0 : index
    %1123 = vector.load %arg12[%c0_913, %c0_914] : memref<16x1xf32, #tpu.memory_space<vmem>>, vector<16x1xf32>
    %1124 = vector.broadcast %1123 : vector<16x1xf32> to vector<16x27xf32>
    %1125 = arith.addf %1122, %1124 : vector<16x27xf32>
    %1126 = vector.extract_strided_slice %1125 {offsets = [0, 0], sizes = [16, 4], strides = [1, 1]} : vector<16x27xf32> to vector<16x4xf32>
    %c0_915 = arith.constant 0 : index
    %c0_916 = arith.constant 0 : index
    %c0_917 = arith.constant 0 : index
    %c0_918 = arith.constant 0 : index
    %c3_919 = arith.constant 3 : index
    %1127 = vector.load %arg25[%c0_915, %c0_916, %c0_917, %c0_918, %c3_919] : memref<1x3x2x16x7xf32, #tpu.memory_space<vmem>>, vector<1x1x1x16x4xf32>
    %1128 = vector.shape_cast %1127 : vector<1x1x1x16x4xf32> to vector<16x4xf32>
    %1129 = vector.shape_cast %1126 : vector<16x4xf32> to vector<1x1x1x16x4xf32>
    tpu.vector_store %arg25[%c0_915, %c0_916, %c0_917, %c0_918, %c3_919], %1129 {strides = array<i32>} : memref<1x3x2x16x7xf32, #tpu.memory_space<vmem>>, vector<1x1x1x16x4xf32>,
    %1130 = vector.extract_strided_slice %1125 {offsets = [0, 4], sizes = [16, 5], strides = [1, 1]} : vector<16x27xf32> to vector<16x5xf32>
    %c0_920 = arith.constant 0 : index
    %c0_921 = arith.constant 0 : index
    %c1_922 = arith.constant 1 : index
    %c0_923 = arith.constant 0 : index
    %c2_924 = arith.constant 2 : index
    %1131 = vector.load %arg25[%c0_920, %c0_921, %c1_922, %c0_923, %c2_924] : memref<1x3x2x16x7xf32, #tpu.memory_space<vmem>>, vector<1x1x1x16x5xf32>
    %1132 = vector.shape_cast %1131 : vector<1x1x1x16x5xf32> to vector<16x5xf32>
    %1133 = vector.shape_cast %1130 : vector<16x5xf32> to vector<1x1x1x16x5xf32>
    tpu.vector_store %arg25[%c0_920, %c0_921, %c1_922, %c0_923, %c2_924], %1133 {strides = array<i32>} : memref<1x3x2x16x7xf32, #tpu.memory_space<vmem>>, vector<1x1x1x16x5xf32>,
    %1134 = vector.extract_strided_slice %1125 {offsets = [0, 9], sizes = [16, 4], strides = [1, 1]} : vector<16x27xf32> to vector<16x4xf32>
    %c0_925 = arith.constant 0 : index
    %c1_926 = arith.constant 1 : index
    %c0_927 = arith.constant 0 : index
    %c0_928 = arith.constant 0 : index
    %c3_929 = arith.constant 3 : index
    %1135 = vector.load %arg25[%c0_925, %c1_926, %c0_927, %c0_928, %c3_929] : memref<1x3x2x16x7xf32, #tpu.memory_space<vmem>>, vector<1x1x1x16x4xf32>
    %1136 = vector.shape_cast %1135 : vector<1x1x1x16x4xf32> to vector<16x4xf32>
    %1137 = vector.shape_cast %1134 : vector<16x4xf32> to vector<1x1x1x16x4xf32>
    tpu.vector_store %arg25[%c0_925, %c1_926, %c0_927, %c0_928, %c3_929], %1137 {strides = array<i32>} : memref<1x3x2x16x7xf32, #tpu.memory_space<vmem>>, vector<1x1x1x16x4xf32>,
    %1138 = vector.extract_strided_slice %1125 {offsets = [0, 13], sizes = [16, 5], strides = [1, 1]} : vector<16x27xf32> to vector<16x5xf32>
    %c0_930 = arith.constant 0 : index
    %c1_931 = arith.constant 1 : index
    %c1_932 = arith.constant 1 : index
    %c0_933 = arith.constant 0 : index
    %c2_934 = arith.constant 2 : index
    %1139 = vector.load %arg25[%c0_930, %c1_931, %c1_932, %c0_933, %c2_934] : memref<1x3x2x16x7xf32, #tpu.memory_space<vmem>>, vector<1x1x1x16x5xf32>
    %1140 = vector.shape_cast %1139 : vector<1x1x1x16x5xf32> to vector<16x5xf32>
    %1141 = vector.shape_cast %1138 : vector<16x5xf32> to vector<1x1x1x16x5xf32>
    tpu.vector_store %arg25[%c0_930, %c1_931, %c1_932, %c0_933, %c2_934], %1141 {strides = array<i32>} : memref<1x3x2x16x7xf32, #tpu.memory_space<vmem>>, vector<1x1x1x16x5xf32>,
    %1142 = vector.extract_strided_slice %1125 {offsets = [0, 18], sizes = [16, 4], strides = [1, 1]} : vector<16x27xf32> to vector<16x4xf32>
    %c0_935 = arith.constant 0 : index
    %c2_936 = arith.constant 2 : index
    %c0_937 = arith.constant 0 : index
    %c0_938 = arith.constant 0 : index
    %c3_939 = arith.constant 3 : index
    %1143 = vector.load %arg25[%c0_935, %c2_936, %c0_937, %c0_938, %c3_939] : memref<1x3x2x16x7xf32, #tpu.memory_space<vmem>>, vector<1x1x1x16x4xf32>
    %1144 = vector.shape_cast %1143 : vector<1x1x1x16x4xf32> to vector<16x4xf32>
    %1145 = vector.shape_cast %1142 : vector<16x4xf32> to vector<1x1x1x16x4xf32>
    tpu.vector_store %arg25[%c0_935, %c2_936, %c0_937, %c0_938, %c3_939], %1145 {strides = array<i32>} : memref<1x3x2x16x7xf32, #tpu.memory_space<vmem>>, vector<1x1x1x16x4xf32>,
    %1146 = vector.extract_strided_slice %1125 {offsets = [0, 22], sizes = [16, 5], strides = [1, 1]} : vector<16x27xf32> to vector<16x5xf32>
    %c0_940 = arith.constant 0 : index
    %c2_941 = arith.constant 2 : index
    %c1_942 = arith.constant 1 : index
    %c0_943 = arith.constant 0 : index
    %c2_944 = arith.constant 2 : index
    %1147 = vector.load %arg25[%c0_940, %c2_941, %c1_942, %c0_943, %c2_944] : memref<1x3x2x16x7xf32, #tpu.memory_space<vmem>>, vector<1x1x1x16x5xf32>
    %1148 = vector.shape_cast %1147 : vector<1x1x1x16x5xf32> to vector<16x5xf32>
    %1149 = vector.shape_cast %1146 : vector<16x5xf32> to vector<1x1x1x16x5xf32>
    tpu.vector_store %arg25[%c0_940, %c2_941, %c1_942, %c0_943, %c2_944], %1149 {strides = array<i32>} : memref<1x3x2x16x7xf32, #tpu.memory_space<vmem>>, vector<1x1x1x16x5xf32>,
    %c0_945 = arith.constant 0 : index
    %c0_946 = arith.constant 0 : index
    %c0_947 = arith.constant 0 : index
    %1150 = vector.load %arg17[%c0_945, %c0_946, %c0_947] : memref<1x16x1xf32, #tpu.memory_space<vmem>>, vector<1x16x1xf32>
    %1151 = vector.shape_cast %1150 : vector<1x16x1xf32> to vector<16x1xf32>
    %c0_948 = arith.constant 0 : index
    %c0_949 = arith.constant 0 : index
    %c0_950 = arith.constant 0 : index
    %c0_951 = arith.constant 0 : index
    %c0_952 = arith.constant 0 : index
    %1152 = vector.load %arg25[%c0_948, %c0_949, %c0_950, %c0_951, %c0_952] : memref<1x3x2x16x7xf32, #tpu.memory_space<vmem>>, vector<1x1x1x16x5xf32>
    %1153 = vector.shape_cast %1152 : vector<1x1x1x16x5xf32> to vector<16x5xf32>
    %c0_953 = arith.constant 0 : index
    %c0_954 = arith.constant 0 : index
    %1154 = vector.load %arg13[%c0_953, %c0_954] : memref<16x6xf32, #tpu.memory_space<vmem>>, vector<16x1xf32>
    %1155 = vector.broadcast %1154 : vector<16x1xf32> to vector<16x5xf32>
    %1156 = arith.mulf %1155, %1153 : vector<16x5xf32>
    %c0_955 = arith.constant 0 : index
    %c0_956 = arith.constant 0 : index
    %c1_957 = arith.constant 1 : index
    %c0_958 = arith.constant 0 : index
    %c0_959 = arith.constant 0 : index
    %1157 = vector.load %arg25[%c0_955, %c0_956, %c1_957, %c0_958, %c0_959] : memref<1x3x2x16x7xf32, #tpu.memory_space<vmem>>, vector<1x1x1x16x5xf32>
    %1158 = vector.shape_cast %1157 : vector<1x1x1x16x5xf32> to vector<16x5xf32>
    %c0_960 = arith.constant 0 : index
    %c1_961 = arith.constant 1 : index
    %1159 = vector.load %arg13[%c0_960, %c1_961] : memref<16x6xf32, #tpu.memory_space<vmem>>, vector<16x1xf32>
    %1160 = vector.broadcast %1159 : vector<16x1xf32> to vector<16x5xf32>
    %1161 = arith.mulf %1160, %1158 : vector<16x5xf32>
    %1162 = arith.addf %1156, %1161 : vector<16x5xf32>
    %c0_962 = arith.constant 0 : index
    %c0_963 = arith.constant 0 : index
    %c0_964 = arith.constant 0 : index
    %c0_965 = arith.constant 0 : index
    %c1_966 = arith.constant 1 : index
    %1163 = vector.load %arg25[%c0_962, %c0_963, %c0_964, %c0_965, %c1_966] : memref<1x3x2x16x7xf32, #tpu.memory_space<vmem>>, vector<1x1x1x16x5xf32>
    %1164 = vector.shape_cast %1163 : vector<1x1x1x16x5xf32> to vector<16x5xf32>
    %c0_967 = arith.constant 0 : index
    %c2_968 = arith.constant 2 : index
    %1165 = vector.load %arg13[%c0_967, %c2_968] : memref<16x6xf32, #tpu.memory_space<vmem>>, vector<16x1xf32>
    %1166 = vector.broadcast %1165 : vector<16x1xf32> to vector<16x5xf32>
    %1167 = arith.mulf %1166, %1164 : vector<16x5xf32>
    %1168 = arith.addf %1162, %1167 : vector<16x5xf32>
    %c0_969 = arith.constant 0 : index
    %c0_970 = arith.constant 0 : index
    %c1_971 = arith.constant 1 : index
    %c0_972 = arith.constant 0 : index
    %c1_973 = arith.constant 1 : index
    %1169 = vector.load %arg25[%c0_969, %c0_970, %c1_971, %c0_972, %c1_973] : memref<1x3x2x16x7xf32, #tpu.memory_space<vmem>>, vector<1x1x1x16x5xf32>
    %1170 = vector.shape_cast %1169 : vector<1x1x1x16x5xf32> to vector<16x5xf32>
    %c0_974 = arith.constant 0 : index
    %c3_975 = arith.constant 3 : index
    %1171 = vector.load %arg13[%c0_974, %c3_975] : memref<16x6xf32, #tpu.memory_space<vmem>>, vector<16x1xf32>
    %1172 = vector.broadcast %1171 : vector<16x1xf32> to vector<16x5xf32>
    %1173 = arith.mulf %1172, %1170 : vector<16x5xf32>
    %1174 = arith.addf %1168, %1173 : vector<16x5xf32>
    %c0_976 = arith.constant 0 : index
    %c0_977 = arith.constant 0 : index
    %c0_978 = arith.constant 0 : index
    %c0_979 = arith.constant 0 : index
    %c2_980 = arith.constant 2 : index
    %1175 = vector.load %arg25[%c0_976, %c0_977, %c0_978, %c0_979, %c2_980] : memref<1x3x2x16x7xf32, #tpu.memory_space<vmem>>, vector<1x1x1x16x5xf32>
    %1176 = vector.shape_cast %1175 : vector<1x1x1x16x5xf32> to vector<16x5xf32>
    %c0_981 = arith.constant 0 : index
    %c4_982 = arith.constant 4 : index
    %1177 = vector.load %arg13[%c0_981, %c4_982] : memref<16x6xf32, #tpu.memory_space<vmem>>, vector<16x1xf32>
    %1178 = vector.broadcast %1177 : vector<16x1xf32> to vector<16x5xf32>
    %1179 = arith.mulf %1178, %1176 : vector<16x5xf32>
    %1180 = arith.addf %1174, %1179 : vector<16x5xf32>
    %c0_983 = arith.constant 0 : index
    %c0_984 = arith.constant 0 : index
    %c1_985 = arith.constant 1 : index
    %c0_986 = arith.constant 0 : index
    %c2_987 = arith.constant 2 : index
    %1181 = vector.load %arg25[%c0_983, %c0_984, %c1_985, %c0_986, %c2_987] : memref<1x3x2x16x7xf32, #tpu.memory_space<vmem>>, vector<1x1x1x16x5xf32>
    %1182 = vector.shape_cast %1181 : vector<1x1x1x16x5xf32> to vector<16x5xf32>
    %c0_988 = arith.constant 0 : index
    %c5_989 = arith.constant 5 : index
    %1183 = vector.load %arg13[%c0_988, %c5_989] : memref<16x6xf32, #tpu.memory_space<vmem>>, vector<16x1xf32>
    %1184 = vector.broadcast %1183 : vector<16x1xf32> to vector<16x5xf32>
    %1185 = arith.mulf %1184, %1182 : vector<16x5xf32>
    %1186 = arith.addf %1180, %1185 : vector<16x5xf32>
    %c0_990 = arith.constant 0 : index
    %c0_991 = arith.constant 0 : index
    %1187 = vector.load %arg14[%c0_990, %c0_991] : memref<16x1xf32, #tpu.memory_space<vmem>>, vector<16x1xf32>
    %1188 = vector.broadcast %1187 : vector<16x1xf32> to vector<16x5xf32>
    %1189 = arith.addf %1186, %1188 : vector<16x5xf32>
    %cst_992 = arith.constant dense<0.000000e+00> : vector<5xf32>
    %1190 = vector.multi_reduction <add>, %1189, %cst_992 [0] : vector<16x5xf32> to vector<5xf32>
    %1191 = vector.shape_cast %1190 : vector<5xf32> to vector<1x5xf32>
    %cst_993 = arith.constant 1.600000e+01 : f32
    %1192 = vector.broadcast %cst_993 : f32 to vector<1x5xf32>
    %1193 = arith.divf %1191, %1192 : vector<1x5xf32>
    %1194 = vector.broadcast %1193 : vector<1x5xf32> to vector<16x5xf32>
    %1195 = arith.subf %1189, %1194 : vector<16x5xf32>
    %1196 = arith.mulf %1195, %1195 : vector<16x5xf32>
    %cst_994 = arith.constant dense<0.000000e+00> : vector<5xf32>
    %1197 = vector.multi_reduction <add>, %1196, %cst_994 [0] : vector<16x5xf32> to vector<5xf32>
    %1198 = vector.shape_cast %1197 : vector<5xf32> to vector<1x5xf32>
    %cst_995 = arith.constant 1.600000e+01 : f32
    %1199 = vector.broadcast %cst_995 : f32 to vector<1x5xf32>
    %1200 = arith.divf %1198, %1199 : vector<1x5xf32>
    %1201 = vector.broadcast %1193 : vector<1x5xf32> to vector<16x5xf32>
    %1202 = arith.subf %1189, %1201 : vector<16x5xf32>
    %cst_996 = arith.constant 9.99999997E-7 : f32
    %1203 = vector.broadcast %cst_996 : f32 to vector<1x5xf32>
    %1204 = arith.addf %1200, %1203 : vector<1x5xf32>
    %1205 = math.rsqrt %1204 : vector<1x5xf32>
    %1206 = vector.broadcast %1205 : vector<1x5xf32> to vector<16x5xf32>
    %1207 = arith.mulf %1202, %1206 : vector<16x5xf32>
    %c0_997 = arith.constant 0 : index
    %c0_998 = arith.constant 0 : index
    %1208 = vector.load %arg15[%c0_997, %c0_998] : memref<16x1xf32, #tpu.memory_space<vmem>>, vector<16x1xf32>
    %1209 = vector.broadcast %1208 : vector<16x1xf32> to vector<16x5xf32>
    %1210 = arith.mulf %1207, %1209 : vector<16x5xf32>
    %c0_999 = arith.constant 0 : index
    %c0_1000 = arith.constant 0 : index
    %1211 = vector.load %arg16[%c0_999, %c0_1000] : memref<16x1xf32, #tpu.memory_space<vmem>>, vector<16x1xf32>
    %1212 = vector.broadcast %1211 : vector<16x1xf32> to vector<16x5xf32>
    %1213 = arith.addf %1210, %1212 : vector<16x5xf32>
    %1214 = vector.broadcast %1151 : vector<16x1xf32> to vector<16x5xf32>
    %1215 = arith.addf %1213, %1214 : vector<16x5xf32>
    %c0_1001 = arith.constant 0 : index
    %c0_1002 = arith.constant 0 : index
    %1216 = vector.load %arg29[%c0_1001, %c0_1002] : memref<16x15xf32, #tpu.memory_space<vmem>>, vector<16x5xf32>
    tpu.vector_store %arg29[%c0_1001, %c0_1002], %1215 {strides = array<i32>} : memref<16x15xf32, #tpu.memory_space<vmem>>, vector<16x5xf32>,
    %c0_1003 = arith.constant 0 : index
    %c1_1004 = arith.constant 1 : index
    %c0_1005 = arith.constant 0 : index
    %c0_1006 = arith.constant 0 : index
    %c0_1007 = arith.constant 0 : index
    %1217 = vector.load %arg25[%c0_1003, %c1_1004, %c0_1005, %c0_1006, %c0_1007] : memref<1x3x2x16x7xf32, #tpu.memory_space<vmem>>, vector<1x1x1x16x5xf32>
    %1218 = vector.shape_cast %1217 : vector<1x1x1x16x5xf32> to vector<16x5xf32>
    %c0_1008 = arith.constant 0 : index
    %c0_1009 = arith.constant 0 : index
    %1219 = vector.load %arg13[%c0_1008, %c0_1009] : memref<16x6xf32, #tpu.memory_space<vmem>>, vector<16x1xf32>
    %1220 = vector.broadcast %1219 : vector<16x1xf32> to vector<16x5xf32>
    %1221 = arith.mulf %1220, %1218 : vector<16x5xf32>
    %c0_1010 = arith.constant 0 : index
    %c1_1011 = arith.constant 1 : index
    %c1_1012 = arith.constant 1 : index
    %c0_1013 = arith.constant 0 : index
    %c0_1014 = arith.constant 0 : index
    %1222 = vector.load %arg25[%c0_1010, %c1_1011, %c1_1012, %c0_1013, %c0_1014] : memref<1x3x2x16x7xf32, #tpu.memory_space<vmem>>, vector<1x1x1x16x5xf32>
    %1223 = vector.shape_cast %1222 : vector<1x1x1x16x5xf32> to vector<16x5xf32>
    %c0_1015 = arith.constant 0 : index
    %c1_1016 = arith.constant 1 : index
    %1224 = vector.load %arg13[%c0_1015, %c1_1016] : memref<16x6xf32, #tpu.memory_space<vmem>>, vector<16x1xf32>
    %1225 = vector.broadcast %1224 : vector<16x1xf32> to vector<16x5xf32>
    %1226 = arith.mulf %1225, %1223 : vector<16x5xf32>
    %1227 = arith.addf %1221, %1226 : vector<16x5xf32>
    %c0_1017 = arith.constant 0 : index
    %c1_1018 = arith.constant 1 : index
    %c0_1019 = arith.constant 0 : index
    %c0_1020 = arith.constant 0 : index
    %c1_1021 = arith.constant 1 : index
    %1228 = vector.load %arg25[%c0_1017, %c1_1018, %c0_1019, %c0_1020, %c1_1021] : memref<1x3x2x16x7xf32, #tpu.memory_space<vmem>>, vector<1x1x1x16x5xf32>
    %1229 = vector.shape_cast %1228 : vector<1x1x1x16x5xf32> to vector<16x5xf32>
    %c0_1022 = arith.constant 0 : index
    %c2_1023 = arith.constant 2 : index
    %1230 = vector.load %arg13[%c0_1022, %c2_1023] : memref<16x6xf32, #tpu.memory_space<vmem>>, vector<16x1xf32>
    %1231 = vector.broadcast %1230 : vector<16x1xf32> to vector<16x5xf32>
    %1232 = arith.mulf %1231, %1229 : vector<16x5xf32>
    %1233 = arith.addf %1227, %1232 : vector<16x5xf32>
    %c0_1024 = arith.constant 0 : index
    %c1_1025 = arith.constant 1 : index
    %c1_1026 = arith.constant 1 : index
    %c0_1027 = arith.constant 0 : index
    %c1_1028 = arith.constant 1 : index
    %1234 = vector.load %arg25[%c0_1024, %c1_1025, %c1_1026, %c0_1027, %c1_1028] : memref<1x3x2x16x7xf32, #tpu.memory_space<vmem>>, vector<1x1x1x16x5xf32>
    %1235 = vector.shape_cast %1234 : vector<1x1x1x16x5xf32> to vector<16x5xf32>
    %c0_1029 = arith.constant 0 : index
    %c3_1030 = arith.constant 3 : index
    %1236 = vector.load %arg13[%c0_1029, %c3_1030] : memref<16x6xf32, #tpu.memory_space<vmem>>, vector<16x1xf32>
    %1237 = vector.broadcast %1236 : vector<16x1xf32> to vector<16x5xf32>
    %1238 = arith.mulf %1237, %1235 : vector<16x5xf32>
    %1239 = arith.addf %1233, %1238 : vector<16x5xf32>
    %c0_1031 = arith.constant 0 : index
    %c1_1032 = arith.constant 1 : index
    %c0_1033 = arith.constant 0 : index
    %c0_1034 = arith.constant 0 : index
    %c2_1035 = arith.constant 2 : index
    %1240 = vector.load %arg25[%c0_1031, %c1_1032, %c0_1033, %c0_1034, %c2_1035] : memref<1x3x2x16x7xf32, #tpu.memory_space<vmem>>, vector<1x1x1x16x5xf32>
    %1241 = vector.shape_cast %1240 : vector<1x1x1x16x5xf32> to vector<16x5xf32>
    %c0_1036 = arith.constant 0 : index
    %c4_1037 = arith.constant 4 : index
    %1242 = vector.load %arg13[%c0_1036, %c4_1037] : memref<16x6xf32, #tpu.memory_space<vmem>>, vector<16x1xf32>
    %1243 = vector.broadcast %1242 : vector<16x1xf32> to vector<16x5xf32>
    %1244 = arith.mulf %1243, %1241 : vector<16x5xf32>
    %1245 = arith.addf %1239, %1244 : vector<16x5xf32>
    %c0_1038 = arith.constant 0 : index
    %c1_1039 = arith.constant 1 : index
    %c1_1040 = arith.constant 1 : index
    %c0_1041 = arith.constant 0 : index
    %c2_1042 = arith.constant 2 : index
    %1246 = vector.load %arg25[%c0_1038, %c1_1039, %c1_1040, %c0_1041, %c2_1042] : memref<1x3x2x16x7xf32, #tpu.memory_space<vmem>>, vector<1x1x1x16x5xf32>
    %1247 = vector.shape_cast %1246 : vector<1x1x1x16x5xf32> to vector<16x5xf32>
    %c0_1043 = arith.constant 0 : index
    %c5_1044 = arith.constant 5 : index
    %1248 = vector.load %arg13[%c0_1043, %c5_1044] : memref<16x6xf32, #tpu.memory_space<vmem>>, vector<16x1xf32>
    %1249 = vector.broadcast %1248 : vector<16x1xf32> to vector<16x5xf32>
    %1250 = arith.mulf %1249, %1247 : vector<16x5xf32>
    %1251 = arith.addf %1245, %1250 : vector<16x5xf32>
    %c0_1045 = arith.constant 0 : index
    %c0_1046 = arith.constant 0 : index
    %1252 = vector.load %arg14[%c0_1045, %c0_1046] : memref<16x1xf32, #tpu.memory_space<vmem>>, vector<16x1xf32>
    %1253 = vector.broadcast %1252 : vector<16x1xf32> to vector<16x5xf32>
    %1254 = arith.addf %1251, %1253 : vector<16x5xf32>
    %cst_1047 = arith.constant dense<0.000000e+00> : vector<5xf32>
    %1255 = vector.multi_reduction <add>, %1254, %cst_1047 [0] : vector<16x5xf32> to vector<5xf32>
    %1256 = vector.shape_cast %1255 : vector<5xf32> to vector<1x5xf32>
    %cst_1048 = arith.constant 1.600000e+01 : f32
    %1257 = vector.broadcast %cst_1048 : f32 to vector<1x5xf32>
    %1258 = arith.divf %1256, %1257 : vector<1x5xf32>
    %1259 = vector.broadcast %1258 : vector<1x5xf32> to vector<16x5xf32>
    %1260 = arith.subf %1254, %1259 : vector<16x5xf32>
    %1261 = arith.mulf %1260, %1260 : vector<16x5xf32>
    %cst_1049 = arith.constant dense<0.000000e+00> : vector<5xf32>
    %1262 = vector.multi_reduction <add>, %1261, %cst_1049 [0] : vector<16x5xf32> to vector<5xf32>
    %1263 = vector.shape_cast %1262 : vector<5xf32> to vector<1x5xf32>
    %cst_1050 = arith.constant 1.600000e+01 : f32
    %1264 = vector.broadcast %cst_1050 : f32 to vector<1x5xf32>
    %1265 = arith.divf %1263, %1264 : vector<1x5xf32>
    %1266 = vector.broadcast %1258 : vector<1x5xf32> to vector<16x5xf32>
    %1267 = arith.subf %1254, %1266 : vector<16x5xf32>
    %cst_1051 = arith.constant 9.99999997E-7 : f32
    %1268 = vector.broadcast %cst_1051 : f32 to vector<1x5xf32>
    %1269 = arith.addf %1265, %1268 : vector<1x5xf32>
    %1270 = math.rsqrt %1269 : vector<1x5xf32>
    %1271 = vector.broadcast %1270 : vector<1x5xf32> to vector<16x5xf32>
    %1272 = arith.mulf %1267, %1271 : vector<16x5xf32>
    %c0_1052 = arith.constant 0 : index
    %c0_1053 = arith.constant 0 : index
    %1273 = vector.load %arg15[%c0_1052, %c0_1053] : memref<16x1xf32, #tpu.memory_space<vmem>>, vector<16x1xf32>
    %1274 = vector.broadcast %1273 : vector<16x1xf32> to vector<16x5xf32>
    %1275 = arith.mulf %1272, %1274 : vector<16x5xf32>
    %c0_1054 = arith.constant 0 : index
    %c0_1055 = arith.constant 0 : index
    %1276 = vector.load %arg16[%c0_1054, %c0_1055] : memref<16x1xf32, #tpu.memory_space<vmem>>, vector<16x1xf32>
    %1277 = vector.broadcast %1276 : vector<16x1xf32> to vector<16x5xf32>
    %1278 = arith.addf %1275, %1277 : vector<16x5xf32>
    %1279 = vector.broadcast %1151 : vector<16x1xf32> to vector<16x5xf32>
    %1280 = arith.addf %1278, %1279 : vector<16x5xf32>
    %c0_1056 = arith.constant 0 : index
    %c5_1057 = arith.constant 5 : index
    %1281 = vector.load %arg29[%c0_1056, %c5_1057] : memref<16x15xf32, #tpu.memory_space<vmem>>, vector<16x5xf32>
    tpu.vector_store %arg29[%c0_1056, %c5_1057], %1280 {strides = array<i32>} : memref<16x15xf32, #tpu.memory_space<vmem>>, vector<16x5xf32>,
    %c0_1058 = arith.constant 0 : index
    %c2_1059 = arith.constant 2 : index
    %c0_1060 = arith.constant 0 : index
    %c0_1061 = arith.constant 0 : index
    %c0_1062 = arith.constant 0 : index
    %1282 = vector.load %arg25[%c0_1058, %c2_1059, %c0_1060, %c0_1061, %c0_1062] : memref<1x3x2x16x7xf32, #tpu.memory_space<vmem>>, vector<1x1x1x16x5xf32>
    %1283 = vector.shape_cast %1282 : vector<1x1x1x16x5xf32> to vector<16x5xf32>
    %c0_1063 = arith.constant 0 : index
    %c0_1064 = arith.constant 0 : index
    %1284 = vector.load %arg13[%c0_1063, %c0_1064] : memref<16x6xf32, #tpu.memory_space<vmem>>, vector<16x1xf32>
    %1285 = vector.broadcast %1284 : vector<16x1xf32> to vector<16x5xf32>
    %1286 = arith.mulf %1285, %1283 : vector<16x5xf32>
    %c0_1065 = arith.constant 0 : index
    %c2_1066 = arith.constant 2 : index
    %c1_1067 = arith.constant 1 : index
    %c0_1068 = arith.constant 0 : index
    %c0_1069 = arith.constant 0 : index
    %1287 = vector.load %arg25[%c0_1065, %c2_1066, %c1_1067, %c0_1068, %c0_1069] : memref<1x3x2x16x7xf32, #tpu.memory_space<vmem>>, vector<1x1x1x16x5xf32>
    %1288 = vector.shape_cast %1287 : vector<1x1x1x16x5xf32> to vector<16x5xf32>
    %c0_1070 = arith.constant 0 : index
    %c1_1071 = arith.constant 1 : index
    %1289 = vector.load %arg13[%c0_1070, %c1_1071] : memref<16x6xf32, #tpu.memory_space<vmem>>, vector<16x1xf32>
    %1290 = vector.broadcast %1289 : vector<16x1xf32> to vector<16x5xf32>
    %1291 = arith.mulf %1290, %1288 : vector<16x5xf32>
    %1292 = arith.addf %1286, %1291 : vector<16x5xf32>
    %c0_1072 = arith.constant 0 : index
    %c2_1073 = arith.constant 2 : index
    %c0_1074 = arith.constant 0 : index
    %c0_1075 = arith.constant 0 : index
    %c1_1076 = arith.constant 1 : index
    %1293 = vector.load %arg25[%c0_1072, %c2_1073, %c0_1074, %c0_1075, %c1_1076] : memref<1x3x2x16x7xf32, #tpu.memory_space<vmem>>, vector<1x1x1x16x5xf32>
    %1294 = vector.shape_cast %1293 : vector<1x1x1x16x5xf32> to vector<16x5xf32>
    %c0_1077 = arith.constant 0 : index
    %c2_1078 = arith.constant 2 : index
    %1295 = vector.load %arg13[%c0_1077, %c2_1078] : memref<16x6xf32, #tpu.memory_space<vmem>>, vector<16x1xf32>
    %1296 = vector.broadcast %1295 : vector<16x1xf32> to vector<16x5xf32>
    %1297 = arith.mulf %1296, %1294 : vector<16x5xf32>
    %1298 = arith.addf %1292, %1297 : vector<16x5xf32>
    %c0_1079 = arith.constant 0 : index
    %c2_1080 = arith.constant 2 : index
    %c1_1081 = arith.constant 1 : index
    %c0_1082 = arith.constant 0 : index
    %c1_1083 = arith.constant 1 : index
    %1299 = vector.load %arg25[%c0_1079, %c2_1080, %c1_1081, %c0_1082, %c1_1083] : memref<1x3x2x16x7xf32, #tpu.memory_space<vmem>>, vector<1x1x1x16x5xf32>
    %1300 = vector.shape_cast %1299 : vector<1x1x1x16x5xf32> to vector<16x5xf32>
    %c0_1084 = arith.constant 0 : index
    %c3_1085 = arith.constant 3 : index
    %1301 = vector.load %arg13[%c0_1084, %c3_1085] : memref<16x6xf32, #tpu.memory_space<vmem>>, vector<16x1xf32>
    %1302 = vector.broadcast %1301 : vector<16x1xf32> to vector<16x5xf32>
    %1303 = arith.mulf %1302, %1300 : vector<16x5xf32>
    %1304 = arith.addf %1298, %1303 : vector<16x5xf32>
    %c0_1086 = arith.constant 0 : index
    %c2_1087 = arith.constant 2 : index
    %c0_1088 = arith.constant 0 : index
    %c0_1089 = arith.constant 0 : index
    %c2_1090 = arith.constant 2 : index
    %1305 = vector.load %arg25[%c0_1086, %c2_1087, %c0_1088, %c0_1089, %c2_1090] : memref<1x3x2x16x7xf32, #tpu.memory_space<vmem>>, vector<1x1x1x16x5xf32>
    %1306 = vector.shape_cast %1305 : vector<1x1x1x16x5xf32> to vector<16x5xf32>
    %c0_1091 = arith.constant 0 : index
    %c4_1092 = arith.constant 4 : index
    %1307 = vector.load %arg13[%c0_1091, %c4_1092] : memref<16x6xf32, #tpu.memory_space<vmem>>, vector<16x1xf32>
    %1308 = vector.broadcast %1307 : vector<16x1xf32> to vector<16x5xf32>
    %1309 = arith.mulf %1308, %1306 : vector<16x5xf32>
    %1310 = arith.addf %1304, %1309 : vector<16x5xf32>
    %c0_1093 = arith.constant 0 : index
    %c2_1094 = arith.constant 2 : index
    %c1_1095 = arith.constant 1 : index
    %c0_1096 = arith.constant 0 : index
    %c2_1097 = arith.constant 2 : index
    %1311 = vector.load %arg25[%c0_1093, %c2_1094, %c1_1095, %c0_1096, %c2_1097] : memref<1x3x2x16x7xf32, #tpu.memory_space<vmem>>, vector<1x1x1x16x5xf32>
    %1312 = vector.shape_cast %1311 : vector<1x1x1x16x5xf32> to vector<16x5xf32>
    %c0_1098 = arith.constant 0 : index
    %c5_1099 = arith.constant 5 : index
    %1313 = vector.load %arg13[%c0_1098, %c5_1099] : memref<16x6xf32, #tpu.memory_space<vmem>>, vector<16x1xf32>
    %1314 = vector.broadcast %1313 : vector<16x1xf32> to vector<16x5xf32>
    %1315 = arith.mulf %1314, %1312 : vector<16x5xf32>
    %1316 = arith.addf %1310, %1315 : vector<16x5xf32>
    %c0_1100 = arith.constant 0 : index
    %c0_1101 = arith.constant 0 : index
    %1317 = vector.load %arg14[%c0_1100, %c0_1101] : memref<16x1xf32, #tpu.memory_space<vmem>>, vector<16x1xf32>
    %1318 = vector.broadcast %1317 : vector<16x1xf32> to vector<16x5xf32>
    %1319 = arith.addf %1316, %1318 : vector<16x5xf32>
    %cst_1102 = arith.constant dense<0.000000e+00> : vector<5xf32>
    %1320 = vector.multi_reduction <add>, %1319, %cst_1102 [0] : vector<16x5xf32> to vector<5xf32>
    %1321 = vector.shape_cast %1320 : vector<5xf32> to vector<1x5xf32>
    %cst_1103 = arith.constant 1.600000e+01 : f32
    %1322 = vector.broadcast %cst_1103 : f32 to vector<1x5xf32>
    %1323 = arith.divf %1321, %1322 : vector<1x5xf32>
    %1324 = vector.broadcast %1323 : vector<1x5xf32> to vector<16x5xf32>
    %1325 = arith.subf %1319, %1324 : vector<16x5xf32>
    %1326 = arith.mulf %1325, %1325 : vector<16x5xf32>
    %cst_1104 = arith.constant dense<0.000000e+00> : vector<5xf32>
    %1327 = vector.multi_reduction <add>, %1326, %cst_1104 [0] : vector<16x5xf32> to vector<5xf32>
    %1328 = vector.shape_cast %1327 : vector<5xf32> to vector<1x5xf32>
    %cst_1105 = arith.constant 1.600000e+01 : f32
    %1329 = vector.broadcast %cst_1105 : f32 to vector<1x5xf32>
    %1330 = arith.divf %1328, %1329 : vector<1x5xf32>
    %1331 = vector.broadcast %1323 : vector<1x5xf32> to vector<16x5xf32>
    %1332 = arith.subf %1319, %1331 : vector<16x5xf32>
    %cst_1106 = arith.constant 9.99999997E-7 : f32
    %1333 = vector.broadcast %cst_1106 : f32 to vector<1x5xf32>
    %1334 = arith.addf %1330, %1333 : vector<1x5xf32>
    %1335 = math.rsqrt %1334 : vector<1x5xf32>
    %1336 = vector.broadcast %1335 : vector<1x5xf32> to vector<16x5xf32>
    %1337 = arith.mulf %1332, %1336 : vector<16x5xf32>
    %c0_1107 = arith.constant 0 : index
    %c0_1108 = arith.constant 0 : index
    %1338 = vector.load %arg15[%c0_1107, %c0_1108] : memref<16x1xf32, #tpu.memory_space<vmem>>, vector<16x1xf32>
    %1339 = vector.broadcast %1338 : vector<16x1xf32> to vector<16x5xf32>
    %1340 = arith.mulf %1337, %1339 : vector<16x5xf32>
    %c0_1109 = arith.constant 0 : index
    %c0_1110 = arith.constant 0 : index
    %1341 = vector.load %arg16[%c0_1109, %c0_1110] : memref<16x1xf32, #tpu.memory_space<vmem>>, vector<16x1xf32>
    %1342 = vector.broadcast %1341 : vector<16x1xf32> to vector<16x5xf32>
    %1343 = arith.addf %1340, %1342 : vector<16x5xf32>
    %1344 = vector.broadcast %1151 : vector<16x1xf32> to vector<16x5xf32>
    %1345 = arith.addf %1343, %1344 : vector<16x5xf32>
    %c0_1111 = arith.constant 0 : index
    %c10_1112 = arith.constant 10 : index
    %1346 = vector.load %arg29[%c0_1111, %c10_1112] : memref<16x15xf32, #tpu.memory_space<vmem>>, vector<16x5xf32>
    tpu.vector_store %arg29[%c0_1111, %c10_1112], %1345 {strides = array<i32>} : memref<16x15xf32, #tpu.memory_space<vmem>>, vector<16x5xf32>,
    %c0_1113 = arith.constant 0 : index
    %c0_1114 = arith.constant 0 : index
    %1347 = vector.load %arg18[%c0_1113, %c0_1114] : memref<64x16xbf16, #tpu.memory_space<vmem>>, vector<64x16xbf16>
    %c0_1115 = arith.constant 0 : index
    %c0_1116 = arith.constant 0 : index
    %1348 = vector.load %arg29[%c0_1115, %c0_1116] : memref<16x15xf32, #tpu.memory_space<vmem>>, vector<16x15xf32>
    %1349 = arith.truncf %1348 : vector<16x15xf32> to vector<16x15xbf16>
    %cst_1117 = arith.constant dense<0.000000e+00> : vector<64x15xf32>
    %1350 = tpu.matmul %1347, %1349, %cst_1117 {dimension_numbers = #tpu.dot_dimension_numbers<[1], [0], [0], [1], [0, 0, 1, 1], [], []>} : vector<64x16xbf16>, vector<16x15xbf16>, vector<64x15xf32> -> vector<64x15xf32>
    %c0_1118 = arith.constant 0 : index
    %c0_1119 = arith.constant 0 : index
    %1351 = vector.load %arg19[%c0_1118, %c0_1119] : memref<64x1xf32, #tpu.memory_space<vmem>>, vector<64x1xf32>
    %1352 = vector.broadcast %1351 : vector<64x1xf32> to vector<64x15xf32>
    %1353 = arith.addf %1350, %1352 : vector<64x15xf32>
    %cst_1120 = arith.constant 5.000000e-01 : f32
    %1354 = vector.broadcast %cst_1120 : f32 to vector<64x15xf32>
    %1355 = arith.mulf %1354, %1353 : vector<64x15xf32>
    %cst_1121 = arith.constant 4.471500e-02 : f32
    %1356 = vector.broadcast %cst_1121 : f32 to vector<64x15xf32>
    %1357 = arith.mulf %1356, %1353 : vector<64x15xf32>
    %1358 = arith.mulf %1357, %1353 : vector<64x15xf32>
    %1359 = arith.mulf %1358, %1353 : vector<64x15xf32>
    %1360 = arith.addf %1353, %1359 : vector<64x15xf32>
    %cst_1122 = arith.constant 0.797884583 : f32
    %1361 = vector.broadcast %cst_1122 : f32 to vector<64x15xf32>
    %1362 = arith.mulf %1361, %1360 : vector<64x15xf32>
    %1363 = math.tanh %1362 : vector<64x15xf32>
    %cst_1123 = arith.constant 1.000000e+00 : f32
    %1364 = vector.broadcast %cst_1123 : f32 to vector<64x15xf32>
    %1365 = arith.addf %1364, %1363 : vector<64x15xf32>
    %1366 = arith.mulf %1355, %1365 : vector<64x15xf32>
    %c0_1124 = arith.constant 0 : index
    %c0_1125 = arith.constant 0 : index
    %1367 = vector.load %arg20[%c0_1124, %c0_1125] : memref<32x64xbf16, #tpu.memory_space<vmem>>, vector<32x64xbf16>
    %1368 = arith.truncf %1366 : vector<64x15xf32> to vector<64x15xbf16>
    %cst_1126 = arith.constant dense<0.000000e+00> : vector<32x15xf32>
    %1369 = tpu.matmul %1367, %1368, %cst_1126 {dimension_numbers = #tpu.dot_dimension_numbers<[1], [0], [0], [1], [0, 0, 1, 1], [], []>} : vector<32x64xbf16>, vector<64x15xbf16>, vector<32x15xf32> -> vector<32x15xf32>
    %c0_1127 = arith.constant 0 : index
    %c0_1128 = arith.constant 0 : index
    %1370 = vector.load %arg21[%c0_1127, %c0_1128] : memref<32x1xf32, #tpu.memory_space<vmem>>, vector<32x1xf32>
    %1371 = vector.broadcast %1370 : vector<32x1xf32> to vector<32x15xf32>
    %1372 = arith.addf %1369, %1371 : vector<32x15xf32>
    %1373 = vector.extract_strided_slice %1372 {offsets = [0, 0], sizes = [32, 5], strides = [1, 1]} : vector<32x15xf32> to vector<32x5xf32>
    %c0_1129 = arith.constant 0 : index
    %c0_1130 = arith.constant 0 : index
    %c0_1131 = arith.constant 0 : index
    %c2_1132 = arith.constant 2 : index
    %1374 = vector.load %arg26[%c0_1129, %c0_1130, %c0_1131, %c2_1132] : memref<1x3x32x7xf32, #tpu.memory_space<vmem>>, vector<1x1x32x5xf32>
    %1375 = vector.shape_cast %1374 : vector<1x1x32x5xf32> to vector<32x5xf32>
    %1376 = vector.shape_cast %1373 : vector<32x5xf32> to vector<1x1x32x5xf32>
    tpu.vector_store %arg26[%c0_1129, %c0_1130, %c0_1131, %c2_1132], %1376 {strides = array<i32>} : memref<1x3x32x7xf32, #tpu.memory_space<vmem>>, vector<1x1x32x5xf32>,
    %1377 = vector.extract_strided_slice %1372 {offsets = [0, 5], sizes = [32, 5], strides = [1, 1]} : vector<32x15xf32> to vector<32x5xf32>
    %c0_1133 = arith.constant 0 : index
    %c1_1134 = arith.constant 1 : index
    %c0_1135 = arith.constant 0 : index
    %c2_1136 = arith.constant 2 : index
    %1378 = vector.load %arg26[%c0_1133, %c1_1134, %c0_1135, %c2_1136] : memref<1x3x32x7xf32, #tpu.memory_space<vmem>>, vector<1x1x32x5xf32>
    %1379 = vector.shape_cast %1378 : vector<1x1x32x5xf32> to vector<32x5xf32>
    %1380 = vector.shape_cast %1377 : vector<32x5xf32> to vector<1x1x32x5xf32>
    tpu.vector_store %arg26[%c0_1133, %c1_1134, %c0_1135, %c2_1136], %1380 {strides = array<i32>} : memref<1x3x32x7xf32, #tpu.memory_space<vmem>>, vector<1x1x32x5xf32>,
    %1381 = vector.extract_strided_slice %1372 {offsets = [0, 10], sizes = [32, 5], strides = [1, 1]} : vector<32x15xf32> to vector<32x5xf32>
    %c0_1137 = arith.constant 0 : index
    %c2_1138 = arith.constant 2 : index
    %c0_1139 = arith.constant 0 : index
    %c2_1140 = arith.constant 2 : index
    %1382 = vector.load %arg26[%c0_1137, %c2_1138, %c0_1139, %c2_1140] : memref<1x3x32x7xf32, #tpu.memory_space<vmem>>, vector<1x1x32x5xf32>
    %1383 = vector.shape_cast %1382 : vector<1x1x32x5xf32> to vector<32x5xf32>
    %1384 = vector.shape_cast %1381 : vector<32x5xf32> to vector<1x1x32x5xf32>
    tpu.vector_store %arg26[%c0_1137, %c2_1138, %c0_1139, %c2_1140], %1384 {strides = array<i32>} : memref<1x3x32x7xf32, #tpu.memory_space<vmem>>, vector<1x1x32x5xf32>,
    %c0_1141 = arith.constant 0 : index
    %c0_1142 = arith.constant 0 : index
    %1385 = vector.load %arg22[%c0_1141, %c0_1142] : memref<32x3xf32, #tpu.memory_space<vmem>>, vector<32x1xf32>
    %c0_1143 = arith.constant 0 : index
    %c0_1144 = arith.constant 0 : index
    %c0_1145 = arith.constant 0 : index
    %c0_1146 = arith.constant 0 : index
    %1386 = vector.load %arg26[%c0_1143, %c0_1144, %c0_1145, %c0_1146] : memref<1x3x32x7xf32, #tpu.memory_space<vmem>>, vector<1x1x32x5xf32>
    %1387 = vector.shape_cast %1386 : vector<1x1x32x5xf32> to vector<32x5xf32>
    %1388 = vector.broadcast %1385 : vector<32x1xf32> to vector<32x5xf32>
    %1389 = arith.mulf %1388, %1387 : vector<32x5xf32>
    %c0_1147 = arith.constant 0 : index
    %c1_1148 = arith.constant 1 : index
    %1390 = vector.load %arg22[%c0_1147, %c1_1148] : memref<32x3xf32, #tpu.memory_space<vmem>>, vector<32x1xf32>
    %c0_1149 = arith.constant 0 : index
    %c0_1150 = arith.constant 0 : index
    %c0_1151 = arith.constant 0 : index
    %c1_1152 = arith.constant 1 : index
    %1391 = vector.load %arg26[%c0_1149, %c0_1150, %c0_1151, %c1_1152] : memref<1x3x32x7xf32, #tpu.memory_space<vmem>>, vector<1x1x32x5xf32>
    %1392 = vector.shape_cast %1391 : vector<1x1x32x5xf32> to vector<32x5xf32>
    %1393 = vector.broadcast %1390 : vector<32x1xf32> to vector<32x5xf32>
    %1394 = arith.mulf %1393, %1392 : vector<32x5xf32>
    %1395 = arith.addf %1389, %1394 : vector<32x5xf32>
    %c0_1153 = arith.constant 0 : index
    %c2_1154 = arith.constant 2 : index
    %1396 = vector.load %arg22[%c0_1153, %c2_1154] : memref<32x3xf32, #tpu.memory_space<vmem>>, vector<32x1xf32>
    %c0_1155 = arith.constant 0 : index
    %c0_1156 = arith.constant 0 : index
    %c0_1157 = arith.constant 0 : index
    %c2_1158 = arith.constant 2 : index
    %1397 = vector.load %arg26[%c0_1155, %c0_1156, %c0_1157, %c2_1158] : memref<1x3x32x7xf32, #tpu.memory_space<vmem>>, vector<1x1x32x5xf32>
    %1398 = vector.shape_cast %1397 : vector<1x1x32x5xf32> to vector<32x5xf32>
    %1399 = vector.broadcast %1396 : vector<32x1xf32> to vector<32x5xf32>
    %1400 = arith.mulf %1399, %1398 : vector<32x5xf32>
    %1401 = arith.addf %1395, %1400 : vector<32x5xf32>
    %cst_1159 = arith.constant dense<0.000000e+00> : vector<5xf32>
    %1402 = vector.multi_reduction <add>, %1401, %cst_1159 [0] : vector<32x5xf32> to vector<5xf32>
    %1403 = vector.shape_cast %1402 : vector<5xf32> to vector<1x5xf32>
    %c0_1160 = arith.constant 0 : index
    %c0_1161 = arith.constant 0 : index
    %1404 = vector.load %arg23[%c0_1160, %c0_1161] : memref<1x1xf32, #tpu.memory_space<vmem>>, vector<1x1xf32>
    %1405 = vector.broadcast %1404 : vector<1x1xf32> to vector<1x5xf32>
    %1406 = arith.addf %1403, %1405 : vector<1x5xf32>
    %c0_1162 = arith.constant 0 : index
    %c0_1163 = arith.constant 0 : index
    %c0_1164 = arith.constant 0 : index
    %1407 = vector.load %arg27[%c0_1162, %c0_1163, %c0_1164] : memref<1x3x5xf32, #tpu.memory_space<vmem>>, vector<1x1x5xf32>
    %1408 = vector.shape_cast %1407 : vector<1x1x5xf32> to vector<1x5xf32>
    %1409 = vector.shape_cast %1406 : vector<1x5xf32> to vector<1x1x5xf32>
    tpu.vector_store %arg27[%c0_1162, %c0_1163, %c0_1164], %1409 {strides = array<i32>} : memref<1x3x5xf32, #tpu.memory_space<vmem>>, vector<1x1x5xf32>,
    %c0_1165 = arith.constant 0 : index
    %c0_1166 = arith.constant 0 : index
    %1410 = vector.load %arg22[%c0_1165, %c0_1166] : memref<32x3xf32, #tpu.memory_space<vmem>>, vector<32x1xf32>
    %c0_1167 = arith.constant 0 : index
    %c1_1168 = arith.constant 1 : index
    %c0_1169 = arith.constant 0 : index
    %c0_1170 = arith.constant 0 : index
    %1411 = vector.load %arg26[%c0_1167, %c1_1168, %c0_1169, %c0_1170] : memref<1x3x32x7xf32, #tpu.memory_space<vmem>>, vector<1x1x32x5xf32>
    %1412 = vector.shape_cast %1411 : vector<1x1x32x5xf32> to vector<32x5xf32>
    %1413 = vector.broadcast %1410 : vector<32x1xf32> to vector<32x5xf32>
    %1414 = arith.mulf %1413, %1412 : vector<32x5xf32>
    %c0_1171 = arith.constant 0 : index
    %c1_1172 = arith.constant 1 : index
    %1415 = vector.load %arg22[%c0_1171, %c1_1172] : memref<32x3xf32, #tpu.memory_space<vmem>>, vector<32x1xf32>
    %c0_1173 = arith.constant 0 : index
    %c1_1174 = arith.constant 1 : index
    %c0_1175 = arith.constant 0 : index
    %c1_1176 = arith.constant 1 : index
    %1416 = vector.load %arg26[%c0_1173, %c1_1174, %c0_1175, %c1_1176] : memref<1x3x32x7xf32, #tpu.memory_space<vmem>>, vector<1x1x32x5xf32>
    %1417 = vector.shape_cast %1416 : vector<1x1x32x5xf32> to vector<32x5xf32>
    %1418 = vector.broadcast %1415 : vector<32x1xf32> to vector<32x5xf32>
    %1419 = arith.mulf %1418, %1417 : vector<32x5xf32>
    %1420 = arith.addf %1414, %1419 : vector<32x5xf32>
    %c0_1177 = arith.constant 0 : index
    %c2_1178 = arith.constant 2 : index
    %1421 = vector.load %arg22[%c0_1177, %c2_1178] : memref<32x3xf32, #tpu.memory_space<vmem>>, vector<32x1xf32>
    %c0_1179 = arith.constant 0 : index
    %c1_1180 = arith.constant 1 : index
    %c0_1181 = arith.constant 0 : index
    %c2_1182 = arith.constant 2 : index
    %1422 = vector.load %arg26[%c0_1179, %c1_1180, %c0_1181, %c2_1182] : memref<1x3x32x7xf32, #tpu.memory_space<vmem>>, vector<1x1x32x5xf32>
    %1423 = vector.shape_cast %1422 : vector<1x1x32x5xf32> to vector<32x5xf32>
    %1424 = vector.broadcast %1421 : vector<32x1xf32> to vector<32x5xf32>
    %1425 = arith.mulf %1424, %1423 : vector<32x5xf32>
    %1426 = arith.addf %1420, %1425 : vector<32x5xf32>
    %cst_1183 = arith.constant dense<0.000000e+00> : vector<5xf32>
    %1427 = vector.multi_reduction <add>, %1426, %cst_1183 [0] : vector<32x5xf32> to vector<5xf32>
    %1428 = vector.shape_cast %1427 : vector<5xf32> to vector<1x5xf32>
    %c0_1184 = arith.constant 0 : index
    %c0_1185 = arith.constant 0 : index
    %1429 = vector.load %arg23[%c0_1184, %c0_1185] : memref<1x1xf32, #tpu.memory_space<vmem>>, vector<1x1xf32>
    %1430 = vector.broadcast %1429 : vector<1x1xf32> to vector<1x5xf32>
    %1431 = arith.addf %1428, %1430 : vector<1x5xf32>
    %c0_1186 = arith.constant 0 : index
    %c1_1187 = arith.constant 1 : index
    %c0_1188 = arith.constant 0 : index
    %1432 = vector.load %arg27[%c0_1186, %c1_1187, %c0_1188] : memref<1x3x5xf32, #tpu.memory_space<vmem>>, vector<1x1x5xf32>
    %1433 = vector.shape_cast %1432 : vector<1x1x5xf32> to vector<1x5xf32>
    %1434 = vector.shape_cast %1431 : vector<1x5xf32> to vector<1x1x5xf32>
    tpu.vector_store %arg27[%c0_1186, %c1_1187, %c0_1188], %1434 {strides = array<i32>} : memref<1x3x5xf32, #tpu.memory_space<vmem>>, vector<1x1x5xf32>,
    %c0_1189 = arith.constant 0 : index
    %c0_1190 = arith.constant 0 : index
    %1435 = vector.load %arg22[%c0_1189, %c0_1190] : memref<32x3xf32, #tpu.memory_space<vmem>>, vector<32x1xf32>
    %c0_1191 = arith.constant 0 : index
    %c2_1192 = arith.constant 2 : index
    %c0_1193 = arith.constant 0 : index
    %c0_1194 = arith.constant 0 : index
    %1436 = vector.load %arg26[%c0_1191, %c2_1192, %c0_1193, %c0_1194] : memref<1x3x32x7xf32, #tpu.memory_space<vmem>>, vector<1x1x32x5xf32>
    %1437 = vector.shape_cast %1436 : vector<1x1x32x5xf32> to vector<32x5xf32>
    %1438 = vector.broadcast %1435 : vector<32x1xf32> to vector<32x5xf32>
    %1439 = arith.mulf %1438, %1437 : vector<32x5xf32>
    %c0_1195 = arith.constant 0 : index
    %c1_1196 = arith.constant 1 : index
    %1440 = vector.load %arg22[%c0_1195, %c1_1196] : memref<32x3xf32, #tpu.memory_space<vmem>>, vector<32x1xf32>
    %c0_1197 = arith.constant 0 : index
    %c2_1198 = arith.constant 2 : index
    %c0_1199 = arith.constant 0 : index
    %c1_1200 = arith.constant 1 : index
    %1441 = vector.load %arg26[%c0_1197, %c2_1198, %c0_1199, %c1_1200] : memref<1x3x32x7xf32, #tpu.memory_space<vmem>>, vector<1x1x32x5xf32>
    %1442 = vector.shape_cast %1441 : vector<1x1x32x5xf32> to vector<32x5xf32>
    %1443 = vector.broadcast %1440 : vector<32x1xf32> to vector<32x5xf32>
    %1444 = arith.mulf %1443, %1442 : vector<32x5xf32>
    %1445 = arith.addf %1439, %1444 : vector<32x5xf32>
    %c0_1201 = arith.constant 0 : index
    %c2_1202 = arith.constant 2 : index
    %1446 = vector.load %arg22[%c0_1201, %c2_1202] : memref<32x3xf32, #tpu.memory_space<vmem>>, vector<32x1xf32>
    %c0_1203 = arith.constant 0 : index
    %c2_1204 = arith.constant 2 : index
    %c0_1205 = arith.constant 0 : index
    %c2_1206 = arith.constant 2 : index
    %1447 = vector.load %arg26[%c0_1203, %c2_1204, %c0_1205, %c2_1206] : memref<1x3x32x7xf32, #tpu.memory_space<vmem>>, vector<1x1x32x5xf32>
    %1448 = vector.shape_cast %1447 : vector<1x1x32x5xf32> to vector<32x5xf32>
    %1449 = vector.broadcast %1446 : vector<32x1xf32> to vector<32x5xf32>
    %1450 = arith.mulf %1449, %1448 : vector<32x5xf32>
    %1451 = arith.addf %1445, %1450 : vector<32x5xf32>
    %cst_1207 = arith.constant dense<0.000000e+00> : vector<5xf32>
    %1452 = vector.multi_reduction <add>, %1451, %cst_1207 [0] : vector<32x5xf32> to vector<5xf32>
    %1453 = vector.shape_cast %1452 : vector<5xf32> to vector<1x5xf32>
    %c0_1208 = arith.constant 0 : index
    %c0_1209 = arith.constant 0 : index
    %1454 = vector.load %arg23[%c0_1208, %c0_1209] : memref<1x1xf32, #tpu.memory_space<vmem>>, vector<1x1xf32>
    %1455 = vector.broadcast %1454 : vector<1x1xf32> to vector<1x5xf32>
    %1456 = arith.addf %1453, %1455 : vector<1x5xf32>
    %c0_1210 = arith.constant 0 : index
    %c2_1211 = arith.constant 2 : index
    %c0_1212 = arith.constant 0 : index
    %1457 = vector.load %arg27[%c0_1210, %c2_1211, %c0_1212] : memref<1x3x5xf32, #tpu.memory_space<vmem>>, vector<1x1x5xf32>
    %1458 = vector.shape_cast %1457 : vector<1x1x5xf32> to vector<1x5xf32>
    %1459 = vector.shape_cast %1456 : vector<1x5xf32> to vector<1x1x5xf32>
    tpu.vector_store %arg27[%c0_1210, %c2_1211, %c0_1212], %1459 {strides = array<i32>} : memref<1x3x5xf32, #tpu.memory_space<vmem>>, vector<1x1x5xf32>,
    return
  }
  func.func @transform_0(%arg0: i32) -> (i32, i32, i32) {
    %c0_i32 = arith.constant 0 : i32
    %c0_i32_0 = arith.constant 0 : i32
    %c0_i32_1 = arith.constant 0 : i32
    return %arg0, %c0_i32, %c0_i32_0 : i32, i32, i32
  }
  func.func @transform_1(%arg0: i32) -> (i32, i32) {
    %c0_i32 = arith.constant 0 : i32
    %c0_i32_0 = arith.constant 0 : i32
    %c0_i32_1 = arith.constant 0 : i32
    return %c0_i32, %c0_i32_0 : i32, i32
  }
  func.func @transform_2(%arg0: i32) -> (i32, i32) {
    %c0_i32 = arith.constant 0 : i32
    %c0_i32_0 = arith.constant 0 : i32
    %c0_i32_1 = arith.constant 0 : i32
    return %c0_i32, %c0_i32_0 : i32, i32
  }
  func.func @transform_3(%arg0: i32) -> (i32, i32) {
    %c0_i32 = arith.constant 0 : i32
    %c0_i32_0 = arith.constant 0 : i32
    %c0_i32_1 = arith.constant 0 : i32
    return %c0_i32, %c0_i32_0 : i32, i32
  }
  func.func @transform_4(%arg0: i32) -> (i32, i32) {
    %c0_i32 = arith.constant 0 : i32
    %c0_i32_0 = arith.constant 0 : i32
    %c0_i32_1 = arith.constant 0 : i32
    return %c0_i32, %c0_i32_0 : i32, i32
  }
  func.func @transform_5(%arg0: i32) -> (i32, i32) {
    %c0_i32 = arith.constant 0 : i32
    %c0_i32_0 = arith.constant 0 : i32
    %c0_i32_1 = arith.constant 0 : i32
    return %c0_i32, %c0_i32_0 : i32, i32
  }
  func.func @transform_6(%arg0: i32) -> (i32, i32) {
    %c0_i32 = arith.constant 0 : i32
    %c0_i32_0 = arith.constant 0 : i32
    %c0_i32_1 = arith.constant 0 : i32
    return %c0_i32, %c0_i32_0 : i32, i32
  }
  func.func @transform_7(%arg0: i32) -> (i32, i32, i32) {
    %c0_i32 = arith.constant 0 : i32
    %c0_i32_0 = arith.constant 0 : i32
    %c0_i32_1 = arith.constant 0 : i32
    return %arg0, %c0_i32, %c0_i32_0 : i32, i32, i32
  }
  func.func @transform_8(%arg0: i32) -> (i32, i32) {
    %c0_i32 = arith.constant 0 : i32
    %c0_i32_0 = arith.constant 0 : i32
    %c0_i32_1 = arith.constant 0 : i32
    return %c0_i32, %c0_i32_0 : i32, i32
  }
  func.func @transform_9(%arg0: i32) -> (i32, i32) {
    %c0_i32 = arith.constant 0 : i32
    %c0_i32_0 = arith.constant 0 : i32
    %c0_i32_1 = arith.constant 0 : i32
    return %c0_i32, %c0_i32_0 : i32, i32
  }
  func.func @transform_10(%arg0: i32) -> (i32, i32) {
    %c0_i32 = arith.constant 0 : i32
    %c0_i32_0 = arith.constant 0 : i32
    %c0_i32_1 = arith.constant 0 : i32
    return %c0_i32, %c0_i32_0 : i32, i32
  }
  func.func @transform_11(%arg0: i32) -> (i32, i32) {
    %c0_i32 = arith.constant 0 : i32
    %c0_i32_0 = arith.constant 0 : i32
    %c0_i32_1 = arith.constant 0 : i32
    return %c0_i32, %c0_i32_0 : i32, i32
  }
  func.func @transform_12(%arg0: i32) -> (i32, i32) {
    %c0_i32 = arith.constant 0 : i32
    %c0_i32_0 = arith.constant 0 : i32
    %c0_i32_1 = arith.constant 0 : i32
    return %c0_i32, %c0_i32_0 : i32, i32
  }
  func.func @transform_13(%arg0: i32) -> (i32, i32) {
    %c0_i32 = arith.constant 0 : i32
    %c0_i32_0 = arith.constant 0 : i32
    %c0_i32_1 = arith.constant 0 : i32
    return %c0_i32, %c0_i32_0 : i32, i32
  }
  func.func @transform_14(%arg0: i32) -> (i32, i32) {
    %c0_i32 = arith.constant 0 : i32
    %c0_i32_0 = arith.constant 0 : i32
    %c0_i32_1 = arith.constant 0 : i32
    return %c0_i32, %c0_i32_0 : i32, i32
  }
  func.func @transform_15(%arg0: i32) -> (i32, i32) {
    %c0_i32 = arith.constant 0 : i32
    %c0_i32_0 = arith.constant 0 : i32
    %c0_i32_1 = arith.constant 0 : i32
    return %c0_i32, %c0_i32_0 : i32, i32
  }
  func.func @transform_16(%arg0: i32) -> (i32, i32, i32) {
    %c0_i32 = arith.constant 0 : i32
    %c0_i32_0 = arith.constant 0 : i32
    %c0_i32_1 = arith.constant 0 : i32
    return %arg0, %c0_i32, %c0_i32_0 : i32, i32, i32
  }
  func.func @transform_17(%arg0: i32) -> (i32, i32) {
    %c0_i32 = arith.constant 0 : i32
    %c0_i32_0 = arith.constant 0 : i32
    %c0_i32_1 = arith.constant 0 : i32
    return %c0_i32, %c0_i32_0 : i32, i32
  }
  func.func @transform_18(%arg0: i32) -> (i32, i32) {
    %c0_i32 = arith.constant 0 : i32
    %c0_i32_0 = arith.constant 0 : i32
    %c0_i32_1 = arith.constant 0 : i32
    return %c0_i32, %c0_i32_0 : i32, i32
  }
  func.func @transform_19(%arg0: i32) -> (i32, i32) {
    %c0_i32 = arith.constant 0 : i32
    %c0_i32_0 = arith.constant 0 : i32
    %c0_i32_1 = arith.constant 0 : i32
    return %c0_i32, %c0_i32_0 : i32, i32
  }
  func.func @transform_20(%arg0: i32) -> (i32, i32) {
    %c0_i32 = arith.constant 0 : i32
    %c0_i32_0 = arith.constant 0 : i32
    %c0_i32_1 = arith.constant 0 : i32
    return %c0_i32, %c0_i32_0 : i32, i32
  }
  func.func @transform_21(%arg0: i32) -> (i32, i32) {
    %c0_i32 = arith.constant 0 : i32
    %c0_i32_0 = arith.constant 0 : i32
    %c0_i32_1 = arith.constant 0 : i32
    return %c0_i32, %c0_i32_0 : i32, i32
  }
  func.func @transform_22(%arg0: i32) -> (i32, i32) {
    %c0_i32 = arith.constant 0 : i32
    %c0_i32_0 = arith.constant 0 : i32
    %c0_i32_1 = arith.constant 0 : i32
    return %c0_i32, %c0_i32_0 : i32, i32
  }
  func.func @transform_23(%arg0: i32) -> (i32, i32, i32, i32, i32) {
    %c0_i32 = arith.constant 0 : i32
    %c0_i32_0 = arith.constant 0 : i32
    %c0_i32_1 = arith.constant 0 : i32
    %c0_i32_2 = arith.constant 0 : i32
    %c0_i32_3 = arith.constant 0 : i32
    return %arg0, %c0_i32, %c0_i32_0, %c0_i32_1, %c0_i32_2 : i32, i32, i32, i32, i32
  }
  func.func @transform_24(%arg0: i32) -> (i32, i32, i32, i32, i32) {
    %c0_i32 = arith.constant 0 : i32
    %c0_i32_0 = arith.constant 0 : i32
    %c0_i32_1 = arith.constant 0 : i32
    %c0_i32_2 = arith.constant 0 : i32
    %c0_i32_3 = arith.constant 0 : i32
    return %arg0, %c0_i32, %c0_i32_0, %c0_i32_1, %c0_i32_2 : i32, i32, i32, i32, i32
  }
  func.func @transform_25(%arg0: i32) -> (i32, i32, i32, i32) {
    %c0_i32 = arith.constant 0 : i32
    %c0_i32_0 = arith.constant 0 : i32
    %c0_i32_1 = arith.constant 0 : i32
    %c0_i32_2 = arith.constant 0 : i32
    return %arg0, %c0_i32, %c0_i32_0, %c0_i32_1 : i32, i32, i32, i32
  }
  func.func @transform_26(%arg0: i32) -> (i32, i32, i32) {
    %c0_i32 = arith.constant 0 : i32
    %c0_i32_0 = arith.constant 0 : i32
    %c0_i32_1 = arith.constant 0 : i32
    return %arg0, %c0_i32, %c0_i32_0 : i32, i32, i32
  }
}

</mosaic_0001>

<bundles_post_ra>
// kernel: squeeze.1
= control target key start
LH: loop header
LB: loop body
LE: loop exit
PB: predicated region body
PF: predicated region fallthrough
CT: control target
= control target key end

     0   :  { %s290_s8 = smov 119   ;;  %s291_s9 = smov 122   ;;  %vm7_vm0 = vcmask 23552   ;;  %s471_s0 = inlined_call_operand.vmem [shape: f32[2,102], index: 0, kind: input, shape index: {}]   ;;  %s472_s1 = inlined_call_operand.vmem [shape: f32[2,34,3], index: 1, kind: output, shape index: {}]  }
   0x1   :  { %v4_v0 = vld [vmem:[%s471_s0] sm:$0x3]  ;;  %s289_s0 = smov 125   ;;  %s292_s10 = smov 116  }
   0x2   :  { %5 = vst [vmem:[#allocation0] sm:$0x3] %v4_v0  ;;  %s293_s11 = smov 113   ;;  %s294_s12 = smov 110  }
   0x3   :  { %s295_s13 = smov 107   ;;  %s296_s14 = smov 104  }
   0x4   :  { %s297_s15 = smov 101   ;;  %s298_s16 = smov 98  }
   0x5   :  { %s299_s17 = smov 95   ;;  %s300_s18 = smov 92  }
   0x6   :  { %s301_s19 = smov 89   ;;  %s302_s20 = smov 86  }
   0x7   :  { %s303_s21 = smov 83   ;;  %s304_s22 = smov 80  }
   0x8   :  { %s305_s23 = smov 77   ;;  %s306_s24 = smov 74  }
   0x9   :  { %v9_v1 = vld [vmem:[#allocation0] sm:$0x3]   ;;  %s307_s25 = smov 71   ;;  %s308_s26 = smov 68  }
   0xa   :  { %v21_v2 = vld [vmem:[#allocation0] sm:$0x3]   ;;  %10 = vrot.lane.b32.xlu0 %v9_v1, %s289_s0  ;;  %s148_s27 = smov 3  ;;  %s309_s28 = smov 65  }
   0xb   :  { %22 = vrot.lane.b32.xlu1 %v21_v2, %s290_s8  ;;  %v15_v3 = vld [vmem:[#allocation0] sm:$0x3]   ;;  %s310_s29 = smov 62   ;;  %s156_s30 = smov 3 }
   0xc   :  { %v27_v4 = vld [vmem:[#allocation0] sm:$0x3]   ;;  %s164_s2 = smov 3  ;;  %s311_s3 = smov 59  }
   0xd   :  { %v33_v5 = vld [vmem:[#allocation0] sm:$0x3]   ;;  %s312_s4 = smov 56   ;;  %s172_s5 = smov 3 }
   0xe   :  { %16 = vrot.lane.b32.xlu0 %v15_v3, %s291_s9  ;;  %v39_v6 = vld [vmem:[#allocation0] sm:$0x3]   ;;  %s180_s6 = smov 3  ;;  %s313_s7 = smov 53  }
   0xf   :  { %28 = vrot.lane.b32.xlu1 %v27_v4, %s292_s10  ;;  %v45_v7 = vld [vmem:[#allocation0] sm:$0x3]   ;;  %s314_s0 = smov 50   ;;  %s188_s8 = smov 3 }
  0x10   :  { %v51_v8 = vld [vmem:[#allocation0] sm:$0x3]   ;;  %s196_s9 = smov 3 }
  0x11   :  { %v57_v9 = vld [vmem:[#allocation0] sm:$0x3]  }
  0x12   :  { %34 = vrot.lane.b32.xlu0 %v33_v5, %s293_s11  ;;  %v63_v10 = vld [vmem:[#allocation0] sm:$0x3]  }
  0x13   :  { %40 = vrot.lane.b32.xlu1 %v39_v6, %s294_s12  ;;  %v69_v11 = vld [vmem:[#allocation0] sm:$0x3]   ;;  %s315_s12 = smov 47  }
  0x14   :  { %v75_v12 = vld [vmem:[#allocation0] sm:$0x3]  }
  0x15   :  { %v81_v13 = vld [vmem:[#allocation0] sm:$0x3]  }
  0x16   :  { %46 = vrot.lane.b32.xlu0 %v45_v7, %s295_s13  ;;  %v87_v14 = vld [vmem:[#allocation0] sm:$0x3]   ;;  %s316_s13 = smov 44  }
  0x17   :  { %52 = vrot.lane.b32.xlu1 %v51_v8, %s296_s14  ;;  %v93_v15 = vld [vmem:[#allocation0] sm:$0x3]   ;;  %s204_s14 = smov 3 }
  0x18   :  { %v99_v16 = vld [vmem:[#allocation0] sm:$0x3]  }
  0x19   :  { %v105_v17 = vld [vmem:[#allocation0] sm:$0x3]  }
  0x1a   :  { %58 = vrot.lane.b32.xlu0 %v57_v9, %s297_s15  ;;  %v111_v18 = vld [vmem:[#allocation0] sm:$0x3]   ;;  %s317_s15 = smov 41  }
  0x1b   :  { %64 = vrot.lane.b32.xlu1 %v63_v10, %s298_s16  ;;  %v117_v19 = vld [vmem:[#allocation0] sm:$0x3]   ;;  %s318_s16 = smov 38  }
  0x1c   :  { %v123_v20 = vld [vmem:[#allocation0] sm:$0x3]  }
  0x1d   :  { %v129_v21 = vld [vmem:[#allocation0] sm:$0x3]  }
  0x1e   :  { %70 = vrot.lane.b32.xlu0 %v69_v11, %s299_s17  ;;  %v135_v22 = vld [vmem:[#allocation0] sm:$0x3]   ;;  %s319_s17 = smov 35  }
  0x1f   :  { %76 = vrot.lane.b32.xlu1 %v75_v12, %s300_s18  ;;  %v141_v23 = vld [vmem:[#allocation0] sm:$0x3]   ;;  %s320_s18 = smov 32  }
  0x20   :  { %v149_v24 = vld [vmem:[#allocation0 + $0x1] ss:$-1 sm:%s148_s27]  }
  0x21   :  { %v157_v25 = vld [vmem:[#allocation0 + $0x1] ss:$-1 sm:%s156_s30]  }
  0x22   :  { %82 = vrot.lane.b32.xlu0 %v81_v13, %s301_s19  ;;  %v165_v26 = vld [vmem:[#allocation0 + $0x1] ss:$-1 sm:%s164_s2]   ;;  %s321_s19 = smov 29  }
  0x23   :  { %88 = vrot.lane.b32.xlu1 %v87_v14, %s302_s20  ;;  %v173_v27 = vld [vmem:[#allocation0 + $0x1] ss:$-1 sm:%s172_s5]  }
  0x24   :  { %v181_v28 = vld [vmem:[#allocation0 + $0x1] ss:$-1 sm:%s180_s6]  }
  0x25   :  { %v6_v29 = vld [vmem:[#allocation0] sm:$0x3]  }
  0x26   :  { %94 = vrot.lane.b32.xlu0 %v93_v15, %s303_s21  ;;  %8 = vst.msk [vmem:[%s472_s1] ss:$40 sm:$0x3] %vm7_vm0, %v6_v29   ;;  %v189_v30 = vld [vmem:[#allocation0 + $0x1] ss:$-1 sm:%s188_s8]  }
  0x27   :  { %100 = vrot.lane.b32.xlu1 %v99_v16, %s304_s22  ;;  %v197_v31 = vld [vmem:[#allocation0 + $0x1] ss:$-1 sm:%s196_s9]  }
  0x28   :  { %v205_v32 = vld [vmem:[#allocation0 + $0x1] ss:$-1 sm:%s204_s14]  }
  0x29   :  { %v211_v33 = vld [vmem:[#allocation0] sm:$0x3]  }
  0x2a   :  { %106 = vrot.lane.b32.xlu0 %v105_v17, %s305_s23  ;;  %v217_v34 = vld [vmem:[#allocation0] sm:$0x3]  }
  0x2b   :  { %112 = vrot.lane.b32.xlu1 %v111_v18, %s306_s24 }
  0x2e   :  { %118 = vrot.lane.b32.xlu0 %v117_v19, %s307_s25 }
  0x2f   :  { %124 = vrot.lane.b32.xlu1 %v123_v20, %s308_s26 }
  0x32   :  { %130 = vrot.lane.b32.xlu0 %v129_v21, %s309_s28 }
  0x33   :  { %136 = vrot.lane.b32.xlu1 %v135_v22, %s310_s29 }
  0x36   :  { %142 = vrot.lane.b32.xlu0 %v141_v23, %s311_s3 }
  0x37   :  { %150 = vrot.lane.b32.xlu1 %v149_v24, %s312_s4 }
  0x3a   :  { %158 = vrot.lane.b32.xlu0 %v157_v25, %s313_s7 }
  0x3b   :  { %166 = vrot.lane.b32.xlu1 %v165_v26, %s314_s0 }
  0x3e   :  { %174 = vrot.lane.b32.xlu0 %v173_v27, %s315_s12 }
  0x3f   :  { %182 = vrot.lane.b32.xlu1 %v181_v28, %s316_s13 }
  0x42   :  { %190 = vrot.lane.b32.xlu0 %v189_v30, %s317_s15 }
  0x43   :  { %198 = vrot.lane.b32.xlu1 %v197_v31, %s318_s16 }
  0x46   :  { %206 = vrot.lane.b32.xlu0 %v205_v32, %s319_s17 }
  0x47   :  { %212 = vrot.lane.b32.xlu1 %v211_v33, %s320_s18 }
  0x4a   :  { %218 = vrot.lane.b32.xlu0 %v217_v34, %s321_s19 }
  0x7c   :  { %v11_v35 = vpop.permute.xlu0 %10  }
  0x7d   :  { %v23_v36 = vpop.permute.xlu1 %22   ;;  %223 = vst.msk [vmem:[%s472_s1 + $0x1] ss:$40 sm:$0x3] %vm7_vm0, %v11_v35  }
  0x7e   :  { %225 = vst.msk [vmem:[%s472_s1 + $0x3] ss:$40 sm:$0x3] %vm7_vm0, %v23_v36  }
  0x80   :  { %v17_v37 = vpop.permute.xlu0 %16  }
  0x81   :  { %v29_v38 = vpop.permute.xlu1 %28   ;;  %224 = vst.msk [vmem:[%s472_s1 + $0x2] ss:$40 sm:$0x3] %vm7_vm0, %v17_v37  }
  0x82   :  { %226 = vst.msk [vmem:[%s472_s1 + $0x4] ss:$40 sm:$0x3] %vm7_vm0, %v29_v38  }
  0x84   :  { %v35_v39 = vpop.permute.xlu0 %34  }
  0x85   :  { %v41_v40 = vpop.permute.xlu1 %40   ;;  %227 = vst.msk [vmem:[%s472_s1 + $0x5] ss:$40 sm:$0x3] %vm7_vm0, %v35_v39  }
  0x86   :  { %228 = vst.msk [vmem:[%s472_s1 + $0x6] ss:$40 sm:$0x3] %vm7_vm0, %v41_v40  }
  0x88   :  { %v47_v41 = vpop.permute.xlu0 %46  }
  0x89   :  { %v53_v42 = vpop.permute.xlu1 %52   ;;  %229 = vst.msk [vmem:[%s472_s1 + $0x7] ss:$40 sm:$0x3] %vm7_vm0, %v47_v41  }
  0x8a   :  { %230 = vst.msk [vmem:[%s472_s1 + $0x8] ss:$40 sm:$0x3] %vm7_vm0, %v53_v42  }
  0x8c   :  { %v59_v43 = vpop.permute.xlu0 %58  }
  0x8d   :  { %v65_v44 = vpop.permute.xlu1 %64   ;;  %231 = vst.msk [vmem:[%s472_s1 + $0x9] ss:$40 sm:$0x3] %vm7_vm0, %v59_v43  }
  0x8e   :  { %232 = vst.msk [vmem:[%s472_s1 + $0xa] ss:$40 sm:$0x3] %vm7_vm0, %v65_v44  }
  0x90   :  { %v71_v45 = vpop.permute.xlu0 %70  }
  0x91   :  { %v77_v46 = vpop.permute.xlu1 %76   ;;  %233 = vst.msk [vmem:[%s472_s1 + $0xb] ss:$40 sm:$0x3] %vm7_vm0, %v71_v45  }
  0x92   :  { %234 = vst.msk [vmem:[%s472_s1 + $0xc] ss:$40 sm:$0x3] %vm7_vm0, %v77_v46  }
  0x94   :  { %v83_v47 = vpop.permute.xlu0 %82  }
  0x95   :  { %v89_v48 = vpop.permute.xlu1 %88   ;;  %235 = vst.msk [vmem:[%s472_s1 + $0xd] ss:$40 sm:$0x3] %vm7_vm0, %v83_v47  }
  0x96   :  { %236 = vst.msk [vmem:[%s472_s1 + $0xe] ss:$40 sm:$0x3] %vm7_vm0, %v89_v48  }
  0x98   :  { %v95_v49 = vpop.permute.xlu0 %94  }
  0x99   :  { %v101_v50 = vpop.permute.xlu1 %100   ;;  %237 = vst.msk [vmem:[%s472_s1 + $0xf] ss:$40 sm:$0x3] %vm7_vm0, %v95_v49  }
  0x9a   :  { %238 = vst.msk [vmem:[%s472_s1 + $0x10] ss:$40 sm:$0x3] %vm7_vm0, %v101_v50  }
  0x9c   :  { %v107_v51 = vpop.permute.xlu0 %106  }
  0x9d   :  { %v113_v52 = vpop.permute.xlu1 %112   ;;  %239 = vst.msk [vmem:[%s472_s1 + $0x11] ss:$40 sm:$0x3] %vm7_vm0, %v107_v51  }
  0x9e   :  { %240 = vst.msk [vmem:[%s472_s1 + $0x12] ss:$40 sm:$0x3] %vm7_vm0, %v113_v52  }
  0xa0   :  { %v119_v53 = vpop.permute.xlu0 %118  }
  0xa1   :  { %v125_v54 = vpop.permute.xlu1 %124   ;;  %241 = vst.msk [vmem:[%s472_s1 + $0x13] ss:$40 sm:$0x3] %vm7_vm0, %v119_v53  }
  0xa2   :  { %242 = vst.msk [vmem:[%s472_s1 + $0x14] ss:$40 sm:$0x3] %vm7_vm0, %v125_v54  }
  0xa4   :  { %v131_v55 = vpop.permute.xlu0 %130  }
  0xa5   :  { %v137_v56 = vpop.permute.xlu1 %136   ;;  %243 = vst.msk [vmem:[%s472_s1 + $0x15] ss:$40 sm:$0x3] %vm7_vm0, %v131_v55  }
  0xa6   :  { %244 = vst.msk [vmem:[%s472_s1 + $0x16] ss:$40 sm:$0x3] %vm7_vm0, %v137_v56  }
  0xa8   :  { %v143_v57 = vpop.permute.xlu0 %142  }
  0xa9   :  { %v151_v58 = vpop.permute.xlu1 %150   ;;  %245 = vst.msk [vmem:[%s472_s1 + $0x17] ss:$40 sm:$0x3] %vm7_vm0, %v143_v57  }
  0xaa   :  { %246 = vst.msk [vmem:[%s472_s1 + $0x40] ss:$-40 sm:$0x3] %vm7_vm0, %v151_v58  }
  0xac   :  { %v159_v59 = vpop.permute.xlu0 %158  }
  0xad   :  { %v167_v60 = vpop.permute.xlu1 %166   ;;  %247 = vst.msk [vmem:[%s472_s1 + $0x41] ss:$-40 sm:$0x3] %vm7_vm0, %v159_v59  }
  0xae   :  { %248 = vst.msk [vmem:[%s472_s1 + $0x42] ss:$-40 sm:$0x3] %vm7_vm0, %v167_v60  }
  0xb0   :  { %v175_v61 = vpop.permute.xlu0 %174  }
  0xb1   :  { %v183_v62 = vpop.permute.xlu1 %182   ;;  %249 = vst.msk [vmem:[%s472_s1 + $0x43] ss:$-40 sm:$0x3] %vm7_vm0, %v175_v61  }
  0xb2   :  { %250 = vst.msk [vmem:[%s472_s1 + $0x44] ss:$-40 sm:$0x3] %vm7_vm0, %v183_v62  }
  0xb4   :  { %v191_v63 = vpop.permute.xlu0 %190  }
  0xb5   :  { %v199_v0 = vpop.permute.xlu1 %198   ;;  %251 = vst.msk [vmem:[%s472_s1 + $0x45] ss:$-40 sm:$0x3] %vm7_vm0, %v191_v63  }
  0xb6   :  { %252 = vst.msk [vmem:[%s472_s1 + $0x46] ss:$-40 sm:$0x3] %vm7_vm0, %v199_v0  }
  0xb8   :  { %v207_v1 = vpop.permute.xlu0 %206  }
  0xb9   :  { %v213_v2 = vpop.permute.xlu1 %212   ;;  %253 = vst.msk [vmem:[%s472_s1 + $0x47] ss:$-40 sm:$0x3] %vm7_vm0, %v207_v1  }
  0xba   :  { %254 = vst.msk [vmem:[%s472_s1 + $0x20] ss:$40 sm:$0x3] %vm7_vm0, %v213_v2  }
  0xbc   :  { %v219_v3 = vpop.permute.xlu0 %218  }
  0xbd   :  { %255 = vst.msk [vmem:[%s472_s1 + $0x21] ss:$40 sm:$0x3] %vm7_vm0, %v219_v3  }

// kernel: discriminator_p_forward.1
= control target key start
LH: loop header
LB: loop body
LE: loop exit
PB: predicated region body
PF: predicated region fallthrough
CT: control target
= control target key end

     0   :  { %s6625_s0 = inlined_call_operand.vmem [shape: f32[2,24,5], index: 0, kind: input, shape index: {}]   ;;  %s6626_s1 = inlined_call_operand.vmem [shape: f32[8,6], index: 1, kind: input, shape index: {}]   ;;  %s6627_s2 = inlined_call_operand.vmem [shape: f32[8,1], index: 2, kind: input, shape index: {}]   ;;  %s6628_s3 = inlined_call_operand.vmem [shape: f32[8,6], index: 3, kind: input, shape index: {}]   ;;  %s6629_s4 = inlined_call_operand.vmem [shape: f32[8,1], index: 4, kind: input, shape index: {}]   ;;  %s6630_s5 = inlined_call_operand.vmem [shape: f32[8,1], index: 5, kind: input, shape index: {}]   ;;  %s6631_s6 = inlined_call_operand.vmem [shape: f32[8,1], index: 6, kind: input, shape index: {}]   ;;  %s6632_s7 = inlined_call_operand.vmem [shape: f32[2,8,1], index: 7, kind: input, shape index: {}]   ;;  %s6633_s8 = inlined_call_operand.vmem [shape: bf16[32,8], index: 8, kind: input, shape index: {}]   ;;  %s6634_s9 = inlined_call_operand.vmem [shape: f32[32,1], index: 9, kind: input, shape index: {}]   ;;  %s6635_s10 = inlined_call_operand.vmem [shape: bf16[16,32], index: 10, kind: input, shape index: {}]   ;;  %s6636_s11 = inlined_call_operand.vmem [shape: f32[16,1], index: 11, kind: input, shape index: {}]   ;;  %s6637_s12 = inlined_call_operand.vmem [shape: f32[16,6], index: 12, kind: input, shape index: {}]   ;;  %s6638_s13 = inlined_call_operand.vmem [shape: f32[16,1], index: 13, kind: input, shape index: {}]   ;;  %s6639_s14 = inlined_call_operand.vmem [shape: f32[16,1], index: 14, kind: input, shape index: {}]   ;;  %s6640_s15 = inlined_call_operand.vmem [shape: f32[16,1], index: 15, kind: input, shape index: {}]   ;;  %s6641_s16 = inlined_call_operand.vmem [shape: f32[2,16,1], index: 16, kind: input, shape index: {}]   ;;  %s6642_s17 = inlined_call_operand.vmem [shape: bf16[64,16], index: 17, kind: input, shape index: {}]   ;;  %s6643_s18 = inlined_call_operand.vmem [shape: f32[64,1], index: 18, kind: input, shape index: {}]   ;;  %s6644_s19 = inlined_call_operand.vmem [shape: bf16[32,64], index: 19, kind: input, shape index: {}]   ;;  %s6645_s20 = inlined_call_operand.vmem [shape: f32[32,1], index: 20, kind: input, shape index: {}]   ;;  %s6646_s21 = inlined_call_operand.vmem [shape: f32[32,3], index: 21, kind: input, shape index: {}]   ;;  %s6647_s22 = inlined_call_operand.<no memory space> [shape: f32[1,1], index: 22, kind: input, shape index: {}]   ;;  %s6648_s23 = inlined_call_operand.vmem [shape: f32[2,3,4,8,6], index: 23, kind: output, shape index: {0}]   ;;  %s6649_s24 = inlined_call_operand.vmem [shape: f32[2,3,2,16,7], index: 24, kind: output, shape index: {1}]   ;;  %s6650_s25 = inlined_call_operand.vmem [shape: f32[2,3,32,7], index: 25, kind: output, shape index: {2}]   ;;  %s6651_s26 = inlined_call_operand.vmem [shape: f32[2,3,5], index: 26, kind: output, shape index: {3}]  }
   0x1   :  { %6668 = sst [smem:[#allocation17_spill]] %s6625_s0  ;;  %v32_v0 = vstv %s6647_s22 }
   0x2   :  { %6669 = sst [smem:[#allocation18_spill]] %s6626_s1  ;;  %33 = vst [vmem:[#allocation4] sm:$0x1] %v32_v0 }
   0x3   :  { %6670 = sst [smem:[#allocation19_spill]] %s6627_s2 }
   0x4   :  { %6671 = sst [smem:[#allocation20_spill]] %s6628_s3 }
   0x5   :  { %6672 = sst [smem:[#allocation21_spill]] %s6629_s4 }
   0x6   :  { %6673 = sst [smem:[#allocation22_spill]] %s6630_s5 }
   0x7   :  { %6674 = sst [smem:[#allocation23_spill]] %s6631_s6 }
   0x8   :  { %6675 = sst [smem:[#allocation24_spill]] %s6632_s7  ;;  %s5062_s7 = smov 0  }
   0x9   :  { %6676 = sst [smem:[#allocation25_spill]] %s6633_s8 }
   0xa   :  { %6677 = sst [smem:[#allocation26_spill]] %s6634_s9 }
   0xb   :  { %6678 = sst [smem:[#allocation27_spill]] %s6635_s10 }
   0xc LB: > { %s4438_s28 = sadd.s32 4294967295, %s4896_s7   ;;  %p4442_p0 = scmp.ge.s32.totalorder %s4896_s7, 1  ;;  %s4896_s7 = sphi %s5062_s7, %s39_s7  }
   0xd   : > { %p740_p1 = scmp.lt.s32.totalorder %s4896_s7, 3 }
   0xf   : > { %p741_p2 = pnand %p4442_p0, %p740_p1 }
  0x11   : > { %744 = sbr.rel (%p741_p2) target bundleno = 2619 (0xa3b), region = 112 }
  0x18   : > { %s6679_s29 = sld [smem:[#allocation18_spill]]  ;;  %v6656_v2 = vmov 1   ;;  %v6660_v3 = vmov 3   ;;  %v6654_v4 = vmov 2   ;;  %v6664_v5 = vmov 4   ;;  %p833_p3 = scmp.lt.s32.totalorder %s4438_s28, 1 }
  0x19   : > { %4733 = vset.pattern.permute.xlu1 %v6656_v2  ;;  %4732 = vset.pattern.permute.xlu0 %v6656_v2  ;;  %v6662_v6 = vmov 5   ;;  %v6658_v7 = vmov 0   ;;  %s6680_s30 = sld [smem:[#allocation17_spill]]  ;;  %s4904_s5 = smov 127   ;;  %vm867_vm0 = vcmask 48128   ;;  %vm1024_vm13 = vcmask 48144  }
  0x1a   : > { %s6721_s28 = smov (!%p833_p3, %s4438_s28), 1  ;;  %s6682_s1 = sld [smem:[#allocation19_spill]]  ;;  %vm1107_vm14 = vcmask 48136   ;;  %vm1194_vm15 = vcmask 39944  }
  0x1b   : > { %s4696_s22 = smul.u32 24, %s6721_s28  ;;  %s6685_s8 = sld [smem:[#allocation20_spill]] }
  0x1c   : > { %s5484_s4 = smul.u32 96, %s6721_s28  ;;  %s4906_s9 = smov 2  }
  0x1d   : > { %s6713_s6 = sld [smem:[#allocation21_spill]]  ;;  %s6714_s3 = sld [smem:[#allocation22_spill]] }
  0x1e   : > { %v5073_v1 = vld [vmem:[%s6679_s29] sm:$0xff]  ;;  %s5497_s0 = scalar_lea.vmem %s6648_s23, %s5484_s4  ;;  %s4909_s27 = smov 9  }
  0x1f   : > { %1668 = vperm.xlu1 %4733, %v5073_v1   ;;  %1304 = vperm.xlu0 %4732, %v5073_v1   ;;  %s5151_s2 = scalar_lea.vmem %s6680_s30, %s4696_s22  ;;  %s4907_s30 = smov 1  }
  0x20   : > { %v5155_v8 = vld [vmem:[%s5151_s2 + $0x8] ss:$0 sm:$0xff]  ;;  %v5158_v10 = vld [vmem:[%s5151_s2 + $0x10] ss:$0 sm:$0xff]  ;;  %v5180_v19 = vld [vmem:[%s5151_s2 + $0x1] ss:$0 sm:$0xff] }
  0x21   : > { %v5187_v22 = vld [vmem:[%s5151_s2 + $0x12] ss:$0 sm:$0xff]  ;;  %v5205_v29 = vld [vmem:[%s5151_s2 + $0x13] ss:$0 sm:$0xff]  ;;  %v5223_v38 = vld [vmem:[%s5151_s2 + $0x4] ss:$0 sm:$0xff] }
  0x22   : > { %v5236_v44 = vld [vmem:[%s5151_s2 + $0x9] ss:$0 sm:$0xff]  ;;  %v5242_v47 = vld [vmem:[%s5151_s2] ss:$0 sm:$0xff]  ;;  %v5255_v55 = vld [vmem:[%s5151_s2 + $0xa] ss:$0 sm:$0xff] }
  0x23   : > { %4738 = vset.pattern.permute.xlu0 %v6660_v3  ;;  %937 = vperm.xlu1 %4733, %v5073_v1   ;;  %v5270_v61 = vld [vmem:[%s5151_s2 + $0x11] ss:$0 sm:$0xff]  ;;  %v5282_v0 = vld [vmem:[%s6682_s1] sm:$0xff]  ;;  %s6715_s22 = sld [smem:[#allocation23_spill]]  ;;  %s4914_s29 = smov 108  }
  0x24   : > { %1596 = vperm.xlu0 %4738, %v5073_v1   ;;  %s4917_s10 = smov 117  }
  0x27   : > { %4734 = vset.pattern.permute.xlu1 %v6660_v3 }
  0x28   : > { %1232 = vperm.xlu0 %4738, %v5073_v1   ;;  %1334 = vperm.xlu1 %4734, %v5073_v1  }
  0x2c   : > { %1792 = vperm.xlu0 %4738, %v5073_v1   ;;  %4735 = vset.pattern.permute.xlu1 %v6654_v4 }
  0x2d   : > { %952 = vperm.xlu1 %4735, %v5073_v1  }
  0x30   : > { %4757 = vset.pattern.permute.xlu0 %v6664_v5 }
  0x31   : > { %1349 = vperm.xlu0 %4757, %v5073_v1   ;;  %4736 = vset.pattern.permute.xlu1 %v6660_v3 }
  0x32   : > { %1698 = vperm.xlu1 %4736, %v5073_v1  }
  0x35   : > { %1975 = vperm.xlu0 %4757, %v5073_v1  }
  0x36   : > { %967 = vperm.xlu1 %4736, %v5073_v1  }
  0x39   : > { %1439 = vperm.xlu0 %4757, %v5073_v1  }
  0x3a   : > { %4737 = vset.pattern.permute.xlu1 %v6664_v5 }
  0x3b   : > { %1713 = vperm.xlu1 %4737, %v5073_v1  }
  0x3d   : > { %1521 = vperm.xlu0 %4757, %v5073_v1  }
  0x3f   : > { %982 = vperm.xlu1 %4737, %v5073_v1  }
  0x41   : > { %4761 = vset.pattern.permute.xlu0 %v6654_v4 }
  0x42   : > { %1319 = vperm.xlu0 %4761, %v5073_v1  }
  0x43   : > { %4739 = vset.pattern.permute.xlu1 %v6662_v6 }
  0x44   : > { %1728 = vperm.xlu1 %4739, %v5073_v1  }
  0x46   : > { %1683 = vperm.xlu0 %4761, %v5073_v1  }
  0x48   : > { %997 = vperm.xlu1 %4739, %v5073_v1  }
  0x4a   : > { %1051 = vperm.xlu0 %4761, %v5073_v1  }
  0x4c   : > { %4740 = vset.pattern.permute.xlu1 %v6664_v5 }
  0x4d   : > { %1611 = vperm.xlu1 %4740, %v5073_v1  }
  0x4e   : > { %1949 = vperm.xlu0 %4761, %v5073_v1  }
  0x51   : > { %4741 = vset.pattern.permute.xlu1 %v6660_v3 }
  0x52   : > { %4764 = vset.pattern.permute.xlu0 %v6662_v6  ;;  %1960 = vperm.xlu1 %4741, %v5073_v1  }
  0x53   : > { %1364 = vperm.xlu0 %4764, %v5073_v1  }
  0x56   : > { %4742 = vset.pattern.permute.xlu1 %v6662_v6 }
  0x57   : > { %1532 = vperm.xlu0 %4764, %v5073_v1   ;;  %1896 = vperm.xlu1 %4742, %v5073_v1  }
  0x5b   : > { %1626 = vperm.xlu0 %4764, %v5073_v1   ;;  %1990 = vperm.xlu1 %4742, %v5073_v1  }
  0x5f   : > { %4743 = vset.pattern.permute.xlu1 %v6658_v7 }
  0x60   : > { %1294 = vperm.xlu1 %4743, %v5073_v1  }
  0x64   : > { %4744 = vset.pattern.permute.xlu1 %v6656_v2 }
  0x65   : > { %1406 = vperm.xlu1 %4744, %v5073_v1  }
  0x69   : > { %4745 = vset.pattern.permute.xlu1 %v6658_v7 }
  0x6a   : > { %1658 = vperm.xlu1 %4745, %v5073_v1  }
  0x6e   : > { %4746 = vset.pattern.permute.xlu1 %v6654_v4 }
  0x6f   : > { %1417 = vperm.xlu1 %4746, %v5073_v1  }
  0x73   : > { %4747 = vset.pattern.permute.xlu1 %v6656_v2 }
  0x74   : > { %1488 = vperm.xlu1 %4747, %v5073_v1  }
  0x78   : > { %1770 = vperm.xlu1 %4747, %v5073_v1  }
  0x7c   : > { %1040 = vperm.xlu1 %4747, %v5073_v1  }
  0x80   : > { %4748 = vset.pattern.permute.xlu1 %v6660_v3 }
  0x81   : > { %1428 = vperm.xlu1 %4748, %v5073_v1  }
  0x85   : > { %4749 = vset.pattern.permute.xlu1 %v6654_v4 }
  0x86   : > { %1499 = vperm.xlu1 %4749, %v5073_v1  }
  0x8a   : > { %4750 = vset.pattern.permute.xlu1 %v6656_v2 }
  0x8b   : > { %1574 = vperm.xlu1 %4750, %v5073_v1  }
  0x8f   : > { %4751 = vset.pattern.permute.xlu1 %v6654_v4 }
  0x90   : > { %1781 = vperm.xlu1 %4751, %v5073_v1  }
  0x94   : > { %4752 = vset.pattern.permute.xlu1 %v6656_v2 }
  0x95   : > { %1852 = vperm.xlu1 %4752, %v5073_v1  }
  0x99   : > { %4753 = vset.pattern.permute.xlu1 %v6662_v6 }
  0x9a   : > { %1167 = vperm.xlu1 %4753, %v5073_v1  }
  0x9e   : > { %v1669_v9 = vpop.permute.xlu1 %1668  ;;  %v1305_v11 = vpop.permute.xlu0 %1304  ;;  %4754 = vset.pattern.permute.xlu1 %v6664_v5 }
  0x9f   : > { %v1311_v12 = vmul.f32 %v5155_v8, %v1305_v11  ;;  %1247 = vperm.xlu1 %4754, %v5073_v1   ;;  %v1675_v13 = vmul.f32 %v5158_v10, %v1669_v9  ;;  %v5289_v9 = vld [vmem:[%s5151_s2 + $0xb] ss:$0 sm:$0xff]  ;;  %v5297_v11 = vld [vmem:[%s5151_s2 + $0x2] ss:$0 sm:$0xff] }
  0xa1   : > { %1313 = vrot.lane.b32.xlu0 %v1311_v12, %s4904_s5 }
  0xa2   : > { %v5165_v14 = vpop.permute.xlu1 %937 }
  0xa3   : > { %v1597_v15 = vpop.permute.xlu0 %1596  ;;  %4755 = vset.pattern.permute.xlu1 %v6660_v3  ;;  %v944_v49 = vmul.f32 %v5242_v47, %v5165_v14 }
  0xa4   : > { %1510 = vperm.xlu1 %4755, %v5073_v1   ;;  %v1603_v34 = vmul.f32 %v5155_v8, %v1597_v15  ;;  %v5310_v15 = vld [vmem:[%s5151_s2 + $0xc] ss:$0 sm:$0xff] }
  0xa5   : > { %1677 = vrot.lane.b32.xlu0 %v1675_v13, %s4904_s5 }
  0xa7   : > { %v5170_v16 = vpop.permute.xlu0 %1232  ;;  %v5172_v17 = vpop.permute.xlu1 %1334 }
  0xa8   : > { %4756 = vset.pattern.permute.xlu1 %v6654_v4  ;;  %v1341_v58 = vmul.f32 %v5255_v55, %v5172_v17 }
  0xa9   : > { %1585 = vperm.xlu1 %4756, %v5073_v1   ;;  %1084 = vperm.xlu0 %4764, %v5073_v1  }
  0xab   : > { %v5177_v18 = vpop.permute.xlu0 %1792 }
  0xac   : > { %v953_v20 = vpop.permute.xlu1 %952 }
  0xad   : > { %1863 = vperm.xlu1 %4756, %v5073_v1   ;;  %4768 = vset.pattern.permute.xlu0 %v6656_v2  ;;  %v959_v21 = vmul.f32 %v5180_v19, %v953_v20 }
  0xae   : > { %1938 = vperm.xlu0 %4768, %v5073_v1  }
  0xb0   : > { %v5189_v23 = vpop.permute.xlu0 %1349 }
  0xb1   : > { %4758 = vset.pattern.permute.xlu1 %v6658_v7  ;;  %v1699_v24 = vpop.permute.xlu1 %1698 }
  0xb2   : > { %v1705_v25 = vmul.f32 %v5187_v22, %v1699_v24  ;;  %1928 = vperm.xlu1 %4758, %v5073_v1   ;;  %961 = vrot.lane.b32.xlu0 %v959_v21, %s4904_s5  ;;  %v5318_v21 = vld [vmem:[%s5151_s2 + $0x3] ss:$0 sm:$0xff] }
  0xb4   : > { %v5195_v26 = vpop.permute.xlu0 %1975 }
  0xb5   : > { %v5197_v27 = vpop.permute.xlu1 %967 }
  0xb6   : > { %4759 = vset.pattern.permute.xlu1 %v6660_v3  ;;  %1707 = vrot.lane.b32.xlu0 %v1705_v25, %s4904_s5  ;;  %v974_v13 = vmul.f32 %v5297_v11, %v5197_v27  ;;  %v5332_v27 = vld [vmem:[%s5151_s2 + $0x14] ss:$0 sm:$0xff] }
  0xb7   : > { %1062 = vperm.xlu1 %4759, %v5073_v1  }
  0xb8   : > { %v5202_v28 = vpop.permute.xlu0 %1439 }
  0xba   : > { %v1714_v30 = vpop.permute.xlu1 %1713 }
  0xbb   : > { %v1720_v31 = vmul.f32 %v5205_v29, %v1714_v30  ;;  %4760 = vset.pattern.permute.xlu1 %v6662_v6 }
  0xbc   : > { %v5209_v32 = vpop.permute.xlu0 %1521  ;;  %1262 = vperm.xlu1 %4760, %v5073_v1  }
  0xbd   : > { %1722 = vrot.lane.b32.xlu0 %v1720_v31, %s4904_s5 }
  0xbe   : > { %v5213_v33 = vpop.permute.xlu1 %982 }
  0xbf   : > { %v989_v24 = vmul.f32 %v5318_v21, %v5213_v33 }
  0xc0   : > { %1450 = vperm.xlu1 %4760, %v5073_v1  }
  0xc1   : > { %v1320_v35 = vpop.permute.xlu0 %1319  ;;  %1605 = vrot.lane.b32.xlu0 %v1603_v34, %s4904_s5 }
  0xc2   : > { %v1326_v45 = vmul.f32 %v5236_v44, %v1320_v35 }
  0xc3   : > { %v5218_v36 = vpop.permute.xlu1 %1728 }
  0xc4   : > { %4762 = vset.pattern.permute.xlu1 %v6664_v5  ;;  %v1735_v30 = vmul.f32 %v5332_v27, %v5218_v36 }
  0xc5   : > { %v1684_v37 = vpop.permute.xlu0 %1683  ;;  %1803 = vperm.xlu1 %4762, %v5073_v1  }
  0xc6   : > { %v1690_v62 = vmul.f32 %v5270_v61, %v1684_v37 }
  0xc7   : > { %v998_v39 = vpop.permute.xlu1 %997 }
  0xc8   : > { %v1004_v40 = vmul.f32 %v5223_v38, %v998_v39 }
  0xc9   : > { %v5226_v41 = vpop.permute.xlu0 %1051  ;;  %4763 = vset.pattern.permute.xlu1 %v6660_v3 }
  0xca   : > { %1874 = vperm.xlu1 %4763, %v5073_v1   ;;  %1006 = vrot.lane.b32.xlu0 %v1004_v40, %s4904_s5  ;;  %v1982_v40 = vmul.f32 %v5270_v61, %v5195_v26 }
  0xcc   : > { %v5231_v42 = vpop.permute.xlu1 %1611 }
  0xcd   : > { %v5233_v43 = vpop.permute.xlu0 %1949  ;;  %v1618_v34 = vmul.f32 %v5236_v44, %v5231_v42 }
  0xce   : > { %6681 = vst [vmem:[#allocation5_spill] sm:$0xff] %v5233_v43  ;;  %4765 = vset.pattern.permute.xlu1 %v6664_v5 }
  0xcf   : > { %1073 = vperm.xlu1 %4765, %v5073_v1  }
  0xd1   : > { %v1961_v46 = vpop.permute.xlu1 %1960 }
  0xd2   : > { %v1365_v48 = vpop.permute.xlu0 %1364  ;;  %v1967_v53 = vmul.f32 %v5158_v10, %v1961_v46 }
  0xd3   : > { %1328 = vrot.lane.b32.xlu1 %v1326_v45, %s4904_s5  ;;  %v1371_v20 = vmul.f32 %v5310_v15, %v1365_v48 }
  0xd4   : > { %4766 = vset.pattern.permute.xlu1 %v6662_v6 }
  0xd6   : > { %v1533_v50 = vpop.permute.xlu0 %1532  ;;  %v1897_v51 = vpop.permute.xlu1 %1896 }
  0xd7   : > { %v1539_v52 = vmul.f32 %v5155_v8, %v1533_v50  ;;  %946 = vrot.lane.b32.xlu1 %v944_v49, %s4904_s5  ;;  %v1903_v56 = vmul.f32 %v5158_v10, %v1897_v51  ;;  %v1356_v10 = vmul.f32 %v5289_v9, %v5189_v23 }
  0xd9   : > { %1541 = vrot.lane.b32.xlu0 %v1539_v52, %s4904_s5 }
  0xda   : > { %v1991_v54 = vpop.permute.xlu1 %1990  ;;  %v1627_v35 = vpop.permute.xlu0 %1626 }
  0xdb   : > { %1814 = vperm.xlu1 %4766, %v5073_v1   ;;  %v1997_v59 = vmul.f32 %v5187_v22, %v1991_v54  ;;  %v1633_v37 = vmul.f32 %v5255_v55, %v1627_v35 }
  0xdd   : > { %1969 = vrot.lane.b32.xlu0 %v1967_v53, %s4904_s5 }
  0xdf   : > { %4767 = vset.pattern.permute.xlu1 %v6664_v5  ;;  %v5259_v57 = vpop.permute.xlu1 %1294 }
  0xe0   : > { %1885 = vperm.xlu1 %4767, %v5073_v1  }
  0xe1   : > { %1905 = vrot.lane.b32.xlu0 %v1903_v56, %s4904_s5 }
  0xe4   : > { %1343 = vrot.lane.b32.xlu1 %v1341_v58, %s4904_s5  ;;  %v5267_v60 = vpop.permute.xlu1 %1406  ;;  %v1239_v58 = vmul.f32 %v5242_v47, %v5170_v16  ;;  %v5413_v16 = vld [vmem:[%s6685_s8] sm:$0xff]  ;;  %s5959_s8 = scalar_lea.vmem %s6649_s24, %s5484_s4 }
  0xe5   : > { %1999 = vrot.lane.b32.xlu0 %v1997_v59, %s4904_s5  ;;  %4769 = vset.pattern.permute.xlu1 %v6658_v7  ;;  %6686 = vst [vmem:[#allocation8_spill] sm:$0xff] %v5413_v16 }
  0xe8   : > { %1692 = vrot.lane.b32.xlu1 %v1690_v62, %s4904_s5 }
  0xe9   : > { %1123 = vperm.xlu0 %4768, %v5073_v1   ;;  %v5277_v63 = vpop.permute.xlu1 %1658 }
  0xec   : > { %1462 = vperm.xlu1 %4769, %v5282_v0  }
  0xed   : > { %1210 = vperm.xlu0 %4768, %v5073_v1  }
  0xee   : > { %v5286_v8 = vpop.permute.xlu1 %1417 }
  0xf0   : > { %1013 = vperm.xlu1 %4769, %v5282_v0  }
  0xf1   : > { %4772 = vset.pattern.permute.xlu0 %v6658_v7 }
  0xf2   : > { %1396 = vperm.xlu0 %4772, %v5073_v1  }
  0xf3   : > { %v5299_v12 = vpop.permute.xlu1 %1488 }
  0xf4   : > { %1358 = vrot.lane.b32.xlu1 %v1356_v10, %s4904_s5 }
  0xf6   : > { %927 = vperm.xlu0 %4772, %v5073_v1  }
  0xf7   : > { %v5305_v14 = vpop.permute.xlu1 %1770 }
  0xf8   : > { %976 = vrot.lane.b32.xlu1 %v974_v13, %s4904_s5 }
  0xfa   : > { %1478 = vperm.xlu0 %4772, %v5073_v1  }
  0xfb   : > { %v5312_v17 = vpop.permute.xlu1 %1040 }
  0xfc   : > { %1826 = vperm.xlu1 %4769, %v5282_v0  }
  0xfe   : > { %1760 = vperm.xlu0 %4772, %v5073_v1  }
 0x100   : > { %1373 = vrot.lane.b32.xlu1 %v1371_v20, %s4904_s5  ;;  %v5321_v23 = vpop.permute.xlu1 %1428 }
 0x102   : > { %1030 = vperm.xlu0 %4772, %v5073_v1  }
 0x104   : > { %991 = vrot.lane.b32.xlu1 %v989_v24, %s4904_s5 }
 0x105   : > { %v5327_v25 = vpop.permute.xlu1 %1499 }
 0x106   : > { %1564 = vperm.xlu0 %4772, %v5073_v1  }
 0x108   : > { %1912 = vperm.xlu1 %4769, %v5282_v0  }
 0x10a   : > { %1842 = vperm.xlu0 %4772, %v5073_v1   ;;  %v5337_v31 = vpop.permute.xlu1 %1574 }
 0x10c   : > { %1737 = vrot.lane.b32.xlu1 %v1735_v30, %s4904_s5 }
 0x10e   : > { %1380 = vperm.xlu0 %4772, %v5282_v0  }
 0x10f   : > { %v5341_v33 = vpop.permute.xlu1 %1781 }
 0x110   : > { %2006 = vperm.xlu1 %4769, %v5282_v0  }
 0x112   : > { %1744 = vperm.xlu0 %4772, %v5282_v0  }
 0x113   : > { %v5358_v45 = vpop.permute.xlu0 %1313 }
 0x114   : > { %1620 = vrot.lane.b32.xlu1 %v1618_v34, %s4904_s5  ;;  %v5348_v36 = vpop.permute.xlu1 %1852 }
 0x116   : > { %1548 = vperm.xlu0 %4772, %v5282_v0  }
 0x117   : > { %v5366_v26 = vpop.permute.xlu0 %1677 }
 0x118   : > { %1635 = vrot.lane.b32.xlu1 %v1633_v37, %s4904_s5 }
 0x119   : > { %v1168_v39 = vpop.permute.xlu1 %1167 }
 0x11a   : > { %1096 = vperm.xlu0 %4772, %v5282_v0  }
 0x11c   : > { %1984 = vrot.lane.b32.xlu1 %v1982_v40, %s4904_s5 }
 0x11e   : > { %1642 = vperm.xlu0 %4772, %v5282_v0   ;;  %v1248_v42 = vpop.permute.xlu1 %1247 }
 0x11f   : > { %v1254_v49 = vmul.f32 %v5180_v19, %v1248_v42 }
 0x120   : > { %1113 = vperm.xlu1 %4769, %v5073_v1  }
 0x122   : > { %1278 = vperm.xlu0 %4772, %v5282_v0  }
 0x123   : > { %v5362_v46 = vpop.permute.xlu1 %1510 }
 0x124   : > { %4770 = vset.pattern.permute.xlu1 %v6654_v4 }
 0x125   : > { %1134 = vperm.xlu1 %4770, %v5073_v1  }
 0x126   : > { %4776 = vset.pattern.permute.xlu0 %v6654_v4 }
 0x127   : > { %1221 = vperm.xlu0 %4776, %v5073_v1  }
 0x128   : > { %v5370_v48 = vpop.permute.xlu1 %1585  ;;  %v5374_v50 = vpop.permute.xlu0 %1084 }
 0x129   : > { %4771 = vset.pattern.permute.xlu1 %v6658_v7 }
 0x12a   : > { %1200 = vperm.xlu1 %4771, %v5073_v1  }
 0x12b   : > { %1256 = vrot.lane.b32.xlu0 %v1254_v49, %s4904_s5 }
 0x12c   : > { %v5378_v51 = vpop.permute.xlu1 %1863 }
 0x12d   : > { %v5382_v52 = vpop.permute.xlu0 %1938 }
 0x12e   : > { %4773 = vset.pattern.permute.xlu1 %v6660_v3  ;;  %6683 = vst [vmem:[#allocation6_spill] sm:$0xff] %v5382_v52 }
 0x12f   : > { %1145 = vperm.xlu1 %4773, %v5073_v1  }
 0x131   : > { %v5384_v53 = vpop.permute.xlu1 %1928  ;;  %v5388_v54 = vpop.permute.xlu0 %961 }
 0x132   : > { %6684 = vst [vmem:[#allocation7_spill] sm:$0xff] %v5384_v53 }
 0x133   : > { %4774 = vset.pattern.permute.xlu1 %v6664_v5  ;;  %v1413_v5 = vmul.f32 %v5255_v55, %v5267_v60 }
 0x134   : > { %1156 = vperm.xlu1 %4774, %v5073_v1   ;;  %v1174_v1 = vmul.f32 %v5242_v47, %v1168_v39 }
 0x135   : > { %v5396_v62 = vpop.permute.xlu0 %1707 }
 0x136   : > { %v5390_v56 = vpop.permute.xlu1 %1062 }
 0x138   : > { %4775 = vset.pattern.permute.xlu1 %v6658_v7 }
 0x139   : > { %1183 = vperm.xlu1 %4775, %v5282_v0   ;;  %v5404_v13 = vpop.permute.xlu0 %1722 }
 0x13b   : > { %v1263_v59 = vpop.permute.xlu1 %1262 }
 0x13c   : > { %v1269_v0 = vmul.f32 %v5297_v11, %v1263_v59 }
 0x13d   : > { %1241 = vrot.lane.b32.xlu1 %v1239_v58, %s4904_s5  ;;  %v5415_v24 = vpop.permute.xlu0 %1605 }
 0x13e   : > { %4777 = vset.pattern.permute.xlu1 %v6654_v4  ;;  %6687 = vst [vmem:[#allocation9_spill] sm:$0xff] %v5415_v24 }
 0x13f   : > { %v5401_v10 = vpop.permute.xlu1 %1450 }
 0x141   : > { %1176 = vrot.lane.b32.xlu1 %v1174_v1, %s4904_s5  ;;  %v5421_v30 = vpop.permute.xlu0 %1006 }
 0x144   : > { %v5407_v20 = vpop.permute.xlu1 %1803 }
 0x145   : > { %1271 = vrot.lane.b32.xlu1 %v1269_v0, %s4904_s5 }
 0x149   : > { %v5417_v47 = vpop.permute.xlu1 %1874  ;;  %2243 = vperm.xlu1 %4777, %v5413_v16   ;;  %v5467_v16 = vld [vmem:[%s5151_s2 + $0xf] ss:$0 sm:$0xff] }
 0x14a   : > { %6688 = vst [vmem:[#allocation10_spill] sm:$0xff] %v5417_v47 }
 0x14b   : > { %v5425_v35 = vpop.permute.xlu0 %1541 }
 0x14d   : > { %4778 = vset.pattern.permute.xlu1 %v6660_v3 }
 0x14e   : > { %v5423_v34 = vpop.permute.xlu1 %1073 }
 0x14f   : > { %v5427_v40 = vpop.permute.xlu0 %1969 }
 0x150   : > { %6689 = vst [vmem:[#allocation11_spill] sm:$0xff] %v5427_v40 }
 0x152   : > { %v1329_v37 = vpop.permute.xlu1 %1328 }
 0x153   : > { %v5431_v49 = vpop.permute.xlu0 %1905 }
 0x154   : > { %6690 = vst [vmem:[#allocation12_spill] sm:$0xff] %v5431_v49 }
 0x156   : > { %v947_v39 = vpop.permute.xlu1 %946 }
 0x157   : > { %v5437_v1 = vpop.permute.xlu0 %1999 }
 0x158   : > { %6692 = vst [vmem:[#allocation14_spill] sm:$0xff] %v5437_v1  ;;  %v1424_v1 = vmul.f32 %v5289_v9, %v5286_v8 }
 0x15a   : > { %v5429_v42 = vpop.permute.xlu1 %1814 }
 0x15f   : > { %v5433_v58 = vpop.permute.xlu1 %1885 }
 0x160   : > { %6691 = vst [vmem:[#allocation13_spill] sm:$0xff] %v5433_v58  ;;  %v5457_v58 = vld [vmem:[%s5151_s2 + $0x7] ss:$0 sm:$0xff] }
 0x163   : > { %v5435_v59 = vpop.permute.xlu1 %1343 }
 0x167   : > { %v1693_v0 = vpop.permute.xlu1 %1692 }
 0x168   : > { %v5439_v4 = vpop.permute.xlu0 %1123 }
 0x169   : > { %6693 = vst [vmem:[#allocation15_spill] sm:$0xff] %v5439_v4 }
 0x16b   : > { %v5441_v2 = vpop.permute.xlu1 %1462 }
 0x16c   : > { %v5443_v7 = vpop.permute.xlu0 %1210 }
 0x16d   : > { %6694 = vst [vmem:[#allocation16_spill] sm:$0xff] %v5443_v7  ;;  %v1435_v7 = vmul.f32 %v5310_v15, %v5321_v23 }
 0x16f   : > { %v5445_v3 = vpop.permute.xlu1 %1013 }
 0x171   : > { %v1397_v6 = vpop.permute.xlu0 %1396 }
 0x172   : > { %v1403_v40 = vmul.f32 %v5236_v44, %v1397_v6 }
 0x173   : > { %v5450_v43 = vpop.permute.xlu1 %1358 }
 0x174   : > { %v1414_v4 = vadd.f32 %v1413_v5, %v1403_v40  ;;  %v5464_v40 = vld [vmem:[%s5151_s2 + $0xd] ss:$0 sm:$0xff] }
 0x175   : > { %v928_v49 = vpop.permute.xlu0 %927 }
 0x176   : > { %v1425_v53 = vadd.f32 %v1424_v1, %v1414_v4  ;;  %v934_v44 = vmul.f32 %v5457_v58, %v928_v49  ;;  %v5470_v4 = vld [vmem:[%s5151_s2 + $0x17] ss:$0 sm:$0xff]  ;;  %v1301_v49 = vmul.f32 %v5467_v16, %v5259_v57  ;;  %v1777_v1 = vmul.f32 %v5187_v22, %v5305_v14  ;;  %v5500_v22 = vld [vmem:[%s5151_s2 + $0xe] ss:$0 sm:$0xff] }
 0x177   : > { %v977_v52 = vpop.permute.xlu1 %976 }
 0x178   : > { %v1436_v24 = vadd.f32 %v1435_v7, %v1425_v53  ;;  %v949_v47 = vadd.f32 %v947_v39, %v934_v44  ;;  %v1495_v7 = vmul.f32 %v5310_v15, %v5299_v12  ;;  %v1446_v39 = vmul.f32 %v5464_v40, %v5202_v28 }
 0x179   : > { %v1479_v55 = vpop.permute.xlu0 %1478  ;;  %v1316_v57 = vadd.f32 %v5358_v45, %v1301_v49  ;;  %v4905_v45 = vmov 0.0  }
 0x17a   : > { %v1485_v8 = vmul.f32 %v5289_v9, %v1479_v55  ;;  %v1665_v9 = vmul.f32 %v5470_v4, %v5277_v63  ;;  %v964_v63 = vadd.f32 %v5388_v54, %v949_v47  ;;  %v1447_v15 = vadd.f32 %v1446_v39, %v1436_v24  ;;  %4456 = vst.msk [vmem:[%s5497_s0 + $0x20] sm:$0xff] %vm867_vm0, %v4905_v45 }
 0x17b   : > { %v5459_v6 = vpop.permute.xlu1 %1826  ;;  %v1331_v14 = vadd.f32 %v1329_v37, %v1316_v57  ;;  %868 = vst.msk [vmem:[%s5497_s0] sm:$0xff] %vm867_vm0, %v4905_v45  ;;  %4451 = vst.msk [vmem:[%s5497_s0 + $0x8] sm:$0xff] %vm867_vm0, %v4905_v45  ;;  %4665 = vmatprep.subr.bf16.mxu1 %v4905_v45  ;;  %v1457_v54 = vmul.f32 %v5500_v22, %v5401_v10 }
 0x17c   : > { %v1496_v55 = vadd.f32 %v1495_v7, %v1485_v8  ;;  %v1680_v12 = vadd.f32 %v5366_v26, %v1665_v9  ;;  %4452 = vst.msk [vmem:[%s5497_s0 + $0x10] sm:$0xff] %vm867_vm0, %v4905_v45  ;;  %4453 = vst.msk [vmem:[%s5497_s0 + $0x18] sm:$0xff] %vm867_vm0, %v4905_v45  ;;  %v1788_v26 = vmul.f32 %v5205_v29, %v5341_v33 }
 0x17d   : > { %v1761_v60 = vpop.permute.xlu0 %1760  ;;  %4457 = vst.msk [vmem:[%s5497_s0 + $0x28] sm:$0xff] %vm867_vm0, %v4905_v45  ;;  %4458 = vst.msk [vmem:[%s5497_s0 + $0x30] sm:$0xff] %vm867_vm0, %v4905_v45  ;;  %v1346_v37 = vadd.f32 %v5435_v59, %v1331_v14  ;;  %v1517_v7 = vmul.f32 %v5500_v22, %v5362_v46  ;;  %v1458_v9 = vadd.f32 %v1457_v54, %v1447_v15 }
 0x17e   : > { %v1767_v23 = vmul.f32 %v5270_v61, %v1761_v60  ;;  %v1506_v61 = vmul.f32 %v5464_v40, %v5327_v25  ;;  %v1695_v25 = vadd.f32 %v1693_v0, %v1680_v12  ;;  %4459 = vst.msk [vmem:[%s5497_s0 + $0x38] sm:$0xff] %vm867_vm0, %v4905_v45  ;;  %4468 = vst.msk [vmem:[%s5497_s0 + $0x40] sm:$0xff] %vm867_vm0, %v4905_v45 }
 0x17f   : > { %v1374_v5 = vpop.permute.xlu1 %1373  ;;  %4469 = vst.msk [vmem:[%s5497_s0 + $0x48] sm:$0xff] %vm867_vm0, %v4905_v45  ;;  %4470 = vst.msk [vmem:[%s5497_s0 + $0x50] sm:$0xff] %vm867_vm0, %v4905_v45  ;;  %v979_v0 = vadd.f32 %v977_v52, %v964_v63  ;;  %v1047_v33 = vmul.f32 %v5297_v11, %v5312_v17  ;;  %v1361_v39 = vadd.f32 %v5450_v43, %v1346_v37  ;;  %v5561_v17 = vld [vmem:[%s5151_s2 + $0x15] ss:$0 sm:$0xff] }
 0x180   : > { %v1778_v60 = vadd.f32 %v1777_v1, %v1767_v23  ;;  %4471 = vst.msk [vmem:[%s5497_s0 + $0x58] sm:$0xff] %vm867_vm0, %v4905_v45  ;;  %v1507_v24 = vadd.f32 %v1506_v61, %v1496_v55  ;;  %v1710_v10 = vadd.f32 %v5396_v62, %v1695_v25  ;;  %v1799_v52 = vmul.f32 %v5332_v27, %v5177_v18  ;;  %v5572_v25 = vld [vmem:[%s5151_s2 + $0x16] ss:$0 sm:$0xff] }
 0x181   : > { %v1031_v53 = vpop.permute.xlu0 %1030  ;;  %v1528_v46 = vmul.f32 %v5467_v16, %v5209_v32  ;;  %v1465_v12 = vadd.f32 %v5441_v2, %v1458_v9  ;;  %v1058_v11 = vmul.f32 %v5318_v21, %v5226_v41  ;;  %v1069_v41 = vmul.f32 %v5223_v38, %v5390_v56  ;;  %v5593_v9 = vld [vmem:[%s5151_s2 + $0x6] ss:$0 sm:$0xff] }
 0x182   : > { %v1037_v8 = vmul.f32 %v5180_v19, %v1031_v53  ;;  %v1789_v23 = vadd.f32 %v1788_v26, %v1778_v60  ;;  %v1518_v19 = vadd.f32 %v1517_v7, %v1507_v24  ;;  %v1376_v53 = vadd.f32 %v1374_v5, %v1361_v39 }
 0x183   : > { %v992_v44 = vpop.permute.xlu1 %991  ;;  %v1725_v18 = vadd.f32 %v5404_v13, %v1710_v10  ;;  %v1810_v5 = vmul.f32 %v5561_v17, %v5407_v20  ;;  %vm1466_vm2 = vcmp.ge.f32.partialorder %v1465_v12, 0.0  ;;  %v5575_v13 = vld [vmem:[%s5151_s2 + $0x5] ss:$0 sm:$0xff]  ;;  %v1859_v37 = vmul.f32 %v5332_v27, %v5348_v36  ;;  %s4912_s2 = smov 22  }
 0x184   : > { %v994_v1 = vadd.f32 %v992_v44, %v979_v0  ;;  %v1048_v55 = vadd.f32 %v1047_v33, %v1037_v8  ;;  %v1800_v61 = vadd.f32 %v1799_v52, %v1789_v23  ;;  %v1529_v44 = vadd.f32 %v1528_v46, %v1518_v19  ;;  %v6695_v46 = vld [vmem:[#allocation8_spill] sm:$0xff] }
 0x185   : > { %v5491_v28 = vpop.permute.xlu0 %1564  ;;  %v1821_v56 = vmul.f32 %v5572_v25, %v5429_v42  ;;  %v1581_v23 = vmul.f32 %v5500_v22, %v5337_v31  ;;  %v1080_v27 = vmul.f32 %v5575_v13, %v5423_v34  ;;  %v1870_v31 = vmul.f32 %v5561_v17, %v5378_v51  ;;  %v6696_v51 = vld [vmem:[#allocation10_spill] sm:$0xff] }
 0x186   : > { %v1009_v43 = vadd.f32 %v5421_v30, %v994_v1  ;;  %v1059_v63 = vadd.f32 %v1058_v11, %v1048_v55  ;;  %v1811_v60 = vadd.f32 %v1810_v5, %v1800_v61  ;;  %v1467_v30 = vmul.f32 0.1, %v1465_v12  ;;  %v6698_v5 = vld [vmem:[#allocation9_spill] sm:$0xff] }
 0x187   : > { %v5543_v47 = vpop.permute.xlu1 %1912  ;;  %v1544_v8 = vadd.f32 %v5425_v35, %v1529_v44  ;;  %v1592_v22 = vmul.f32 %v5467_v16, %v5370_v48  ;;  %v1091_v1 = vmul.f32 %v5593_v9, %v5374_v50  ;;  %vm2183_vm0 = vcmask 39936  }
 0x188   : > { %v1016_v20 = vadd.f32 %v5445_v3, %v1009_v43  ;;  %v1571_v3 = vmul.f32 %v5464_v40, %v5491_v28  ;;  %v1468_v42 = vsel %vm1466_vm2, %v1465_v12, %v1467_v30  ;;  %vm2674_vm2 = vcmask 64512  }
 0x189   : > { %v1843_v49 = vpop.permute.xlu0 %1842 }
 0x18a   : > { %v1849_v26 = vmul.f32 %v5205_v29, %v1843_v49  ;;  %v1070_v29 = vadd.f32 %v1069_v41, %v1059_v63  ;;  %v1822_v49 = vadd.f32 %v1821_v56, %v1811_v60  ;;  %v1018_v39 = vmul.f32 0.1, %v1016_v20 }
 0x18b   : > { %v1738_v59 = vpop.permute.xlu1 %1737  ;;  %vm1017_vm4 = vcmp.ge.f32.partialorder %v1016_v20, 0.0  ;;  %v1582_v34 = vadd.f32 %v1581_v23, %v1571_v3  ;;  %v6699_v63 = vmov 4  }
 0x18c   : > { %v1740_v2 = vadd.f32 %v1738_v59, %v1725_v18  ;;  %v1860_v33 = vadd.f32 %v1859_v37, %v1849_v26  ;;  %v1081_v28 = vadd.f32 %v1080_v27, %v1070_v29  ;;  %v1019_v19 = vsel %vm1017_vm4, %v1016_v20, %v1018_v39  ;;  %v6701_v20 = vld [vmem:[#allocation7_spill] sm:$0xff] }
 0x18d   : > { %v1381_v57 = vpop.permute.xlu0 %1380  ;;  %v1593_v12 = vadd.f32 %v1592_v22, %v1582_v34  ;;  %v1935_v26 = vmul.f32 %v5561_v17, %v6701_v20  ;;  %v6703_v17 = vld [vmem:[#allocation5_spill] sm:$0xff]  ;;  %vm2330_vm4 = vcmask 105544  }
 0x18e   : > { %v1383_v62 = vadd.f32 %v1381_v57, %v1376_v53  ;;  %v1871_v52 = vadd.f32 %v1870_v31, %v1860_v33  ;;  %v1829_v53 = vadd.f32 %v5459_v6, %v1822_v49  ;;  %v1881_v57 = vmul.f32 %v5572_v25, %v6696_v51  ;;  %v6697_v6 = vld [vmem:[#allocation13_spill] sm:$0xff]  ;;  %v6706_v31 = vld [vmem:[#allocation14_spill] sm:$0xff] }
 0x18f   : > { %v5567_v32 = vpop.permute.xlu1 %2006  ;;  %v1092_v48 = vadd.f32 %v1091_v1, %v1081_v28  ;;  %v1608_v44 = vadd.f32 %v6698_v5, %v1593_v12 }
 0x190   : > { %vm1384_vm1 = vcmp.ge.f32.partialorder %v1383_v62, 0.0  ;;  %v1385_v15 = vmul.f32 0.1, %v1383_v62  ;;  %v1882_v16 = vadd.f32 %v1881_v57, %v1871_v52  ;;  %v1831_v43 = vmul.f32 0.1, %v1829_v53  ;;  %v6707_v52 = vld [vmem:[#allocation15_spill] sm:$0xff] }
 0x191   : > { %v1745_v14 = vpop.permute.xlu0 %1744  ;;  %vm1830_vm6 = vcmp.ge.f32.partialorder %v1829_v53, 0.0 }
 0x192   : > { %v1747_v54 = vadd.f32 %v1745_v14, %v1740_v2  ;;  %v1386_v24 = vsel %vm1384_vm1, %v1383_v62, %v1385_v15  ;;  %v1892_v62 = vmul.f32 %v5470_v4, %v6697_v6  ;;  %v1832_v60 = vsel %vm1830_vm6, %v1829_v53, %v1831_v43  ;;  %v6700_v14 = vld [vmem:[#allocation6_spill] sm:$0xff] }
 0x193   : > { %1388 = vrot.lane.b32.xlu0 %v1386_v24, %s4906_s9  ;;  %v1621_v0 = vpop.permute.xlu1 %1620  ;;  %v1945_v30 = vmul.f32 %v5572_v25, %v6700_v14  ;;  %v1956_v25 = vmul.f32 %v5470_v4, %v6703_v17  ;;  %v6705_v4 = vmov 5   ;;  %vm2083_vm1 = vcmask 31744  }
 0x194   : > { %v1749_v7 = vmul.f32 0.1, %v1747_v54  ;;  %vm1748_vm3 = vcmp.ge.f32.partialorder %v1747_v54, 0.0  ;;  %v1893_v2 = vadd.f32 %v1892_v62, %v1882_v16  ;;  %v1623_v15 = vadd.f32 %v1621_v0, %v1608_v44 }
 0x195   : > { %v1549_v36 = vpop.permute.xlu0 %1548  ;;  %vm2534_vm6 = vcmask 179344  }
 0x196   : > { %v1551_v35 = vadd.f32 %v1549_v36, %v1544_v8  ;;  %v1750_v10 = vsel %vm1748_vm3, %v1747_v54, %v1749_v7  ;;  %v6702_v8 = vld [vmem:[#allocation12_spill] sm:$0xff]  ;;  %v1946_v7 = vadd.f32 %v1945_v30, %v1935_v26  ;;  %vm2224_vm3 = vcmask 72736  }
 0x197   : > { %1470 = vrot.lane.b32.xlu0 %v1468_v42, %s4907_s30  ;;  %1752 = vrot.lane.b32.xlu1 %v1750_v10, %s4906_s9  ;;  %v1636_v40 = vpop.permute.xlu1 %1635  ;;  %v1908_v3 = vadd.f32 %v6702_v8, %v1893_v2  ;;  %v6704_v42 = vld [vmem:[#allocation11_spill] sm:$0xff] }
 0x198   : > { %v1553_v59 = vmul.f32 0.1, %v1551_v35  ;;  %vm1552_vm5 = vcmp.ge.f32.partialorder %v1551_v35, 0.0  ;;  %v1638_v24 = vadd.f32 %v1636_v40, %v1623_v15  ;;  %v1957_v36 = vadd.f32 %v1956_v25, %v1946_v7 }
 0x199   : > { %v1097_v55 = vpop.permute.xlu0 %1096  ;;  %v1915_v27 = vadd.f32 %v5543_v47, %v1908_v3 }
 0x19a   : > { %v1099_v11 = vadd.f32 %v1097_v55, %v1092_v48  ;;  %v1554_v50 = vsel %vm1552_vm5, %v1551_v35, %v1553_v59  ;;  %v1972_v49 = vadd.f32 %v6704_v42, %v1957_v36  ;;  %v1130_v59 = vmul.f32 %v5223_v38, %v6707_v52 }
 0x19b   : > { %2254 = vperm.xlu1 %4778, %v6695_v46   ;;  %v1985_v61 = vpop.permute.xlu1 %1984  ;;  %1021 = vrot.lane.b32.xlu0 %v1019_v19, %s4906_s9  ;;  %v1917_v10 = vmul.f32 0.1, %v1915_v27  ;;  %vm1916_vm9 = vcmp.ge.f32.partialorder %v1915_v27, 0.0  ;;  %v6708_v19 = vld [vmem:[#allocation16_spill] sm:$0xff]  ;;  %vm2428_vm5 = vcmask 146536  }
 0x19c   : > { %v1101_v41 = vmul.f32 0.1, %v1099_v11  ;;  %vm1100_vm7 = vcmp.ge.f32.partialorder %v1099_v11, 0.0  ;;  %v1987_v39 = vadd.f32 %v1985_v61, %v1972_v49  ;;  %v1217_v53 = vmul.f32 %v5593_v9, %v6708_v19 }
 0x19d   : > { %v1643_v54 = vpop.permute.xlu0 %1642  ;;  %v1918_v40 = vsel %vm1916_vm9, %v1915_v27, %v1917_v10  ;;  %vm4913_vm9 = vmmov 0  }
 0x19e   : > { %v1645_v56 = vadd.f32 %v1643_v54, %v1638_v24  ;;  %v1102_v0 = vsel %vm1100_vm7, %v1099_v11, %v1101_v41  ;;  %v2002_v34 = vadd.f32 %v6706_v31, %v1987_v39  ;;  %v6709_v11 = vmov 3   ;;  %4669 = vmatprep.mubr.msk.bf16.mxu1 %vm4913_vm9, %v4905_v45 }
 0x19f   : > { %1556 = vrot.lane.b32.xlu1 %v1554_v50, %s4907_s30  ;;  %v1114_v18 = vpop.permute.xlu1 %1113  ;;  %2447 = vperm.xlu0 %4776, %v6695_v46   ;;  %v6710_v24 = vmov 0   ;;  %vm2632_vm7 = vcmask 220336  }
 0x1a0   : > { %4780 = vset.pattern.permute.xlu1 %v6699_v63  ;;  %v1647_v23 = vmul.f32 0.1, %v1645_v56  ;;  %vm1646_vm8 = vcmp.ge.f32.partialorder %v1645_v56, 0.0  ;;  %v1120_v22 = vmul.f32 %v5318_v21, %v1114_v18  ;;  %v2009_v55 = vadd.f32 %v5567_v32, %v2002_v34 }
 0x1a1   : > { %v1279_v47 = vpop.permute.xlu0 %1278 }
 0x1a2   : > { %v1648_v35 = vsel %vm1646_vm8, %v1645_v56, %v1647_v23  ;;  %v1131_v12 = vadd.f32 %v1130_v59, %v1120_v22  ;;  %v2011_v32 = vmul.f32 0.1, %v2009_v55  ;;  %vm2010_vm10 = vcmp.ge.f32.partialorder %v2009_v55, 0.0 }
 0x1a3   : > { %1834 = vrot.lane.b32.xlu1 %v1832_v60, %s4907_s30  ;;  %4779 = vset.pattern.permute.xlu0 %v6699_v63  ;;  %v6712_v56 = vmov 2   ;;  %vm2681_vm8 = vcmask 1043456  }
 0x1a4   : > { %v1135_v37 = vpop.permute.xlu1 %1134  ;;  %2157 = vperm.xlu0 %4779, %v6695_v46   ;;  %v2012_v62 = vsel %vm2010_vm10, %v2009_v55, %v2011_v32  ;;  %vm2791_vm10 = vcmask 261120  }
 0x1a5   : > { %v1141_v61 = vmul.f32 %v5575_v13, %v1135_v37  ;;  %v6711_v37 = vmov 1  }
 0x1a6   : > { %v1222_v51 = vpop.permute.xlu0 %1221 }
 0x1a7   : > { %1104 = vrot.lane.b32.xlu1 %v1102_v0, %s4907_s30  ;;  %v1228_v21 = vmul.f32 %v5457_v58, %v1222_v51  ;;  %v1142_v38 = vadd.f32 %v1141_v61, %v1131_v12  ;;  %v5681_v0 = vld [vmem:[%s6713_s6] sm:$0xff]  ;;  %s6716_s6 = sld [smem:[#allocation24_spill]] }
 0x1a8   : > { %2468 = vperm.xlu0 %4779, %v6695_v46  }
 0x1a9   : > { %v1201_v29 = vpop.permute.xlu1 %1200 }
 0x1aa   : > { %v1207_v1 = vmul.f32 %v5575_v13, %v1201_v29  ;;  %v1257_v2 = vpop.permute.xlu0 %1256 }
 0x1ab   : > { %2264 = vperm.xlu1 %4780, %v6695_v46  }
 0x1ac   : > { %2566 = vperm.xlu0 %4779, %v6695_v46   ;;  %v1218_v48 = vadd.f32 %v1217_v53, %v1207_v1 }
 0x1ae   : > { %v1146_v33 = vpop.permute.xlu1 %1145  ;;  %v1229_v18 = vadd.f32 %v1228_v21, %v1218_v48 }
 0x1af   : > { %1650 = vrot.lane.b32.xlu1 %v1648_v35, %s4907_s30  ;;  %v1152_v16 = vmul.f32 %v5593_v9, %v1146_v33 }
 0x1b0   : > { %4782 = vset.pattern.permute.xlu0 %v6705_v4 }
 0x1b1   : > { %2167 = vperm.xlu0 %4782, %v6695_v46   ;;  %v1153_v43 = vadd.f32 %v1152_v16, %v1142_v38 }
 0x1b3   : > { %1920 = vrot.lane.b32.xlu1 %v1918_v40, %s4907_s30  ;;  %v1157_v28 = vpop.permute.xlu1 %1156 }
 0x1b4   : > { %v1163_v50 = vmul.f32 %v5457_v58, %v1157_v28 }
 0x1b5   : > { %2576 = vperm.xlu0 %4782, %v6695_v46  }
 0x1b6   : > { %v1164_v5 = vadd.f32 %v1163_v50, %v1153_v43 }
 0x1b7   : > { %2362 = vperm.xlu1 %4780, %v6695_v46  }
 0x1b8   : > { %v1184_v57 = vpop.permute.xlu1 %1183 }
 0x1b9   : > { %4783 = vset.pattern.permute.xlu0 %v6709_v11 }
 0x1ba   : > { %2458 = vperm.xlu0 %4783, %v6695_v46  }
 0x1bb   : > { %4781 = vset.pattern.permute.xlu1 %v6705_v4 }
 0x1bc   : > { %2274 = vperm.xlu1 %4781, %v6695_v46   ;;  %v1242_v13 = vpop.permute.xlu1 %1241 }
 0x1bd   : > { %v1244_v6 = vadd.f32 %v1242_v13, %v1229_v18 }
 0x1bf   : > { %v1259_v41 = vadd.f32 %v1257_v2, %v1244_v6 }
 0x1c0   : > { %2014 = vrot.lane.b32.xlu1 %v2012_v62, %s4907_s30  ;;  %v1177_v9 = vpop.permute.xlu1 %1176 }
 0x1c1   : > { %v1179_v44 = vadd.f32 %v1177_v9, %v1164_v5 }
 0x1c3   : > { %v1186_v15 = vadd.f32 %v1184_v57, %v1179_v44 }
 0x1c4   : > { %2372 = vperm.xlu1 %4781, %v6695_v46   ;;  %v1272_v58 = vpop.permute.xlu1 %1271 }
 0x1c5   : > { %v1274_v60 = vadd.f32 %v1272_v58, %v1259_v41  ;;  %vm1187_vm11 = vcmp.ge.f32.partialorder %v1186_v15, 0.0  ;;  %v1188_v14 = vmul.f32 0.1, %v1186_v15 }
 0x1c7   : > { %v1281_v30 = vadd.f32 %v1279_v47, %v1274_v60  ;;  %v1189_v20 = vsel %vm1187_vm11, %v1186_v15, %v1188_v14  ;;  %v2311_v14 = vld [vmem:[%s6714_s3] sm:$0xff]  ;;  %s4910_s3 = smov 13   ;;  %vm875_vm11 = vcmask 56320  }
 0x1c8   : > { %2478 = vperm.xlu1 %4781, %v6695_v46   ;;  %1191 = vrot.lane.b32.xlu0 %v1189_v20, %s4907_s30  ;;  %v2244_v8 = vpop.permute.xlu1 %2243  ;;  %4460 = vst.msk [vmem:[%s5959_s8 + $0x20] sm:$0xff] %vm875_vm11, %v4905_v45  ;;  %876 = vst.msk [vmem:[%s5959_s8] sm:$0xff] %vm875_vm11, %v4905_v45 }
 0x1c9   : > { %vm1282_vm12 = vcmp.ge.f32.partialorder %v1281_v30, 0.0  ;;  %v1283_v26 = vmul.f32 0.1, %v1281_v30  ;;  %877 = vst.msk [vmem:[%s5959_s8 + $0x8] sm:$0xff] %vm875_vm11, %v4905_v45  ;;  %4454 = vst.msk [vmem:[%s5959_s8 + $0x10] sm:$0xff] %vm875_vm11, %v4905_v45 }
 0x1ca   : > { %4455 = vst.msk [vmem:[%s5959_s8 + $0x18] sm:$0xff] %vm875_vm11, %v4905_v45  ;;  %4461 = vst.msk [vmem:[%s5959_s8 + $0x28] sm:$0xff] %vm875_vm11, %v4905_v45 }
 0x1cb   : > { %v1284_v54 = vsel %vm1282_vm12, %v1281_v30, %v1283_v26  ;;  %4462 = vst.msk [vmem:[%s5959_s8 + $0x30] sm:$0xff] %vm875_vm11, %v4905_v45  ;;  %4463 = vst.msk [vmem:[%s5959_s8 + $0x38] sm:$0xff] %vm875_vm11, %v4905_v45  ;;  %vm2844_vm12 = vcmask 56344  }
 0x1cc   : > { %4784 = vset.pattern.permute.xlu1 %v6710_v24  ;;  %1286 = vrot.lane.b32.xlu0 %v1284_v54, %s4907_s30  ;;  %s4444_s30 = sshll.u32 %s6721_s28, 3  ;;  %4472 = vst.msk [vmem:[%s5959_s8 + $0x40] sm:$0xff] %vm875_vm11, %v4905_v45  ;;  %4473 = vst.msk [vmem:[%s5959_s8 + $0x48] sm:$0xff] %vm875_vm11, %v4905_v45 }
 0x1cd   : > { %2131 = vperm.xlu1 %4784, %v6695_v46   ;;  %s841_s1 = scalar_lea.vmem %s6716_s6, %s4444_s30  ;;  %s4911_s30 = smov 18   ;;  %4474 = vst.msk [vmem:[%s5959_s8 + $0x50] sm:$0xff] %vm875_vm11, %v4905_v45  ;;  %4475 = vst.msk [vmem:[%s5959_s8 + $0x58] sm:$0xff] %vm875_vm11, %v4905_v45 }
 0x1ce   : > { %s4918_s6 = smov 3  }
 0x1d0   : > { %2151 = vperm.xlu0 %4783, %v6695_v46  }
 0x1d1   : > { %4785 = vset.pattern.permute.xlu1 %v6711_v37 }
 0x1d2   : > { %2137 = vperm.xlu1 %4785, %v6695_v46  }
 0x1d4   : > { %4794 = vset.pattern.permute.xlu0 %v6711_v37 }
 0x1d5   : > { %2546 = vperm.xlu0 %4794, %v6695_v46  }
 0x1d6   : > { %4786 = vset.pattern.permute.xlu1 %v6712_v56 }
 0x1d7   : > { %2036 = vperm.xlu1 %4786, %v6695_v46  }
 0x1d9   : > { %4797 = vset.pattern.permute.xlu0 %v6712_v56 }
 0x1da   : > { %2553 = vperm.xlu0 %4797, %v6695_v46  }
 0x1db   : > { %4787 = vset.pattern.permute.xlu1 %v6711_v37 }
 0x1dc   : > { %2236 = vperm.xlu1 %4787, %v6695_v46  }
 0x1de   : > { %4798 = vset.pattern.permute.xlu0 %v6710_v24 }
 0x1df   : > { %2230 = vperm.xlu0 %4798, %v6695_v46  }
 0x1e0   : > { %4788 = vset.pattern.permute.xlu1 %v6712_v56 }
 0x1e1   : > { %2144 = vperm.xlu1 %4788, %v6695_v46  }
 0x1e3   : > { %2336 = vperm.xlu0 %4798, %v6695_v46  }
 0x1e5   : > { %4789 = vset.pattern.permute.xlu1 %v6711_v37 }
 0x1e6   : > { %2342 = vperm.xlu1 %4789, %v6695_v46  }
 0x1e7   : > { %2434 = vperm.xlu0 %4798, %v6695_v46  }
 0x1ea   : > { %4790 = vset.pattern.permute.xlu1 %v6709_v11 }
 0x1eb   : > { %2047 = vperm.xlu1 %4790, %v6695_v46   ;;  %2179 = vperm.xlu0 %4798, %v5681_v0  }
 0x1ef   : > { %4791 = vset.pattern.permute.xlu1 %v6711_v37 }
 0x1f0   : > { %2440 = vperm.xlu1 %4791, %v6695_v46  }
 0x1f4   : > { %4792 = vset.pattern.permute.xlu1 %v6712_v56 }
 0x1f5   : > { %2349 = vperm.xlu1 %4792, %v6695_v46  }
 0x1f9   : > { %4793 = vset.pattern.permute.xlu1 %v6710_v24 }
 0x1fa   : > { %2540 = vperm.xlu1 %4793, %v6695_v46  }
 0x1fe   : > { %4795 = vset.pattern.permute.xlu1 %v6699_v63 }
 0x1ff   : > { %2057 = vperm.xlu1 %4795, %v6695_v46  }
 0x203   : > { %4796 = vset.pattern.permute.xlu1 %v6709_v11 }
 0x204   : > { %2356 = vperm.xlu1 %4796, %v6695_v46  }
 0x205   : > { %v1389_v3 = vpop.permute.xlu0 %1388 }
 0x206   : > { %4513 = vst.msk [vmem:[%s5497_s0 + $0x20] sm:$0xff] %vm1024_vm13, %v1389_v3  ;;  %v2212_v3 = vld [vmem:[%s6715_s22] sm:$0xff]  ;;  %s6717_s22 = sld [smem:[#allocation25_spill]] }
 0x208   : > { %4799 = vset.pattern.permute.xlu1 %v6705_v4 }
 0x209   : > { %v1471_v7 = vpop.permute.xlu0 %1470  ;;  %2067 = vperm.xlu1 %4799, %v6695_v46   ;;  %v1753_v17 = vpop.permute.xlu1 %1752 }
 0x20a   : > { %4520 = vst.msk [vmem:[%s5497_s0 + $0x28] sm:$0xff] %vm1107_vm14, %v1471_v7 }
 0x20b   : > { %4541 = vst.msk [vmem:[%s5497_s0 + $0x40] sm:$0xff] %vm1024_vm13, %v1753_v17 }
 0x20d   : > { %4800 = vset.pattern.permute.xlu1 %v6709_v11  ;;  %v1022_v25 = vpop.permute.xlu0 %1021  ;;  %v5708_v29 = vld [vmem:[%s5497_s0 + $0x20] sm:$0xff] }
 0x20e   : > { %1025 = vst.msk [vmem:[%s5497_s0] sm:$0xff] %vm1024_vm13, %v1022_v25  ;;  %2560 = vperm.xlu1 %4800, %v6695_v46   ;;  %v2246_v23 = vmul.f32 %v5708_v29, %v2244_v8  ;;  %v2018_v25 = vld [vmem:[%s841_s1] sm:$0xff]  ;;  %s6718_s1 = sld [smem:[#allocation26_spill]]  ;;  %vm2853_vm13 = vcmask 56336  }
 0x211   : > { %v5713_v27 = vld [vmem:[%s5497_s0 + $0x28] sm:$0xff] }
 0x212   : > { %4801 = vset.pattern.permute.xlu1 %v6710_v24  ;;  %v5719_v33 = vld [vmem:[%s5497_s0 + $0x40] sm:$0xff] }
 0x213   : > { %2286 = vperm.xlu1 %4801, %v5681_v0  }
 0x215   : > { %v5728_v47 = vld [vmem:[%s5497_s0] sm:$0xff] }
 0x217   : > { %2384 = vperm.xlu1 %4801, %v5681_v0  }
 0x21a   : > { %v2255_v36 = vpop.permute.xlu1 %2254 }
 0x21b   : > { %v2257_v42 = vmul.f32 %v5713_v27, %v2255_v36  ;;  %2248 = vrot.lane.b32.xlu1 %v2246_v23, %s4904_s5 }
 0x21d   : > { %2259 = vrot.lane.b32.xlu0 %v2257_v42, %s4904_s5 }
 0x21e   : > { %v1557_v49 = vpop.permute.xlu1 %1556  ;;  %v2448_v35 = vpop.permute.xlu0 %2447 }
 0x21f   : > { %4527 = vst.msk [vmem:[%s5497_s0 + $0x30] sm:$0xff] %vm1194_vm15, %v1557_v49  ;;  %v2450_v10 = vmul.f32 %v5719_v33, %v2448_v35 }
 0x221   : > { %2452 = vrot.lane.b32.xlu0 %v2450_v10, %s4904_s5 }
 0x222   : > { %v1835_v39 = vpop.permute.xlu1 %1834 }
 0x223   : > { %4548 = vst.msk [vmem:[%s5497_s0 + $0x48] sm:$0xff] %vm1107_vm14, %v1835_v39  ;;  %v2158_v40 = vpop.permute.xlu0 %2157 }
 0x224   : > { %v2160_v31 = vmul.f32 %v2158_v40, %v5728_v47 }
 0x225   : > { %2490 = vperm.xlu0 %4798, %v5681_v0  }
 0x226   : > { %v1105_v34 = vpop.permute.xlu1 %1104  ;;  %2162 = vrot.lane.b32.xlu1 %v2160_v31, %s4904_s5  ;;  %v5736_v22 = vld [vmem:[%s5497_s0 + $0x30] sm:$0xff] }
 0x227   : > { %4492 = vst.msk [vmem:[%s5497_s0 + $0x8] sm:$0xff] %vm1107_vm14, %v1105_v34  ;;  %v2469_v28 = vpop.permute.xlu0 %2468  ;;  %vm3550_vm14 = vcmask 130048  }
 0x22a   : > { %v2265_v1 = vpop.permute.xlu1 %2264  ;;  %v5748_v12 = vld [vmem:[%s5497_s0 + $0x48] sm:$0xff] }
 0x22b   : > { %v2267_v52 = vmul.f32 %v5736_v22, %v2265_v1  ;;  %v2567_v59 = vpop.permute.xlu0 %2566 }
 0x22c   : > { %v2569_v18 = vmul.f32 %v5719_v33, %v2567_v59 }
 0x22d   : > { %2269 = vrot.lane.b32.xlu1 %v2267_v52, %s4904_s5 }
 0x22e   : > { %v1651_v19 = vpop.permute.xlu1 %1650  ;;  %v4566_v32 = vld [vmem:[%s5497_s0 + $0x8] sm:$0xff] }
 0x22f   : > { %4534 = vst.msk [vmem:[%s5497_s0 + $0x38] sm:$0xff] %vm1194_vm15, %v1651_v19 }
 0x230   : > { %v2168_v53 = vpop.permute.xlu0 %2167 }
 0x231   : > { %2588 = vperm.xlu1 %4801, %v5681_v0   ;;  %v2170_v43 = vmul.f32 %v4566_v32, %v2168_v53 }
 0x232   : > { %v1921_v55 = vpop.permute.xlu1 %1920 }
 0x233   : > { %4555 = vst.msk [vmem:[%s5497_s0 + $0x50] sm:$0xff] %vm1194_vm15, %v1921_v55 }
 0x234   : > { %v2577_v61 = vpop.permute.xlu0 %2576 }
 0x235   : > { %4802 = vset.pattern.permute.xlu1 %v6711_v37  ;;  %v2579_v44 = vmul.f32 %v5748_v12, %v2577_v61 }
 0x236   : > { %v2363_v51 = vpop.permute.xlu1 %2362  ;;  %v5766_v62 = vld [vmem:[%s5497_s0 + $0x38] sm:$0xff] }
 0x237   : > { %v2365_v57 = vmul.f32 %v5708_v29, %v2363_v51 }
 0x239   : > { %2367 = vrot.lane.b32.xlu1 %v2365_v57, %s4904_s5  ;;  %v2459_v21 = vpop.permute.xlu0 %2458 }
 0x23a   : > { %v2461_v48 = vmul.f32 %v5748_v12, %v2459_v21  ;;  %v5753_v16 = vld [vmem:[%s5497_s0 + $0x50] sm:$0xff] }
 0x23b   : > { %v2275_v38 = vpop.permute.xlu1 %2274  ;;  %v2471_v50 = vmul.f32 %v5753_v16, %v2469_v28 }
 0x23c   : > { %2463 = vrot.lane.b32.xlu0 %v2461_v48, %s4904_s5  ;;  %v2277_v9 = vmul.f32 %v5766_v62, %v2275_v38 }
 0x23d   : > { %2473 = vrot.lane.b32.xlu1 %v2471_v50, %s4904_s5  ;;  %v1192_v13 = vpop.permute.xlu0 %1191 }
 0x23e   : > { %4499 = vst.msk [vmem:[%s5497_s0 + $0x10] sm:$0xff] %vm1194_vm15, %v1192_v13 }
 0x23f   : > { %v2015_v6 = vpop.permute.xlu1 %2014 }
 0x240   : > { %4562 = vst.msk [vmem:[%s5497_s0 + $0x58] sm:$0xff] %vm1194_vm15, %v2015_v6  ;;  %2172 = vrot.lane.b32.xlu0 %v2170_v43, %s4904_s5 }
 0x241   : > { %2571 = vrot.lane.b32.xlu1 %v2569_v18, %s4904_s5  ;;  %v1287_v5 = vpop.permute.xlu0 %1286 }
 0x242   : > { %4506 = vst.msk [vmem:[%s5497_s0 + $0x18] sm:$0xff] %vm1194_vm15, %v1287_v5  ;;  %vm3275_vm15 = vcmask 80936  }
 0x243   : > { %v2373_v2 = vpop.permute.xlu1 %2372 }
 0x244   : > { %2279 = vrot.lane.b32.xlu0 %v2277_v9, %s4904_s5  ;;  %v2375_v15 = vmul.f32 %v5713_v27, %v2373_v2 }
 0x245   : > { %2581 = vrot.lane.b32.xlu1 %v2579_v44, %s4904_s5  ;;  %v5804_v52 = vld [vmem:[%s5497_s0 + $0x10] sm:$0xff] }
 0x247   : > { %v5777_v41 = vld [vmem:[%s5497_s0 + $0x58] sm:$0xff]  ;;  %v2479_v58 = vpop.permute.xlu1 %2478 }
 0x248   : > { %2377 = vrot.lane.b32.xlu0 %v2375_v15, %s4904_s5  ;;  %v2481_v60 = vmul.f32 %v5777_v41, %v2479_v58 }
 0x249   : > { %2029 = vperm.xlu1 %4802, %v6695_v46   ;;  %v5811_v61 = vld [vmem:[%s5497_s0 + $0x18] sm:$0xff]  ;;  %s4908_s0 = smov 4  }
 0x24c   : > { %v2132_v30 = vpop.permute.xlu1 %2131  ;;  %2483 = vrot.lane.b32.xlu0 %v2481_v60, %s4904_s5 }
 0x24d   : > { %4803 = vset.pattern.permute.xlu1 %v6710_v24  ;;  %v2134_v26 = vmul.f32 %v2132_v30, %v5728_v47 }
 0x24e   : > { %2314 = vperm.xlu1 %4803, %v2311_v14  }
 0x24f   : > { %v2152_v35 = vpop.permute.xlu0 %2151 }
 0x250   : > { %2023 = vperm.xlu0 %4798, %v6695_v46   ;;  %v2154_v60 = vmul.f32 %v5811_v61, %v2152_v35 }
 0x251   : > { %v2138_v20 = vpop.permute.xlu1 %2137 }
 0x252   : > { %v2140_v54 = vmul.f32 %v4566_v32, %v2138_v20  ;;  %2412 = vperm.xlu1 %4803, %v2311_v14  }
 0x254   : > { %v2141_v8 = vadd.f32 %v2140_v54, %v2134_v26  ;;  %2208 = vperm.xlu0 %4798, %v2311_v14   ;;  %v2547_v39 = vpop.permute.xlu0 %2546 }
 0x255   : > { %v2549_v34 = vmul.f32 %v5748_v12, %v2547_v39 }
 0x256   : > { %v2037_v7 = vpop.permute.xlu1 %2036  ;;  %2518 = vperm.xlu1 %4803, %v2311_v14  }
 0x257   : > { %v2039_v17 = vmul.f32 %v5728_v47, %v2037_v7 }
 0x258   : > { %2215 = vperm.xlu0 %4798, %v2212_v3  }
 0x259   : > { %v2554_v40 = vpop.permute.xlu0 %2553 }
 0x25a   : > { %2419 = vperm.xlu1 %4803, %v2212_v3   ;;  %v2556_v28 = vmul.f32 %v5753_v16, %v2554_v40 }
 0x25b   : > { %v2237_v46 = vpop.permute.xlu1 %2236 }
 0x25c   : > { %2321 = vperm.xlu0 %4798, %v2212_v3   ;;  %v2239_v2 = vmul.f32 %v5766_v62, %v2237_v46 }
 0x25e   : > { %2041 = vrot.lane.b32.xlu1 %v2039_v17, %s4904_s5 }
 0x260   : > { %v2145_v23 = vpop.permute.xlu1 %2144  ;;  %2122 = vperm.xlu0 %4798, %v2018_v25  }
 0x261   : > { %v2147_v5 = vmul.f32 %v5804_v52, %v2145_v23 }
 0x262   : > { %2079 = vperm.xlu1 %4803, %v5681_v0  }
 0x263   : > { %v2148_v15 = vadd.f32 %v2147_v5, %v2141_v8 }
 0x264   : > { %2616 = vperm.xlu0 %4798, %v2311_v14  }
 0x265   : > { %v2343_v36 = vpop.permute.xlu1 %2342  ;;  %v2155_v54 = vadd.f32 %v2154_v60, %v2148_v15 }
 0x266   : > { %v2345_v30 = vmul.f32 %v5713_v27, %v2343_v36 }
 0x268   : > { %2525 = vperm.xlu0 %4798, %v2212_v3  }
 0x26a   : > { %v2048_v42 = vpop.permute.xlu1 %2047 }
 0x26b   : > { %v2050_v49 = vmul.f32 %v4566_v32, %v2048_v42 }
 0x26c   : > { %2623 = vperm.xlu0 %4798, %v2212_v3  }
 0x26d   : > { %2052 = vrot.lane.b32.xlu1 %v2050_v49, %s4904_s5 }
 0x26f   : > { %v2441_v10 = vpop.permute.xlu1 %2440 }
 0x270   : > { %v2443_v46 = vmul.f32 %v5777_v41, %v2441_v10 }
 0x274   : > { %v2350_v47 = vpop.permute.xlu1 %2349 }
 0x275   : > { %v2352_v17 = vmul.f32 %v5736_v22, %v2350_v47 }
 0x279   : > { %v2541_v31 = vpop.permute.xlu1 %2540 }
 0x27a   : > { %v2543_v0 = vmul.f32 %v5719_v33, %v2541_v31  ;;  %v2231_v33 = vpop.permute.xlu0 %2230 }
 0x27b   : > { %v2233_v9 = vmul.f32 %v5736_v22, %v2231_v33 }
 0x27c   : > { %v2550_v1 = vadd.f32 %v2549_v34, %v2543_v0 }
 0x27e   : > { %v2058_v59 = vpop.permute.xlu1 %2057  ;;  %v5806_v19 = vadd.f32 %v2556_v28, %v2550_v1  ;;  %v2337_v21 = vpop.permute.xlu0 %2336 }
 0x27f   : > { %v2060_v53 = vmul.f32 %v5804_v52, %v2058_v59 }
 0x281   : > { %2062 = vrot.lane.b32.xlu0 %v2060_v53, %s4904_s5 }
 0x282   : > { %v2435_v38 = vpop.permute.xlu0 %2434 }
 0x283   : > { %v2357_v55 = vpop.permute.xlu1 %2356  ;;  %v2437_v27 = vmul.f32 %v5753_v16, %v2435_v38 }
 0x284   : > { %v2359_v8 = vmul.f32 %v5766_v62, %v2357_v55 }
 0x285   : > { %2109 = vperm.xlu0 %4798, %v2311_v14   ;;  %v2240_v14 = vadd.f32 %v2239_v2, %v2233_v9  ;;  %v2444_v34 = vadd.f32 %v2443_v46, %v2437_v27 }
 0x286   : > { %v2180_v50 = vpop.permute.xlu0 %2179 }
 0x288   : > { %v2068_v51 = vpop.permute.xlu1 %2067 }
 0x289   : > { %v2070_v57 = vmul.f32 %v5811_v61, %v2068_v51 }
 0x28b   : > { %2072 = vrot.lane.b32.xlu1 %v2070_v57, %s4904_s5 }
 0x28d   : > { %v2561_v12 = vpop.permute.xlu1 %2560 }
 0x28e   : > { %v2563_v62 = vmul.f32 %v5777_v41, %v2561_v12 }
 0x28f   : > { %2116 = vperm.xlu1 %4803, %v2212_v3   ;;  %v2260_v13 = vpop.permute.xlu0 %2259  ;;  %v2339_v3 = vmul.f32 %v5708_v29, %v2337_v21 }
 0x291   : > { %v2346_v23 = vadd.f32 %v2345_v30, %v2339_v3 }
 0x292   : > { %v2287_v48 = vpop.permute.xlu1 %2286 }
 0x293   : > { %v2453_v18 = vpop.permute.xlu0 %2452  ;;  %v2353_v36 = vadd.f32 %v2352_v17, %v2346_v23 }
 0x294   : > { %v2455_v1 = vadd.f32 %v2453_v18, %v2444_v34 }
 0x295   : > { %v2360_v47 = vadd.f32 %v2359_v8, %v2353_v36 }
 0x296   : > { %v2385_v32 = vpop.permute.xlu1 %2384 }
 0x29a   : > { %v2249_v43 = vpop.permute.xlu1 %2248 }
 0x29b   : > { %v2251_v26 = vadd.f32 %v2249_v43, %v2240_v14 }
 0x29d   : > { %v2262_v49 = vadd.f32 %v2260_v13, %v2251_v26 }
 0x29e   : > { %v2163_v6 = vpop.permute.xlu1 %2162 }
 0x29f   : > { %v2165_v25 = vadd.f32 %v2163_v6, %v2155_v54  ;;  %v2564_v6 = vadd.f32 %v2563_v62, %v5806_v19 }
 0x2a2   : > { %v2270_v58 = vpop.permute.xlu1 %2269 }
 0x2a3   : > { %v2272_v40 = vadd.f32 %v2270_v58, %v2262_v49 }
 0x2a4   : > { %v2491_v44 = vpop.permute.xlu0 %2490 }
 0x2ae   : > { %v2464_v20 = vpop.permute.xlu0 %2463 }
 0x2af   : > { %v2466_v16 = vadd.f32 %v2464_v20, %v2455_v1 }
 0x2b0   : > { %v2589_v7 = vpop.permute.xlu1 %2588 }
 0x2b2   : > { %v2173_v42 = vpop.permute.xlu0 %2172 }
 0x2b3   : > { %v2175_v35 = vadd.f32 %v2173_v42, %v2165_v25 }
 0x2b4   : > { %v2368_v39 = vpop.permute.xlu1 %2367 }
 0x2b5   : > { %v2182_v31 = vadd.f32 %v2180_v50, %v2175_v35  ;;  %v2370_v59 = vadd.f32 %v2368_v39, %v2360_v47 }
 0x2b6   : > { %v2280_v29 = vpop.permute.xlu0 %2279 }
 0x2b7   : > { %v2184_v22 = vsel %vm2183_vm0, %v2182_v31, 0.0  ;;  %v2282_v0 = vadd.f32 %v2280_v29, %v2272_v40 }
 0x2b8   : > { %v2185_v28 = vrot.slane %v2184_v22, 4  ;;  %v2474_v10 = vpop.permute.xlu1 %2473 }
 0x2b9   : > { %v2289_v53 = vadd.f32 %v2287_v48, %v2282_v0  ;;  %v2476_v13 = vadd.f32 %v2474_v10, %v2466_v16 }
 0x2ba   : > { %v2186_v55 = vadd.f32 %v2185_v28, %v2184_v22  ;;  %v2378_v51 = vpop.permute.xlu0 %2377 }
 0x2bb   : > { %v2290_v57 = vsel %vm2083_vm1, %v2289_v53, 0.0  ;;  %v2380_v33 = vadd.f32 %v2378_v51, %v2370_v59 }
 0x2bc   : > { %v2187_v21 = vrot.slane %v2186_v55, 2  ;;  %v2291_v38 = vrot.slane %v2290_v57, 4  ;;  %v2572_v50 = vpop.permute.xlu1 %2571 }
 0x2bd   : > { %v2387_v43 = vadd.f32 %v2385_v32, %v2380_v33  ;;  %v2574_v12 = vadd.f32 %v2572_v50, %v2564_v6 }
 0x2be   : > { %v2188_v5 = vadd.f32 %v2187_v21, %v2186_v55  ;;  %v2292_v9 = vadd.f32 %v2291_v38, %v2290_v57  ;;  %v2484_v2 = vpop.permute.xlu0 %2483 }
 0x2bf   : > { %v2388_v41 = vsel %vm2183_vm0, %v2387_v43, 0.0  ;;  %v2486_v48 = vadd.f32 %v2484_v2, %v2476_v13 }
 0x2c0   : > { %v2293_v18 = vrot.slane %v2292_v9, 2  ;;  %v2389_v15 = vrot.slane %v2388_v41, 4  ;;  %v2582_v58 = vpop.permute.xlu1 %2581  ;;  %v2189_v60 = vrot.slane %v2188_v5, 1 }
 0x2c1   : > { %v2493_v14 = vadd.f32 %v2491_v44, %v2486_v48  ;;  %v2584_v30 = vadd.f32 %v2582_v58, %v2574_v12 }
 0x2c2   : > { %v2294_v20 = vadd.f32 %v2293_v18, %v2292_v9  ;;  %v2390_v26 = vadd.f32 %v2389_v15, %v2388_v41  ;;  %v2190_v54 = vadd.f32 %v2189_v60, %v2188_v5 }
 0x2c3   : > { %v2494_v32 = vsel %vm2083_vm1, %v2493_v14, 0.0  ;;  %v2591_v3 = vadd.f32 %v2589_v7, %v2584_v30 }
 0x2c4   : > { %v2391_v19 = vrot.slane %v2390_v26, 2  ;;  %v2495_v17 = vrot.slane %v2494_v32, 4  ;;  %v2295_v25 = vrot.slane %v2294_v20, 1  ;;  %v2191_v23 = vmul.f32 0.125, %v2190_v54 }
 0x2c5   : > { %v2592_v42 = vsel %vm2183_vm0, %v2591_v3, 0.0 }
 0x2c6   : > { %v2392_v46 = vadd.f32 %v2391_v19, %v2390_v26  ;;  %v2496_v8 = vadd.f32 %v2495_v17, %v2494_v32  ;;  %v2593_v49 = vrot.slane %v2592_v42, 4  ;;  %v2296_v35 = vadd.f32 %v2295_v25, %v2294_v20 }
 0x2c7   : > { %v5832_v39 = vsub.f32 %v2182_v31, %v2191_v23 }
 0x2c8   : > { %v2497_v44 = vrot.slane %v2496_v8, 2  ;;  %v2594_v27 = vadd.f32 %v2593_v49, %v2592_v42  ;;  %v2297_v36 = vmul.f32 0.125, %v2296_v35  ;;  %v2393_v40 = vrot.slane %v2392_v46, 1  ;;  %v5841_v1 = vpop.permute.xlu1 %2029 }
 0x2c9   : > { %v2193_v29 = vmul.f32 %v5832_v39, %v5832_v39 }
 0x2ca   : > { %v2498_v7 = vadd.f32 %v2497_v44, %v2496_v8  ;;  %v2595_v34 = vrot.slane %v2594_v27, 2  ;;  %v5836_v22 = vsub.f32 %v2289_v53, %v2297_v36  ;;  %v2394_v47 = vadd.f32 %v2393_v40, %v2392_v46 }
 0x2cb   : > { %v2194_v0 = vsel %vm2183_vm0, %v2193_v29, 0.0 }
 0x2cc   : > { %v2596_v28 = vadd.f32 %v2595_v34, %v2594_v27  ;;  %v2299_v10 = vmul.f32 %v5836_v22, %v5836_v22  ;;  %v2395_v31 = vmul.f32 0.125, %v2394_v47  ;;  %v2195_v62 = vrot.slane %v2194_v0, 4 }
 0x2cd   : > { %v2499_v59 = vrot.slane %v2498_v7, 1  ;;  %v2315_v12 = vpop.permute.xlu1 %2314 }
 0x2ce   : > { %v2300_v55 = vsel %vm2083_vm1, %v2299_v10, 0.0  ;;  %v5844_v51 = vsub.f32 %v2387_v43, %v2395_v31  ;;  %v2196_v16 = vadd.f32 %v2195_v62, %v2194_v0  ;;  %v2597_v57 = vrot.slane %v2596_v28, 1 }
 0x2cf   : > { %v2301_v53 = vrot.slane %v2300_v55, 4  ;;  %v5846_v33 = vpop.permute.xlu0 %2023  ;;  %v2500_v21 = vadd.f32 %v2499_v59, %v2498_v7 }
 0x2d0   : > { %v2397_v38 = vmul.f32 %v5844_v51, %v5844_v51  ;;  %v2197_v50 = vrot.slane %v2196_v16, 2  ;;  %v2598_v13 = vadd.f32 %v2597_v57, %v2596_v28 }
 0x2d1   : > { %v2302_v6 = vadd.f32 %v2301_v53, %v2300_v55  ;;  %v2501_v5 = vmul.f32 0.125, %v2500_v21  ;;  %v2413_v8 = vpop.permute.xlu1 %2412 }
 0x2d2   : > { %v2398_v9 = vsel %vm2183_vm0, %v2397_v38, 0.0  ;;  %v2198_v2 = vadd.f32 %v2197_v50, %v2196_v16  ;;  %v2599_v41 = vmul.f32 0.125, %v2598_v13 }
 0x2d3   : > { %v2303_v43 = vrot.slane %v2302_v6, 2  ;;  %v2399_v48 = vrot.slane %v2398_v9, 4  ;;  %v2209_v18 = vpop.permute.xlu0 %2208  ;;  %v5851_v15 = vsub.f32 %v2493_v14, %v2501_v5 }
 0x2d4   : > { %v2199_v58 = vrot.slane %v2198_v2, 1  ;;  %v5853_v60 = vsub.f32 %v2591_v3, %v2599_v41 }
 0x2d5   : > { %v2304_v30 = vadd.f32 %v2303_v43, %v2302_v6  ;;  %v2400_v20 = vadd.f32 %v2399_v48, %v2398_v9  ;;  %v2503_v26 = vmul.f32 %v5851_v15, %v5851_v15  ;;  %v2519_v62 = vpop.permute.xlu1 %2518 }
 0x2d6   : > { %v2200_v54 = vadd.f32 %v2199_v58, %v2198_v2  ;;  %v2601_v32 = vmul.f32 %v5853_v60, %v5853_v60 }
 0x2d7   : > { %v2305_v19 = vrot.slane %v2304_v30, 1  ;;  %v2401_v17 = vrot.slane %v2400_v20, 2  ;;  %v2504_v25 = vsel %vm2083_vm1, %v2503_v26, 0.0  ;;  %v2216_v23 = vpop.permute.xlu0 %2215 }
 0x2d8   : > { %v2201_v42 = vmul.f32 0.125, %v2200_v54  ;;  %v2505_v14 = vrot.slane %v2504_v25, 4  ;;  %v2602_v46 = vsel %vm2183_vm0, %v2601_v32, 0.0 }
 0x2d9   : > { %v2306_v3 = vadd.f32 %v2305_v19, %v2304_v30  ;;  %v2402_v49 = vadd.f32 %v2401_v17, %v2400_v20  ;;  %v2603_v35 = vrot.slane %v2602_v46, 4  ;;  %v2420_v13 = vpop.permute.xlu1 %2419 }
 0x2da   : > { %v2202_v44 = vadd.f32 1e-06, %v2201_v42  ;;  %v2506_v27 = vadd.f32 %v2505_v14, %v2504_v25 }
 0x2db   : > { %v2307_v36 = vmul.f32 0.125, %v2306_v3  ;;  %v2403_v40 = vrot.slane %v2402_v49, 1  ;;  %v2604_v29 = vadd.f32 %v2603_v35, %v2602_v46  ;;  %v2322_v0 = vpop.permute.xlu0 %2321 }
 0x2dc   : > { %4848 = vrsqrt.f32 %v2202_v44  ;;  %v2507_v7 = vrot.slane %v2506_v27, 2 }
 0x2dd   : > { %v2308_v34 = vadd.f32 1e-06, %v2307_v36  ;;  %v2404_v47 = vadd.f32 %v2403_v40, %v2402_v49  ;;  %v2605_v28 = vrot.slane %v2604_v29, 2  ;;  %v2042_v26 = vpop.permute.xlu1 %2041 }
 0x2de   : > { %v2508_v10 = vadd.f32 %v2507_v7, %v2506_v27 }
 0x2df   : > { %4850 = vrsqrt.f32 %v2308_v34  ;;  %v2405_v31 = vmul.f32 0.125, %v2404_v47  ;;  %v2606_v59 = vadd.f32 %v2605_v28, %v2604_v29  ;;  %v5861_v21 = vpop.permute.xlu0 %2122  ;;  %v2640_v47 = vld [vmem:[%s6718_s1] sm:$0xff]  ;;  %v2641_v28 = vld [vmem:[%s6718_s1 + $0x8] sm:$0xff] }
 0x2e0   : > { %v2509_v55 = vrot.slane %v2508_v10, 1 }
 0x2e1   : > { %v2406_v16 = vadd.f32 1e-06, %v2405_v31  ;;  %v2607_v57 = vrot.slane %v2606_v59, 1 }
 0x2e2   : > { %v2510_v53 = vadd.f32 %v2509_v55, %v2508_v10 }
 0x2e3   : > { %4852 = vrsqrt.f32 %v2406_v16  ;;  %v2608_v38 = vadd.f32 %v2607_v57, %v2606_v59  ;;  %v2617_v58 = vpop.permute.xlu0 %2616  ;;  %v2643_v59 = vld [vmem:[%s6718_s1 + $0x18] sm:$0xff]  ;;  %v2774_v57 = vld [vmem:[%s6636_s11] sm:$0xff] }
 0x2e4   : > { %v2511_v50 = vmul.f32 0.125, %v2510_v53 }
 0x2e5   : > { %v2609_v6 = vmul.f32 0.125, %v2608_v38  ;;  %v2775_v38 = vld [vmem:[%s6636_s11 + $0x8] sm:$0xff] }
 0x2e6   : > { %v4849_v5 = vpop.eup %4848  ;;  %v2512_v9 = vadd.f32 1e-06, %v2511_v50 }
 0x2e7   : > { %v2204_v2 = vmul.f32 %v4849_v5, %v5832_v39  ;;  %v2610_v41 = vadd.f32 1e-06, %v2609_v6  ;;  %v2526_v42 = vpop.permute.xlu0 %2525 }
 0x2e8   : > { %4854 = vrsqrt.f32 %v2512_v9 }
 0x2e9   : > { %v4851_v43 = vpop.eup %4850  ;;  %v2211_v48 = vmul.f32 %v2209_v18, %v2204_v2  ;;  %4856 = vrsqrt.f32 %v2610_v41  ;;  %v2080_v18 = vpop.permute.xlu1 %2079 }
 0x2ea   : > { %v2310_v30 = vmul.f32 %v4851_v43, %v5836_v22  ;;  %v2026_v22 = vmul.f32 %v5804_v52, %v5846_v33 }
 0x2eb   : > { %v2218_v20 = vadd.f32 %v2216_v23, %v2211_v48  ;;  %v2624_v44 = vpop.permute.xlu0 %2623 }
 0x2ec   : > { %v2317_v54 = vmul.f32 %v2315_v12, %v2310_v30 }
 0x2ed   : > { %v4853_v32 = vpop.eup %4852  ;;  %v2219_v19 = vadd.f32 %v2218_v20, %v5861_v21  ;;  %v2053_v52 = vpop.permute.xlu1 %2052 }
 0x2ee   : > { %v2408_v17 = vmul.f32 %v4853_v32, %v5844_v51  ;;  %v2324_v25 = vadd.f32 %v2322_v0, %v2317_v54  ;;  %v2032_v51 = vmul.f32 %v5811_v61, %v5841_v1  ;;  %v4839_v1 = vld [vmem:[%s6717_s22] sm:$0xff]  }
 0x2ef   : > { %2221 = vrot.lane.b32.xlu0 %v2219_v19, %s4908_s0  ;;  %4661 = vmatprep.mubr.msk.bf16.mxu0 %vm2674_vm2, %v4839_v1  ;;  %s6719_s0 = sld [smem:[#allocation27_spill]] }
 0x2f0   : > { %v2415_v39 = vmul.f32 %v2413_v8, %v2408_v17  ;;  %v2325_v14 = vadd.f32 %v2324_v25, %v5861_v21  ;;  %v2033_v27 = vadd.f32 %v2032_v51, %v2026_v22 }
 0x2f2   : > { %v4855_v46 = vpop.eup %4854  ;;  %v2422_v23 = vadd.f32 %v2420_v13, %v2415_v39  ;;  %2327 = vrot.lane.b32.xlu1 %v2325_v14, %s4909_s27  ;;  %v2044_v40 = vadd.f32 %v2042_v26, %v2033_v27  ;;  %v5918_v27 = vld [vmem:[%s6637_s12 + $0x8] sm:$0xff] }
 0x2f3   : > { %v4857_v12 = vpop.eup %4856  ;;  %v2514_v3 = vmul.f32 %v4855_v46, %v5851_v15  ;;  %v2063_v15 = vpop.permute.xlu0 %2062 }
 0x2f4   : > { %v2612_v49 = vmul.f32 %v4857_v12, %v5853_v60  ;;  %v2423_v8 = vadd.f32 %v2422_v23, %v5861_v21  ;;  %v2055_v34 = vadd.f32 %v2053_v52, %v2044_v40 }
 0x2f5   : > { %v2521_v35 = vmul.f32 %v2519_v62, %v2514_v3  ;;  %v2642_v62 = vld [vmem:[%s6718_s1 + $0x10] sm:$0xff] }
 0x2f6   : > { %v2619_v36 = vmul.f32 %v2617_v58, %v2612_v49  ;;  %2425 = vrot.lane.b32.xlu0 %v2423_v8, %s4910_s3  ;;  %v2065_v60 = vadd.f32 %v2063_v15, %v2055_v34 }
 0x2f7   : > { %v2528_v33 = vadd.f32 %v2526_v42, %v2521_v35  ;;  %v4840_v35 = vld [vmem:[%s6717_s22 + $0x8] sm:$0xff]  }
 0x2f8   : > { %v2626_v29 = vadd.f32 %v2624_v44, %v2619_v36  ;;  %v5913_v44 = vld [vmem:[%s6637_s12] sm:$0xff] }
 0x2f9   : > { %v2529_v7 = vadd.f32 %v2528_v33, %v5861_v21 }
 0x2fa   : > { %v2627_v61 = vadd.f32 %v2626_v29, %v5861_v21 }
 0x2fb   : > { %2531 = vrot.lane.b32.xlu1 %v2529_v7, %s4911_s30  ;;  %s4915_s30 = smov 122  }
 0x2fc   : > { %2629 = vrot.lane.b32.xlu0 %v2627_v61, %s4912_s2  ;;  %s4916_s2 = smov 113  }
 0x2fd   : > { %v2073_v0 = vpop.permute.xlu1 %2072 }
 0x2fe   : > { %v2075_v10 = vadd.f32 %v2073_v0, %v2065_v60 }
 0x2ff   : > { %2646 = vperm.xlu1 %4803, %v2640_v47  }
 0x300   : > { %v2082_v31 = vadd.f32 %v2080_v18, %v2075_v10  ;;  %2651 = vperm.xlu0 %4798, %v2641_v28  }
 0x302   : > { %v2084_v55 = vsel %vm2083_vm1, %v2082_v31, 0.0 }
 0x303   : > { %v2085_v16 = vrot.slane %v2084_v55, 4  ;;  %2656 = vperm.xlu1 %4803, %v2642_v62  }
 0x304   : > { %2661 = vperm.xlu0 %4798, %v2643_v59   ;;  %v2110_v42 = vpop.permute.xlu0 %2109 }
 0x305   : > { %v2086_v53 = vadd.f32 %v2085_v16, %v2084_v55 }
 0x307   : > { %v2087_v50 = vrot.slane %v2086_v53, 2  ;;  %2778 = vperm.xlu1 %4803, %v2774_v57  }
 0x308   : > { %2783 = vperm.xlu0 %4798, %v2775_v38  }
 0x309   : > { %v2088_v13 = vadd.f32 %v2087_v50, %v2086_v53 }
 0x30b   : > { %v2089_v6 = vrot.slane %v2088_v13, 1  ;;  %4804 = vset.pattern.permute.xlu1 %v6712_v56 }
 0x30c   : > { %4807 = vset.pattern.permute.xlu0 %v6699_v63  ;;  %3116 = vperm.xlu1 %4804, %v5913_v44  }
 0x30d   : > { %v2090_v5 = vadd.f32 %v2089_v6, %v2088_v13  ;;  %3160 = vperm.xlu0 %4807, %v5918_v27  }
 0x30e   : > { %v2117_v14 = vpop.permute.xlu1 %2116 }
 0x30f   : > { %v2092_v9 = vmul.f32 0.125, %v2090_v5 }
 0x310   : > { %3313 = vperm.xlu1 %4804, %v5918_v27  }
 0x311   : > { %v2093_v2 = vsub.f32 %v2082_v31, %v2092_v9  ;;  %4808 = vset.pattern.permute.xlu0 %v6705_v4 }
 0x312   : > { %3176 = vperm.xlu0 %4808, %v5913_v44  }
 0x313   : > { %v2094_v41 = vmul.f32 %v2093_v2, %v2093_v2 }
 0x314   : > { %4805 = vset.pattern.permute.xlu1 %v6709_v11 }
 0x315   : > { %v2095_v43 = vsel %vm2083_vm1, %v2094_v41, 0.0  ;;  %3140 = vperm.xlu1 %4805, %v5918_v27  }
 0x316   : > { %v2096_v48 = vrot.slane %v2095_v43, 4  ;;  %3373 = vperm.xlu0 %4808, %v5918_v27  }
 0x318   : > { %v2097_v58 = vadd.f32 %v2096_v48, %v2095_v43 }
 0x319   : > { %3329 = vperm.xlu1 %4805, %v5913_v44  }
 0x31a   : > { %v2098_v30 = vrot.slane %v2097_v58, 2  ;;  %4810 = vset.pattern.permute.xlu0 %v6712_v56 }
 0x31b   : > { %3120 = vperm.xlu0 %4810, %v5918_v27  }
 0x31c   : > { %v2099_v20 = vadd.f32 %v2098_v30, %v2097_v58 }
 0x31d   : > { %4806 = vset.pattern.permute.xlu1 %v6699_v63 }
 0x31e   : > { %v2100_v26 = vrot.slane %v2099_v20, 1  ;;  %3156 = vperm.xlu1 %4806, %v5913_v44  }
 0x31f   : > { %3309 = vperm.xlu0 %4810, %v5913_v44  }
 0x320   : > { %v2101_v54 = vadd.f32 %v2100_v26, %v2099_v20 }
 0x322   : > { %v2102_v32 = vmul.f32 0.125, %v2101_v54  ;;  %3349 = vperm.xlu1 %4806, %v5913_v44  }
 0x323   : > { %2921 = vperm.xlu0 %4810, %v5913_v44  }
 0x324   : > { %v2103_v19 = vadd.f32 1e-06, %v2102_v32 }
 0x326   : > { %4858 = vrsqrt.f32 %v2103_v19  ;;  %3353 = vperm.xlu1 %4806, %v5918_v27  }
 0x327   : > { %4813 = vset.pattern.permute.xlu0 %v6709_v11 }
 0x328   : > { %3136 = vperm.xlu0 %4813, %v5913_v44  }
 0x32a   : > { %4809 = vset.pattern.permute.xlu1 %v6705_v4 }
 0x32b   : > { %3180 = vperm.xlu1 %4809, %v5918_v27  }
 0x32c   : > { %3333 = vperm.xlu0 %4813, %v5918_v27  }
 0x32f   : > { %3369 = vperm.xlu1 %4809, %v5913_v44  }
 0x330   : > { %v4859_v17 = vpop.eup %4858 }
 0x331   : > { %v2105_v25 = vmul.f32 %v4859_v17, %v2093_v2 }
 0x333   : > { %v2112_v39 = vmul.f32 %v2110_v42, %v2105_v25  ;;  %4811 = vset.pattern.permute.xlu1 %v6710_v24 }
 0x334   : > { %3091 = vperm.xlu1 %4811, %v5913_v44  }
 0x335   : > { %v2119_v18 = vadd.f32 %v2117_v14, %v2112_v39 }
 0x337   : > { %v2125_v46 = vadd.f32 %v5861_v21, %v2119_v18 }
 0x338   : > { %4812 = vset.pattern.permute.xlu1 %v6711_v37 }
 0x339   : > { %2126 = vst.msk [vmem:[#allocation2] sm:$0xff] %vm2083_vm1, %v2125_v46  ;;  %3104 = vperm.xlu1 %4812, %v5913_v44   ;;  %vm3468_vm1 = vcmask 121936  }
 0x33d   : > { %3108 = vperm.xlu1 %4812, %v5918_v27  }
 0x341   : > { %4814 = vset.pattern.permute.xlu1 %v6712_v56 }
 0x342   : > { %2925 = vperm.xlu1 %4814, %v5918_v27  }
 0x346   : > { %4815 = vset.pattern.permute.xlu1 %v6710_v24 }
 0x361   : > { %v2222_v22 = vpop.permute.xlu0 %2221 }
 0x362   : > { %2225 = vst.msk [vmem:[#allocation2] sm:$0xff] %vm2224_vm3, %v2222_v22 }
 0x364   : > { %v2328_v23 = vpop.permute.xlu1 %2327 }
 0x365   : > { %2331 = vst.msk [vmem:[#allocation2] sm:$0xff] %vm2330_vm4, %v2328_v23 }
 0x368   : > { %v2426_v12 = vpop.permute.xlu0 %2425 }
 0x369   : > { %2429 = vst.msk [vmem:[#allocation2] sm:$0xff] %vm2428_vm5, %v2426_v12 }
 0x36d   : > { %v2532_v3 = vpop.permute.xlu1 %2531 }
 0x36e   : > { %2535 = vst.msk [vmem:[#allocation2] sm:$0xff] %vm2534_vm6, %v2532_v3  ;;  %v2630_v51 = vpop.permute.xlu0 %2629 }
 0x36f   : > { %2633 = vst.msk [vmem:[#allocation2] sm:$0xff] %vm2632_vm7, %v2630_v51  ;;  %v4841_v51 = vld [vmem:[%s6719_s0] sm:$0xff]   ;;  %s4919_s0 = smov 126  }
 0x376   : > { %v2638_v49 = vld [vmem:[#allocation2] sm:$0xff] }
 0x377   : > { %v2639_v21 = vpack.c.bf16 %v2638_v49, %v2638_v49 }
 0x379   : > { %4695 = vmatprep.subr.msk.bf16.mxu0 %vm2681_vm8, %v2639_v21  ;;  %v2683_v8 = vsel %vm2681_vm8, %v2639_v21, 0 }
 0x37a   : > { %4660 = vmatpush3.bf16.msra.mxu0 %v2683_v8 }
 0x37d   : > { %4662 = vmatmul.mubr.msk.bf16.vlgmr.msra.gmra.mrb[0].mxu0 %vm2674_vm2, %v4840_v35  ;;  %vm3742_vm2 = vcmask 523264  }
 0x37e   : > { %v2647_v36 = vpop.permute.xlu1 %2646 }
 0x37f   : > { %v2652_v52 = vpop.permute.xlu0 %2651 }
 0x382   : > { %v2657_v33 = vpop.permute.xlu1 %2656 }
 0x383   : > { %v2662_v15 = vpop.permute.xlu0 %2661 }
 0x386   : > { %v2779_v49 = vpop.permute.xlu1 %2778 }
 0x450   : > { %v4663_v40 = vpop.f32.mrb[0].mxu0 }
 0x451   : > { %v2728_v29 = vadd.f32 %v4663_v40, %v2657_v33  ;;  %v2719_v7 = vpop.f32.mrb[1].mxu0  ;;  %v2784_v33 = vpop.permute.xlu0 %2783 }
 0x452   : > { %v2720_v34 = vadd.f32 %v2719_v7, %v2647_v36  ;;  %v4664_v61 = vpop.f32.mrb[2].mxu0  ;;  %v6017_v7 = vld [vmem:[%s6638_s13 + $0x8] sm:$0xff] }
 0x453   : > { %v2740_v1 = vmul.f32 0.044715, %v2728_v29  ;;  %v2731_v60 = vadd.f32 %v4664_v61, %v2662_v15  ;;  %v2722_v47 = vpop.f32.mrb[3].mxu0  ;;  %v2736_v19 = vmul.f32 0.5, %v2728_v29  ;;  %v3117_v15 = vpop.permute.xlu1 %3116 }
 0x454   : > { %v2738_v0 = vmul.f32 0.044715, %v2720_v34  ;;  %v2723_v28 = vadd.f32 %v2722_v47, %v2652_v52  ;;  %v2734_v42 = vmul.f32 0.5, %v2720_v34 }
 0x455   : > { %v2744_v10 = vmul.f32 %v2740_v1, %v2728_v29  ;;  %v2741_v31 = vmul.f32 0.044715, %v2731_v60  ;;  %v2737_v17 = vmul.f32 0.5, %v2731_v60  ;;  %v6034_v1 = vpop.permute.xlu0 %3160 }
 0x456   : > { %v2742_v62 = vmul.f32 %v2738_v0, %v2720_v34  ;;  %v2739_v59 = vmul.f32 0.044715, %v2723_v28  ;;  %v2735_v39 = vmul.f32 0.5, %v2723_v28 }
 0x457   : > { %v2748_v55 = vmul.f32 %v2744_v10, %v2728_v29  ;;  %v2745_v16 = vmul.f32 %v2741_v31, %v2731_v60 }
 0x458   : > { %v2743_v57 = vmul.f32 %v2739_v59, %v2723_v28  ;;  %v2746_v53 = vmul.f32 %v2742_v62, %v2720_v34 }
 0x459   : > { %v2749_v38 = vmul.f32 %v2745_v16, %v2731_v60  ;;  %v2752_v50 = vadd.f32 %v2748_v55, %v2728_v29  ;;  %v6010_v29 = vld [vmem:[%s6638_s13] sm:$0xff] }
 0x45a   : > { %v2747_v13 = vmul.f32 %v2743_v57, %v2723_v28  ;;  %v2750_v6 = vadd.f32 %v2746_v53, %v2720_v34  ;;  %v3314_v34 = vpop.permute.xlu1 %3313 }
 0x45b   : > { %v2753_v5 = vadd.f32 %v2749_v38, %v2731_v60  ;;  %v2756_v9 = vmul.f32 0.7978846, %v2752_v50  ;;  %v6036_v60 = vpop.permute.xlu0 %3176 }
 0x45c   : > { %v2751_v2 = vadd.f32 %v2747_v13, %v2723_v28  ;;  %v2754_v41 = vmul.f32 0.7978846, %v2750_v6 }
 0x45d   : > { %v2757_v43 = vmul.f32 0.7978846, %v2753_v5  ;;  %4860 = vtanh.f32 %v2756_v9 }
 0x45e   : > { %v2755_v48 = vmul.f32 0.7978846, %v2751_v2  ;;  %4862 = vtanh.f32 %v2754_v41 }
 0x45f   : > { %4864 = vtanh.f32 %v2757_v43  ;;  %v6040_v0 = vpop.permute.xlu0 %3373 }
 0x460   : > { %4866 = vtanh.f32 %v2755_v48 }
 0x463   : > { %v3121_v10 = vpop.permute.xlu0 %3120 }
 0x467   : > { %v4861_v58 = vpop.eup %4860  ;;  %v3310_v59 = vpop.permute.xlu0 %3309 }
 0x468   : > { %v4863_v30 = vpop.eup %4862  ;;  %v2764_v20 = vadd.f32 1.0, %v4861_v58 }
 0x469   : > { %v4865_v26 = vpop.eup %4864  ;;  %v2762_v54 = vadd.f32 1.0, %v4863_v30 }
 0x46a   : > { %v4867_v32 = vpop.eup %4866  ;;  %v2765_v25 = vadd.f32 1.0, %v4865_v26  ;;  %v2768_v18 = vmul.f32 %v2764_v20, %v2736_v19 }
 0x46b   : > { %v2763_v14 = vadd.f32 1.0, %v4867_v32  ;;  %v2766_v22 = vmul.f32 %v2762_v54, %v2734_v42  ;;  %v6046_v16 = vpop.permute.xlu0 %2921 }
 0x46c   : > { %v2769_v46 = vmul.f32 %v2765_v25, %v2737_v17 }
 0x46d   : > { %v2767_v23 = vmul.f32 %v2763_v14, %v2735_v39 }
 0x46e   : > { %v2773_v12 = vpack.c.bf16 %v2769_v46, %v2768_v18 }
 0x46f   : > { %v2772_v3 = vpack.c.bf16 %v2767_v23, %v2766_v22  ;;  %v3137_v57 = vpop.permute.xlu0 %3136 }
 0x471   : > { %4666 = vmatpush3.bf16.msra.mxu1 %v2772_v3 }
 0x472   : > { %4667 = vmatprep.subr.bf16.mxu1 %v4905_v45 }
 0x473   : > { %v3334_v50 = vpop.permute.xlu0 %3333 }
 0x475   : > { %4668 = vmatpush3.bf16.msra.mxu1 %v2773_v12 }
 0x478   : > { %4670 = vmatmul.mubr.msk.bf16.vlgmr.msra.gmra.mrb[0].mxu1 %vm2791_vm10, %v4841_v51 }
 0x54b   : > { %v2829_v21 = vpop.f32.mrb[0].mxu1 }
 0x54c   : > { %v2830_v8 = vadd.f32 %v2829_v21, %v2779_v49  ;;  %v4671_v35 = vpop.f32.mrb[1].mxu1 }
 0x54d   : > { %v2832_v36 = vpop.f32.mrb[2].mxu1 }
 0x54e   : > { %2880 = vrot.lane.b32.xlu0 %v2830_v8, %s4914_s29  ;;  %2856 = vrot.lane.b32.xlu1 %v2830_v8, %s4915_s30  ;;  %v4672_v52 = vpop.f32.mrb[3].mxu1  ;;  %v2833_v40 = vadd.f32 %v2832_v36, %v2784_v33 }
 0x552   : > { %2872 = vrot.lane.b32.xlu1 %v2830_v8, %s4916_s2  ;;  %2858 = vrot.lane.b32.xlu0 %v2833_v40, %s4915_s30 }
 0x556   : > { %2864 = vrot.lane.b32.xlu1 %v2830_v8, %s4917_s10  ;;  %2874 = vrot.lane.b32.xlu0 %v2833_v40, %s4916_s2  ;;  %s4921_s2 = smov 10  }
 0x55a   : > { %2838 = vrot.lane.b32.xlu1 %v2830_v8, %s4918_s6  ;;  %2847 = vrot.lane.b32.xlu0 %v2830_v8, %s4919_s0 }
 0x55e   : > { %2866 = vrot.lane.b32.xlu1 %v2833_v40, %s4917_s10  ;;  %2941 = vperm.xlu0 %4813, %v5913_v44   ;;  %s4641_s10 = sshll.u32 %s6721_s28, 4 }
 0x55f   : > { %s846_s3 = scalar_lea.vmem %s6641_s16, %s4641_s10 }
 0x562   : > { %2882 = vrot.lane.b32.xlu1 %v2833_v40, %s4914_s29  ;;  %4819 = vset.pattern.permute.xlu0 %v6699_v63  ;;  %s4923_s29 = smov 120  }
 0x563   : > { %2965 = vperm.xlu0 %4819, %v5918_v27  }
 0x566   : > { %3284 = vperm.xlu1 %4815, %v5913_v44  }
 0x567   : > { %4820 = vset.pattern.permute.xlu0 %v6710_v24 }
 0x568   : > { %3096 = vperm.xlu0 %4820, %v5918_v27  }
 0x56a   : > { %4816 = vset.pattern.permute.xlu1 %v6711_v37 }
 0x56b   : > { %3297 = vperm.xlu1 %4816, %v5913_v44  }
 0x56c   : > { %3289 = vperm.xlu0 %4820, %v5918_v27  }
 0x56f   : > { %3301 = vperm.xlu1 %4816, %v5918_v27  }
 0x570   : > { %3199 = vperm.xlu0 %4820, %v6010_v29  }
 0x573   : > { %4817 = vset.pattern.permute.xlu1 %v6709_v11  ;;  %v6028_v11 = vpop.permute.xlu1 %3140 }
 0x574   : > { %2945 = vperm.xlu1 %4817, %v5918_v27   ;;  %3397 = vperm.xlu0 %4820, %v6017_v7  }
 0x578   : > { %4818 = vset.pattern.permute.xlu1 %v6699_v63  ;;  %2840 = vrot.lane.b32.xlu0 %v2833_v40, %s4918_s6  ;;  %v3330_v63 = vpop.permute.xlu1 %3329 }
 0x579   : > { %2961 = vperm.xlu1 %4818, %v5913_v44   ;;  %4824 = vset.pattern.permute.xlu0 %v6711_v37 }
 0x57c   : > { %v3157_v61 = vpop.permute.xlu1 %3156 }
 0x57d   : > { %4821 = vset.pattern.permute.xlu1 %v6705_v4 }
 0x57e   : > { %2981 = vperm.xlu1 %4821, %v5913_v44  }
 0x580   : > { %v3350_v4 = vpop.permute.xlu1 %3349 }
 0x582   : > { %2985 = vperm.xlu1 %4821, %v5918_v27  }
 0x584   : > { %v6038_v47 = vpop.permute.xlu1 %3353 }
 0x586   : > { %4822 = vset.pattern.permute.xlu1 %v6710_v24 }
 0x587   : > { %3204 = vperm.xlu1 %4822, %v6017_v7  }
 0x588   : > { %v6042_v28 = vpop.permute.xlu1 %3180 }
 0x58b   : > { %3392 = vperm.xlu1 %4822, %v6010_v29  }
 0x58c   : > { %v6044_v31 = vpop.permute.xlu1 %3369 }
 0x58f   : > { %2849 = vrot.lane.b32.xlu1 %v2833_v40, %s4919_s0 }
 0x590   : > { %v3092_v62 = vpop.permute.xlu1 %3091 }
 0x594   : > { %v3105_v55 = vpop.permute.xlu1 %3104 }
 0x598   : > { %v6048_v53 = vpop.permute.xlu1 %3108 }
 0x59c   : > { %v6050_v38 = vpop.permute.xlu1 %2925 }
 0x5c0   : > { %v2857_v13 = vpop.permute.xlu1 %2856  ;;  %v2881_v6 = vpop.permute.xlu0 %2880 }
 0x5c1   : > { %4593 = vst.msk [vmem:[%s5959_s8 + $0x20] sm:$0xff] %vm2844_vm12, %v2857_v13 }
 0x5c2   : > { %4599 = vst.msk [vmem:[%s5959_s8 + $0x50] sm:$0xff] %vm2853_vm13, %v2881_v6 }
 0x5c4   : > { %v2873_v5 = vpop.permute.xlu1 %2872  ;;  %v2859_v9 = vpop.permute.xlu0 %2858 }
 0x5c5   : > { %4597 = vst.msk [vmem:[%s5959_s8 + $0x40] sm:$0xff] %vm2844_vm12, %v2873_v5  ;;  %4594 = vst.msk [vmem:[%s5959_s8 + $0x28] sm:$0xff] %vm2844_vm12, %v2859_v9  ;;  %v3237_v5 = vld [vmem:[%s6639_s14] sm:$0xff] }
 0x5c8   : > { %v2865_v2 = vpop.permute.xlu1 %2864  ;;  %v2875_v41 = vpop.permute.xlu0 %2874  ;;  %v4603_v43 = vld [vmem:[%s5959_s8 + $0x20] sm:$0xff] }
 0x5c9   : > { %4595 = vst.msk [vmem:[%s5959_s8 + $0x30] sm:$0xff] %vm2853_vm13, %v2865_v2  ;;  %v3123_v48 = vmul.f32 %v4603_v43, %v3117_v15  ;;  %v4609_v42 = vld [vmem:[%s5959_s8 + $0x50] sm:$0xff]  ;;  %v3099_v39 = vmul.f32 %v4603_v43, %v3092_v62  ;;  %v3163_v12 = vmul.f32 %v4603_v43, %v3157_v61  ;;  %v3238_v43 = vld [vmem:[%s6639_s14 + $0x8] sm:$0xff] }
 0x5ca   : > { %4598 = vst.msk [vmem:[%s5959_s8 + $0x48] sm:$0xff] %vm2844_vm12, %v2875_v41  ;;  %v3336_v22 = vmul.f32 %v4609_v42, %v3330_v63 }
 0x5cb   : > { %3127 = vrot.lane.b32.xlu0 %v3123_v48, %s4904_s5 }
 0x5cc   : > { %v2839_v58 = vpop.permute.xlu1 %2838  ;;  %v2848_v30 = vpop.permute.xlu0 %2847  ;;  %v4607_v20 = vld [vmem:[%s5959_s8 + $0x40] sm:$0xff]  ;;  %v4604_v35 = vld [vmem:[%s5959_s8 + $0x28] sm:$0xff] }
 0x5cd   : > { %2845 = vst.msk [vmem:[%s5959_s8] sm:$0xff] %vm2844_vm12, %v2839_v58  ;;  %v3316_v26 = vmul.f32 %v4607_v20, %v3310_v59  ;;  %v3356_v49 = vmul.f32 %v4607_v20, %v3350_v4  ;;  %v3124_v36 = vmul.f32 %v4604_v35, %v3121_v10  ;;  %v3164_v52 = vmul.f32 %v4604_v35, %v6034_v1 }
 0x5ce   : > { %4591 = vst.msk [vmem:[%s5959_s8 + $0x10] sm:$0xff] %vm2853_vm13, %v2848_v30  ;;  %v3376_v1 = vmul.f32 %v4609_v42, %v6044_v31  ;;  %v3251_v30 = vld [vmem:[%s6640_s15] sm:$0xff] }
 0x5cf   : > { %3320 = vrot.lane.b32.xlu1 %v3316_v26, %s4904_s5  ;;  %v2889_v26 = vld [vmem:[%s846_s3 + $0x8] sm:$0xff] }
 0x5d0   : > { %v2867_v54 = vpop.permute.xlu1 %2866  ;;  %v4605_v32 = vld [vmem:[%s5959_s8 + $0x30] sm:$0xff] }
 0x5d1   : > { %v4608_v19 = vld [vmem:[%s5959_s8 + $0x48] sm:$0xff]  ;;  %4596 = vst.msk [vmem:[%s5959_s8 + $0x38] sm:$0xff] %vm2853_vm13, %v2867_v54  ;;  %v3143_v17 = vmul.f32 %v4605_v32, %v3137_v57  ;;  %v3111_v14 = vmul.f32 %v4605_v32, %v3105_v55  ;;  %v3183_v15 = vmul.f32 %v4605_v32, %v6036_v60  ;;  %v2888_v32 = vld [vmem:[%s846_s3] sm:$0xff] }
 0x5d2   : > { %v3317_v25 = vmul.f32 %v4608_v19, %v3314_v34  ;;  %v3357_v34 = vmul.f32 %v4608_v19, %v6038_v47 }
 0x5d3   : > { %3147 = vrot.lane.b32.xlu1 %v3143_v17, %s4904_s5  ;;  %v6079_v46 = vadd.f32 %v3111_v14, %v3099_v39 }
 0x5d4   : > { %3322 = vrot.lane.b32.xlu0 %v3317_v25, %s4904_s5  ;;  %v2883_v18 = vpop.permute.xlu1 %2882  ;;  %v6129_v2 = vld [vmem:[%s5959_s8] sm:$0xff] }
 0x5d5   : > { %4600 = vst.msk [vmem:[%s5959_s8 + $0x58] sm:$0xff] %vm2853_vm13, %v2883_v18 }
 0x5d7   : > { %3340 = vrot.lane.b32.xlu1 %v3336_v22, %s4904_s5 }
 0x5d8   : > { %v4606_v23 = vld [vmem:[%s5959_s8 + $0x38] sm:$0xff] }
 0x5d9   : > { %v3144_v3 = vmul.f32 %v4606_v23, %v6028_v11  ;;  %v3112_v61 = vmul.f32 %v4606_v23, %v6048_v53  ;;  %v3184_v4 = vmul.f32 %v4606_v23, %v6042_v28 }
 0x5db   : > { %3167 = vrot.lane.b32.xlu1 %v3163_v12, %s4919_s0  ;;  %3149 = vrot.lane.b32.xlu0 %v3144_v3, %s4904_s5 }
 0x5dc   : > { %v4610_v51 = vld [vmem:[%s5959_s8 + $0x58] sm:$0xff] }
 0x5dd   : > { %v3337_v21 = vmul.f32 %v4610_v51, %v3334_v50  ;;  %v6089_v8 = vpop.permute.xlu0 %2941  ;;  %v3377_v47 = vmul.f32 %v4610_v51, %v6040_v0 }
 0x5df   : > { %3360 = vrot.lane.b32.xlu1 %v3356_v49, %s4919_s0  ;;  %3342 = vrot.lane.b32.xlu0 %v3337_v21, %s4904_s5 }
 0x5e2   : > { %v6095_v33 = vpop.permute.xlu0 %2965 }
 0x5e3   : > { %3129 = vrot.lane.b32.xlu1 %v3124_v36, %s4904_s5  ;;  %3169 = vrot.lane.b32.xlu0 %v3164_v52, %s4919_s0 }
 0x5e5   : > { %v3285_v40 = vpop.permute.xlu1 %3284 }
 0x5e6   : > { %v3292_v59 = vmul.f32 %v4607_v20, %v3285_v40  ;;  %v6153_v20 = vld [vmem:[%s5959_s8 + $0x10] sm:$0xff] }
 0x5e7   : > { %3187 = vrot.lane.b32.xlu1 %v3183_v15, %s4919_s0  ;;  %3362 = vrot.lane.b32.xlu0 %v3357_v34, %s4919_s0  ;;  %v3097_v11 = vpop.permute.xlu0 %3096 }
 0x5e8   : > { %v3100_v63 = vmul.f32 %v4604_v35, %v3097_v11 }
 0x5ea   : > { %v3298_v10 = vpop.permute.xlu1 %3297  ;;  %v6106_v62 = vadd.f32 %v3112_v61, %v3100_v63 }
 0x5eb   : > { %v3304_v55 = vmul.f32 %v4609_v42, %v3298_v10  ;;  %3380 = vrot.lane.b32.xlu1 %v3376_v1, %s4919_s0  ;;  %3189 = vrot.lane.b32.xlu0 %v3184_v4, %s4919_s0  ;;  %v3290_v60 = vpop.permute.xlu0 %3289 }
 0x5ec   : > { %v3293_v31 = vmul.f32 %v4608_v19, %v3290_v60 }
 0x5ed   : > { %v6111_v57 = vadd.f32 %v3304_v55, %v3292_v59 }
 0x5ee   : > { %v3302_v53 = vpop.permute.xlu1 %3301 }
 0x5ef   : > { %v3305_v50 = vmul.f32 %v4610_v51, %v3302_v53  ;;  %2896 = vperm.xlu1 %4822, %v5913_v44   ;;  %3382 = vrot.lane.b32.xlu0 %v3377_v47, %s4919_s0  ;;  %v6115_v28 = vpop.permute.xlu0 %3199 }
 0x5f1   : > { %v6117_v13 = vadd.f32 %v3305_v50, %v3293_v31 }
 0x5f3   : > { %4823 = vset.pattern.permute.xlu1 %v6711_v37  ;;  %2913 = vperm.xlu0 %4824, %v5918_v27   ;;  %v6121_v0 = vpop.permute.xlu0 %3397  ;;  %v2946_v6 = vpop.permute.xlu1 %2945 }
 0x5f4   : > { %2909 = vperm.xlu1 %4823, %v5913_v44   ;;  %v2928_v44 = vmul.f32 %v6046_v16, %v6129_v2 }
 0x5f7   : > { %4825 = vset.pattern.permute.xlu0 %v6710_v24  ;;  %v2841_v9 = vpop.permute.xlu0 %2840 }
 0x5f8   : > { %2846 = vst.msk [vmem:[%s5959_s8 + $0x8] sm:$0xff] %vm2844_vm12, %v2841_v9  ;;  %v2962_v41 = vpop.permute.xlu1 %2961  ;;  %4826 = vset.pattern.permute.xlu1 %v6710_v24  ;;  %2901 = vperm.xlu0 %4825, %v5918_v27   ;;  %v3252_v27 = vld [vmem:[%s6640_s15 + $0x8] sm:$0xff] }
 0x5f9   : > { %3241 = vperm.xlu1 %4826, %v3237_v5   ;;  %v2968_v39 = vmul.f32 %v2962_v41, %v6129_v2 }
 0x5fc   : > { %2932 = vrot.lane.b32.xlu0 %v2928_v44, %s4904_s5 }
 0x5fd   : > { %v2982_v48 = vpop.permute.xlu1 %2981  ;;  %3246 = vperm.xlu1 %4826, %v3238_v43  }
 0x5fe   : > { %v2988_v18 = vmul.f32 %v6153_v20, %v2982_v48 }
 0x5ff   : > { %v6166_v19 = vld [vmem:[%s5959_s8 + $0x8] sm:$0xff] }
 0x600   : > { %3434 = vperm.xlu0 %4825, %v3237_v5   ;;  %v2929_v42 = vmul.f32 %v6050_v38, %v6166_v19  ;;  %v2969_v14 = vmul.f32 %v6095_v33, %v6166_v19 }
 0x601   : > { %3439 = vperm.xlu1 %4826, %v3238_v43   ;;  %v2986_v58 = vpop.permute.xlu1 %2985 }
 0x604   : > { %3009 = vperm.xlu0 %4825, %v6017_v7  }
 0x605   : > { %3004 = vperm.xlu1 %4826, %v6010_v29   ;;  %v2948_v29 = vmul.f32 %v6153_v20, %v6089_v8 }
 0x606   : > { %v6146_v16 = vpop.permute.xlu1 %3204 }
 0x608   : > { %3260 = vperm.xlu0 %4825, %v3252_v27  }
 0x609   : > { %3255 = vperm.xlu1 %4826, %v3251_v30  }
 0x60a   : > { %v6155_v7 = vpop.permute.xlu1 %3392 }
 0x60c   : > { %3453 = vperm.xlu0 %4825, %v3252_v27  }
 0x60d   : > { %2952 = vrot.lane.b32.xlu1 %v2948_v29, %s4904_s5 }
 0x60e   : > { %v2850_v54 = vpop.permute.xlu1 %2849 }
 0x60f   : > { %4592 = vst.msk [vmem:[%s5959_s8 + $0x18] sm:$0xff] %vm2853_vm13, %v2850_v54 }
 0x610   : > { %3078 = vperm.xlu0 %4825, %v2889_v26  }
 0x611   : > { %3448 = vperm.xlu1 %4826, %v3251_v30  }
 0x615   : > { %3073 = vperm.xlu1 %4826, %v2888_v32  }
 0x616   : > { %v6169_v17 = vld [vmem:[%s5959_s8 + $0x18] sm:$0xff]  ;;  %s4920_s8 = smov 5  }
 0x617   : > { %v2949_v25 = vmul.f32 %v6169_v17, %v2946_v6  ;;  %v2989_v22 = vmul.f32 %v6169_v17, %v2986_v58 }
 0x619   : > { %2954 = vrot.lane.b32.xlu0 %v2949_v25, %s4904_s5  ;;  %2934 = vrot.lane.b32.xlu1 %v2929_v42, %s4904_s5 }
 0x61d   : > { %2974 = vrot.lane.b32.xlu0 %v2969_v14, %s4919_s0  ;;  %2972 = vrot.lane.b32.xlu1 %v2968_v39, %s4919_s0 }
 0x621   : > { %2994 = vrot.lane.b32.xlu0 %v2989_v22, %s4919_s0  ;;  %2992 = vrot.lane.b32.xlu1 %v2988_v18, %s4919_s0 }
 0x625   : > { %3052 = vperm.xlu0 %4825, %v3238_v43   ;;  %3047 = vperm.xlu1 %4826, %v3237_v5  }
 0x629   : > { %3066 = vperm.xlu0 %4825, %v3252_v27   ;;  %3061 = vperm.xlu1 %4826, %v3251_v30  }
 0x63d   : > { %v3128_v23 = vpop.permute.xlu0 %3127 }
 0x63e   : > { %v3133_v36 = vadd.f32 %v3128_v23, %v6079_v46 }
 0x641   : > { %v3321_v38 = vpop.permute.xlu1 %3320 }
 0x642   : > { %v3326_v34 = vadd.f32 %v3321_v38, %v6111_v57 }
 0x645   : > { %v3148_v12 = vpop.permute.xlu1 %3147 }
 0x646   : > { %v3323_v3 = vpop.permute.xlu0 %3322  ;;  %v3153_v40 = vadd.f32 %v3148_v12, %v3133_v36 }
 0x647   : > { %v3327_v59 = vadd.f32 %v3323_v3, %v6117_v13 }
 0x649   : > { %v3341_v51 = vpop.permute.xlu1 %3340 }
 0x64a   : > { %v3346_v4 = vadd.f32 %v3341_v51, %v3326_v34 }
 0x64d   : > { %v3168_v49 = vpop.permute.xlu1 %3167  ;;  %v3150_v21 = vpop.permute.xlu0 %3149 }
 0x64e   : > { %v3173_v11 = vadd.f32 %v3168_v49, %v3153_v40 }
 0x651   : > { %v3361_v8 = vpop.permute.xlu1 %3360  ;;  %v3343_v35 = vpop.permute.xlu0 %3342 }
 0x652   : > { %v3366_v55 = vadd.f32 %v3361_v8, %v3346_v4  ;;  %v3347_v46 = vadd.f32 %v3343_v35, %v3327_v59 }
 0x655   : > { %v3130_v52 = vpop.permute.xlu1 %3129  ;;  %v3170_v33 = vpop.permute.xlu0 %3169 }
 0x656   : > { %v3134_v15 = vadd.f32 %v3130_v52, %v6106_v62 }
 0x658   : > { %v3154_v63 = vadd.f32 %v3150_v21, %v3134_v15 }
 0x659   : > { %v3188_v61 = vpop.permute.xlu1 %3187  ;;  %v3363_v1 = vpop.permute.xlu0 %3362 }
 0x65a   : > { %v3193_v10 = vadd.f32 %v3188_v61, %v3173_v11  ;;  %v3174_v60 = vadd.f32 %v3170_v33, %v3154_v63  ;;  %v3367_v62 = vadd.f32 %v3363_v1, %v3347_v46 }
 0x65c   : > { %v3207_v31 = vadd.f32 %v6115_v28, %v3193_v10 }
 0x65d   : > { %v3381_v47 = vpop.permute.xlu1 %3380  ;;  %v3190_v53 = vpop.permute.xlu0 %3189 }
 0x65e   : > { %v3386_v50 = vadd.f32 %v3381_v47, %v3366_v55  ;;  %v3194_v6 = vadd.f32 %v3190_v53, %v3174_v60  ;;  %v3209_v9 = vsel %vm2183_vm0, %v3207_v31, 0.0 }
 0x660   : > { %v3208_v57 = vadd.f32 %v6146_v16, %v3194_v6  ;;  %v3400_v41 = vadd.f32 %v6155_v7, %v3386_v50 }
 0x661   : > { %v3383_v5 = vpop.permute.xlu0 %3382 }
 0x662   : > { %v3210_v44 = vsel %vm2183_vm0, %v3208_v57, 0.0  ;;  %v3387_v13 = vadd.f32 %v3383_v5, %v3367_v62  ;;  %v3402_v27 = vsel %vm2183_vm0, %v3400_v41, 0.0 }
 0x663   : > { %v3211_v43 = vadd.f32 %v3210_v44, %v3209_v9 }
 0x664   : > { %v3401_v48 = vadd.f32 %v6121_v0, %v3387_v13 }
 0x665   : > { %v3212_v58 = vrot.slane %v3211_v43, 4 }
 0x666   : > { %v3403_v28 = vsel %vm2183_vm0, %v3401_v48, 0.0 }
 0x667   : > { %v3213_v30 = vadd.f32 %v3212_v58, %v3211_v43  ;;  %v3404_v29 = vadd.f32 %v3403_v28, %v3402_v27 }
 0x669   : > { %v3214_v26 = vrot.slane %v3213_v30, 2  ;;  %v3405_v16 = vrot.slane %v3404_v29, 4 }
 0x66b   : > { %v3215_v54 = vadd.f32 %v3214_v26, %v3213_v30  ;;  %v3406_v32 = vadd.f32 %v3405_v16, %v3404_v29 }
 0x66d   : > { %v3216_v25 = vrot.slane %v3215_v54, 1  ;;  %v3407_v42 = vrot.slane %v3406_v32, 2 }
 0x66e   : > { %v2897_v7 = vpop.permute.xlu1 %2896 }
 0x66f   : > { %v3217_v39 = vadd.f32 %v3216_v25, %v3215_v54  ;;  %v3408_v14 = vadd.f32 %v3407_v42, %v3406_v32 }
 0x671   : > { %v3218_v18 = vmul.f32 0.0625, %v3217_v39  ;;  %v3409_v22 = vrot.slane %v3408_v14, 1 }
 0x672   : > { %v2914_v38 = vpop.permute.xlu0 %2913 }
 0x673   : > { %v3220_v0 = vsub.f32 %v3208_v57, %v3218_v18  ;;  %v3410_v23 = vadd.f32 %v3409_v22, %v3408_v14  ;;  %v2910_v12 = vpop.permute.xlu1 %2909  ;;  %v3219_v3 = vsub.f32 %v3207_v31, %v3218_v18 }
 0x674   : > { %v2916_v42 = vmul.f32 %v6153_v20, %v2910_v12 }
 0x675   : > { %v3222_v51 = vmul.f32 %v3220_v0, %v3220_v0  ;;  %v3411_v49 = vmul.f32 0.0625, %v3410_v23  ;;  %v3221_v21 = vmul.f32 %v3219_v3, %v3219_v3  ;;  %v2904_v23 = vmul.f32 %v2897_v7, %v6129_v2 }
 0x677   : > { %v3224_v8 = vsel %vm2183_vm0, %v3222_v51, 0.0  ;;  %v3413_v35 = vsub.f32 %v3401_v48, %v3411_v49  ;;  %v2902_v36 = vpop.permute.xlu0 %2901  ;;  %v3223_v52 = vsel %vm2183_vm0, %v3221_v21, 0.0  ;;  %v3412_v33 = vsub.f32 %v3400_v41, %v3411_v49 }
 0x678   : > { %v3242_v40 = vpop.permute.xlu1 %3241  ;;  %v3225_v15 = vadd.f32 %v3224_v8, %v3223_v52  ;;  %v2905_v39 = vmul.f32 %v2902_v36, %v6166_v19  ;;  %v2917_v51 = vmul.f32 %v6169_v17, %v2914_v38  ;;  %v2918_v52 = vadd.f32 %v2916_v42, %v2904_v23  ;;  %v3711_v23 = vld [vmem:[%s6645_s20 + $0x18] sm:$0xff] }
 0x679   : > { %v3415_v34 = vmul.f32 %v3413_v35, %v3413_v35  ;;  %v3414_v11 = vmul.f32 %v3412_v33, %v3412_v33 }
 0x67a   : > { %v3226_v63 = vrot.slane %v3225_v15, 4 }
 0x67b   : > { %v3417_v61 = vsel %vm2183_vm0, %v3415_v34, 0.0  ;;  %v2933_v1 = vpop.permute.xlu0 %2932  ;;  %v3416_v4 = vsel %vm2183_vm0, %v3414_v11, 0.0  ;;  %v2919_v34 = vadd.f32 %v2917_v51, %v2905_v39 }
 0x67c   : > { %v3227_v10 = vadd.f32 %v3226_v63, %v3225_v15  ;;  %v3247_v59 = vpop.permute.xlu1 %3246  ;;  %v3418_v55 = vadd.f32 %v3417_v61, %v3416_v4  ;;  %v2938_v19 = vadd.f32 %v2933_v1, %v2918_v52  ;;  %v6266_v52 = vld [vmem:[%s6646_s21] sm:$0xff] }
 0x67e   : > { %v3228_v60 = vrot.slane %v3227_v10, 2  ;;  %v3419_v47 = vrot.slane %v3418_v55, 4 }
 0x67f   : > { %v3435_v53 = vpop.permute.xlu0 %3434 }
 0x680   : > { %v3229_v46 = vadd.f32 %v3228_v60, %v3227_v10  ;;  %v3420_v31 = vadd.f32 %v3419_v47, %v3418_v55  ;;  %v3440_v50 = vpop.permute.xlu1 %3439  ;;  %v4842_v60 = vld [vmem:[%s6642_s17] sm:$0xff]  }
 0x681   : > { %4675 = vmatprep.mubr.msk.bf16.mxu0 %vm3550_vm14, %v4842_v60 }
 0x682   : > { %v3230_v6 = vrot.slane %v3229_v46, 1  ;;  %v3421_v62 = vrot.slane %v3420_v31, 2 }
 0x683   : > { %v6201_v57 = vpop.permute.xlu0 %3009 }
 0x684   : > { %v3231_v5 = vadd.f32 %v3230_v6, %v3229_v46  ;;  %v3422_v9 = vadd.f32 %v3421_v62, %v3420_v31  ;;  %v6203_v41 = vpop.permute.xlu1 %3004  ;;  %v3483_v6 = vld [vmem:[%s6643_s18 + $0x8] sm:$0xff] }
 0x686   : > { %v3232_v44 = vmul.f32 0.0625, %v3231_v5  ;;  %v3423_v13 = vrot.slane %v3422_v9, 1 }
 0x687   : > { %v3261_v43 = vpop.permute.xlu0 %3260 }
 0x688   : > { %v3233_v48 = vadd.f32 1e-06, %v3232_v44  ;;  %v3424_v58 = vadd.f32 %v3423_v13, %v3422_v9  ;;  %v3256_v27 = vpop.permute.xlu1 %3255  ;;  %v3485_v13 = vld [vmem:[%s6643_s18 + $0x18] sm:$0xff] }
 0x68a   : > { %4868 = vrsqrt.f32 %v3233_v48  ;;  %v3425_v28 = vmul.f32 0.0625, %v3424_v58  ;;  %v3487_v58 = vld [vmem:[%s6643_s18 + $0x28] sm:$0xff] }
 0x68b   : > { %v3454_v30 = vpop.permute.xlu0 %3453 }
 0x68c   : > { %v3426_v29 = vadd.f32 1e-06, %v3425_v28  ;;  %v2953_v26 = vpop.permute.xlu1 %2952 }
 0x68e   : > { %4870 = vrsqrt.f32 %v3426_v29  ;;  %v3489_v29 = vld [vmem:[%s6643_s18 + $0x38] sm:$0xff] }
 0x68f   : > { %v6205_v16 = vpop.permute.xlu0 %3078 }
 0x690   : > { %v3449_v54 = vpop.permute.xlu1 %3448 }
 0x693   : > { %v2955_v32 = vpop.permute.xlu0 %2954 }
 0x694   : > { %v4869_v25 = vpop.eup %4868  ;;  %v6209_v14 = vpop.permute.xlu1 %3073 }
 0x695   : > { %v3235_v18 = vmul.f32 %v4869_v25, %v3219_v3  ;;  %v3236_v22 = vmul.f32 %v4869_v25, %v3220_v0  ;;  %v3709_v25 = vld [vmem:[%s6645_s20 + $0x8] sm:$0xff] }
 0x697   : > { %v3249_v49 = vmul.f32 %v3242_v40, %v3235_v18  ;;  %v3250_v21 = vmul.f32 %v3247_v59, %v3236_v22  ;;  %v2975_v12 = vpop.permute.xlu0 %2974  ;;  %v2958_v40 = vadd.f32 %v2953_v26, %v2938_v19  ;;  %v3710_v22 = vld [vmem:[%s6645_s20 + $0x10] sm:$0xff] }
 0x698   : > { %v4871_v8 = vpop.eup %4870  ;;  %v2935_v15 = vpop.permute.xlu1 %2934 }
 0x699   : > { %v3428_v11 = vmul.f32 %v4871_v8, %v3412_v33  ;;  %v3429_v63 = vmul.f32 %v4871_v8, %v3413_v35  ;;  %v3264_v61 = vadd.f32 %v3261_v43, %v3250_v21  ;;  %v3263_v20 = vadd.f32 %v3256_v27, %v3249_v49 }
 0x69a   : > { %v2939_v36 = vadd.f32 %v2935_v15, %v2919_v34 }
 0x69b   : > { %v3442_v4 = vmul.f32 %v3435_v53, %v3428_v11  ;;  %v3443_v3 = vmul.f32 %v3440_v50, %v3429_v63  ;;  %v3266_v0 = vadd.f32 %v3264_v61, %v6205_v16  ;;  %v3265_v2 = vadd.f32 %v3263_v20, %v6209_v14  ;;  %v2995_v59 = vpop.permute.xlu0 %2994  ;;  %v3482_v50 = vld [vmem:[%s6643_s18] sm:$0xff]  ;;  %v6273_v11 = vld [vmem:[%s6646_s21 + $0x10] sm:$0xff] }
 0x69c   : > { %v2959_v17 = vadd.f32 %v2955_v32, %v2939_v36  ;;  %v2973_v7 = vpop.permute.xlu1 %2972  ;;  %v3708_v32 = vld [vmem:[%s6645_s20] sm:$0xff] }
 0x69d   : > { %v3457_v38 = vadd.f32 %v3454_v30, %v3443_v3  ;;  %v3456_v10 = vadd.f32 %v3449_v54, %v3442_v4  ;;  %3269 = vrot.lane.b32.xlu1 %v3265_v2, %s4920_s8  ;;  %3271 = vrot.lane.b32.xlu0 %v3266_v0, %s4920_s8  ;;  %v2978_v55 = vadd.f32 %v2973_v7, %v2958_v40  ;;  %v3488_v30 = vld [vmem:[%s6643_s18 + $0x30] sm:$0xff]  ;;  %s6385_s8 = scalar_lea.vmem %s6650_s25, %s5484_s4  ;;  %s4922_s4 = smov 125  }
 0x69e   : > { %v2979_v35 = vadd.f32 %v2975_v12, %v2959_v17  ;;  %883 = vst.msk [vmem:[%s6385_s8 + $0x10] sm:$0xff] %vm875_vm11, %v4905_v45  ;;  %881 = vst.msk [vmem:[%s6385_s8] sm:$0xff] %vm875_vm11, %v4905_v45 }
 0x69f   : > { %v3459_v33 = vadd.f32 %v3457_v38, %v6205_v16  ;;  %v3458_v1 = vadd.f32 %v3456_v10, %v6209_v14  ;;  %882 = vst.msk [vmem:[%s6385_s8 + $0x8] sm:$0xff] %vm875_vm11, %v4905_v45  ;;  %884 = vst.msk [vmem:[%s6385_s8 + $0x18] sm:$0xff] %vm875_vm11, %v4905_v45 }
 0x6a0   : > { %v2999_v47 = vadd.f32 %v2995_v59, %v2979_v35  ;;  %v2993_v53 = vpop.permute.xlu1 %2992  ;;  %4464 = vst.msk [vmem:[%s6385_s8 + $0x20] sm:$0xff] %vm875_vm11, %v4905_v45  ;;  %4465 = vst.msk [vmem:[%s6385_s8 + $0x28] sm:$0xff] %vm875_vm11, %v4905_v45 }
 0x6a1   : > { %v2998_v46 = vadd.f32 %v2993_v53, %v2978_v55  ;;  %3462 = vrot.lane.b32.xlu1 %v3458_v1, %s4921_s2  ;;  %3464 = vrot.lane.b32.xlu0 %v3459_v33, %s4921_s2  ;;  %4466 = vst.msk [vmem:[%s6385_s8 + $0x30] sm:$0xff] %vm875_vm11, %v4905_v45  ;;  %4467 = vst.msk [vmem:[%s6385_s8 + $0x38] sm:$0xff] %vm875_vm11, %v4905_v45 }
 0x6a2   : > { %v3013_v31 = vadd.f32 %v6201_v57, %v2999_v47  ;;  %v3484_v57 = vld [vmem:[%s6643_s18 + $0x10] sm:$0xff]  ;;  %4476 = vst.msk [vmem:[%s6385_s8 + $0x40] sm:$0xff] %vm875_vm11, %v4905_v45  ;;  %4477 = vst.msk [vmem:[%s6385_s8 + $0x48] sm:$0xff] %vm875_vm11, %v4905_v45 }
 0x6a3   : > { %v3012_v62 = vadd.f32 %v6203_v41, %v2998_v46  ;;  %v3486_v41 = vld [vmem:[%s6643_s18 + $0x20] sm:$0xff]  ;;  %4478 = vst.msk [vmem:[%s6385_s8 + $0x50] sm:$0xff] %vm875_vm11, %v4905_v45  ;;  %4479 = vst.msk [vmem:[%s6385_s8 + $0x58] sm:$0xff] %vm875_vm11, %v4905_v45 }
 0x6a4   : > { %v3015_v5 = vsel %vm2183_vm0, %v3013_v31, 0.0  ;;  %v3048_v3 = vpop.permute.xlu1 %3047  ;;  %v3053_v0 = vpop.permute.xlu0 %3052 }
 0x6a5   : > { %v3014_v9 = vsel %vm2183_vm0, %v3012_v62, 0.0  ;;  %3492 = vperm.xlu1 %4826, %v3482_v50   ;;  %3497 = vperm.xlu0 %4825, %v3483_v6  }
 0x6a6   : > { %v3016_v44 = vadd.f32 %v3015_v5, %v3014_v9  ;;  %v4846_v5 = vld [vmem:[%s6644_s19] sm:$0xff]   ;;  %v6302_v9 = vld [vmem:[%s6646_s21 + $0x18] sm:$0xff] }
 0x6a7   : > { %4691 = vmatprep.mubr.msk.bf16.mxu1 %vm3742_vm2, %v4846_v5 }
 0x6a8   : > { %v3017_v43 = vrot.slane %v3016_v44, 4  ;;  %v3062_v10 = vpop.permute.xlu1 %3061  ;;  %v3067_v35 = vpop.permute.xlu0 %3066 }
 0x6a9   : > { %3502 = vperm.xlu1 %4826, %v3484_v57   ;;  %3507 = vperm.xlu0 %4825, %v3485_v13  }
 0x6aa   : > { %v3018_v48 = vadd.f32 %v3017_v43, %v3016_v44  ;;  %v6307_v44 = vld [vmem:[%s6646_s21 + $0x8] sm:$0xff] }
 0x6ac   : > { %v3019_v27 = vrot.slane %v3018_v48, 2 }
 0x6ad   : > { %3512 = vperm.xlu1 %4826, %v3486_v41   ;;  %3517 = vperm.xlu0 %4825, %v3487_v58  }
 0x6ae   : > { %v3020_v28 = vadd.f32 %v3019_v27, %v3018_v48 }
 0x6b0   : > { %v3021_v26 = vrot.slane %v3020_v28, 1 }
 0x6b1   : > { %3522 = vperm.xlu1 %4826, %v3488_v30   ;;  %3527 = vperm.xlu0 %4825, %v3489_v29  }
 0x6b2   : > { %v3022_v54 = vadd.f32 %v3021_v26, %v3020_v28 }
 0x6b4   : > { %v3024_v42 = vmul.f32 0.0625, %v3022_v54 }
 0x6b5   : > { %3714 = vperm.xlu1 %4826, %v3708_v32   ;;  %3719 = vperm.xlu0 %4825, %v3709_v25  }
 0x6b6   : > { %v3026_v39 = vsub.f32 %v3013_v31, %v3024_v42  ;;  %v3025_v18 = vsub.f32 %v3012_v62, %v3024_v42  ;;  %v4845_v62 = vld [vmem:[%s6642_s17 + $0x18] sm:$0xff]  }
 0x6b8   : > { %v3027_v51 = vmul.f32 %v3025_v18, %v3025_v18  ;;  %v3028_v49 = vmul.f32 %v3026_v39, %v3026_v39 }
 0x6b9   : > { %3724 = vperm.xlu1 %4826, %v3710_v22   ;;  %3729 = vperm.xlu0 %4825, %v3711_v23  }
 0x6ba   : > { %v3029_v21 = vsel %vm2183_vm0, %v3027_v51, 0.0  ;;  %v3030_v8 = vsel %vm2183_vm0, %v3028_v49, 0.0 }
 0x6bb   : > { %v3031_v15 = vadd.f32 %v3030_v8, %v3029_v21 }
 0x6bd   : > { %v3032_v34 = vrot.slane %v3031_v15, 4  ;;  %3860 = vperm.xlu1 %4826, %v6266_v52   ;;  %4828 = vset.pattern.permute.xlu0 %v6711_v37 }
 0x6be   : > { %3887 = vperm.xlu0 %4828, %v6307_v44  }
 0x6bf   : > { %v3033_v63 = vadd.f32 %v3032_v34, %v3031_v15 }
 0x6c1   : > { %v3034_v61 = vrot.slane %v3033_v63, 2  ;;  %3870 = vperm.xlu1 %4826, %v6273_v11  }
 0x6c2   : > { %4025 = vperm.xlu0 %4828, %v6307_v44  }
 0x6c3   : > { %v3035_v20 = vadd.f32 %v3034_v61, %v3033_v63 }
 0x6c5   : > { %v3036_v12 = vrot.slane %v3035_v20, 1  ;;  %4827 = vset.pattern.permute.xlu1 %v6711_v37 }
 0x6c6   : > { %3883 = vperm.xlu1 %4827, %v6266_v52   ;;  %4029 = vperm.xlu0 %4828, %v6273_v11  }
 0x6c7   : > { %v3037_v19 = vadd.f32 %v3036_v12, %v3035_v20 }
 0x6c9   : > { %v3038_v36 = vmul.f32 0.0625, %v3037_v19 }
 0x6ca   : > { %3891 = vperm.xlu1 %4827, %v6273_v11   ;;  %4831 = vset.pattern.permute.xlu0 %v6712_v56 }
 0x6cb   : > { %v3039_v4 = vadd.f32 1e-06, %v3038_v36  ;;  %3923 = vperm.xlu0 %4831, %v6266_v52  }
 0x6cd   : > { %4872 = vrsqrt.f32 %v3039_v4 }
 0x6ce   : > { %3895 = vperm.xlu1 %4827, %v6302_v9  }
 0x6cf   : > { %3935 = vperm.xlu0 %4831, %v6302_v9  }
 0x6d2   : > { %4829 = vset.pattern.permute.xlu1 %v6712_v56 }
 0x6d3   : > { %3927 = vperm.xlu1 %4829, %v6307_v44   ;;  %4065 = vperm.xlu0 %4831, %v6307_v44  }
 0x6d7   : > { %v4873_v2 = vpop.eup %4872  ;;  %3931 = vperm.xlu1 %4829, %v6273_v11   ;;  %4202 = vperm.xlu0 %4831, %v6307_v44  }
 0x6d8   : > { %v3041_v17 = vmul.f32 %v4873_v2, %v3025_v18  ;;  %v3042_v7 = vmul.f32 %v4873_v2, %v3026_v39 }
 0x6da   : > { %v3055_v38 = vmul.f32 %v3048_v3, %v3041_v17  ;;  %v3056_v40 = vmul.f32 %v3053_v0, %v3042_v7 }
 0x6db   : > { %4830 = vset.pattern.permute.xlu1 %v6711_v37  ;;  %4069 = vperm.xlu0 %4831, %v6273_v11  }
 0x6dc   : > { %v3069_v33 = vadd.f32 %v3062_v10, %v3055_v38  ;;  %v3070_v1 = vadd.f32 %v3067_v35, %v3056_v40  ;;  %4021 = vperm.xlu1 %4830, %v6266_v52  }
 0x6de   : > { %v3081_v59 = vadd.f32 %v6209_v14, %v3069_v33  ;;  %v3082_v55 = vadd.f32 %v6205_v16, %v3070_v1  ;;  %v4843_v16 = vld [vmem:[%s6642_s17 + $0x8] sm:$0xff]   ;;  %v4844_v14 = vld [vmem:[%s6642_s17 + $0x10] sm:$0xff]  }
 0x6df   : > { %4206 = vperm.xlu0 %4831, %v6273_v11  }
 0x6e0   : > { %3083 = vst.msk [vmem:[#allocation3] sm:$0xff] %vm2183_vm0, %v3081_v59  ;;  %3084 = vst.msk [vmem:[#allocation3 + $0x8] sm:$0xff] %vm2183_vm0, %v3082_v55  ;;  %4158 = vperm.xlu1 %4830, %v6266_v52  }
 0x6e4   : > { %4162 = vperm.xlu1 %4830, %v6307_v44  }
 0x6e8   : > { %4832 = vset.pattern.permute.xlu1 %v6712_v56 }
 0x6e9   : > { %4061 = vperm.xlu1 %4832, %v6266_v52  }
 0x6ed   : > { %4833 = vset.pattern.permute.xlu1 %v6711_v37 }
 0x6ee   : > { %4166 = vperm.xlu1 %4833, %v6273_v11  }
 0x6f2   : > { %4834 = vset.pattern.permute.xlu1 %v6712_v56 }
 0x6f3   : > { %4198 = vperm.xlu1 %4834, %v6266_v52  }
 0x6f7   : > { %4835 = vset.pattern.permute.xlu1 %v6711_v37 }
 0x6f8   : > { %4033 = vperm.xlu1 %4835, %v6302_v9  }
 0x70f   : > { %v3270_v60 = vpop.permute.xlu1 %3269  ;;  %v3272_v47 = vpop.permute.xlu0 %3271 }
 0x710   : > { %3276 = vst.msk [vmem:[#allocation3] sm:$0xff] %vm3275_vm15, %v3270_v60  ;;  %3277 = vst.msk [vmem:[#allocation3 + $0x8] sm:$0xff] %vm3275_vm15, %v3272_v47 }
 0x713   : > { %v3463_v53 = vpop.permute.xlu1 %3462  ;;  %v3465_v46 = vpop.permute.xlu0 %3464 }
 0x714   : > { %3469 = vst.msk [vmem:[#allocation3] sm:$0xff] %vm3468_vm1, %v3463_v53  ;;  %3470 = vst.msk [vmem:[#allocation3 + $0x8] sm:$0xff] %vm3468_vm1, %v3465_v46 }
 0x71b   : > { %v3479_v31 = vld [vmem:[#allocation3] sm:$0xff]  ;;  %v3480_v50 = vld [vmem:[#allocation3 + $0x8] sm:$0xff] }
 0x71c   : > { %v3481_v6 = vpack.c.bf16 %v3480_v50, %v3479_v31 }
 0x71e   : > { %4673 = vmatprep.subr.bf16.mxu0 %v3481_v6 }
 0x71f   : > { %4674 = vmatpush3.bf16.msra.mxu0 %v3481_v6 }
 0x722   : > { %4676 = vmatmul.mubr.msk.bf16.vlgmr.msra.gmra.mrb[4].mxu0 %vm3550_vm14, %v4843_v16 }
 0x723   : > { %4679 = vmatprep.mubr.msk.bf16.mxu0 %vm3550_vm14, %v4844_v14 }
 0x724   : > { %v3493_v57 = vpop.permute.xlu1 %3492  ;;  %v3498_v13 = vpop.permute.xlu0 %3497 }
 0x728   : > { %v3503_v43 = vpop.permute.xlu1 %3502  ;;  %v3508_v48 = vpop.permute.xlu0 %3507 }
 0x72a   : > { %4680 = vmatmul.mubr.msk.bf16.gmra.mrb[8].mxu0 %vm3550_vm14, %v4845_v62 }
 0x72c   : > { %v3513_v28 = vpop.permute.xlu1 %3512  ;;  %v3518_v37 = vpop.permute.xlu0 %3517 }
 0x730   : > { %v3523_v21 = vpop.permute.xlu1 %3522  ;;  %v3528_v19 = vpop.permute.xlu0 %3527 }
 0x7f5   : > { %v4677_v41 = vpop.f32.mrb[4].mxu0 }
 0x7f6   : > { %v6335_v58 = vadd.f32 %v4677_v41, %v3503_v43  ;;  %v3597_v27 = vpop.f32.mrb[5].mxu0 }
 0x7f7   : > { %v6337_v30 = vadd.f32 %v3597_v27, %v3493_v57  ;;  %v4678_v29 = vpop.f32.mrb[6].mxu0 }
 0x7f8   : > { %v3638_v26 = vmul.f32 0.044715, %v6335_v58  ;;  %v6340_v54 = vadd.f32 %v4678_v29, %v3508_v48  ;;  %v3600_v32 = vpop.f32.mrb[7].mxu0 }
 0x7f9   : > { %v3636_v25 = vmul.f32 0.044715, %v6337_v30  ;;  %v6343_v42 = vadd.f32 %v3600_v32, %v3498_v13 }
 0x7fa   : > { %v3646_v39 = vmul.f32 %v3638_v26, %v6335_v58  ;;  %v3639_v18 = vmul.f32 0.044715, %v6340_v54 }
 0x7fb   : > { %v3644_v22 = vmul.f32 %v3636_v25, %v6337_v30  ;;  %v3637_v23 = vmul.f32 0.044715, %v6343_v42 }
 0x7fc   : > { %v3654_v51 = vmul.f32 %v3646_v39, %v6335_v58  ;;  %v3647_v49 = vmul.f32 %v3639_v18, %v6340_v54  ;;  %v3630_v18 = vmul.f32 0.5, %v6335_v58 }
 0x7fd   : > { %v3652_v8 = vmul.f32 %v3644_v22, %v6337_v30  ;;  %v3645_v15 = vmul.f32 %v3637_v23, %v6343_v42  ;;  %v4681_v34 = vpop.f32.mrb[8].mxu0  ;;  %v3631_v22 = vmul.f32 0.5, %v6340_v54 }
 0x7fe   : > { %v3655_v63 = vmul.f32 %v3647_v49, %v6340_v54  ;;  %v6354_v61 = vadd.f32 %v4681_v34, %v3523_v21  ;;  %v3613_v20 = vpop.f32.mrb[9].mxu0  ;;  %v3662_v12 = vadd.f32 %v3654_v51, %v6335_v58  ;;  %v3628_v51 = vmul.f32 0.5, %v6337_v30 }
 0x7ff   : > { %v3653_v36 = vmul.f32 %v3645_v15, %v6343_v42  ;;  %v6358_v4 = vadd.f32 %v3613_v20, %v3513_v28  ;;  %v4682_v3 = vpop.f32.mrb[10].mxu0  ;;  %v3660_v0 = vadd.f32 %v3652_v8, %v6337_v30  ;;  %v3629_v49 = vmul.f32 0.5, %v6343_v42 }
 0x800   : > { %v3642_v2 = vmul.f32 0.044715, %v6354_v61  ;;  %v3625_v17 = vadd.f32 %v4682_v3, %v3528_v19  ;;  %v3616_v7 = vpop.f32.mrb[11].mxu0  ;;  %v3663_v38 = vadd.f32 %v3655_v63, %v6340_v54  ;;  %v3670_v40 = vmul.f32 0.7978846, %v3662_v12 }
 0x801   : > { %v3640_v10 = vmul.f32 0.044715, %v6358_v4  ;;  %v3617_v35 = vadd.f32 %v3616_v7, %v3518_v37  ;;  %v3661_v33 = vadd.f32 %v3653_v36, %v6343_v42  ;;  %v3668_v1 = vmul.f32 0.7978846, %v3660_v0 }
 0x802   : > { %v3650_v59 = vmul.f32 %v3642_v2, %v6354_v61  ;;  %v3643_v55 = vmul.f32 0.044715, %v3625_v17  ;;  %v3671_v60 = vmul.f32 0.7978846, %v3663_v38  ;;  %4874 = vtanh.f32 %v3670_v40 }
 0x803   : > { %v3648_v47 = vmul.f32 %v3640_v10, %v6358_v4  ;;  %v3641_v53 = vmul.f32 0.044715, %v3617_v35  ;;  %v3669_v46 = vmul.f32 0.7978846, %v3661_v33  ;;  %4876 = vtanh.f32 %v3668_v1 }
 0x804   : > { %v3658_v31 = vmul.f32 %v3650_v59, %v6354_v61  ;;  %v3651_v50 = vmul.f32 %v3643_v55, %v3625_v17  ;;  %4878 = vtanh.f32 %v3671_v60  ;;  %v3634_v54 = vmul.f32 0.5, %v6354_v61 }
 0x805   : > { %v3656_v6 = vmul.f32 %v3648_v47, %v6358_v4  ;;  %v3649_v16 = vmul.f32 %v3641_v53, %v3617_v35  ;;  %4880 = vtanh.f32 %v3669_v46  ;;  %v3635_v30 = vmul.f32 0.5, %v3625_v17 }
 0x806   : > { %v3659_v14 = vmul.f32 %v3651_v50, %v3625_v17  ;;  %v3666_v62 = vadd.f32 %v3658_v31, %v6354_v61  ;;  %v3632_v42 = vmul.f32 0.5, %v6358_v4  ;;  %v3633_v38 = vmul.f32 0.5, %v3617_v35  ;;  %v4847_v61 = vld [vmem:[%s6644_s19 + $0x8] sm:$0xff]  }
 0x807   : > { %v3657_v5 = vmul.f32 %v3649_v16, %v3617_v35  ;;  %v3664_v57 = vadd.f32 %v3656_v6, %v6358_v4  ;;  %v3715_v4 = vpop.permute.xlu1 %3714 }
 0x808   : > { %v3667_v13 = vadd.f32 %v3659_v14, %v3625_v17  ;;  %v3674_v43 = vmul.f32 0.7978846, %v3666_v62  ;;  %v3720_v17 = vpop.permute.xlu0 %3719 }
 0x809   : > { %v3665_v48 = vadd.f32 %v3657_v5, %v3617_v35  ;;  %v3672_v41 = vmul.f32 0.7978846, %v3664_v57 }
 0x80a   : > { %v3675_v27 = vmul.f32 0.7978846, %v3667_v13  ;;  %4882 = vtanh.f32 %v3674_v43 }
 0x80b   : > { %v3673_v28 = vmul.f32 0.7978846, %v3665_v48  ;;  %4884 = vtanh.f32 %v3672_v41  ;;  %v3725_v35 = vpop.permute.xlu1 %3724 }
 0x80c   : > { %v4875_v29 = vpop.eup %4874  ;;  %4886 = vtanh.f32 %v3675_v27  ;;  %v3730_v31 = vpop.permute.xlu0 %3729 }
 0x80d   : > { %v4877_v26 = vpop.eup %4876  ;;  %v3686_v32 = vadd.f32 1.0, %v4875_v29  ;;  %4888 = vtanh.f32 %v3673_v28 }
 0x80e   : > { %v4879_v37 = vpop.eup %4878  ;;  %v3684_v25 = vadd.f32 1.0, %v4877_v26 }
 0x80f   : > { %v4881_v39 = vpop.eup %4880  ;;  %v3687_v23 = vadd.f32 1.0, %v4879_v37  ;;  %v3694_v8 = vmul.f32 %v3686_v32, %v3630_v18  ;;  %v6436_v62 = vpop.permute.xlu1 %3860 }
 0x810   : > { %v3685_v21 = vadd.f32 1.0, %v4881_v39  ;;  %v3692_v34 = vmul.f32 %v3684_v25, %v3628_v51  ;;  %v6453_v13 = vpop.permute.xlu0 %3887 }
 0x811   : > { %v3695_v15 = vmul.f32 %v3687_v23, %v3631_v22 }
 0x812   : > { %v3693_v63 = vmul.f32 %v3685_v21, %v3629_v49 }
 0x813   : > { %v3705_v20 = vpack.c.bf16 %v3695_v15, %v3694_v8  ;;  %v6440_v5 = vpop.permute.xlu1 %3870 }
 0x814   : > { %v4883_v12 = vpop.eup %4882  ;;  %v3704_v19 = vpack.c.bf16 %v3693_v63, %v3692_v34  ;;  %v6455_v48 = vpop.permute.xlu0 %4025 }
 0x815   : > { %v4885_v36 = vpop.eup %4884  ;;  %v3690_v3 = vadd.f32 1.0, %v4883_v12 }
 0x816   : > { %v4887_v0 = vpop.eup %4886  ;;  %4683 = vmatprep.subr.bf16.mxu1 %v3704_v19  ;;  %v3688_v58 = vadd.f32 1.0, %v4885_v36 }
 0x817   : > { %v4889_v2 = vpop.eup %4888  ;;  %4684 = vmatpush3.bf16.msra.mxu1 %v3704_v19  ;;  %v3691_v7 = vadd.f32 1.0, %v4887_v0  ;;  %v3698_v10 = vmul.f32 %v3690_v3, %v3634_v54 }
 0x818   : > { %4685 = vmatprep.subr.bf16.mxu1 %v3705_v20  ;;  %v3689_v40 = vadd.f32 1.0, %v4889_v2  ;;  %v3696_v1 = vmul.f32 %v3688_v58, %v3632_v42 }
 0x819   : > { %v3699_v33 = vmul.f32 %v3691_v7, %v3635_v30 }
 0x81a   : > { %v3697_v59 = vmul.f32 %v3689_v40, %v3633_v38 }
 0x81b   : > { %4686 = vmatpush3.bf16.msra.mxu1 %v3705_v20  ;;  %v3707_v55 = vpack.c.bf16 %v3699_v33, %v3698_v10 }
 0x81c   : > { %v3706_v60 = vpack.c.bf16 %v3697_v59, %v3696_v1 }
 0x81e   : > { %4687 = vmatprep.subr.bf16.mxu1 %v3706_v60 }
 0x81f   : > { %4688 = vmatpush3.bf16.msra.mxu1 %v3706_v60 }
 0x820   : > { %4689 = vmatprep.subr.bf16.mxu1 %v3707_v55 }
 0x823   : > { %4690 = vmatpush3.bf16.msra.mxu1 %v3707_v55 }
 0x826   : > { %4692 = vmatmul.mubr.msk.bf16.vlgmr.msra.gmra.mrb[4].mxu1 %vm3742_vm2, %v4847_v61 }
 0x8f9   : > { %v4693_v47 = vpop.f32.mrb[4].mxu1 }
 0x8fa   : > { %v3792_v53 = vadd.f32 %v4693_v47, %v3725_v35  ;;  %v3783_v46 = vpop.f32.mrb[5].mxu1 }
 0x8fb   : > { %v4694_v50 = vpop.f32.mrb[6].mxu1  ;;  %v3784_v45 = vadd.f32 %v3783_v46, %v3715_v4 }
 0x8fc   : > { %v3795_v6 = vadd.f32 %v4694_v50, %v3730_v31  ;;  %3806 = vrot.lane.b32.xlu1 %v3792_v53, %s4906_s9  ;;  %v3786_v16 = vpop.f32.mrb[7].mxu1 }
 0x8fd   : > { %v3787_v14 = vadd.f32 %v3786_v16, %v3720_v17 }
 0x8fe   : > { %3808 = vrot.lane.b32.xlu0 %v3795_v6, %s4906_s9 }
 0x900   : > { %3822 = vrot.lane.b32.xlu1 %v3792_v53, %s4922_s4 }
 0x902   : > { %3824 = vrot.lane.b32.xlu0 %v3795_v6, %s4922_s4 }
 0x904   : > { %3838 = vrot.lane.b32.xlu1 %v3792_v53, %s4923_s29 }
 0x906   : > { %3840 = vrot.lane.b32.xlu0 %v3795_v6, %s4923_s29 }
 0x908   : > { %3802 = vrot.lane.b32.xlu1 %v3784_v45, %s4906_s9 }
 0x90a   : > { %3804 = vrot.lane.b32.xlu0 %v3787_v14, %s4906_s9 }
 0x90c   : > { %3818 = vrot.lane.b32.xlu1 %v3784_v45, %s4922_s4 }
 0x90e   : > { %3820 = vrot.lane.b32.xlu0 %v3787_v14, %s4922_s4 }
 0x910   : > { %3834 = vrot.lane.b32.xlu1 %v3784_v45, %s4923_s29 }
 0x912   : > { %3836 = vrot.lane.b32.xlu0 %v3787_v14, %s4923_s29 }
 0x914   : > { %4170 = vperm.xlu1 %4835, %v6302_v9  }
 0x916   : > { %4210 = vperm.xlu0 %4831, %v6302_v9  }
 0x918   : > { %4836 = vset.pattern.permute.xlu1 %v6712_v56  ;;  %v6445_v56 = vpop.permute.xlu1 %3883 }
 0x919   : > { %4073 = vperm.xlu1 %4836, %v6302_v9  }
 0x91a   : > { %4837 = vset.pattern.permute.xlu0 %v6710_v24 }
 0x91b   : > { %3865 = vperm.xlu0 %4837, %v6307_v44  }
 0x91d   : > { %4838 = vset.pattern.permute.xlu1 %v6710_v24  ;;  %v3892_v24 = vpop.permute.xlu1 %3891 }
 0x91e   : > { %3998 = vperm.xlu1 %4838, %v6266_v52  }
 0x91f   : > { %3875 = vperm.xlu0 %4837, %v6302_v9  }
 0x921   : > { %v6449_v57 = vpop.permute.xlu1 %3895 }
 0x922   : > { %4135 = vperm.xlu1 %4838, %v6266_v52  }
 0x923   : > { %4003 = vperm.xlu0 %4837, %v6307_v44  }
 0x925   : > { %v6451_v52 = vpop.permute.xlu1 %3927 }
 0x926   : > { %4140 = vperm.xlu1 %4838, %v6307_v44  }
 0x927   : > { %4008 = vperm.xlu0 %4837, %v6273_v11  }
 0x929   : > { %v3932_v43 = vpop.permute.xlu1 %3931 }
 0x92a   : > { %4145 = vperm.xlu1 %4838, %v6273_v11   ;;  %v4030_v11 = vpop.permute.xlu0 %4029 }
 0x92b   : > { %4013 = vperm.xlu0 %4837, %v6302_v9  }
 0x92d   : > { %v6457_v44 = vpop.permute.xlu1 %4021 }
 0x92e   : > { %4150 = vperm.xlu1 %4838, %v6302_v9   ;;  %v6461_v27 = vpop.permute.xlu0 %3923 }
 0x931   : > { %v6459_v41 = vpop.permute.xlu1 %4158 }
 0x932   : > { %v6465_v28 = vpop.permute.xlu0 %3935 }
 0x935   : > { %v6463_v9 = vpop.permute.xlu1 %4162 }
 0x936   : > { %v6467_v26 = vpop.permute.xlu0 %4065 }
 0x939   : > { %v4062_v29 = vpop.permute.xlu1 %4061 }
 0x93a   : > { %v6469_v37 = vpop.permute.xlu0 %4202 }
 0x93d   : > { %v4167_v32 = vpop.permute.xlu1 %4166 }
 0x93e   : > { %v4070_v39 = vpop.permute.xlu0 %4069 }
 0x941   : > { %v6471_v25 = vpop.permute.xlu1 %4198 }
 0x942   : > { %v4207_v22 = vpop.permute.xlu0 %4206 }
 0x945   : > { %v4034_v18 = vpop.permute.xlu1 %4033 }
 0x96e   : > { %v3807_v23 = vpop.permute.xlu1 %3806 }
 0x96f   : > { %3816 = vst.msk [vmem:[%s6385_s8 + $0x10] sm:$0xff] %vm2853_vm13, %v3807_v23 }
 0x970   : > { %v3809_v51 = vpop.permute.xlu0 %3808 }
 0x971   : > { %3817 = vst.msk [vmem:[%s6385_s8 + $0x18] sm:$0xff] %vm2853_vm13, %v3809_v51 }
 0x972   : > { %v3823_v49 = vpop.permute.xlu1 %3822 }
 0x973   : > { %4625 = vst.msk [vmem:[%s6385_s8 + $0x30] sm:$0xff] %vm2853_vm13, %v3823_v49 }
 0x974   : > { %v3825_v21 = vpop.permute.xlu0 %3824 }
 0x975   : > { %4626 = vst.msk [vmem:[%s6385_s8 + $0x38] sm:$0xff] %vm2853_vm13, %v3825_v21 }
 0x976   : > { %v3839_v8 = vpop.permute.xlu1 %3838  ;;  %v6482_v15 = vld [vmem:[%s6385_s8 + $0x10] sm:$0xff] }
 0x977   : > { %4629 = vst.msk [vmem:[%s6385_s8 + $0x50] sm:$0xff] %vm2853_vm13, %v3839_v8  ;;  %v3900_v34 = vmul.f32 %v3892_v24, %v6482_v15  ;;  %v3940_v2 = vmul.f32 %v3932_v43, %v6482_v15 }
 0x978   : > { %v3841_v63 = vpop.permute.xlu0 %3840  ;;  %v6525_v1 = vld [vmem:[%s6385_s8 + $0x18] sm:$0xff] }
 0x979   : > { %4630 = vst.msk [vmem:[%s6385_s8 + $0x58] sm:$0xff] %vm2853_vm13, %v3841_v63  ;;  %3910 = vrot.lane.b32.xlu0 %v3900_v34, %s4904_s5  ;;  %v3901_v55 = vmul.f32 %v6449_v57, %v6525_v1  ;;  %v3941_v50 = vmul.f32 %v6465_v28, %v6525_v1 }
 0x97a   : > { %v3803_v20 = vpop.permute.xlu1 %3802  ;;  %v6491_v12 = vld [vmem:[%s6385_s8 + $0x30] sm:$0xff] }
 0x97b   : > { %3814 = vst.msk [vmem:[%s6385_s8] sm:$0xff] %vm2853_vm13, %v3803_v20  ;;  %v4038_v19 = vmul.f32 %v6491_v12, %v4030_v11  ;;  %v4078_v7 = vmul.f32 %v6491_v12, %v4070_v39  ;;  %v3975_v11 = vld [vmem:[#allocation4] sm:$0x1] }
 0x97c   : > { %v3805_v36 = vpop.permute.xlu0 %3804  ;;  %v6534_v60 = vld [vmem:[%s6385_s8 + $0x38] sm:$0xff] }
 0x97d   : > { %3815 = vst.msk [vmem:[%s6385_s8 + $0x8] sm:$0xff] %vm2853_vm13, %v3805_v36  ;;  %4048 = vrot.lane.b32.xlu0 %v4038_v19, %s4904_s5  ;;  %v4039_v4 = vmul.f32 %v6534_v60, %v4034_v18 }
 0x97e   : > { %v3819_v3 = vpop.permute.xlu1 %3818  ;;  %v6500_v0 = vld [vmem:[%s6385_s8 + $0x50] sm:$0xff] }
 0x97f   : > { %4623 = vst.msk [vmem:[%s6385_s8 + $0x20] sm:$0xff] %vm2853_vm13, %v3819_v3  ;;  %v4175_v58 = vmul.f32 %v6500_v0, %v4167_v32  ;;  %v4215_v10 = vmul.f32 %v6500_v0, %v4207_v22 }
 0x980   : > { %v3821_v54 = vpop.permute.xlu0 %3820  ;;  %v6547_v47 = vld [vmem:[%s6385_s8 + $0x58] sm:$0xff] }
 0x981   : > { %4624 = vst.msk [vmem:[%s6385_s8 + $0x28] sm:$0xff] %vm2853_vm13, %v3821_v54  ;;  %4185 = vrot.lane.b32.xlu1 %v4175_v58, %s4904_s5  ;;  %3950 = vrot.lane.b32.xlu0 %v3940_v2, %s4919_s0 }
 0x982   : > { %v3835_v30 = vpop.permute.xlu1 %3834  ;;  %v6522_v33 = vld [vmem:[%s6385_s8] sm:$0xff] }
 0x983   : > { %4627 = vst.msk [vmem:[%s6385_s8 + $0x40] sm:$0xff] %vm2853_vm13, %v3835_v30  ;;  %v3898_v59 = vmul.f32 %v6445_v56, %v6522_v33  ;;  %v3938_v31 = vmul.f32 %v6461_v27, %v6522_v33 }
 0x984   : > { %v3837_v42 = vpop.permute.xlu0 %3836  ;;  %v6560_v6 = vld [vmem:[%s6385_s8 + $0x8] sm:$0xff] }
 0x985   : > { %4628 = vst.msk [vmem:[%s6385_s8 + $0x48] sm:$0xff] %vm2853_vm13, %v3837_v42  ;;  %4088 = vrot.lane.b32.xlu0 %v4078_v7, %s4919_s0  ;;  %v3899_v45 = vmul.f32 %v6453_v13, %v6560_v6 }
 0x986   : > { %v6517_v38 = vld [vmem:[%s6385_s8 + $0x20] sm:$0xff] }
 0x987   : > { %v4076_v40 = vmul.f32 %v6517_v38, %v4062_v29  ;;  %v4036_v61 = vmul.f32 %v6517_v38, %v6457_v44  ;;  %v4113_v29 = vld [vmem:[#allocation4] sm:$0x1] }
 0x988   : > { %v4632_v14 = vld [vmem:[%s6385_s8 + $0x28] sm:$0xff] }
 0x989   : > { %4084 = vrot.lane.b32.xlu1 %v4076_v40, %s4919_s0  ;;  %4225 = vrot.lane.b32.xlu0 %v4215_v10, %s4919_s0  ;;  %v4077_v56 = vmul.f32 %v4632_v14, %v6467_v26  ;;  %v4037_v57 = vmul.f32 %v4632_v14, %v6455_v48  ;;  %v4250_v48 = vld [vmem:[#allocation4] sm:$0x1] }
 0x98a   : > { %v6542_v17 = vld [vmem:[%s6385_s8 + $0x40] sm:$0xff] }
 0x98b   : > { %v4173_v53 = vmul.f32 %v6542_v17, %v6459_v41  ;;  %v4213_v16 = vmul.f32 %v6542_v17, %v6471_v25  ;;  %v3939_v41 = vmul.f32 %v6451_v52, %v6560_v6 }
 0x98c   : > { %v6574_v43 = vld [vmem:[%s6385_s8 + $0x48] sm:$0xff] }
 0x98d   : > { %3906 = vrot.lane.b32.xlu0 %v3898_v59, %s4904_s5  ;;  %3912 = vrot.lane.b32.xlu1 %v3901_v55, %s4904_s5  ;;  %v4174_v13 = vmul.f32 %v6574_v43, %v6463_v9  ;;  %v4214_v27 = vmul.f32 %v6574_v43, %v6469_v37 }
 0x991   : > { %4044 = vrot.lane.b32.xlu0 %v4036_v61, %s4904_s5  ;;  %4050 = vrot.lane.b32.xlu1 %v4039_v4, %s4904_s5 }
 0x993   : > { %v4171_v35 = vpop.permute.xlu1 %4170 }
 0x994   : > { %v4176_v46 = vmul.f32 %v6547_v47, %v4171_v35 }
 0x995   : > { %4181 = vrot.lane.b32.xlu0 %v4173_v53, %s4904_s5  ;;  %v4211_v28 = vpop.permute.xlu0 %4210 }
 0x996   : > { %4187 = vrot.lane.b32.xlu1 %v4176_v46, %s4904_s5  ;;  %v4216_v9 = vmul.f32 %v6547_v47, %v4211_v28 }
 0x998   : > { %v4074_v24 = vpop.permute.xlu1 %4073 }
 0x999   : > { %3946 = vrot.lane.b32.xlu0 %v3938_v31, %s4919_s0  ;;  %v4079_v44 = vmul.f32 %v6534_v60, %v4074_v24 }
 0x99a   : > { %3952 = vrot.lane.b32.xlu1 %v3941_v50, %s4919_s0  ;;  %v3866_v26 = vpop.permute.xlu0 %3865 }
 0x99d   : > { %4221 = vrot.lane.b32.xlu0 %v4213_v16, %s4919_s0  ;;  %v3999_v52 = vpop.permute.xlu1 %3998 }
 0x99e   : > { %3908 = vrot.lane.b32.xlu1 %v3899_v45, %s4904_s5  ;;  %v3876_v32 = vpop.permute.xlu0 %3875  ;;  %v4016_v40 = vmul.f32 %v6517_v38, %v3999_v52 }
 0x9a1   : > { %4086 = vrot.lane.b32.xlu0 %v4077_v56, %s4919_s0  ;;  %v4136_v39 = vpop.permute.xlu1 %4135  ;;  %v3878_v56 = vmul.f32 %v6436_v62, %v6522_v33 }
 0x9a2   : > { %4046 = vrot.lane.b32.xlu1 %v4037_v57, %s4904_s5  ;;  %v4004_v25 = vpop.permute.xlu0 %4003 }
 0x9a3   : > { %v4017_v61 = vmul.f32 %v4632_v14, %v4004_v25  ;;  %v3880_v14 = vmul.f32 %v6440_v5, %v6482_v15 }
 0x9a5   : > { %4090 = vrot.lane.b32.xlu0 %v4079_v44, %s4919_s0  ;;  %v4141_v22 = vpop.permute.xlu1 %4140  ;;  %v3879_v44 = vmul.f32 %v3866_v26, %v6560_v6 }
 0x9a6   : > { %4183 = vrot.lane.b32.xlu1 %v4174_v13, %s4904_s5  ;;  %v4009_v18 = vpop.permute.xlu0 %4008  ;;  %s4450_s5 = sshll.u32 %s6721_s28, 2 }
 0x9a7   : > { %v4018_v4 = vmul.f32 %v6491_v12, %v4009_v18  ;;  %s865_s30 = scalar_lea.vmem %s6651_s26, %s4450_s5 }
 0x9a9   : > { %3978 = vperm.xlu0 %4837, %v3975_v11   ;;  %v4146_v37 = vpop.permute.xlu1 %4145 }
 0x9aa   : > { %3948 = vrot.lane.b32.xlu1 %v3939_v41, %s4919_s0  ;;  %v4014_v23 = vpop.permute.xlu0 %4013  ;;  %v4155_v5 = vmul.f32 %v6500_v0, %v4146_v37 }
 0x9ab   : > { %v4019_v46 = vmul.f32 %v6534_v60, %v4014_v23 }
 0x9ad   : > { %4253 = vperm.xlu0 %4837, %v4250_v48   ;;  %v6590_v21 = vpop.permute.xlu1 %4150  ;;  %v3881_v48 = vmul.f32 %v3876_v32, %v6525_v1 }
 0x9ae   : > { %4223 = vrot.lane.b32.xlu1 %v4214_v27, %s4919_s0  ;;  %v4153_v27 = vmul.f32 %v6542_v17, %v4136_v39  ;;  %v4156_v0 = vmul.f32 %v6547_v47, %v6590_v21 }
 0x9b2   : > { %4227 = vrot.lane.b32.xlu1 %v4216_v9, %s4919_s0 }
 0x9b6   : > { %4116 = vperm.xlu1 %4838, %v4113_v29   ;;  %v4154_v29 = vmul.f32 %v6574_v43, %v4141_v22 }
 0x9eb   : > { %v3911_v51 = vpop.permute.xlu0 %3910 }
 0x9ec   : > { %v3920_v33 = vadd.f32 %v3911_v51, %v3880_v14 }
 0x9ef   : > { %v4049_v49 = vpop.permute.xlu0 %4048 }
 0x9f0   : > { %v4058_v31 = vadd.f32 %v4049_v49, %v4018_v4 }
 0x9f3   : > { %v3951_v8 = vpop.permute.xlu0 %3950  ;;  %v4186_v34 = vpop.permute.xlu1 %4185 }
 0x9f4   : > { %v3960_v25 = vadd.f32 %v3951_v8, %v3920_v33  ;;  %v4195_v32 = vadd.f32 %v4186_v34, %v4155_v5 }
 0x9f6   : > { %v3965_v37 = vsel %vm2183_vm0, %v3960_v25, 0.0 }
 0x9f7   : > { %v4089_v63 = vpop.permute.xlu0 %4088 }
 0x9f8   : > { %v4098_v45 = vadd.f32 %v4089_v63, %v4058_v31 }
 0x9fa   : > { %v4103_v28 = vsel %vm2183_vm0, %v4098_v45, 0.0 }
 0x9fb   : > { %v4085_v20 = vpop.permute.xlu1 %4084  ;;  %v4226_v19 = vpop.permute.xlu0 %4225 }
 0x9fc   : > { %v4235_v8 = vadd.f32 %v4226_v19, %v4195_v32 }
 0x9ff   : > { %v3913_v36 = vpop.permute.xlu1 %3912  ;;  %v3907_v3 = vpop.permute.xlu0 %3906 }
 0xa00   : > { %v3918_v13 = vadd.f32 %v3907_v3, %v3878_v56  ;;  %v3921_v15 = vadd.f32 %v3913_v36, %v3881_v48 }
 0xa03   : > { %v4051_v58 = vpop.permute.xlu1 %4050  ;;  %v4045_v2 = vpop.permute.xlu0 %4044 }
 0xa04   : > { %v4056_v55 = vadd.f32 %v4045_v2, %v4016_v40  ;;  %v4059_v24 = vadd.f32 %v4051_v58, %v4019_v46 }
 0xa06   : > { %v4096_v50 = vadd.f32 %v4085_v20, %v4056_v55  ;;  %v4240_v55 = vsel %vm2183_vm0, %v4235_v8, 0.0 }
 0xa07   : > { %v4182_v54 = vpop.permute.xlu0 %4181 }
 0xa08   : > { %v4188_v30 = vpop.permute.xlu1 %4187  ;;  %v4100_v11 = vsel %vm2183_vm0, %v4096_v50, 0.0  ;;  %v4193_v18 = vadd.f32 %v4182_v54, %v4153_v27 }
 0xa09   : > { %v4196_v34 = vadd.f32 %v4188_v30, %v4156_v0 }
 0xa0b   : > { %v3947_v7 = vpop.permute.xlu0 %3946 }
 0xa0c   : > { %v3953_v42 = vpop.permute.xlu1 %3952  ;;  %v3958_v9 = vadd.f32 %v3947_v7, %v3918_v13 }
 0xa0d   : > { %v3961_v17 = vadd.f32 %v3953_v42, %v3921_v15 }
 0xa0e   : > { %v3962_v51 = vsel %vm2183_vm0, %v3958_v9, 0.0 }
 0xa0f   : > { %v4222_v10 = vpop.permute.xlu0 %4221  ;;  %v3967_v2 = vsel %vm2183_vm0, %v3961_v17, 0.0 }
 0xa10   : > { %v3909_v59 = vpop.permute.xlu1 %3908  ;;  %v4233_v49 = vadd.f32 %v4222_v10, %v4193_v18 }
 0xa11   : > { %v3919_v6 = vadd.f32 %v3909_v59, %v3879_v44  ;;  %v3981_v59 = vlaneseq }
 0xa12   : > { %v4237_v54 = vsel %vm2183_vm0, %v4233_v49, 0.0 }
 0xa13   : > { %v4087_v35 = vpop.permute.xlu0 %4086 }
 0xa14   : > { %v4047_v53 = vpop.permute.xlu1 %4046 }
 0xa15   : > { %v4057_v16 = vadd.f32 %v4047_v53, %v4017_v61  ;;  %v3982_v53 = vshrl.u32 %v3981_v59, 7 }
 0xa17   : > { %v4097_v57 = vadd.f32 %v4087_v35, %v4057_v16  ;;  %v4091_v38 = vpop.permute.xlu0 %4090 }
 0xa18   : > { %v4184_v12 = vpop.permute.xlu1 %4183  ;;  %v4099_v41 = vadd.f32 %v4091_v38, %v4059_v24  ;;  %v3983_v24 = vsub.s32 0, %v3982_v53 }
 0xa19   : > { %v4101_v60 = vsel %vm2183_vm0, %v4097_v57, 0.0  ;;  %v4194_v63 = vadd.f32 %v4184_v12, %v4154_v29 }
 0xa1a   : > { %v4102_v62 = vadd.f32 %v4101_v60, %v4100_v11  ;;  %v4105_v23 = vsel %vm2183_vm0, %v4099_v41, 0.0 }
 0xa1c   : > { %v4104_v26 = vadd.f32 %v4103_v28, %v4102_v62  ;;  %v3949_v52 = vpop.permute.xlu1 %3948 }
 0xa1d   : > { %v3959_v1 = vadd.f32 %v3949_v52, %v3919_v6 }
 0xa1e   : > { %v4106_v39 = vadd.f32 %v4105_v23, %v4104_v26 }
 0xa1f   : > { %v3963_v20 = vsel %vm2183_vm0, %v3959_v1, 0.0 }
 0xa20   : > { %v3964_v43 = vadd.f32 %v3963_v20, %v3962_v51  ;;  %v4224_v22 = vpop.permute.xlu1 %4223  ;;  %v4107_v3 = vrot.slane %v4106_v39, 4 }
 0xa21   : > { %v4234_v36 = vadd.f32 %v4224_v22, %v4194_v63 }
 0xa22   : > { %v3966_v58 = vadd.f32 %v3965_v37, %v3964_v43  ;;  %v4108_v21 = vadd.f32 %v4107_v3, %v4106_v39 }
 0xa23   : > { %v4238_v7 = vsel %vm2183_vm0, %v4234_v36, 0.0 }
 0xa24   : > { %v3968_v42 = vadd.f32 %v3967_v2, %v3966_v58  ;;  %v4239_v40 = vadd.f32 %v4238_v7, %v4237_v54  ;;  %v4228_v10 = vpop.permute.xlu1 %4227  ;;  %v4109_v46 = vrot.slane %v4108_v21, 2 }
 0xa25   : > { %v4236_v47 = vadd.f32 %v4228_v10, %v4196_v34 }
 0xa26   : > { %v3969_v19 = vrot.slane %v3968_v42, 4  ;;  %v4241_v61 = vadd.f32 %v4240_v55, %v4239_v40  ;;  %v4110_v44 = vadd.f32 %v4109_v46, %v4108_v21 }
 0xa27   : > { %v4242_v4 = vsel %vm2183_vm0, %v4236_v47, 0.0  ;;  %vm3986_vm0 = vcmask 32768  }
 0xa28   : > { %v4243_v30 = vadd.f32 %v4242_v4, %v4241_v61  ;;  %v3970_v35 = vadd.f32 %v3969_v19, %v3968_v42  ;;  %v3979_v16 = vpop.permute.xlu0 %3978  ;;  %v4111_v48 = vrot.slane %v4110_v44, 1 }
 0xa29   : > { %v3984_v12 = vrot.slane %v3979_v16, %v3983_v24 }
 0xa2a   : > { %v4244_v31 = vrot.slane %v4243_v30, 4  ;;  %v3971_v50 = vrot.slane %v3970_v35, 2  ;;  %v4112_v9 = vadd.f32 %v4111_v48, %v4110_v44 }
 0xa2c   : > { %v4245_v45 = vadd.f32 %v4244_v31, %v4243_v30  ;;  %v3972_v56 = vadd.f32 %v3971_v50, %v3970_v35  ;;  %v4254_v11 = vpop.permute.xlu0 %4253 }
 0xa2d   : > { %v4259_v62 = vrot.slane %v4254_v11, %v3983_v24 }
 0xa2e   : > { %v4246_v57 = vrot.slane %v4245_v45, 2  ;;  %v3973_v38 = vrot.slane %v3972_v56, 1 }
 0xa30   : > { %v3974_v14 = vadd.f32 %v3973_v38, %v3972_v56  ;;  %v4247_v13 = vadd.f32 %v4246_v57, %v4245_v45 }
 0xa32   : > { %v3985_v60 = vadd.f32 %v3984_v12, %v3974_v14  ;;  %v4248_v41 = vrot.slane %v4247_v13, 1 }
 0xa34   : > { %3987 = vst.msk [vmem:[%s865_s30] sm:$0x1] %vm3986_vm0, %v3985_v60  ;;  %v4249_v27 = vadd.f32 %v4248_v41, %v4247_v13 }
 0xa35   : > { %v4117_v33 = vpop.permute.xlu1 %4116 }
 0xa36   : > { %v4260_v28 = vadd.f32 %v4259_v62, %v4249_v27  ;;  %v4122_v6 = vrot.slane %v4117_v33, %v3983_v24 }
 0xa38   : > { %4261 = vst.msk [vmem:[%s865_s30 + $0x2] sm:$0x1] %vm3986_vm0, %v4260_v28  ;;  %v4123_v29 = vadd.f32 %v4122_v6, %v4112_v9 }
 0xa3a   : > { %4124 = vst.msk [vmem:[%s865_s30 + $0x1] sm:$0x1] %vm3986_vm0, %v4123_v29 }
 0xa3b PF: > { %s39_s7 = sadd.s32 1, %s4896_s7  }
 0xa3c   : > { %p36_p4 = scmp.ge.s32.totalorder %s39_s7, 4  }
 0xa3e   :  { %38 = sbr.rel (!%p36_p4) target bundleno = 12 (0xc), region = 202 }

</bundles_post_ra>
